<compile_context>
chip_gen: v6e
topology: v6e:2x2x1
jax: 0.10.0
libtpu: 0.0.40
codegen_flags: <defaults>
</compile_context>

<pallas_src>
import functools
import math

import jax
import jax.numpy as jnp
from jax.experimental import pallas as pl
from jax.experimental.pallas import tpu as pltpu


NUM_CLASSES = 80
HIDDEN = 32
INTERPOLATE = 2                      # -> interpolate + 1 = 3 heads
FPN_CHANNELS = (32, 64, 128)
FPN_STRIDES = (4, 8, 16)
_VMEM_LIMIT = 32 * 1024 * 1024       # safe on v5e/v6e/v7x; tiles here use only a few MiB


def _round_up(x, m):
    return (x + m - 1) // m * m


def _m_tiling(m, tm):
    """Pick (padded_M, block_M) for an M-tiled GEMM."""
    mp = _round_up(m, 8)
    if mp > tm:
        return _round_up(m, tm), tm
    return mp, mp


# ----------------------------------------------------------------------------
# Pallas kernels
# ----------------------------------------------------------------------------
def _gemm_bias_act_kernel(x_ref, w_ref, b_ref, o_ref, *, activation):
    """Fused (tm,K)x(K,N) bf16 GEMM (f32 accumulate) + bias + activation."""
    acc = jnp.dot(x_ref[...], w_ref[...], preferred_element_type=jnp.float32)
    acc = acc + b_ref[...]
    if activation == "silu":
        acc = acc * jax.nn.sigmoid(acc)
    elif activation == "sigmoid":
        acc = jax.nn.sigmoid(acc)
    o_ref[...] = acc.astype(o_ref.dtype)


def _pred_decode_kernel(f_ref, w_ref, b_ref, o_ref, *, stride, hw, wd, blk_m, nout):
    """Fused prediction GEMM (all heads' cls/reg/obj) + YOLOX box decode epilogue.

    Output columns are [head0: reg(4) obj(1) cls(80) | head1: ... | head2: ...].
    xy=(raw+grid)*stride, wh=exp(raw)*stride, obj/cls=sigmoid(raw).
    """
    acc = jnp.dot(f_ref[...], w_ref[...], preferred_element_type=jnp.float32)
    acc = acc + b_ref[...]

    # column position inside each head's 85-wide slab (f32 math: no vector int div)
    col = jax.lax.broadcasted_iota(jnp.int32, acc.shape, 1).astype(jnp.float32)
    colm = col - jnp.floor(col / nout) * nout

    # anchor (x, y) generated in-kernel from the flattened row index (b, y, x order)
    row = jax.lax.broadcasted_iota(jnp.int32, acc.shape, 0) + pl.program_id(0) * blk_m
    rowf = row.astype(jnp.float32)
    pos = rowf - jnp.floor(rowf / hw) * hw          # row % (H*W)
    gy = jnp.floor(pos / wd)
    gx = pos - gy * wd

    g = jnp.where(colm == 0.0, gx, jnp.where(colm == 1.0, gy, 0.0))
    xy = (acc + g) * stride
    is_wh = (colm >= 2.0) & (colm < 4.0)
    wh = jnp.exp(jnp.where(is_wh, acc, 0.0)) * stride   # exp masked -> no spurious inf
    sig = jax.nn.sigmoid(acc)
    out = jnp.where(colm < 2.0, xy, jnp.where(is_wh, wh, sig))
    o_ref[...] = out.astype(o_ref.dtype)


# ----------------------------------------------------------------------------
# GEMM wrappers (M-tiled, full-dim K/N blocks, bf16 operands, no lane padding)
# ----------------------------------------------------------------------------
def fused_matmul(x, w, b, activation="none", out_dtype=jnp.float32, tm=512):
    """x:(M,K) @ w:(K,N) + b:(N,) with fused activation. Tiled over M only."""
    m, k = x.shape
    n = w.shape[1]
    mp, blk_m = _m_tiling(m, tm)
    xb = x.astype(jnp.bfloat16)
    if mp != m:
        xb = jnp.pad(xb, ((0, mp - m), (0, 0)))
    out = pl.pallas_call(
        functools.partial(_gemm_bias_act_kernel, activation=activation),
        out_shape=jax.ShapeDtypeStruct((mp, n), out_dtype),
        grid=(mp // blk_m,),
        in_specs=[
            pl.BlockSpec((blk_m, k), lambda i: (i, 0)),
            pl.BlockSpec((k, n), lambda i: (0, 0)),
            pl.BlockSpec((1, n), lambda i: (0, 0)),
        ],
        out_specs=pl.BlockSpec((blk_m, n), lambda i: (i, 0)),
        compiler_params=pltpu.CompilerParams(
            dimension_semantics=("parallel",),
            vmem_limit_bytes=_VMEM_LIMIT,
        ),
    )(xb, w.astype(jnp.bfloat16), b.reshape(1, n).astype(jnp.float32))
    return out[:m] if mp != m else out


def fused_pred_decode(feat, w, b, *, stride, h, wd, tm=512):
    """Fused prediction GEMM + box decode for one FPN level. feat:(M, 2*nh*HIDDEN)."""
    m, k = feat.shape
    n = w.shape[1]
    mp, blk_m = _m_tiling(m, tm)
    fb = feat.astype(jnp.bfloat16)
    if mp != m:
        fb = jnp.pad(fb, ((0, mp - m), (0, 0)))
    kern = functools.partial(
        _pred_decode_kernel,
        stride=float(stride), hw=float(h * wd), wd=float(wd),
        blk_m=blk_m, nout=float(5 + NUM_CLASSES))
    out = pl.pallas_call(
        kern,
        out_shape=jax.ShapeDtypeStruct((mp, n), jnp.float32),
        grid=(mp // blk_m,),
        in_specs=[
            pl.BlockSpec((blk_m, k), lambda i: (i, 0)),
            pl.BlockSpec((k, n), lambda i: (0, 0)),
            pl.BlockSpec((1, n), lambda i: (0, 0)),
        ],
        out_specs=pl.BlockSpec((blk_m, n), lambda i: (i, 0)),
        compiler_params=pltpu.CompilerParams(
            dimension_semantics=("parallel",),
            vmem_limit_bytes=_VMEM_LIMIT,
        ),
    )(fb, w.astype(jnp.bfloat16), b.reshape(1, n).astype(jnp.float32))
    return out[:m] if mp != m else out


# ----------------------------------------------------------------------------
# Conv = NHWC im2col (glue) + Pallas GEMM
# ----------------------------------------------------------------------------
def _im2col_nhwc(x, kh, kw, stride, pad):
    """x:(B,H,W,C) -> patches (B*Ho*Wo, kh*kw*C), channels fastest (no transposes)."""
    b, h, w, c = x.shape
    xp = jnp.pad(x, ((0, 0), (pad, pad), (pad, pad), (0, 0)))
    ho = (h + 2 * pad - kh) // stride + 1
    wo = (w + 2 * pad - kw) // stride + 1
    cols = []
    for i in range(kh):
        for j in range(kw):
            cols.append(xp[:, i:i + stride * ho:stride, j:j + stride * wo:stride, :])
    patches = jnp.concatenate(cols, axis=-1)              # (B, Ho, Wo, kh*kw*C)
    return patches.reshape(b * ho * wo, kh * kw * c), ho, wo


def conv2d_nhwc(x, w, b, stride=1, pad=0, activation="none", out_dtype=jnp.bfloat16):
    """x:(B,H,W,Cin) NHWC, w:(Cout,Cin,kh,kw) PyTorch layout -> (B,Ho,Wo,Cout)."""
    bsz = x.shape[0]
    cout, cin, kh, kw = w.shape
    if kh == 1 and kw == 1 and stride == 1 and pad == 0:
        ho, wo = x.shape[1], x.shape[2]
        patches = x.reshape(bsz * ho * wo, cin)            # 1x1 conv: free reshape
    else:
        patches, ho, wo = _im2col_nhwc(x, kh, kw, stride, pad)
    wm = w.transpose(2, 3, 1, 0).reshape(kh * kw * cin, cout)
    out = fused_matmul(patches, wm, b, activation, out_dtype)
    return out.reshape(bsz, ho, wo, cout)


# ----------------------------------------------------------------------------
# Parameters (deterministic synthetic init — no checkpoints)
# ----------------------------------------------------------------------------
def _init_conv(key, cout, cin, k):
    wk, bk = jax.random.split(key)
    fan_in = cin * k * k
    w = jax.random.normal(wk, (cout, cin, k, k), jnp.float32) / math.sqrt(fan_in)
    b = jax.random.normal(bk, (cout,), jnp.float32) * 0.01
    return {"w": w, "b": b}


def init_params(key):
    """Per-module params mirroring the PyTorch structure (Conv+BN folded to conv+bias)."""
    keys = jax.random.split(key, 64)
    ki = iter(range(64))
    backbone = {
        # simplified YOLOPAFPN (3x3 stride-2 Conv->SiLU stages)
        # TODO(synk): real YOLOPAFPN also has CSP blocks + top-down/bottom-up PAN.
        "stem": _init_conv(keys[next(ki)], 16, 3, 3),
        "dark3": _init_conv(keys[next(ki)], 32, 16, 3),
        "dark4": _init_conv(keys[next(ki)], 64, 32, 3),
        "dark5": _init_conv(keys[next(ki)], 128, 64, 3),
    }
    heads = []
    for _ in range(INTERPOLATE + 1):
        head = {"levels": []}
        for cl in FPN_CHANNELS:
            head["levels"].append({
                "stem": _init_conv(keys[next(ki)], HIDDEN, cl, 1),
                "cls_conv": _init_conv(keys[next(ki)], HIDDEN, HIDDEN, 3),
                "reg_conv": _init_conv(keys[next(ki)], HIDDEN, HIDDEN, 3),
                "cls_pred": _init_conv(keys[next(ki)], NUM_CLASSES, HIDDEN, 1),
                "reg_pred": _init_conv(keys[next(ki)], 4, HIDDEN, 1),
                "obj_pred": _init_conv(keys[next(ki)], 1, HIDDEN, 1),
            })
        heads.append(head)
    return {"backbone": backbone, "heads": heads}


def fuse_head_params(heads):
    """Fold the (interpolate+1) per-head weights into lane-dense fused GEMM weights.

    Done once at setup time; zero blocks make the fused GEMMs numerically identical
    to running the heads separately.
    """
    nh = len(heads)
    nout = 5 + NUM_CLASSES
    levels = []
    for lvl, cl in enumerate(FPN_CHANNELS):
        lps = [heads[h]["levels"][lvl] for h in range(nh)]
        # 3 stems (1x1) -> one (Cl, nh*HIDDEN) GEMM
        stem_w = jnp.concatenate(
            [lp["stem"]["w"].reshape(HIDDEN, cl).T for lp in lps], axis=1)
        stem_b = jnp.concatenate([lp["stem"]["b"] for lp in lps])
        # 3 cls_convs + 3 reg_convs (3x3) -> one block-diagonal (9*nh*H, 2*nh*H) GEMM
        conv_w = jnp.zeros((9, nh * HIDDEN, 2 * nh * HIDDEN), jnp.float32)
        cls_b, reg_b = [], []
        for h, lp in enumerate(lps):
            wc = lp["cls_conv"]["w"].transpose(2, 3, 1, 0).reshape(9, HIDDEN, HIDDEN)
            wr = lp["reg_conv"]["w"].transpose(2, 3, 1, 0).reshape(9, HIDDEN, HIDDEN)
            r0 = h * HIDDEN
            conv_w = conv_w.at[:, r0:r0 + HIDDEN, r0:r0 + HIDDEN].set(wc)
            conv_w = conv_w.at[:, r0:r0 + HIDDEN,
                               nh * HIDDEN + r0:nh * HIDDEN + r0 + HIDDEN].set(wr)
            cls_b.append(lp["cls_conv"]["b"])
            reg_b.append(lp["reg_conv"]["b"])
        conv_w = conv_w.reshape(9 * nh * HIDDEN, 2 * nh * HIDDEN)
        conv_b = jnp.concatenate(cls_b + reg_b)
        # 9 prediction 1x1 convs -> one (2*nh*H, nh*85) GEMM; cols = [reg,obj,cls]/head
        pred_w = jnp.zeros((2 * nh * HIDDEN, nh * nout), jnp.float32)
        pred_b = jnp.zeros((nh * nout,), jnp.float32)
        for h, lp in enumerate(lps):
            base = h * nout
            crow = h * HIDDEN                 # cls_feat rows
            rrow = nh * HIDDEN + h * HIDDEN   # reg_feat rows
            pred_w = pred_w.at[rrow:rrow + HIDDEN, base:base + 4].set(
                lp["reg_pred"]["w"].reshape(4, HIDDEN).T)
            pred_w = pred_w.at[rrow:rrow + HIDDEN, base + 4:base + 5].set(
                lp["obj_pred"]["w"].reshape(1, HIDDEN).T)
            pred_w = pred_w.at[crow:crow + HIDDEN, base + 5:base + nout].set(
                lp["cls_pred"]["w"].reshape(NUM_CLASSES, HIDDEN).T)
            pred_b = pred_b.at[base:base + 4].set(lp["reg_pred"]["b"])
            pred_b = pred_b.at[base + 4:base + 5].set(lp["obj_pred"]["b"])
            pred_b = pred_b.at[base + 5:base + nout].set(lp["cls_pred"]["b"])
        levels.append({"stem_w": stem_w, "stem_b": stem_b,
                       "conv_w": conv_w, "conv_b": conv_b,
                       "pred_w": pred_w, "pred_b": pred_b})
    return levels


# ----------------------------------------------------------------------------
# Forward pass
# ----------------------------------------------------------------------------
def backbone_forward(p, x):
    c1 = conv2d_nhwc(x, p["stem"]["w"], p["stem"]["b"], 2, 1, "silu")
    c2 = conv2d_nhwc(c1, p["dark3"]["w"], p["dark3"]["b"], 2, 1, "silu")
    c3 = conv2d_nhwc(c2, p["dark4"]["w"], p["dark4"]["b"], 2, 1, "silu")
    c4 = conv2d_nhwc(c3, p["dark5"]["w"], p["dark5"]["b"], 2, 1, "silu")
    return (c2, c3, c4)        # fpn_outs at strides (4, 8, 16)


def head_level_forward(lp, f, stride):
    """All (interpolate+1) heads for one FPN level in 3 fused pallas_calls."""
    b, h, w, c = f.shape
    m = b * h * w
    nh = INTERPOLATE + 1
    # fused 3-head stem (1x1 + SiLU)
    stem = fused_matmul(f.reshape(m, c), lp["stem_w"], lp["stem_b"],
                        activation="silu", out_dtype=jnp.bfloat16)
    stem = stem.reshape(b, h, w, nh * HIDDEN)
    # fused cls_conv + reg_conv for all heads (3x3 + SiLU, block-diagonal weights)
    patches, _, _ = _im2col_nhwc(stem, 3, 3, 1, 1)
    feats = fused_matmul(patches, lp["conv_w"], lp["conv_b"],
                         activation="silu", out_dtype=jnp.bfloat16)   # (M, 2*nh*HIDDEN)
    # fused cls/reg/obj predictions + YOLOX box decode (lane-dense N = nh*85)
    dec = fused_pred_decode(feats, lp["pred_w"], lp["pred_b"],
                            stride=stride, h=h, wd=w)                 # (M, nh*85)
    return dec.reshape(b, h * w, nh, 5 + NUM_CLASSES)


def yolox_forward(params, x):
    x = jnp.transpose(x, (0, 2, 3, 1))     # single NCHW -> NHWC conversion
    fpn_outs = backbone_forward(params["backbone"], x)
    per_level = [head_level_forward(lp, f, s)
                 for lp, f, s in zip(params["head_levels"], fpn_outs, FPN_STRIDES)]
    all_heads = jnp.concatenate(per_level, axis=1)   # (B, A, n_heads, 85)
    # eval path: every head consumes the shared FPN features; one decoded output each.
    return [all_heads[:, :, hh, :] for hh in range(INTERPOLATE + 1)]


# ----------------------------------------------------------------------------
if __name__ == "__main__":
    key = jax.random.PRNGKey(0)
    pkey, xkey = jax.random.split(key)
    raw = init_params(pkey)
    params = {"backbone": raw["backbone"],
              "head_levels": fuse_head_params(raw["heads"])}

    # small input consistent with the module: NCHW image batch
    x = jax.random.normal(xkey, (2, 3, 32, 32), jnp.float32)

    outputs = jax.jit(yolox_forward)(params, x)
    outputs = jax.block_until_ready(outputs)

    # (interpolate+1)=3 heads, each (B=2, A=8*8+4*4+2*2=84, 4+1+80=85)
    assert len(outputs) == INTERPOLATE + 1
    for o in outputs:
        assert o.shape == (2, 84, 85)
        assert bool(jnp.all(jnp.isfinite(o)))

    print("KERNEL_OK")
</pallas_src>

<mosaic_0001>
module attributes {stable_mosaic.version = 11 : i64} {
  func.func @_gemm_bias_act_kernel(%arg0: i32, %arg1: memref<512x27xbf16, #tpu.memory_space<vmem>>, %arg2: memref<27x16xbf16, #tpu.memory_space<vmem>>, %arg3: memref<1x16xf32, #tpu.memory_space<vmem>>, %arg4: memref<512x16xbf16, #tpu.memory_space<vmem>>) attributes {dimension_semantics = [#tpu.dimension_semantics<parallel>], iteration_bounds = array<i64: 1>, scalar_prefetch = 0 : i64, scratch_operands = 0 : i64, tpu.core_type = #tpu.core_type<tc>, window_params = [{transform_indices = @transform_0, window_bounds = array<i64: 512, 27>}, {pipeline_mode = #tpu.pipeline_mode<synchronous>, transform_indices = @transform_1, window_bounds = array<i64: 27, 16>}, {pipeline_mode = #tpu.pipeline_mode<synchronous>, transform_indices = @transform_2, window_bounds = array<i64: 1, 16>}, {transform_indices = @transform_3, window_bounds = array<i64: 512, 16>}]} {
    %c0 = arith.constant 0 : index
    %c0_0 = arith.constant 0 : index
    %0 = vector.load %arg1[%c0, %c0_0] : memref<512x27xbf16, #tpu.memory_space<vmem>>, vector<512x27xbf16>
    %c0_1 = arith.constant 0 : index
    %c0_2 = arith.constant 0 : index
    %1 = vector.load %arg2[%c0_1, %c0_2] : memref<27x16xbf16, #tpu.memory_space<vmem>>, vector<27x16xbf16>
    %cst = arith.constant dense<0.000000e+00> : vector<512x16xf32>
    %2 = tpu.matmul %0, %1, %cst {dimension_numbers = #tpu.dot_dimension_numbers<[1], [0], [0], [1], [0, 0, 1, 1], [], []>} : vector<512x27xbf16>, vector<27x16xbf16>, vector<512x16xf32> -> vector<512x16xf32>
    %c0_3 = arith.constant 0 : index
    %c0_4 = arith.constant 0 : index
    %3 = vector.load %arg3[%c0_3, %c0_4] : memref<1x16xf32, #tpu.memory_space<vmem>>, vector<1x16xf32>
    %4 = vector.broadcast %3 : vector<1x16xf32> to vector<512x16xf32>
    %5 = arith.addf %2, %4 : vector<512x16xf32>
    %6 = arith.negf %5 : vector<512x16xf32>
    %7 = math.exp %6 : vector<512x16xf32>
    %cst_5 = arith.constant 1.000000e+00 : f32
    %8 = vector.broadcast %cst_5 : f32 to vector<512x16xf32>
    %9 = arith.addf %8, %7 : vector<512x16xf32>
    %10 = arith.divf %8, %9 : vector<512x16xf32>
    %11 = arith.mulf %5, %10 : vector<512x16xf32>
    %12 = arith.truncf %11 : vector<512x16xf32> to vector<512x16xbf16>
    %c0_6 = arith.constant 0 : index
    %c0_7 = arith.constant 0 : index
    %13 = vector.load %arg4[%c0_6, %c0_7] : memref<512x16xbf16, #tpu.memory_space<vmem>>, vector<512x16xbf16>
    tpu.vector_store %arg4[%c0_6, %c0_7], %12 {strides = array<i32>} : memref<512x16xbf16, #tpu.memory_space<vmem>>, vector<512x16xbf16>,
    return
  }
  func.func @transform_0(%arg0: i32) -> (i32, i32) {
    %c0_i32 = arith.constant 0 : i32
    %c0_i32_0 = arith.constant 0 : i32
    return %arg0, %c0_i32 : i32, i32
  }
  func.func @transform_1(%arg0: i32) -> (i32, i32) {
    %c0_i32 = arith.constant 0 : i32
    %c0_i32_0 = arith.constant 0 : i32
    %c0_i32_1 = arith.constant 0 : i32
    return %c0_i32, %c0_i32_0 : i32, i32
  }
  func.func @transform_2(%arg0: i32) -> (i32, i32) {
    %c0_i32 = arith.constant 0 : i32
    %c0_i32_0 = arith.constant 0 : i32
    %c0_i32_1 = arith.constant 0 : i32
    return %c0_i32, %c0_i32_0 : i32, i32
  }
  func.func @transform_3(%arg0: i32) -> (i32, i32) {
    %c0_i32 = arith.constant 0 : i32
    %c0_i32_0 = arith.constant 0 : i32
    return %arg0, %c0_i32 : i32, i32
  }
}

module attributes {stable_mosaic.version = 11 : i64} {
  func.func @_gemm_bias_act_kernel(%arg0: i32, %arg1: memref<128x144xbf16, #tpu.memory_space<vmem>>, %arg2: memref<144x32xbf16, #tpu.memory_space<vmem>>, %arg3: memref<1x32xf32, #tpu.memory_space<vmem>>, %arg4: memref<128x32xbf16, #tpu.memory_space<vmem>>) attributes {dimension_semantics = [#tpu.dimension_semantics<parallel>], iteration_bounds = array<i64: 1>, scalar_prefetch = 0 : i64, scratch_operands = 0 : i64, tpu.core_type = #tpu.core_type<tc>, window_params = [{transform_indices = @transform_0, window_bounds = array<i64: 128, 144>}, {pipeline_mode = #tpu.pipeline_mode<synchronous>, transform_indices = @transform_1, window_bounds = array<i64: 144, 32>}, {pipeline_mode = #tpu.pipeline_mode<synchronous>, transform_indices = @transform_2, window_bounds = array<i64: 1, 32>}, {transform_indices = @transform_3, window_bounds = array<i64: 128, 32>}]} {
    %c0 = arith.constant 0 : index
    %c0_0 = arith.constant 0 : index
    %0 = vector.load %arg1[%c0, %c0_0] : memref<128x144xbf16, #tpu.memory_space<vmem>>, vector<128x144xbf16>
    %c0_1 = arith.constant 0 : index
    %c0_2 = arith.constant 0 : index
    %1 = vector.load %arg2[%c0_1, %c0_2] : memref<144x32xbf16, #tpu.memory_space<vmem>>, vector<144x32xbf16>
    %cst = arith.constant dense<0.000000e+00> : vector<128x32xf32>
    %2 = tpu.matmul %0, %1, %cst {dimension_numbers = #tpu.dot_dimension_numbers<[1], [0], [0], [1], [0, 0, 1, 1], [], []>} : vector<128x144xbf16>, vector<144x32xbf16>, vector<128x32xf32> -> vector<128x32xf32>
    %c0_3 = arith.constant 0 : index
    %c0_4 = arith.constant 0 : index
    %3 = vector.load %arg3[%c0_3, %c0_4] : memref<1x32xf32, #tpu.memory_space<vmem>>, vector<1x32xf32>
    %4 = vector.broadcast %3 : vector<1x32xf32> to vector<128x32xf32>
    %5 = arith.addf %2, %4 : vector<128x32xf32>
    %6 = arith.negf %5 : vector<128x32xf32>
    %7 = math.exp %6 : vector<128x32xf32>
    %cst_5 = arith.constant 1.000000e+00 : f32
    %8 = vector.broadcast %cst_5 : f32 to vector<128x32xf32>
    %9 = arith.addf %8, %7 : vector<128x32xf32>
    %10 = arith.divf %8, %9 : vector<128x32xf32>
    %11 = arith.mulf %5, %10 : vector<128x32xf32>
    %12 = arith.truncf %11 : vector<128x32xf32> to vector<128x32xbf16>
    %c0_6 = arith.constant 0 : index
    %c0_7 = arith.constant 0 : index
    %13 = vector.load %arg4[%c0_6, %c0_7] : memref<128x32xbf16, #tpu.memory_space<vmem>>, vector<128x32xbf16>
    tpu.vector_store %arg4[%c0_6, %c0_7], %12 {strides = array<i32>} : memref<128x32xbf16, #tpu.memory_space<vmem>>, vector<128x32xbf16>,
    return
  }
  func.func @transform_0(%arg0: i32) -> (i32, i32) {
    %c0_i32 = arith.constant 0 : i32
    %c0_i32_0 = arith.constant 0 : i32
    return %arg0, %c0_i32 : i32, i32
  }
  func.func @transform_1(%arg0: i32) -> (i32, i32) {
    %c0_i32 = arith.constant 0 : i32
    %c0_i32_0 = arith.constant 0 : i32
    %c0_i32_1 = arith.constant 0 : i32
    return %c0_i32, %c0_i32_0 : i32, i32
  }
  func.func @transform_2(%arg0: i32) -> (i32, i32) {
    %c0_i32 = arith.constant 0 : i32
    %c0_i32_0 = arith.constant 0 : i32
    %c0_i32_1 = arith.constant 0 : i32
    return %c0_i32, %c0_i32_0 : i32, i32
  }
  func.func @transform_3(%arg0: i32) -> (i32, i32) {
    %c0_i32 = arith.constant 0 : i32
    %c0_i32_0 = arith.constant 0 : i32
    return %arg0, %c0_i32 : i32, i32
  }
}

module attributes {stable_mosaic.version = 11 : i64} {
  func.func @_gemm_bias_act_kernel(%arg0: i32, %arg1: memref<128x32xbf16, #tpu.memory_space<vmem>>, %arg2: memref<32x96xbf16, #tpu.memory_space<vmem>>, %arg3: memref<1x96xf32, #tpu.memory_space<vmem>>, %arg4: memref<128x96xbf16, #tpu.memory_space<vmem>>) attributes {dimension_semantics = [#tpu.dimension_semantics<parallel>], iteration_bounds = array<i64: 1>, scalar_prefetch = 0 : i64, scratch_operands = 0 : i64, tpu.core_type = #tpu.core_type<tc>, window_params = [{transform_indices = @transform_0, window_bounds = array<i64: 128, 32>}, {pipeline_mode = #tpu.pipeline_mode<synchronous>, transform_indices = @transform_1, window_bounds = array<i64: 32, 96>}, {pipeline_mode = #tpu.pipeline_mode<synchronous>, transform_indices = @transform_2, window_bounds = array<i64: 1, 96>}, {transform_indices = @transform_3, window_bounds = array<i64: 128, 96>}]} {
    %c0 = arith.constant 0 : index
    %c0_0 = arith.constant 0 : index
    %0 = vector.load %arg1[%c0, %c0_0] : memref<128x32xbf16, #tpu.memory_space<vmem>>, vector<128x32xbf16>
    %c0_1 = arith.constant 0 : index
    %c0_2 = arith.constant 0 : index
    %1 = vector.load %arg2[%c0_1, %c0_2] : memref<32x96xbf16, #tpu.memory_space<vmem>>, vector<32x96xbf16>
    %cst = arith.constant dense<0.000000e+00> : vector<128x96xf32>
    %2 = tpu.matmul %0, %1, %cst {dimension_numbers = #tpu.dot_dimension_numbers<[1], [0], [0], [1], [0, 0, 1, 1], [], []>} : vector<128x32xbf16>, vector<32x96xbf16>, vector<128x96xf32> -> vector<128x96xf32>
    %c0_3 = arith.constant 0 : index
    %c0_4 = arith.constant 0 : index
    %3 = vector.load %arg3[%c0_3, %c0_4] : memref<1x96xf32, #tpu.memory_space<vmem>>, vector<1x96xf32>
    %4 = vector.broadcast %3 : vector<1x96xf32> to vector<128x96xf32>
    %5 = arith.addf %2, %4 : vector<128x96xf32>
    %6 = arith.negf %5 : vector<128x96xf32>
    %7 = math.exp %6 : vector<128x96xf32>
    %cst_5 = arith.constant 1.000000e+00 : f32
    %8 = vector.broadcast %cst_5 : f32 to vector<128x96xf32>
    %9 = arith.addf %8, %7 : vector<128x96xf32>
    %10 = arith.divf %8, %9 : vector<128x96xf32>
    %11 = arith.mulf %5, %10 : vector<128x96xf32>
    %12 = arith.truncf %11 : vector<128x96xf32> to vector<128x96xbf16>
    %c0_6 = arith.constant 0 : index
    %c0_7 = arith.constant 0 : index
    %13 = vector.load %arg4[%c0_6, %c0_7] : memref<128x96xbf16, #tpu.memory_space<vmem>>, vector<128x96xbf16>
    tpu.vector_store %arg4[%c0_6, %c0_7], %12 {strides = array<i32>} : memref<128x96xbf16, #tpu.memory_space<vmem>>, vector<128x96xbf16>,
    return
  }
  func.func @transform_0(%arg0: i32) -> (i32, i32) {
    %c0_i32 = arith.constant 0 : i32
    %c0_i32_0 = arith.constant 0 : i32
    return %arg0, %c0_i32 : i32, i32
  }
  func.func @transform_1(%arg0: i32) -> (i32, i32) {
    %c0_i32 = arith.constant 0 : i32
    %c0_i32_0 = arith.constant 0 : i32
    %c0_i32_1 = arith.constant 0 : i32
    return %c0_i32, %c0_i32_0 : i32, i32
  }
  func.func @transform_2(%arg0: i32) -> (i32, i32) {
    %c0_i32 = arith.constant 0 : i32
    %c0_i32_0 = arith.constant 0 : i32
    %c0_i32_1 = arith.constant 0 : i32
    return %c0_i32, %c0_i32_0 : i32, i32
  }
  func.func @transform_3(%arg0: i32) -> (i32, i32) {
    %c0_i32 = arith.constant 0 : i32
    %c0_i32_0 = arith.constant 0 : i32
    return %arg0, %c0_i32 : i32, i32
  }
}

module attributes {stable_mosaic.version = 11 : i64} {
  func.func @_gemm_bias_act_kernel(%arg0: i32, %arg1: memref<128x864xbf16, #tpu.memory_space<vmem>>, %arg2: memref<864x192xbf16, #tpu.memory_space<vmem>>, %arg3: memref<1x192xf32, #tpu.memory_space<vmem>>, %arg4: memref<128x192xbf16, #tpu.memory_space<vmem>>) attributes {dimension_semantics = [#tpu.dimension_semantics<parallel>], iteration_bounds = array<i64: 1>, scalar_prefetch = 0 : i64, scratch_operands = 0 : i64, tpu.core_type = #tpu.core_type<tc>, window_params = [{transform_indices = @transform_0, window_bounds = array<i64: 128, 864>}, {pipeline_mode = #tpu.pipeline_mode<synchronous>, transform_indices = @transform_1, window_bounds = array<i64: 864, 192>}, {pipeline_mode = #tpu.pipeline_mode<synchronous>, transform_indices = @transform_2, window_bounds = array<i64: 1, 192>}, {transform_indices = @transform_3, window_bounds = array<i64: 128, 192>}]} {
    %c0 = arith.constant 0 : index
    %c0_0 = arith.constant 0 : index
    %0 = vector.load %arg1[%c0, %c0_0] : memref<128x864xbf16, #tpu.memory_space<vmem>>, vector<128x864xbf16>
    %c0_1 = arith.constant 0 : index
    %c0_2 = arith.constant 0 : index
    %1 = vector.load %arg2[%c0_1, %c0_2] : memref<864x192xbf16, #tpu.memory_space<vmem>>, vector<864x192xbf16>
    %cst = arith.constant dense<0.000000e+00> : vector<128x192xf32>
    %2 = tpu.matmul %0, %1, %cst {dimension_numbers = #tpu.dot_dimension_numbers<[1], [0], [0], [1], [0, 0, 1, 1], [], []>} : vector<128x864xbf16>, vector<864x192xbf16>, vector<128x192xf32> -> vector<128x192xf32>
    %c0_3 = arith.constant 0 : index
    %c0_4 = arith.constant 0 : index
    %3 = vector.load %arg3[%c0_3, %c0_4] : memref<1x192xf32, #tpu.memory_space<vmem>>, vector<1x192xf32>
    %4 = vector.broadcast %3 : vector<1x192xf32> to vector<128x192xf32>
    %5 = arith.addf %2, %4 : vector<128x192xf32>
    %6 = arith.negf %5 : vector<128x192xf32>
    %7 = math.exp %6 : vector<128x192xf32>
    %cst_5 = arith.constant 1.000000e+00 : f32
    %8 = vector.broadcast %cst_5 : f32 to vector<128x192xf32>
    %9 = arith.addf %8, %7 : vector<128x192xf32>
    %10 = arith.divf %8, %9 : vector<128x192xf32>
    %11 = arith.mulf %5, %10 : vector<128x192xf32>
    %12 = arith.truncf %11 : vector<128x192xf32> to vector<128x192xbf16>
    %c0_6 = arith.constant 0 : index
    %c0_7 = arith.constant 0 : index
    %13 = vector.load %arg4[%c0_6, %c0_7] : memref<128x192xbf16, #tpu.memory_space<vmem>>, vector<128x192xbf16>
    tpu.vector_store %arg4[%c0_6, %c0_7], %12 {strides = array<i32>} : memref<128x192xbf16, #tpu.memory_space<vmem>>, vector<128x192xbf16>,
    return
  }
  func.func @transform_0(%arg0: i32) -> (i32, i32) {
    %c0_i32 = arith.constant 0 : i32
    %c0_i32_0 = arith.constant 0 : i32
    return %arg0, %c0_i32 : i32, i32
  }
  func.func @transform_1(%arg0: i32) -> (i32, i32) {
    %c0_i32 = arith.constant 0 : i32
    %c0_i32_0 = arith.constant 0 : i32
    %c0_i32_1 = arith.constant 0 : i32
    return %c0_i32, %c0_i32_0 : i32, i32
  }
  func.func @transform_2(%arg0: i32) -> (i32, i32) {
    %c0_i32 = arith.constant 0 : i32
    %c0_i32_0 = arith.constant 0 : i32
    %c0_i32_1 = arith.constant 0 : i32
    return %c0_i32, %c0_i32_0 : i32, i32
  }
  func.func @transform_3(%arg0: i32) -> (i32, i32) {
    %c0_i32 = arith.constant 0 : i32
    %c0_i32_0 = arith.constant 0 : i32
    return %arg0, %c0_i32 : i32, i32
  }
}

module attributes {stable_mosaic.version = 11 : i64} {
  func.func @_pred_decode_kernel(%arg0: i32, %arg1: memref<128x192xbf16, #tpu.memory_space<vmem>>, %arg2: memref<192x255xbf16, #tpu.memory_space<vmem>>, %arg3: memref<1x255xf32, #tpu.memory_space<vmem>>, %arg4: memref<128x255xf32, #tpu.memory_space<vmem>>) attributes {dimension_semantics = [#tpu.dimension_semantics<parallel>], iteration_bounds = array<i64: 1>, scalar_prefetch = 0 : i64, scratch_operands = 0 : i64, tpu.core_type = #tpu.core_type<tc>, window_params = [{transform_indices = @transform_0, window_bounds = array<i64: 128, 192>}, {pipeline_mode = #tpu.pipeline_mode<synchronous>, transform_indices = @transform_1, window_bounds = array<i64: 192, 255>}, {pipeline_mode = #tpu.pipeline_mode<synchronous>, transform_indices = @transform_2, window_bounds = array<i64: 1, 255>}, {transform_indices = @transform_3, window_bounds = array<i64: 128, 255>}]} {
    %c0 = arith.constant 0 : index
    %c0_0 = arith.constant 0 : index
    %0 = vector.load %arg1[%c0, %c0_0] : memref<128x192xbf16, #tpu.memory_space<vmem>>, vector<128x192xbf16>
    %c0_1 = arith.constant 0 : index
    %c0_2 = arith.constant 0 : index
    %1 = vector.load %arg2[%c0_1, %c0_2] : memref<192x255xbf16, #tpu.memory_space<vmem>>, vector<192x255xbf16>
    %cst = arith.constant dense<0.000000e+00> : vector<128x255xf32>
    %2 = tpu.matmul %0, %1, %cst {dimension_numbers = #tpu.dot_dimension_numbers<[1], [0], [0], [1], [0, 0, 1, 1], [], []>} : vector<128x192xbf16>, vector<192x255xbf16>, vector<128x255xf32> -> vector<128x255xf32>
    %c0_3 = arith.constant 0 : index
    %c0_4 = arith.constant 0 : index
    %3 = vector.load %arg3[%c0_3, %c0_4] : memref<1x255xf32, #tpu.memory_space<vmem>>, vector<1x255xf32>
    %4 = vector.broadcast %3 : vector<1x255xf32> to vector<128x255xf32>
    %5 = arith.addf %2, %4 : vector<128x255xf32>
    %6 = tpu.iota {dimensions = array<i32: 1>} : vector<128x255xi32>
    %7 = arith.sitofp %6 : vector<128x255xi32> to vector<128x255xf32>
    %cst_5 = arith.constant 8.500000e+01 : f32
    %8 = vector.broadcast %cst_5 : f32 to vector<128x255xf32>
    %9 = arith.divf %7, %8 : vector<128x255xf32>
    %10 = math.floor %9 : vector<128x255xf32>
    %cst_6 = arith.constant 8.500000e+01 : f32
    %11 = vector.broadcast %cst_6 : f32 to vector<128x255xf32>
    %12 = arith.mulf %10, %11 : vector<128x255xf32>
    %13 = arith.subf %7, %12 : vector<128x255xf32>
    %14 = tpu.iota {dimensions = array<i32: 0>} : vector<128x255xi32>
    %c128_i32 = arith.constant 128 : i32
    %15 = arith.muli %arg0, %c128_i32 : i32
    %16 = vector.broadcast %15 : i32 to vector<128x255xi32>
    %17 = arith.addi %14, %16 : vector<128x255xi32>
    %18 = arith.sitofp %17 : vector<128x255xi32> to vector<128x255xf32>
    %cst_7 = arith.constant 6.400000e+01 : f32
    %19 = vector.broadcast %cst_7 : f32 to vector<128x255xf32>
    %20 = arith.divf %18, %19 : vector<128x255xf32>
    %21 = math.floor %20 : vector<128x255xf32>
    %cst_8 = arith.constant 6.400000e+01 : f32
    %22 = vector.broadcast %cst_8 : f32 to vector<128x255xf32>
    %23 = arith.mulf %21, %22 : vector<128x255xf32>
    %24 = arith.subf %18, %23 : vector<128x255xf32>
    %cst_9 = arith.constant 8.000000e+00 : f32
    %25 = vector.broadcast %cst_9 : f32 to vector<128x255xf32>
    %26 = arith.divf %24, %25 : vector<128x255xf32>
    %27 = math.floor %26 : vector<128x255xf32>
    %cst_10 = arith.constant 8.000000e+00 : f32
    %28 = vector.broadcast %cst_10 : f32 to vector<128x255xf32>
    %29 = arith.mulf %27, %28 : vector<128x255xf32>
    %30 = arith.subf %24, %29 : vector<128x255xf32>
    %cst_11 = arith.constant 0.000000e+00 : f32
    %31 = vector.broadcast %cst_11 : f32 to vector<128x255xf32>
    %32 = arith.cmpf oeq, %13, %31 : vector<128x255xf32>
    %cst_12 = arith.constant 1.000000e+00 : f32
    %33 = vector.broadcast %cst_12 : f32 to vector<128x255xf32>
    %34 = arith.cmpf oeq, %13, %33 : vector<128x255xf32>
    %cst_13 = arith.constant 0.000000e+00 : f32
    %35 = vector.broadcast %cst_13 : f32 to vector<128x255xf32>
    %36 = arith.select %34, %27, %35 : vector<128x255xi1>, vector<128x255xf32>
    %37 = arith.select %32, %30, %36 : vector<128x255xi1>, vector<128x255xf32>
    %38 = arith.addf %5, %37 : vector<128x255xf32>
    %cst_14 = arith.constant 4.000000e+00 : f32
    %39 = vector.broadcast %cst_14 : f32 to vector<128x255xf32>
    %40 = arith.mulf %38, %39 : vector<128x255xf32>
    %cst_15 = arith.constant 2.000000e+00 : f32
    %41 = vector.broadcast %cst_15 : f32 to vector<128x255xf32>
    %42 = arith.cmpf oge, %13, %41 : vector<128x255xf32>
    %cst_16 = arith.constant 4.000000e+00 : f32
    %43 = vector.broadcast %cst_16 : f32 to vector<128x255xf32>
    %44 = arith.cmpf olt, %13, %43 : vector<128x255xf32>
    %45 = arith.andi %42, %44 : vector<128x255xi1>
    %cst_17 = arith.constant 0.000000e+00 : f32
    %46 = vector.broadcast %cst_17 : f32 to vector<128x255xf32>
    %47 = arith.select %45, %5, %46 : vector<128x255xi1>, vector<128x255xf32>
    %48 = math.exp %47 : vector<128x255xf32>
    %cst_18 = arith.constant 4.000000e+00 : f32
    %49 = vector.broadcast %cst_18 : f32 to vector<128x255xf32>
    %50 = arith.mulf %48, %49 : vector<128x255xf32>
    %51 = arith.negf %5 : vector<128x255xf32>
    %52 = math.exp %51 : vector<128x255xf32>
    %cst_19 = arith.constant 1.000000e+00 : f32
    %53 = vector.broadcast %cst_19 : f32 to vector<128x255xf32>
    %54 = arith.addf %53, %52 : vector<128x255xf32>
    %55 = arith.divf %53, %54 : vector<128x255xf32>
    %cst_20 = arith.constant 2.000000e+00 : f32
    %56 = vector.broadcast %cst_20 : f32 to vector<128x255xf32>
    %57 = arith.cmpf olt, %13, %56 : vector<128x255xf32>
    %58 = arith.select %45, %50, %55 : vector<128x255xi1>, vector<128x255xf32>
    %59 = arith.select %57, %40, %58 : vector<128x255xi1>, vector<128x255xf32>
    %c0_21 = arith.constant 0 : index
    %c0_22 = arith.constant 0 : index
    %60 = vector.load %arg4[%c0_21, %c0_22] : memref<128x255xf32, #tpu.memory_space<vmem>>, vector<128x255xf32>
    tpu.vector_store %arg4[%c0_21, %c0_22], %59 {strides = array<i32>} : memref<128x255xf32, #tpu.memory_space<vmem>>, vector<128x255xf32>,
    return
  }
  func.func @transform_0(%arg0: i32) -> (i32, i32) {
    %c0_i32 = arith.constant 0 : i32
    %c0_i32_0 = arith.constant 0 : i32
    return %arg0, %c0_i32 : i32, i32
  }
  func.func @transform_1(%arg0: i32) -> (i32, i32) {
    %c0_i32 = arith.constant 0 : i32
    %c0_i32_0 = arith.constant 0 : i32
    %c0_i32_1 = arith.constant 0 : i32
    return %c0_i32, %c0_i32_0 : i32, i32
  }
  func.func @transform_2(%arg0: i32) -> (i32, i32) {
    %c0_i32 = arith.constant 0 : i32
    %c0_i32_0 = arith.constant 0 : i32
    %c0_i32_1 = arith.constant 0 : i32
    return %c0_i32, %c0_i32_0 : i32, i32
  }
  func.func @transform_3(%arg0: i32) -> (i32, i32) {
    %c0_i32 = arith.constant 0 : i32
    %c0_i32_0 = arith.constant 0 : i32
    return %arg0, %c0_i32 : i32, i32
  }
}

module attributes {stable_mosaic.version = 11 : i64} {
  func.func @_gemm_bias_act_kernel(%arg0: i32, %arg1: memref<32x64xbf16, #tpu.memory_space<vmem>>, %arg2: memref<64x96xbf16, #tpu.memory_space<vmem>>, %arg3: memref<1x96xf32, #tpu.memory_space<vmem>>, %arg4: memref<32x96xbf16, #tpu.memory_space<vmem>>) attributes {dimension_semantics = [#tpu.dimension_semantics<parallel>], iteration_bounds = array<i64: 1>, scalar_prefetch = 0 : i64, scratch_operands = 0 : i64, tpu.core_type = #tpu.core_type<tc>, window_params = [{transform_indices = @transform_0, window_bounds = array<i64: 32, 64>}, {pipeline_mode = #tpu.pipeline_mode<synchronous>, transform_indices = @transform_1, window_bounds = array<i64: 64, 96>}, {pipeline_mode = #tpu.pipeline_mode<synchronous>, transform_indices = @transform_2, window_bounds = array<i64: 1, 96>}, {transform_indices = @transform_3, window_bounds = array<i64: 32, 96>}]} {
    %c0 = arith.constant 0 : index
    %c0_0 = arith.constant 0 : index
    %0 = vector.load %arg1[%c0, %c0_0] : memref<32x64xbf16, #tpu.memory_space<vmem>>, vector<32x64xbf16>
    %c0_1 = arith.constant 0 : index
    %c0_2 = arith.constant 0 : index
    %1 = vector.load %arg2[%c0_1, %c0_2] : memref<64x96xbf16, #tpu.memory_space<vmem>>, vector<64x96xbf16>
    %cst = arith.constant dense<0.000000e+00> : vector<32x96xf32>
    %2 = tpu.matmul %0, %1, %cst {dimension_numbers = #tpu.dot_dimension_numbers<[1], [0], [0], [1], [0, 0, 1, 1], [], []>} : vector<32x64xbf16>, vector<64x96xbf16>, vector<32x96xf32> -> vector<32x96xf32>
    %c0_3 = arith.constant 0 : index
    %c0_4 = arith.constant 0 : index
    %3 = vector.load %arg3[%c0_3, %c0_4] : memref<1x96xf32, #tpu.memory_space<vmem>>, vector<1x96xf32>
    %4 = vector.broadcast %3 : vector<1x96xf32> to vector<32x96xf32>
    %5 = arith.addf %2, %4 : vector<32x96xf32>
    %6 = arith.negf %5 : vector<32x96xf32>
    %7 = math.exp %6 : vector<32x96xf32>
    %cst_5 = arith.constant 1.000000e+00 : f32
    %8 = vector.broadcast %cst_5 : f32 to vector<32x96xf32>
    %9 = arith.addf %8, %7 : vector<32x96xf32>
    %10 = arith.divf %8, %9 : vector<32x96xf32>
    %11 = arith.mulf %5, %10 : vector<32x96xf32>
    %12 = arith.truncf %11 : vector<32x96xf32> to vector<32x96xbf16>
    %c0_6 = arith.constant 0 : index
    %c0_7 = arith.constant 0 : index
    %13 = vector.load %arg4[%c0_6, %c0_7] : memref<32x96xbf16, #tpu.memory_space<vmem>>, vector<32x96xbf16>
    tpu.vector_store %arg4[%c0_6, %c0_7], %12 {strides = array<i32>} : memref<32x96xbf16, #tpu.memory_space<vmem>>, vector<32x96xbf16>,
    return
  }
  func.func @transform_0(%arg0: i32) -> (i32, i32) {
    %c0_i32 = arith.constant 0 : i32
    %c0_i32_0 = arith.constant 0 : i32
    return %arg0, %c0_i32 : i32, i32
  }
  func.func @transform_1(%arg0: i32) -> (i32, i32) {
    %c0_i32 = arith.constant 0 : i32
    %c0_i32_0 = arith.constant 0 : i32
    %c0_i32_1 = arith.constant 0 : i32
    return %c0_i32, %c0_i32_0 : i32, i32
  }
  func.func @transform_2(%arg0: i32) -> (i32, i32) {
    %c0_i32 = arith.constant 0 : i32
    %c0_i32_0 = arith.constant 0 : i32
    %c0_i32_1 = arith.constant 0 : i32
    return %c0_i32, %c0_i32_0 : i32, i32
  }
  func.func @transform_3(%arg0: i32) -> (i32, i32) {
    %c0_i32 = arith.constant 0 : i32
    %c0_i32_0 = arith.constant 0 : i32
    return %arg0, %c0_i32 : i32, i32
  }
}

module attributes {stable_mosaic.version = 11 : i64} {
  func.func @_gemm_bias_act_kernel(%arg0: i32, %arg1: memref<32x288xbf16, #tpu.memory_space<vmem>>, %arg2: memref<288x64xbf16, #tpu.memory_space<vmem>>, %arg3: memref<1x64xf32, #tpu.memory_space<vmem>>, %arg4: memref<32x64xbf16, #tpu.memory_space<vmem>>) attributes {dimension_semantics = [#tpu.dimension_semantics<parallel>], iteration_bounds = array<i64: 1>, scalar_prefetch = 0 : i64, scratch_operands = 0 : i64, tpu.core_type = #tpu.core_type<tc>, window_params = [{transform_indices = @transform_0, window_bounds = array<i64: 32, 288>}, {pipeline_mode = #tpu.pipeline_mode<synchronous>, transform_indices = @transform_1, window_bounds = array<i64: 288, 64>}, {pipeline_mode = #tpu.pipeline_mode<synchronous>, transform_indices = @transform_2, window_bounds = array<i64: 1, 64>}, {transform_indices = @transform_3, window_bounds = array<i64: 32, 64>}]} {
    %c0 = arith.constant 0 : index
    %c0_0 = arith.constant 0 : index
    %0 = vector.load %arg1[%c0, %c0_0] : memref<32x288xbf16, #tpu.memory_space<vmem>>, vector<32x288xbf16>
    %c0_1 = arith.constant 0 : index
    %c0_2 = arith.constant 0 : index
    %1 = vector.load %arg2[%c0_1, %c0_2] : memref<288x64xbf16, #tpu.memory_space<vmem>>, vector<288x64xbf16>
    %cst = arith.constant dense<0.000000e+00> : vector<32x64xf32>
    %2 = tpu.matmul %0, %1, %cst {dimension_numbers = #tpu.dot_dimension_numbers<[1], [0], [0], [1], [0, 0, 1, 1], [], []>} : vector<32x288xbf16>, vector<288x64xbf16>, vector<32x64xf32> -> vector<32x64xf32>
    %c0_3 = arith.constant 0 : index
    %c0_4 = arith.constant 0 : index
    %3 = vector.load %arg3[%c0_3, %c0_4] : memref<1x64xf32, #tpu.memory_space<vmem>>, vector<1x64xf32>
    %4 = vector.broadcast %3 : vector<1x64xf32> to vector<32x64xf32>
    %5 = arith.addf %2, %4 : vector<32x64xf32>
    %6 = arith.negf %5 : vector<32x64xf32>
    %7 = math.exp %6 : vector<32x64xf32>
    %cst_5 = arith.constant 1.000000e+00 : f32
    %8 = vector.broadcast %cst_5 : f32 to vector<32x64xf32>
    %9 = arith.addf %8, %7 : vector<32x64xf32>
    %10 = arith.divf %8, %9 : vector<32x64xf32>
    %11 = arith.mulf %5, %10 : vector<32x64xf32>
    %12 = arith.truncf %11 : vector<32x64xf32> to vector<32x64xbf16>
    %c0_6 = arith.constant 0 : index
    %c0_7 = arith.constant 0 : index
    %13 = vector.load %arg4[%c0_6, %c0_7] : memref<32x64xbf16, #tpu.memory_space<vmem>>, vector<32x64xbf16>
    tpu.vector_store %arg4[%c0_6, %c0_7], %12 {strides = array<i32>} : memref<32x64xbf16, #tpu.memory_space<vmem>>, vector<32x64xbf16>,
    return
  }
  func.func @transform_0(%arg0: i32) -> (i32, i32) {
    %c0_i32 = arith.constant 0 : i32
    %c0_i32_0 = arith.constant 0 : i32
    return %arg0, %c0_i32 : i32, i32
  }
  func.func @transform_1(%arg0: i32) -> (i32, i32) {
    %c0_i32 = arith.constant 0 : i32
    %c0_i32_0 = arith.constant 0 : i32
    %c0_i32_1 = arith.constant 0 : i32
    return %c0_i32, %c0_i32_0 : i32, i32
  }
  func.func @transform_2(%arg0: i32) -> (i32, i32) {
    %c0_i32 = arith.constant 0 : i32
    %c0_i32_0 = arith.constant 0 : i32
    %c0_i32_1 = arith.constant 0 : i32
    return %c0_i32, %c0_i32_0 : i32, i32
  }
  func.func @transform_3(%arg0: i32) -> (i32, i32) {
    %c0_i32 = arith.constant 0 : i32
    %c0_i32_0 = arith.constant 0 : i32
    return %arg0, %c0_i32 : i32, i32
  }
}

module attributes {stable_mosaic.version = 11 : i64} {
  func.func @_gemm_bias_act_kernel(%arg0: i32, %arg1: memref<32x864xbf16, #tpu.memory_space<vmem>>, %arg2: memref<864x192xbf16, #tpu.memory_space<vmem>>, %arg3: memref<1x192xf32, #tpu.memory_space<vmem>>, %arg4: memref<32x192xbf16, #tpu.memory_space<vmem>>) attributes {dimension_semantics = [#tpu.dimension_semantics<parallel>], iteration_bounds = array<i64: 1>, scalar_prefetch = 0 : i64, scratch_operands = 0 : i64, tpu.core_type = #tpu.core_type<tc>, window_params = [{transform_indices = @transform_0, window_bounds = array<i64: 32, 864>}, {pipeline_mode = #tpu.pipeline_mode<synchronous>, transform_indices = @transform_1, window_bounds = array<i64: 864, 192>}, {pipeline_mode = #tpu.pipeline_mode<synchronous>, transform_indices = @transform_2, window_bounds = array<i64: 1, 192>}, {transform_indices = @transform_3, window_bounds = array<i64: 32, 192>}]} {
    %c0 = arith.constant 0 : index
    %c0_0 = arith.constant 0 : index
    %0 = vector.load %arg1[%c0, %c0_0] : memref<32x864xbf16, #tpu.memory_space<vmem>>, vector<32x864xbf16>
    %c0_1 = arith.constant 0 : index
    %c0_2 = arith.constant 0 : index
    %1 = vector.load %arg2[%c0_1, %c0_2] : memref<864x192xbf16, #tpu.memory_space<vmem>>, vector<864x192xbf16>
    %cst = arith.constant dense<0.000000e+00> : vector<32x192xf32>
    %2 = tpu.matmul %0, %1, %cst {dimension_numbers = #tpu.dot_dimension_numbers<[1], [0], [0], [1], [0, 0, 1, 1], [], []>} : vector<32x864xbf16>, vector<864x192xbf16>, vector<32x192xf32> -> vector<32x192xf32>
    %c0_3 = arith.constant 0 : index
    %c0_4 = arith.constant 0 : index
    %3 = vector.load %arg3[%c0_3, %c0_4] : memref<1x192xf32, #tpu.memory_space<vmem>>, vector<1x192xf32>
    %4 = vector.broadcast %3 : vector<1x192xf32> to vector<32x192xf32>
    %5 = arith.addf %2, %4 : vector<32x192xf32>
    %6 = arith.negf %5 : vector<32x192xf32>
    %7 = math.exp %6 : vector<32x192xf32>
    %cst_5 = arith.constant 1.000000e+00 : f32
    %8 = vector.broadcast %cst_5 : f32 to vector<32x192xf32>
    %9 = arith.addf %8, %7 : vector<32x192xf32>
    %10 = arith.divf %8, %9 : vector<32x192xf32>
    %11 = arith.mulf %5, %10 : vector<32x192xf32>
    %12 = arith.truncf %11 : vector<32x192xf32> to vector<32x192xbf16>
    %c0_6 = arith.constant 0 : index
    %c0_7 = arith.constant 0 : index
    %13 = vector.load %arg4[%c0_6, %c0_7] : memref<32x192xbf16, #tpu.memory_space<vmem>>, vector<32x192xbf16>
    tpu.vector_store %arg4[%c0_6, %c0_7], %12 {strides = array<i32>} : memref<32x192xbf16, #tpu.memory_space<vmem>>, vector<32x192xbf16>,
    return
  }
  func.func @transform_0(%arg0: i32) -> (i32, i32) {
    %c0_i32 = arith.constant 0 : i32
    %c0_i32_0 = arith.constant 0 : i32
    return %arg0, %c0_i32 : i32, i32
  }
  func.func @transform_1(%arg0: i32) -> (i32, i32) {
    %c0_i32 = arith.constant 0 : i32
    %c0_i32_0 = arith.constant 0 : i32
    %c0_i32_1 = arith.constant 0 : i32
    return %c0_i32, %c0_i32_0 : i32, i32
  }
  func.func @transform_2(%arg0: i32) -> (i32, i32) {
    %c0_i32 = arith.constant 0 : i32
    %c0_i32_0 = arith.constant 0 : i32
    %c0_i32_1 = arith.constant 0 : i32
    return %c0_i32, %c0_i32_0 : i32, i32
  }
  func.func @transform_3(%arg0: i32) -> (i32, i32) {
    %c0_i32 = arith.constant 0 : i32
    %c0_i32_0 = arith.constant 0 : i32
    return %arg0, %c0_i32 : i32, i32
  }
}

module attributes {stable_mosaic.version = 11 : i64} {
  func.func @_pred_decode_kernel(%arg0: i32, %arg1: memref<32x192xbf16, #tpu.memory_space<vmem>>, %arg2: memref<192x255xbf16, #tpu.memory_space<vmem>>, %arg3: memref<1x255xf32, #tpu.memory_space<vmem>>, %arg4: memref<32x255xf32, #tpu.memory_space<vmem>>) attributes {dimension_semantics = [#tpu.dimension_semantics<parallel>], iteration_bounds = array<i64: 1>, scalar_prefetch = 0 : i64, scratch_operands = 0 : i64, tpu.core_type = #tpu.core_type<tc>, window_params = [{transform_indices = @transform_0, window_bounds = array<i64: 32, 192>}, {pipeline_mode = #tpu.pipeline_mode<synchronous>, transform_indices = @transform_1, window_bounds = array<i64: 192, 255>}, {pipeline_mode = #tpu.pipeline_mode<synchronous>, transform_indices = @transform_2, window_bounds = array<i64: 1, 255>}, {transform_indices = @transform_3, window_bounds = array<i64: 32, 255>}]} {
    %c0 = arith.constant 0 : index
    %c0_0 = arith.constant 0 : index
    %0 = vector.load %arg1[%c0, %c0_0] : memref<32x192xbf16, #tpu.memory_space<vmem>>, vector<32x192xbf16>
    %c0_1 = arith.constant 0 : index
    %c0_2 = arith.constant 0 : index
    %1 = vector.load %arg2[%c0_1, %c0_2] : memref<192x255xbf16, #tpu.memory_space<vmem>>, vector<192x255xbf16>
    %cst = arith.constant dense<0.000000e+00> : vector<32x255xf32>
    %2 = tpu.matmul %0, %1, %cst {dimension_numbers = #tpu.dot_dimension_numbers<[1], [0], [0], [1], [0, 0, 1, 1], [], []>} : vector<32x192xbf16>, vector<192x255xbf16>, vector<32x255xf32> -> vector<32x255xf32>
    %c0_3 = arith.constant 0 : index
    %c0_4 = arith.constant 0 : index
    %3 = vector.load %arg3[%c0_3, %c0_4] : memref<1x255xf32, #tpu.memory_space<vmem>>, vector<1x255xf32>
    %4 = vector.broadcast %3 : vector<1x255xf32> to vector<32x255xf32>
    %5 = arith.addf %2, %4 : vector<32x255xf32>
    %6 = tpu.iota {dimensions = array<i32: 1>} : vector<32x255xi32>
    %7 = arith.sitofp %6 : vector<32x255xi32> to vector<32x255xf32>
    %cst_5 = arith.constant 8.500000e+01 : f32
    %8 = vector.broadcast %cst_5 : f32 to vector<32x255xf32>
    %9 = arith.divf %7, %8 : vector<32x255xf32>
    %10 = math.floor %9 : vector<32x255xf32>
    %cst_6 = arith.constant 8.500000e+01 : f32
    %11 = vector.broadcast %cst_6 : f32 to vector<32x255xf32>
    %12 = arith.mulf %10, %11 : vector<32x255xf32>
    %13 = arith.subf %7, %12 : vector<32x255xf32>
    %14 = tpu.iota {dimensions = array<i32: 0>} : vector<32x255xi32>
    %c32_i32 = arith.constant 32 : i32
    %15 = arith.muli %arg0, %c32_i32 : i32
    %16 = vector.broadcast %15 : i32 to vector<32x255xi32>
    %17 = arith.addi %14, %16 : vector<32x255xi32>
    %18 = arith.sitofp %17 : vector<32x255xi32> to vector<32x255xf32>
    %cst_7 = arith.constant 1.600000e+01 : f32
    %19 = vector.broadcast %cst_7 : f32 to vector<32x255xf32>
    %20 = arith.divf %18, %19 : vector<32x255xf32>
    %21 = math.floor %20 : vector<32x255xf32>
    %cst_8 = arith.constant 1.600000e+01 : f32
    %22 = vector.broadcast %cst_8 : f32 to vector<32x255xf32>
    %23 = arith.mulf %21, %22 : vector<32x255xf32>
    %24 = arith.subf %18, %23 : vector<32x255xf32>
    %cst_9 = arith.constant 4.000000e+00 : f32
    %25 = vector.broadcast %cst_9 : f32 to vector<32x255xf32>
    %26 = arith.divf %24, %25 : vector<32x255xf32>
    %27 = math.floor %26 : vector<32x255xf32>
    %cst_10 = arith.constant 4.000000e+00 : f32
    %28 = vector.broadcast %cst_10 : f32 to vector<32x255xf32>
    %29 = arith.mulf %27, %28 : vector<32x255xf32>
    %30 = arith.subf %24, %29 : vector<32x255xf32>
    %cst_11 = arith.constant 0.000000e+00 : f32
    %31 = vector.broadcast %cst_11 : f32 to vector<32x255xf32>
    %32 = arith.cmpf oeq, %13, %31 : vector<32x255xf32>
    %cst_12 = arith.constant 1.000000e+00 : f32
    %33 = vector.broadcast %cst_12 : f32 to vector<32x255xf32>
    %34 = arith.cmpf oeq, %13, %33 : vector<32x255xf32>
    %cst_13 = arith.constant 0.000000e+00 : f32
    %35 = vector.broadcast %cst_13 : f32 to vector<32x255xf32>
    %36 = arith.select %34, %27, %35 : vector<32x255xi1>, vector<32x255xf32>
    %37 = arith.select %32, %30, %36 : vector<32x255xi1>, vector<32x255xf32>
    %38 = arith.addf %5, %37 : vector<32x255xf32>
    %cst_14 = arith.constant 8.000000e+00 : f32
    %39 = vector.broadcast %cst_14 : f32 to vector<32x255xf32>
    %40 = arith.mulf %38, %39 : vector<32x255xf32>
    %cst_15 = arith.constant 2.000000e+00 : f32
    %41 = vector.broadcast %cst_15 : f32 to vector<32x255xf32>
    %42 = arith.cmpf oge, %13, %41 : vector<32x255xf32>
    %cst_16 = arith.constant 4.000000e+00 : f32
    %43 = vector.broadcast %cst_16 : f32 to vector<32x255xf32>
    %44 = arith.cmpf olt, %13, %43 : vector<32x255xf32>
    %45 = arith.andi %42, %44 : vector<32x255xi1>
    %cst_17 = arith.constant 0.000000e+00 : f32
    %46 = vector.broadcast %cst_17 : f32 to vector<32x255xf32>
    %47 = arith.select %45, %5, %46 : vector<32x255xi1>, vector<32x255xf32>
    %48 = math.exp %47 : vector<32x255xf32>
    %cst_18 = arith.constant 8.000000e+00 : f32
    %49 = vector.broadcast %cst_18 : f32 to vector<32x255xf32>
    %50 = arith.mulf %48, %49 : vector<32x255xf32>
    %51 = arith.negf %5 : vector<32x255xf32>
    %52 = math.exp %51 : vector<32x255xf32>
    %cst_19 = arith.constant 1.000000e+00 : f32
    %53 = vector.broadcast %cst_19 : f32 to vector<32x255xf32>
    %54 = arith.addf %53, %52 : vector<32x255xf32>
    %55 = arith.divf %53, %54 : vector<32x255xf32>
    %cst_20 = arith.constant 2.000000e+00 : f32
    %56 = vector.broadcast %cst_20 : f32 to vector<32x255xf32>
    %57 = arith.cmpf olt, %13, %56 : vector<32x255xf32>
    %58 = arith.select %45, %50, %55 : vector<32x255xi1>, vector<32x255xf32>
    %59 = arith.select %57, %40, %58 : vector<32x255xi1>, vector<32x255xf32>
    %c0_21 = arith.constant 0 : index
    %c0_22 = arith.constant 0 : index
    %60 = vector.load %arg4[%c0_21, %c0_22] : memref<32x255xf32, #tpu.memory_space<vmem>>, vector<32x255xf32>
    tpu.vector_store %arg4[%c0_21, %c0_22], %59 {strides = array<i32>} : memref<32x255xf32, #tpu.memory_space<vmem>>, vector<32x255xf32>,
    return
  }
  func.func @transform_0(%arg0: i32) -> (i32, i32) {
    %c0_i32 = arith.constant 0 : i32
    %c0_i32_0 = arith.constant 0 : i32
    return %arg0, %c0_i32 : i32, i32
  }
  func.func @transform_1(%arg0: i32) -> (i32, i32) {
    %c0_i32 = arith.constant 0 : i32
    %c0_i32_0 = arith.constant 0 : i32
    %c0_i32_1 = arith.constant 0 : i32
    return %c0_i32, %c0_i32_0 : i32, i32
  }
  func.func @transform_2(%arg0: i32) -> (i32, i32) {
    %c0_i32 = arith.constant 0 : i32
    %c0_i32_0 = arith.constant 0 : i32
    %c0_i32_1 = arith.constant 0 : i32
    return %c0_i32, %c0_i32_0 : i32, i32
  }
  func.func @transform_3(%arg0: i32) -> (i32, i32) {
    %c0_i32 = arith.constant 0 : i32
    %c0_i32_0 = arith.constant 0 : i32
    return %arg0, %c0_i32 : i32, i32
  }
}

module attributes {stable_mosaic.version = 11 : i64} {
  func.func @_gemm_bias_act_kernel(%arg0: i32, %arg1: memref<8x576xbf16, #tpu.memory_space<vmem>>, %arg2: memref<576x128xbf16, #tpu.memory_space<vmem>>, %arg3: memref<1x128xf32, #tpu.memory_space<vmem>>, %arg4: memref<8x128xbf16, #tpu.memory_space<vmem>>) attributes {dimension_semantics = [#tpu.dimension_semantics<parallel>], iteration_bounds = array<i64: 1>, scalar_prefetch = 0 : i64, scratch_operands = 0 : i64, tpu.core_type = #tpu.core_type<tc>, window_params = [{transform_indices = @transform_0, window_bounds = array<i64: 8, 576>}, {pipeline_mode = #tpu.pipeline_mode<synchronous>, transform_indices = @transform_1, window_bounds = array<i64: 576, 128>}, {pipeline_mode = #tpu.pipeline_mode<synchronous>, transform_indices = @transform_2, window_bounds = array<i64: 1, 128>}, {transform_indices = @transform_3, window_bounds = array<i64: 8, 128>}]} {
    %c0 = arith.constant 0 : index
    %c0_0 = arith.constant 0 : index
    %0 = vector.load %arg1[%c0, %c0_0] : memref<8x576xbf16, #tpu.memory_space<vmem>>, vector<8x576xbf16>
    %c0_1 = arith.constant 0 : index
    %c0_2 = arith.constant 0 : index
    %1 = vector.load %arg2[%c0_1, %c0_2] : memref<576x128xbf16, #tpu.memory_space<vmem>>, vector<576x128xbf16>
    %cst = arith.constant dense<0.000000e+00> : vector<8x128xf32>
    %2 = tpu.matmul %0, %1, %cst {dimension_numbers = #tpu.dot_dimension_numbers<[1], [0], [0], [1], [0, 0, 1, 1], [], []>} : vector<8x576xbf16>, vector<576x128xbf16>, vector<8x128xf32> -> vector<8x128xf32>
    %c0_3 = arith.constant 0 : index
    %c0_4 = arith.constant 0 : index
    %3 = vector.load %arg3[%c0_3, %c0_4] : memref<1x128xf32, #tpu.memory_space<vmem>>, vector<1x128xf32>
    %4 = vector.broadcast %3 : vector<1x128xf32> to vector<8x128xf32>
    %5 = arith.addf %2, %4 : vector<8x128xf32>
    %6 = arith.negf %5 : vector<8x128xf32>
    %7 = math.exp %6 : vector<8x128xf32>
    %cst_5 = arith.constant 1.000000e+00 : f32
    %8 = vector.broadcast %cst_5 : f32 to vector<8x128xf32>
    %9 = arith.addf %8, %7 : vector<8x128xf32>
    %10 = arith.divf %8, %9 : vector<8x128xf32>
    %11 = arith.mulf %5, %10 : vector<8x128xf32>
    %12 = arith.truncf %11 : vector<8x128xf32> to vector<8x128xbf16>
    %c0_6 = arith.constant 0 : index
    %c0_7 = arith.constant 0 : index
    %13 = vector.load %arg4[%c0_6, %c0_7] : memref<8x128xbf16, #tpu.memory_space<vmem>>, vector<8x128xbf16>
    tpu.vector_store %arg4[%c0_6, %c0_7], %12 {strides = array<i32>} : memref<8x128xbf16, #tpu.memory_space<vmem>>, vector<8x128xbf16>,
    return
  }
  func.func @transform_0(%arg0: i32) -> (i32, i32) {
    %c0_i32 = arith.constant 0 : i32
    %c0_i32_0 = arith.constant 0 : i32
    return %arg0, %c0_i32 : i32, i32
  }
  func.func @transform_1(%arg0: i32) -> (i32, i32) {
    %c0_i32 = arith.constant 0 : i32
    %c0_i32_0 = arith.constant 0 : i32
    %c0_i32_1 = arith.constant 0 : i32
    return %c0_i32, %c0_i32_0 : i32, i32
  }
  func.func @transform_2(%arg0: i32) -> (i32, i32) {
    %c0_i32 = arith.constant 0 : i32
    %c0_i32_0 = arith.constant 0 : i32
    %c0_i32_1 = arith.constant 0 : i32
    return %c0_i32, %c0_i32_0 : i32, i32
  }
  func.func @transform_3(%arg0: i32) -> (i32, i32) {
    %c0_i32 = arith.constant 0 : i32
    %c0_i32_0 = arith.constant 0 : i32
    return %arg0, %c0_i32 : i32, i32
  }
}

module attributes {stable_mosaic.version = 11 : i64} {
  func.func @_gemm_bias_act_kernel(%arg0: i32, %arg1: memref<8x128xbf16, #tpu.memory_space<vmem>>, %arg2: memref<128x96xbf16, #tpu.memory_space<vmem>>, %arg3: memref<1x96xf32, #tpu.memory_space<vmem>>, %arg4: memref<8x96xbf16, #tpu.memory_space<vmem>>) attributes {dimension_semantics = [#tpu.dimension_semantics<parallel>], iteration_bounds = array<i64: 1>, scalar_prefetch = 0 : i64, scratch_operands = 0 : i64, tpu.core_type = #tpu.core_type<tc>, window_params = [{transform_indices = @transform_0, window_bounds = array<i64: 8, 128>}, {pipeline_mode = #tpu.pipeline_mode<synchronous>, transform_indices = @transform_1, window_bounds = array<i64: 128, 96>}, {pipeline_mode = #tpu.pipeline_mode<synchronous>, transform_indices = @transform_2, window_bounds = array<i64: 1, 96>}, {transform_indices = @transform_3, window_bounds = array<i64: 8, 96>}]} {
    %c0 = arith.constant 0 : index
    %c0_0 = arith.constant 0 : index
    %0 = vector.load %arg1[%c0, %c0_0] : memref<8x128xbf16, #tpu.memory_space<vmem>>, vector<8x128xbf16>
    %c0_1 = arith.constant 0 : index
    %c0_2 = arith.constant 0 : index
    %1 = vector.load %arg2[%c0_1, %c0_2] : memref<128x96xbf16, #tpu.memory_space<vmem>>, vector<128x96xbf16>
    %cst = arith.constant dense<0.000000e+00> : vector<8x96xf32>
    %2 = tpu.matmul %0, %1, %cst {dimension_numbers = #tpu.dot_dimension_numbers<[1], [0], [0], [1], [0, 0, 1, 1], [], []>} : vector<8x128xbf16>, vector<128x96xbf16>, vector<8x96xf32> -> vector<8x96xf32>
    %c0_3 = arith.constant 0 : index
    %c0_4 = arith.constant 0 : index
    %3 = vector.load %arg3[%c0_3, %c0_4] : memref<1x96xf32, #tpu.memory_space<vmem>>, vector<1x96xf32>
    %4 = vector.broadcast %3 : vector<1x96xf32> to vector<8x96xf32>
    %5 = arith.addf %2, %4 : vector<8x96xf32>
    %6 = arith.negf %5 : vector<8x96xf32>
    %7 = math.exp %6 : vector<8x96xf32>
    %cst_5 = arith.constant 1.000000e+00 : f32
    %8 = vector.broadcast %cst_5 : f32 to vector<8x96xf32>
    %9 = arith.addf %8, %7 : vector<8x96xf32>
    %10 = arith.divf %8, %9 : vector<8x96xf32>
    %11 = arith.mulf %5, %10 : vector<8x96xf32>
    %12 = arith.truncf %11 : vector<8x96xf32> to vector<8x96xbf16>
    %c0_6 = arith.constant 0 : index
    %c0_7 = arith.constant 0 : index
    %13 = vector.load %arg4[%c0_6, %c0_7] : memref<8x96xbf16, #tpu.memory_space<vmem>>, vector<8x96xbf16>
    tpu.vector_store %arg4[%c0_6, %c0_7], %12 {strides = array<i32>} : memref<8x96xbf16, #tpu.memory_space<vmem>>, vector<8x96xbf16>,
    return
  }
  func.func @transform_0(%arg0: i32) -> (i32, i32) {
    %c0_i32 = arith.constant 0 : i32
    %c0_i32_0 = arith.constant 0 : i32
    return %arg0, %c0_i32 : i32, i32
  }
  func.func @transform_1(%arg0: i32) -> (i32, i32) {
    %c0_i32 = arith.constant 0 : i32
    %c0_i32_0 = arith.constant 0 : i32
    %c0_i32_1 = arith.constant 0 : i32
    return %c0_i32, %c0_i32_0 : i32, i32
  }
  func.func @transform_2(%arg0: i32) -> (i32, i32) {
    %c0_i32 = arith.constant 0 : i32
    %c0_i32_0 = arith.constant 0 : i32
    %c0_i32_1 = arith.constant 0 : i32
    return %c0_i32, %c0_i32_0 : i32, i32
  }
  func.func @transform_3(%arg0: i32) -> (i32, i32) {
    %c0_i32 = arith.constant 0 : i32
    %c0_i32_0 = arith.constant 0 : i32
    return %arg0, %c0_i32 : i32, i32
  }
}

module attributes {stable_mosaic.version = 11 : i64} {
  func.func @_pred_decode_kernel(%arg0: i32, %arg1: memref<8x192xbf16, #tpu.memory_space<vmem>>, %arg2: memref<192x255xbf16, #tpu.memory_space<vmem>>, %arg3: memref<1x255xf32, #tpu.memory_space<vmem>>, %arg4: memref<8x255xf32, #tpu.memory_space<vmem>>) attributes {dimension_semantics = [#tpu.dimension_semantics<parallel>], iteration_bounds = array<i64: 1>, scalar_prefetch = 0 : i64, scratch_operands = 0 : i64, tpu.core_type = #tpu.core_type<tc>, window_params = [{transform_indices = @transform_0, window_bounds = array<i64: 8, 192>}, {pipeline_mode = #tpu.pipeline_mode<synchronous>, transform_indices = @transform_1, window_bounds = array<i64: 192, 255>}, {pipeline_mode = #tpu.pipeline_mode<synchronous>, transform_indices = @transform_2, window_bounds = array<i64: 1, 255>}, {transform_indices = @transform_3, window_bounds = array<i64: 8, 255>}]} {
    %c0 = arith.constant 0 : index
    %c0_0 = arith.constant 0 : index
    %0 = vector.load %arg1[%c0, %c0_0] : memref<8x192xbf16, #tpu.memory_space<vmem>>, vector<8x192xbf16>
    %c0_1 = arith.constant 0 : index
    %c0_2 = arith.constant 0 : index
    %1 = vector.load %arg2[%c0_1, %c0_2] : memref<192x255xbf16, #tpu.memory_space<vmem>>, vector<192x255xbf16>
    %cst = arith.constant dense<0.000000e+00> : vector<8x255xf32>
    %2 = tpu.matmul %0, %1, %cst {dimension_numbers = #tpu.dot_dimension_numbers<[1], [0], [0], [1], [0, 0, 1, 1], [], []>} : vector<8x192xbf16>, vector<192x255xbf16>, vector<8x255xf32> -> vector<8x255xf32>
    %c0_3 = arith.constant 0 : index
    %c0_4 = arith.constant 0 : index
    %3 = vector.load %arg3[%c0_3, %c0_4] : memref<1x255xf32, #tpu.memory_space<vmem>>, vector<1x255xf32>
    %4 = vector.broadcast %3 : vector<1x255xf32> to vector<8x255xf32>
    %5 = arith.addf %2, %4 : vector<8x255xf32>
    %6 = tpu.iota {dimensions = array<i32: 1>} : vector<8x255xi32>
    %7 = arith.sitofp %6 : vector<8x255xi32> to vector<8x255xf32>
    %cst_5 = arith.constant 8.500000e+01 : f32
    %8 = vector.broadcast %cst_5 : f32 to vector<8x255xf32>
    %9 = arith.divf %7, %8 : vector<8x255xf32>
    %10 = math.floor %9 : vector<8x255xf32>
    %cst_6 = arith.constant 8.500000e+01 : f32
    %11 = vector.broadcast %cst_6 : f32 to vector<8x255xf32>
    %12 = arith.mulf %10, %11 : vector<8x255xf32>
    %13 = arith.subf %7, %12 : vector<8x255xf32>
    %14 = tpu.iota {dimensions = array<i32: 0>} : vector<8x255xi32>
    %c8_i32 = arith.constant 8 : i32
    %15 = arith.muli %arg0, %c8_i32 : i32
    %16 = vector.broadcast %15 : i32 to vector<8x255xi32>
    %17 = arith.addi %14, %16 : vector<8x255xi32>
    %18 = arith.sitofp %17 : vector<8x255xi32> to vector<8x255xf32>
    %cst_7 = arith.constant 4.000000e+00 : f32
    %19 = vector.broadcast %cst_7 : f32 to vector<8x255xf32>
    %20 = arith.divf %18, %19 : vector<8x255xf32>
    %21 = math.floor %20 : vector<8x255xf32>
    %cst_8 = arith.constant 4.000000e+00 : f32
    %22 = vector.broadcast %cst_8 : f32 to vector<8x255xf32>
    %23 = arith.mulf %21, %22 : vector<8x255xf32>
    %24 = arith.subf %18, %23 : vector<8x255xf32>
    %cst_9 = arith.constant 2.000000e+00 : f32
    %25 = vector.broadcast %cst_9 : f32 to vector<8x255xf32>
    %26 = arith.divf %24, %25 : vector<8x255xf32>
    %27 = math.floor %26 : vector<8x255xf32>
    %cst_10 = arith.constant 2.000000e+00 : f32
    %28 = vector.broadcast %cst_10 : f32 to vector<8x255xf32>
    %29 = arith.mulf %27, %28 : vector<8x255xf32>
    %30 = arith.subf %24, %29 : vector<8x255xf32>
    %cst_11 = arith.constant 0.000000e+00 : f32
    %31 = vector.broadcast %cst_11 : f32 to vector<8x255xf32>
    %32 = arith.cmpf oeq, %13, %31 : vector<8x255xf32>
    %cst_12 = arith.constant 1.000000e+00 : f32
    %33 = vector.broadcast %cst_12 : f32 to vector<8x255xf32>
    %34 = arith.cmpf oeq, %13, %33 : vector<8x255xf32>
    %cst_13 = arith.constant 0.000000e+00 : f32
    %35 = vector.broadcast %cst_13 : f32 to vector<8x255xf32>
    %36 = arith.select %34, %27, %35 : vector<8x255xi1>, vector<8x255xf32>
    %37 = arith.select %32, %30, %36 : vector<8x255xi1>, vector<8x255xf32>
    %38 = arith.addf %5, %37 : vector<8x255xf32>
    %cst_14 = arith.constant 1.600000e+01 : f32
    %39 = vector.broadcast %cst_14 : f32 to vector<8x255xf32>
    %40 = arith.mulf %38, %39 : vector<8x255xf32>
    %cst_15 = arith.constant 2.000000e+00 : f32
    %41 = vector.broadcast %cst_15 : f32 to vector<8x255xf32>
    %42 = arith.cmpf oge, %13, %41 : vector<8x255xf32>
    %cst_16 = arith.constant 4.000000e+00 : f32
    %43 = vector.broadcast %cst_16 : f32 to vector<8x255xf32>
    %44 = arith.cmpf olt, %13, %43 : vector<8x255xf32>
    %45 = arith.andi %42, %44 : vector<8x255xi1>
    %cst_17 = arith.constant 0.000000e+00 : f32
    %46 = vector.broadcast %cst_17 : f32 to vector<8x255xf32>
    %47 = arith.select %45, %5, %46 : vector<8x255xi1>, vector<8x255xf32>
    %48 = math.exp %47 : vector<8x255xf32>
    %cst_18 = arith.constant 1.600000e+01 : f32
    %49 = vector.broadcast %cst_18 : f32 to vector<8x255xf32>
    %50 = arith.mulf %48, %49 : vector<8x255xf32>
    %51 = arith.negf %5 : vector<8x255xf32>
    %52 = math.exp %51 : vector<8x255xf32>
    %cst_19 = arith.constant 1.000000e+00 : f32
    %53 = vector.broadcast %cst_19 : f32 to vector<8x255xf32>
    %54 = arith.addf %53, %52 : vector<8x255xf32>
    %55 = arith.divf %53, %54 : vector<8x255xf32>
    %cst_20 = arith.constant 2.000000e+00 : f32
    %56 = vector.broadcast %cst_20 : f32 to vector<8x255xf32>
    %57 = arith.cmpf olt, %13, %56 : vector<8x255xf32>
    %58 = arith.select %45, %50, %55 : vector<8x255xi1>, vector<8x255xf32>
    %59 = arith.select %57, %40, %58 : vector<8x255xi1>, vector<8x255xf32>
    %c0_21 = arith.constant 0 : index
    %c0_22 = arith.constant 0 : index
    %60 = vector.load %arg4[%c0_21, %c0_22] : memref<8x255xf32, #tpu.memory_space<vmem>>, vector<8x255xf32>
    tpu.vector_store %arg4[%c0_21, %c0_22], %59 {strides = array<i32>} : memref<8x255xf32, #tpu.memory_space<vmem>>, vector<8x255xf32>,
    return
  }
  func.func @transform_0(%arg0: i32) -> (i32, i32) {
    %c0_i32 = arith.constant 0 : i32
    %c0_i32_0 = arith.constant 0 : i32
    return %arg0, %c0_i32 : i32, i32
  }
  func.func @transform_1(%arg0: i32) -> (i32, i32) {
    %c0_i32 = arith.constant 0 : i32
    %c0_i32_0 = arith.constant 0 : i32
    %c0_i32_1 = arith.constant 0 : i32
    return %c0_i32, %c0_i32_0 : i32, i32
  }
  func.func @transform_2(%arg0: i32) -> (i32, i32) {
    %c0_i32 = arith.constant 0 : i32
    %c0_i32_0 = arith.constant 0 : i32
    %c0_i32_1 = arith.constant 0 : i32
    return %c0_i32, %c0_i32_0 : i32, i32
  }
  func.func @transform_3(%arg0: i32) -> (i32, i32) {
    %c0_i32 = arith.constant 0 : i32
    %c0_i32_0 = arith.constant 0 : i32
    return %arg0, %c0_i32 : i32, i32
  }
}

module attributes {stable_mosaic.version = 11 : i64} {
  func.func @_gemm_bias_act_kernel(%arg0: i32, %arg1: memref<8x864xbf16, #tpu.memory_space<vmem>>, %arg2: memref<864x192xbf16, #tpu.memory_space<vmem>>, %arg3: memref<1x192xf32, #tpu.memory_space<vmem>>, %arg4: memref<8x192xbf16, #tpu.memory_space<vmem>>) attributes {dimension_semantics = [#tpu.dimension_semantics<parallel>], iteration_bounds = array<i64: 1>, scalar_prefetch = 0 : i64, scratch_operands = 0 : i64, tpu.core_type = #tpu.core_type<tc>, window_params = [{transform_indices = @transform_0, window_bounds = array<i64: 8, 864>}, {pipeline_mode = #tpu.pipeline_mode<synchronous>, transform_indices = @transform_1, window_bounds = array<i64: 864, 192>}, {pipeline_mode = #tpu.pipeline_mode<synchronous>, transform_indices = @transform_2, window_bounds = array<i64: 1, 192>}, {transform_indices = @transform_3, window_bounds = array<i64: 8, 192>}]} {
    %c0 = arith.constant 0 : index
    %c0_0 = arith.constant 0 : index
    %0 = vector.load %arg1[%c0, %c0_0] : memref<8x864xbf16, #tpu.memory_space<vmem>>, vector<8x864xbf16>
    %c0_1 = arith.constant 0 : index
    %c0_2 = arith.constant 0 : index
    %1 = vector.load %arg2[%c0_1, %c0_2] : memref<864x192xbf16, #tpu.memory_space<vmem>>, vector<864x192xbf16>
    %cst = arith.constant dense<0.000000e+00> : vector<8x192xf32>
    %2 = tpu.matmul %0, %1, %cst {dimension_numbers = #tpu.dot_dimension_numbers<[1], [0], [0], [1], [0, 0, 1, 1], [], []>} : vector<8x864xbf16>, vector<864x192xbf16>, vector<8x192xf32> -> vector<8x192xf32>
    %c0_3 = arith.constant 0 : index
    %c0_4 = arith.constant 0 : index
    %3 = vector.load %arg3[%c0_3, %c0_4] : memref<1x192xf32, #tpu.memory_space<vmem>>, vector<1x192xf32>
    %4 = vector.broadcast %3 : vector<1x192xf32> to vector<8x192xf32>
    %5 = arith.addf %2, %4 : vector<8x192xf32>
    %6 = arith.negf %5 : vector<8x192xf32>
    %7 = math.exp %6 : vector<8x192xf32>
    %cst_5 = arith.constant 1.000000e+00 : f32
    %8 = vector.broadcast %cst_5 : f32 to vector<8x192xf32>
    %9 = arith.addf %8, %7 : vector<8x192xf32>
    %10 = arith.divf %8, %9 : vector<8x192xf32>
    %11 = arith.mulf %5, %10 : vector<8x192xf32>
    %12 = arith.truncf %11 : vector<8x192xf32> to vector<8x192xbf16>
    %c0_6 = arith.constant 0 : index
    %c0_7 = arith.constant 0 : index
    %13 = vector.load %arg4[%c0_6, %c0_7] : memref<8x192xbf16, #tpu.memory_space<vmem>>, vector<8x192xbf16>
    tpu.vector_store %arg4[%c0_6, %c0_7], %12 {strides = array<i32>} : memref<8x192xbf16, #tpu.memory_space<vmem>>, vector<8x192xbf16>,
    return
  }
  func.func @transform_0(%arg0: i32) -> (i32, i32) {
    %c0_i32 = arith.constant 0 : i32
    %c0_i32_0 = arith.constant 0 : i32
    return %arg0, %c0_i32 : i32, i32
  }
  func.func @transform_1(%arg0: i32) -> (i32, i32) {
    %c0_i32 = arith.constant 0 : i32
    %c0_i32_0 = arith.constant 0 : i32
    %c0_i32_1 = arith.constant 0 : i32
    return %c0_i32, %c0_i32_0 : i32, i32
  }
  func.func @transform_2(%arg0: i32) -> (i32, i32) {
    %c0_i32 = arith.constant 0 : i32
    %c0_i32_0 = arith.constant 0 : i32
    %c0_i32_1 = arith.constant 0 : i32
    return %c0_i32, %c0_i32_0 : i32, i32
  }
  func.func @transform_3(%arg0: i32) -> (i32, i32) {
    %c0_i32 = arith.constant 0 : i32
    %c0_i32_0 = arith.constant 0 : i32
    return %arg0, %c0_i32 : i32, i32
  }
}

</mosaic_0001>

<bundles_post_ra>
// kernel: yolox_forward.13
= control target key start
LH: loop header
LB: loop body
LE: loop exit
PB: predicated region body
PF: predicated region fallthrough
CT: control target
= control target key end

     0   :  { %vm358_vm0 = vcmask 1044480   ;;  %vm359_vm1 = vcmask 1045504   ;;  %v2084_v1 = vmov 65535   ;;  %vm261_vm2 = vcmask 220160   ;;  %s2831_s1 = inlined_call_operand.vmem [shape: bf16[27,16], index: 1, kind: input, shape index: {}]   ;;  %s2832_s0 = inlined_call_operand.vmem [shape: bf16[512,27], index: 0, kind: input, shape index: {}]   ;;  %s2833_s2 = inlined_call_operand.vmem [shape: f32[1,16], index: 2, kind: input, shape index: {}]   ;;  %s2834_s3 = inlined_call_operand.vmem [shape: bf16[512,16], index: 3, kind: output, shape index: {}]  }
   0x1   :  { %v1793_v0 = vld [vmem:[%s2831_s1 + $0x8] sm:$0x3f]   ;;  %v360_v2 = vsel %vm358_vm0, 4294967295, %v2084_v1  ;;  %v1795_v4 = vld [vmem:[%s2832_s0] sm:$0xff]   ;;  %v1799_v10 = vld [vmem:[%s2832_s0 + $0x10] sm:$0xff]   ;;  %vm1358_vm3 = vcmask 125952  }
   0x2   :  { %v361_v3 = vsel %vm359_vm1, %v360_v2, 0  ;;  %v1794_v6 = vld [vmem:[%s2831_s1] sm:$0xff]   ;;  %1724 = vmatprep.mubr.msk.bf16.mxu0 %vm261_vm2, %v1795_v4  ;;  %v1797_v8 = vld [vmem:[%s2832_s0 + $0x8] sm:$0xff]   ;;  %v1800_v11 = vld [vmem:[%s2832_s0 + $0x90] sm:$0xff]  }
   0x3   :  { %v363_v5 = vand.u32 %v1793_v0, %v361_v3  ;;  %v1796_v7 = vld [vmem:[%s2832_s0 + $0x80] sm:$0xff]   ;;  %v1798_v9 = vld [vmem:[%s2832_s0 + $0x88] sm:$0xff]   ;;  %v1801_v12 = vld [vmem:[%s2832_s0 + $0x18] sm:$0xff]  }
   0x4   :  { %1756 = vmatprep.mubr.msk.bf16.mxu1 %vm261_vm2, %v1796_v7  ;;  %v1802_v13 = vld [vmem:[%s2832_s0 + $0x98] sm:$0xff]   ;;  %v1803_v14 = vld [vmem:[%s2832_s0 + $0x20] sm:$0xff]   ;;  %v1805_v16 = vld [vmem:[%s2832_s0 + $0x28] sm:$0xff]  }
   0x5   :  { %1720 = vmatprep.subr.bf16.mxu0 %v363_v5  ;;  %1788 = vmatprep.subr.bf16.mxu1 %v363_v5  ;;  %v1804_v15 = vld [vmem:[%s2832_s0 + $0xa0] sm:$0xff]   ;;  %v1806_v17 = vld [vmem:[%s2832_s0 + $0xa8] sm:$0xff]   ;;  %v1807_v18 = vld [vmem:[%s2832_s0 + $0x30] sm:$0xff]  }
   0x6   :  { %1721 = vmatpush3.bf16.msra.mxu0 %v363_v5  ;;  %1790 = vmatpush3.bf16.msra.mxu1 %v363_v5  ;;  %v1808_v19 = vld [vmem:[%s2832_s0 + $0xb0] sm:$0xff]   ;;  %v1809_v20 = vld [vmem:[%s2832_s0 + $0x38] sm:$0xff]   ;;  %v1811_v22 = vld [vmem:[%s2832_s0 + $0x40] sm:$0xff]  }
   0x7   :  { %1722 = vmatprep.subr.bf16.mxu0 %v1794_v6  ;;  %1789 = vmatprep.subr.bf16.mxu1 %v1794_v6  ;;  %v1810_v21 = vld [vmem:[%s2832_s0 + $0xb8] sm:$0xff]   ;;  %v1812_v23 = vld [vmem:[%s2832_s0 + $0xc0] sm:$0xff]   ;;  %v1813_v24 = vld [vmem:[%s2832_s0 + $0x48] sm:$0xff]  }
   0x8   :  { %v1814_v25 = vld [vmem:[%s2832_s0 + $0xc8] sm:$0xff]   ;;  %v1815_v26 = vld [vmem:[%s2832_s0 + $0x50] sm:$0xff]   ;;  %v1817_v28 = vld [vmem:[%s2832_s0 + $0x58] sm:$0xff]  }
   0x9   :  { %v1816_v27 = vld [vmem:[%s2832_s0 + $0xd0] sm:$0xff]   ;;  %v1818_v29 = vld [vmem:[%s2832_s0 + $0xd8] sm:$0xff]   ;;  %v1819_v30 = vld [vmem:[%s2832_s0 + $0x60] sm:$0xff]  }
   0xa   :  { %1723 = vmatpush3.bf16.msra.mxu0 %v1794_v6  ;;  %1791 = vmatpush3.bf16.msra.mxu1 %v1794_v6  ;;  %v1820_v31 = vld [vmem:[%s2832_s0 + $0xe0] sm:$0xff]   ;;  %v1821_v32 = vld [vmem:[%s2832_s0 + $0x68] sm:$0xff]   ;;  %v1823_v34 = vld [vmem:[%s2832_s0 + $0x70] sm:$0xff]  }
   0xb   :  { %v1822_v33 = vld [vmem:[%s2832_s0 + $0xe8] sm:$0xff]   ;;  %v1824_v35 = vld [vmem:[%s2832_s0 + $0xf0] sm:$0xff]   ;;  %v1825_v36 = vld [vmem:[%s2832_s0 + $0x78] sm:$0xff]  }
   0xc   :  { %v1826_v37 = vld [vmem:[%s2832_s0 + $0xf8] sm:$0xff]   ;;  %v2242_v38 = vld [vmem:[%s2833_s2] ss:$0 sm:$0xff] }
   0xd   :  { %1725 = vmatmul.mubr.msk.bf16.vlgmr.msra.gmra.mxu0 %vm261_vm2, %v1797_v8  ;;  %1757 = vmatmul.mubr.msk.bf16.vlgmr.msra.gmra.mxu1 %vm261_vm2, %v1798_v9 }
   0xe   :  { %1728 = vmatprep.mubr.msk.bf16.mxu0 %vm261_vm2, %v1799_v10  ;;  %1760 = vmatprep.mubr.msk.bf16.mxu1 %vm261_vm2, %v1800_v11 }
  0x15   :  { %1729 = vmatmul.mubr.msk.bf16.gmra.mxu0 %vm261_vm2, %v1801_v12  ;;  %1761 = vmatmul.mubr.msk.bf16.gmra.mxu1 %vm261_vm2, %v1802_v13 }
  0x16   :  { %1732 = vmatprep.mubr.msk.bf16.mxu0 %vm261_vm2, %v1803_v14  ;;  %1764 = vmatprep.mubr.msk.bf16.mxu1 %vm261_vm2, %v1804_v15 }
  0x1d   :  { %1733 = vmatmul.mubr.msk.bf16.gmra.mxu0 %vm261_vm2, %v1805_v16  ;;  %1765 = vmatmul.mubr.msk.bf16.gmra.mxu1 %vm261_vm2, %v1806_v17 }
  0x1e   :  { %1736 = vmatprep.mubr.msk.bf16.mxu0 %vm261_vm2, %v1807_v18  ;;  %1768 = vmatprep.mubr.msk.bf16.mxu1 %vm261_vm2, %v1808_v19 }
  0x25   :  { %1737 = vmatmul.mubr.msk.bf16.gmra.mxu0 %vm261_vm2, %v1809_v20  ;;  %1769 = vmatmul.mubr.msk.bf16.gmra.mxu1 %vm261_vm2, %v1810_v21 }
  0x26   :  { %1740 = vmatprep.mubr.msk.bf16.mxu0 %vm261_vm2, %v1811_v22  ;;  %1772 = vmatprep.mubr.msk.bf16.mxu1 %vm261_vm2, %v1812_v23 }
  0x2d   :  { %1741 = vmatmul.mubr.msk.bf16.gmra.mxu0 %vm261_vm2, %v1813_v24  ;;  %1773 = vmatmul.mubr.msk.bf16.gmra.mxu1 %vm261_vm2, %v1814_v25 }
  0x2e   :  { %1744 = vmatprep.mubr.msk.bf16.mxu0 %vm261_vm2, %v1815_v26  ;;  %1776 = vmatprep.mubr.msk.bf16.mxu1 %vm261_vm2, %v1816_v27 }
  0x35   :  { %1745 = vmatmul.mubr.msk.bf16.gmra.mxu0 %vm261_vm2, %v1817_v28  ;;  %1777 = vmatmul.mubr.msk.bf16.gmra.mxu1 %vm261_vm2, %v1818_v29 }
  0x36   :  { %1748 = vmatprep.mubr.msk.bf16.mxu0 %vm261_vm2, %v1819_v30  ;;  %1780 = vmatprep.mubr.msk.bf16.mxu1 %vm261_vm2, %v1820_v31 }
  0x3d   :  { %1749 = vmatmul.mubr.msk.bf16.gmra.mxu0 %vm261_vm2, %v1821_v32  ;;  %1781 = vmatmul.mubr.msk.bf16.gmra.mxu1 %vm261_vm2, %v1822_v33 }
  0x3e   :  { %1752 = vmatprep.mubr.msk.bf16.mxu0 %vm261_vm2, %v1823_v34  ;;  %1784 = vmatprep.mubr.msk.bf16.mxu1 %vm261_vm2, %v1824_v35 }
  0x45   :  { %1753 = vmatmul.mubr.msk.bf16.gmra.mxu0 %vm261_vm2, %v1825_v36  ;;  %1785 = vmatmul.mubr.msk.bf16.gmra.mxu1 %vm261_vm2, %v1826_v37 }
  0xcd   :  { %v1726_v39 = vpop.f32.mrf.mxu0  ;;  %v1758_v40 = vpop.f32.mrf.mxu1 }
  0xce   :  { %v2245_v41 = vadd.f32 %v1726_v39, %v2242_v38  ;;  %v2248_v42 = vadd.f32 %v1758_v40, %v2242_v38 }
  0xcf   :  { %v399_v43 = vpop.f32.mrf.mxu0  ;;  %v527_v44 = vpop.f32.mrf.mxu1 }
  0xd0   :  { %v1496_v45 = vmul.f32 -1.442695, %v2245_v41  ;;  %v1528_v46 = vmul.f32 -1.442695, %v2248_v42  ;;  %v2253_v47 = vadd.f32 %v2242_v38, %v399_v43  ;;  %v2256_v48 = vadd.f32 %v2242_v38, %v527_v44 }
  0xd1   :  { %v1727_v49 = vpop.f32.mrf.mxu0  ;;  %v1759_v50 = vpop.f32.mrf.mxu1 }
  0xd2   :  { %1827 = vpow2.f32 %v1496_v45  ;;  %v1494_v51 = vmul.f32 -1.442695, %v2253_v47  ;;  %v1526_v52 = vmul.f32 -1.442695, %v2256_v48  ;;  %v2261_v53 = vadd.f32 %v1727_v49, %v2242_v38 }
  0xd3   :  { %1829 = vpow2.f32 %v1528_v46  ;;  %v2264_v54 = vadd.f32 %v1759_v50, %v2242_v38  ;;  %v402_v55 = vpop.f32.mrf.mxu0  ;;  %v530_v56 = vpop.f32.mrf.mxu1 }
  0xd4   :  { %1831 = vpow2.f32 %v1494_v51  ;;  %v1497_v57 = vmul.f32 -1.442695, %v2261_v53  ;;  %v2268_v58 = vadd.f32 %v2242_v38, %v402_v55  ;;  %v2271_v59 = vadd.f32 %v2242_v38, %v530_v56 }
  0xd5   :  { %1833 = vpow2.f32 %v1526_v52  ;;  %v1529_v60 = vmul.f32 -1.442695, %v2264_v54  ;;  %v1730_v61 = vpop.f32.mrf.mxu0  ;;  %v1762_v62 = vpop.f32.mrf.mxu1 }
  0xd6   :  { %1835 = vpow2.f32 %v1497_v57  ;;  %v1495_v63 = vmul.f32 -1.442695, %v2268_v58  ;;  %v1527_v0 = vmul.f32 -1.442695, %v2271_v59  ;;  %v2277_v1 = vadd.f32 %v1730_v61, %v2242_v38 }
  0xd7   :  { %1837 = vpow2.f32 %v1529_v60  ;;  %v2280_v2 = vadd.f32 %v1762_v62, %v2242_v38  ;;  %v415_v3 = vpop.f32.mrf.mxu0  ;;  %v543_v4 = vpop.f32.mrf.mxu1 }
  0xd8   :  { %1839 = vpow2.f32 %v1495_v63  ;;  %v1500_v5 = vmul.f32 -1.442695, %v2277_v1  ;;  %v2284_v6 = vadd.f32 %v2242_v38, %v415_v3  ;;  %v2287_v7 = vadd.f32 %v2242_v38, %v543_v4 }
  0xd9   :  { %1841 = vpow2.f32 %v1527_v0  ;;  %v1532_v8 = vmul.f32 -1.442695, %v2280_v2  ;;  %v1731_v9 = vpop.f32.mrf.mxu0  ;;  %v1763_v10 = vpop.f32.mrf.mxu1 }
  0xda   :  { %1843 = vpow2.f32 %v1500_v5  ;;  %v1498_v11 = vmul.f32 -1.442695, %v2284_v6  ;;  %v1530_v12 = vmul.f32 -1.442695, %v2287_v7  ;;  %v2293_v13 = vadd.f32 %v1731_v9, %v2242_v38 }
  0xdb   :  { %1845 = vpow2.f32 %v1532_v8  ;;  %v2296_v14 = vadd.f32 %v1763_v10, %v2242_v38  ;;  %v418_v15 = vpop.f32.mrf.mxu0  ;;  %v546_v16 = vpop.f32.mrf.mxu1 }
  0xdc   :  { %1847 = vpow2.f32 %v1498_v11  ;;  %v1501_v17 = vmul.f32 -1.442695, %v2293_v13  ;;  %v2300_v18 = vadd.f32 %v2242_v38, %v418_v15  ;;  %v2303_v19 = vadd.f32 %v2242_v38, %v546_v16 }
  0xdd   :  { %1849 = vpow2.f32 %v1530_v12  ;;  %v1533_v20 = vmul.f32 -1.442695, %v2296_v14  ;;  %v1734_v21 = vpop.f32.mrf.mxu0  ;;  %v1766_v22 = vpop.f32.mrf.mxu1 }
  0xde   :  { %1851 = vpow2.f32 %v1501_v17  ;;  %v1499_v23 = vmul.f32 -1.442695, %v2300_v18  ;;  %v1531_v24 = vmul.f32 -1.442695, %v2303_v19  ;;  %v2309_v45 = vadd.f32 %v1734_v21, %v2242_v38 }
  0xdf   :  { %v1828_v25 = vpop.eup %1827  ;;  %1853 = vpow2.f32 %v1533_v20  ;;  %v431_v26 = vpop.f32.mrf.mxu0  ;;  %v2312_v56 = vadd.f32 %v1766_v22, %v2242_v38 }
  0xe0   :  { %v559_v27 = vpop.f32.mrf.mxu1  ;;  %v1830_v28 = vpop.eup %1829  ;;  %v848_v29 = vadd.f32 1.0, %v1828_v25  ;;  %1855 = vpow2.f32 %v1499_v23  ;;  %v2315_v61 = vadd.f32 %v2242_v38, %v431_v26  ;;  %v1504_v0 = vmul.f32 -1.442695, %v2309_v45 }
  0xe1   :  { %v1832_v30 = vpop.eup %1831  ;;  %v880_v31 = vadd.f32 1.0, %v1830_v28  ;;  %1857 = vpow2.f32 %v1531_v24  ;;  %v1735_v32 = vpop.f32.mrf.mxu0  ;;  %v2319_v8 = vadd.f32 %v2242_v38, %v559_v27  ;;  %v1536_v15 = vmul.f32 -1.442695, %v2312_v56 }
  0xe2   :  { %v1834_v33 = vpop.eup %1833  ;;  %1859 = vrcp.f32 %v848_v29  ;;  %v846_v34 = vadd.f32 1.0, %v1832_v30  ;;  %v1767_v35 = vpop.f32.mrf.mxu1  ;;  %v2322_v9 = vadd.f32 %v1735_v32, %v2242_v38  ;;  %v1502_v21 = vmul.f32 -1.442695, %v2315_v61 }
  0xe3   :  { %v1836_v36 = vpop.eup %1835  ;;  %1861 = vrcp.f32 %v880_v31  ;;  %v878_v37 = vadd.f32 1.0, %v1834_v33  ;;  %v434_v46 = vpop.f32.mrf.mxu0  ;;  %v2326_v16 = vadd.f32 %v1767_v35, %v2242_v38  ;;  %v1534_v30 = vmul.f32 -1.442695, %v2319_v8 }
  0xe4   :  { %v1838_v39 = vpop.eup %1837  ;;  %1863 = vrcp.f32 %v846_v34  ;;  %v849_v40 = vadd.f32 1.0, %v1836_v36  ;;  %v562_v51 = vpop.f32.mrf.mxu1  ;;  %v2330_v22 = vadd.f32 %v2242_v38, %v434_v46  ;;  %v1505_v31 = vmul.f32 -1.442695, %v2322_v9 }
  0xe5   :  { %v1840_v43 = vpop.eup %1839  ;;  %1865 = vrcp.f32 %v878_v37  ;;  %v881_v44 = vadd.f32 1.0, %v1838_v39  ;;  %v1738_v3 = vpop.f32.mrf.mxu0  ;;  %v2333_v25 = vadd.f32 %v2242_v38, %v562_v51  ;;  %v1537_v35 = vmul.f32 -1.442695, %v2326_v16 }
  0xe6   :  { %v1842_v49 = vpop.eup %1841  ;;  %1867 = vrcp.f32 %v849_v40  ;;  %v847_v50 = vadd.f32 1.0, %v1840_v43  ;;  %v1770_v10 = vpop.f32.mrf.mxu1  ;;  %v2336_v26 = vadd.f32 %v1738_v3, %v2242_v38  ;;  %v1503_v40 = vmul.f32 -1.442695, %v2330_v22 }
  0xe7   :  { %v1844_v52 = vpop.eup %1843  ;;  %1869 = vrcp.f32 %v881_v44  ;;  %v879_v55 = vadd.f32 1.0, %v1842_v49  ;;  %v447_v27 = vpop.f32.mrf.mxu0  ;;  %v2342_v36 = vadd.f32 %v1770_v10, %v2242_v38  ;;  %v1535_v49 = vmul.f32 -1.442695, %v2333_v25 }
  0xe8   :  { %v1846_v57 = vpop.eup %1845  ;;  %1871 = vrcp.f32 %v847_v50  ;;  %v852_v60 = vadd.f32 1.0, %v1844_v52  ;;  %v575_v32 = vpop.f32.mrf.mxu1  ;;  %v2347_v43 = vadd.f32 %v2242_v38, %v447_v27  ;;  %v1508_v50 = vmul.f32 -1.442695, %v2336_v26 }
  0xe9   :  { %v1848_v62 = vpop.eup %1847  ;;  %1873 = vrcp.f32 %v879_v55  ;;  %v884_v63 = vadd.f32 1.0, %v1846_v57  ;;  %v1739_v51 = vpop.f32.mrf.mxu0 }
  0xea   :  { %v1850_v4 = vpop.eup %1849  ;;  %1875 = vrcp.f32 %v852_v60  ;;  %v850_v5 = vadd.f32 1.0, %v1848_v62  ;;  %v1771_v60 = vpop.f32.mrf.mxu1 }
  0xeb   :  { %v1852_v11 = vpop.eup %1851  ;;  %1877 = vrcp.f32 %v884_v63  ;;  %v882_v12 = vadd.f32 1.0, %v1850_v4 }
  0xec   :  { %v1854_v17 = vpop.eup %1853  ;;  %1879 = vrcp.f32 %v850_v5  ;;  %v853_v20 = vadd.f32 1.0, %v1852_v11 }
  0xed   :  { %v1856_v23 = vpop.eup %1855  ;;  %1881 = vrcp.f32 %v882_v12  ;;  %v885_v24 = vadd.f32 1.0, %v1854_v17  ;;  %v2370_v12 = vadd.f32 %v1739_v51, %v2242_v38 }
  0xee   :  { %v1858_v28 = vpop.eup %1857  ;;  %1883 = vrcp.f32 %v853_v20  ;;  %v851_v29 = vadd.f32 1.0, %v1856_v23  ;;  %v578_v23 = vpop.f32.mrf.mxu1 }
  0xef   :  { %v1860_v33 = vpop.eup %1859  ;;  %1885 = vrcp.f32 %v885_v24  ;;  %v883_v34 = vadd.f32 1.0, %v1858_v28  ;;  %v2384_v28 = vadd.f32 %v1771_v60, %v2242_v38 }
  0xf0   :  { %v1862_v37 = vpop.eup %1861  ;;  %v1040_v39 = vmul.f32 %v1860_v33, %v2245_v41  ;;  %1887 = vrcp.f32 %v851_v29  ;;  %v2354_v41 = vadd.f32 %v2242_v38, %v575_v32 }
  0xf1   :  { %v1864_v44 = vpop.eup %1863  ;;  %v1072_v46 = vmul.f32 %v1862_v37, %v2248_v42  ;;  %1889 = vrcp.f32 %v883_v34  ;;  %v1540_v42 = vmul.f32 -1.442695, %v2342_v36  ;;  %v2400_v34 = vadd.f32 %v2242_v38, %v578_v23 }
  0xf2   :  { %v1866_v52 = vpop.eup %1865  ;;  %v1624_v55 = vpack.c.bf16 %v1040_v39, %v1040_v39  ;;  %v1038_v57 = vmul.f32 %v1864_v44, %v2253_v47  ;;  %1891 = vpow2.f32 %v1504_v0  ;;  %v1506_v0 = vmul.f32 -1.442695, %v2347_v43  ;;  %v2410_v44 = vpop.f32.mrf.mxu1 }
  0xf3   :  { %v1868_v62 = vpop.eup %1867  ;;  %v1656_v63 = vpack.c.bf16 %v1072_v46, %v1072_v46  ;;  %v1070_v3 = vmul.f32 %v1866_v52, %v2256_v48  ;;  %1893 = vpow2.f32 %v1536_v15  ;;  %v450_v15 = vpop.f32.mrf.mxu0  ;;  %v1541_v51 = vmul.f32 -1.442695, %v2384_v28 }
  0xf4   :  { %v1870_v4 = vpop.eup %1869  ;;  %1361 = vst.msk [vmem:[%s2834_s3 + $0x8] sm:$0xf] %vm1358_vm3, %v1624_v55  ;;  %v1622_v5 = vpack.c.bf16 %v1038_v57, %v1038_v57  ;;  %v1041_v47 = vmul.f32 %v1868_v62, %v2261_v53  ;;  %1895 = vpow2.f32 %v1502_v21  ;;  %v1538_v21 = vmul.f32 -1.442695, %v2354_v41 }
  0xf5   :  { %v1872_v10 = vpop.eup %1871  ;;  %1393 = vst.msk [vmem:[%s2834_s3 + $0x88] sm:$0xf] %vm1358_vm3, %v1656_v63  ;;  %v1654_v48 = vpack.c.bf16 %v1070_v3, %v1070_v3  ;;  %v1073_v11 = vmul.f32 %v1870_v4, %v2264_v54  ;;  %1897 = vpow2.f32 %v1534_v30  ;;  %v1539_v62 = vmul.f32 -1.442695, %v2400_v34  ;;  %v591_v4 = vpop.f32.mrf.mxu1 }
  0xf6   :  { %v1874_v17 = vpop.eup %1873  ;;  %1359 = vst.msk [vmem:[%s2834_s3] sm:$0xf] %vm1358_vm3, %v1622_v5  ;;  %v1625_v53 = vpack.c.bf16 %v1041_v47, %v1041_v47  ;;  %v1039_v20 = vmul.f32 %v1872_v10, %v2268_v58  ;;  %1899 = vpow2.f32 %v1505_v31  ;;  %v2392_v31 = vadd.f32 %v2242_v38, %v450_v15 }
  0xf7   :  { %v1876_v24 = vpop.eup %1875  ;;  %1391 = vst.msk [vmem:[%s2834_s3 + $0x80] sm:$0xf] %vm1358_vm3, %v1654_v48  ;;  %v1657_v54 = vpack.c.bf16 %v1073_v11, %v1073_v11  ;;  %v1071_v27 = vmul.f32 %v1874_v17, %v2271_v59  ;;  %1901 = vpow2.f32 %v1537_v35  ;;  %v2402_v35 = vpop.f32.mrf.mxu0 }
  0xf8   :  { %v1878_v29 = vpop.eup %1877  ;;  %1362 = vst.msk [vmem:[%s2834_s3 + $0xc] sm:$0xf] %vm1358_vm3, %v1625_v53  ;;  %v1623_v58 = vpack.c.bf16 %v1039_v20, %v1039_v20  ;;  %v1044_v30 = vmul.f32 %v1876_v24, %v2277_v1  ;;  %1903 = vpow2.f32 %v1503_v40  ;;  %v1509_v40 = vmul.f32 -1.442695, %v2370_v12  ;;  %v1775_v20 = vpop.f32.mrf.mxu1 }
  0xf9   :  { %v1880_v32 = vpop.eup %1879  ;;  %1394 = vst.msk [vmem:[%s2834_s3 + $0x8c] sm:$0xf] %vm1358_vm3, %v1657_v54  ;;  %v1655_v59 = vpack.c.bf16 %v1071_v27, %v1071_v27  ;;  %v1076_v33 = vmul.f32 %v1878_v29, %v2280_v2  ;;  %1905 = vpow2.f32 %v1535_v49  ;;  %v1507_v55 = vmul.f32 -1.442695, %v2392_v31  ;;  %v463_v63 = vpop.f32.mrf.mxu0 }
  0xfa   :  { %v1882_v1 = vpop.eup %1881  ;;  %1360 = vst.msk [vmem:[%s2834_s3 + $0x4] sm:$0xf] %vm1358_vm3, %v1623_v58  ;;  %v1628_v37 = vpack.c.bf16 %v1044_v30, %v1044_v30  ;;  %v1042_v39 = vmul.f32 %v1880_v32, %v2284_v6  ;;  %1907 = vpow2.f32 %v1508_v50  ;;  %v2458_v58 = vadd.f32 %v2402_v35, %v2242_v38 }
  0xfb   :  { %v1884_v2 = vpop.eup %1883  ;;  %1392 = vst.msk [vmem:[%s2834_s3 + $0x84] sm:$0xf] %vm1358_vm3, %v1655_v59  ;;  %v1660_v46 = vpack.c.bf16 %v1076_v33, %v1076_v33  ;;  %v1074_v49 = vmul.f32 %v1882_v1, %v2287_v7  ;;  %1909 = vpow2.f32 %v1540_v42  ;;  %v594_v33 = vpop.f32.mrf.mxu1 }
  0xfc   :  { %v1886_v52 = vpop.eup %1885  ;;  %1365 = vst.msk [vmem:[%s2834_s3 + $0x18] sm:$0xf] %vm1358_vm3, %v1628_v37  ;;  %v1626_v6 = vpack.c.bf16 %v1042_v39, %v1042_v39  ;;  %v1045_v50 = vmul.f32 %v1884_v2, %v2293_v13  ;;  %1911 = vpow2.f32 %v1506_v0  ;;  %v2462_v39 = vadd.f32 %v2410_v44, %v2242_v38 }
  0xfd   :  { %v1888_v57 = vpop.eup %1887  ;;  %1397 = vst.msk [vmem:[%s2834_s3 + $0x98] sm:$0xf] %vm1358_vm3, %v1660_v46  ;;  %v1658_v7 = vpack.c.bf16 %v1074_v49, %v1074_v49  ;;  %v1077_v60 = vmul.f32 %v1886_v52, %v2296_v14  ;;  %1913 = vpow2.f32 %v1538_v21  ;;  %v2465_v46 = vadd.f32 %v2242_v38, %v463_v63 }
  0xfe   :  { %v1890_v3 = vpop.eup %1889  ;;  %1363 = vst.msk [vmem:[%s2834_s3 + $0x10] sm:$0xf] %vm1358_vm3, %v1626_v6  ;;  %v1629_v13 = vpack.c.bf16 %v1045_v50, %v1045_v50  ;;  %v1043_v42 = vmul.f32 %v1888_v57, %v2300_v18  ;;  %1915 = vpow2.f32 %v1509_v40  ;;  %v1778_v57 = vpop.f32.mrf.mxu1  ;;  %v2476_v63 = vadd.f32 %v1775_v20, %v2242_v38 }
  0xff   :  { %v1892_v5 = vpop.eup %1891  ;;  %1395 = vst.msk [vmem:[%s2834_s3 + $0x90] sm:$0xf] %vm1358_vm3, %v1658_v7  ;;  %v1661_v14 = vpack.c.bf16 %v1077_v60, %v1077_v60  ;;  %v1075_v47 = vmul.f32 %v1890_v3, %v2303_v19  ;;  %1917 = vpow2.f32 %v1541_v51  ;;  %v1743_v19 = vpop.f32.mrf.mxu0  ;;  %v1512_v51 = vmul.f32 -1.442695, %v2458_v58 }
 0x100   :  { %v1894_v0 = vpop.eup %1893  ;;  %1366 = vst.msk [vmem:[%s2834_s3 + $0x1c] sm:$0xf] %vm1358_vm3, %v1629_v13  ;;  %v1627_v10 = vpack.c.bf16 %v1043_v42, %v1043_v42  ;;  %v856_v18 = vadd.f32 1.0, %v1892_v5  ;;  %1919 = vpow2.f32 %v1507_v55  ;;  %v2469_v55 = vadd.f32 %v2242_v38, %v591_v4 }
 0x101   :  { %v1896_v48 = vpop.eup %1895  ;;  %1398 = vst.msk [vmem:[%s2834_s3 + $0x9c] sm:$0xf] %vm1358_vm3, %v1661_v14  ;;  %v1659_v11 = vpack.c.bf16 %v1075_v47, %v1075_v47  ;;  %v888_v15 = vadd.f32 1.0, %v1894_v0  ;;  %1921 = vpow2.f32 %v1539_v62  ;;  %v466_v30 = vpop.f32.mrf.mxu0  ;;  %v2472_v44 = vadd.f32 %v1743_v19, %v2242_v38 }
 0x102   :  { %v1898_v17 = vpop.eup %1897  ;;  %1364 = vst.msk [vmem:[%s2834_s3 + $0x14] sm:$0xf] %vm1358_vm3, %v1627_v10  ;;  %1923 = vrcp.f32 %v856_v18  ;;  %v854_v53 = vadd.f32 1.0, %v1896_v48  ;;  %v1544_v62 = vmul.f32 -1.442695, %v2462_v39  ;;  %v2480_v4 = vadd.f32 %v2242_v38, %v466_v30  ;;  %v607_v19 = vpop.f32.mrf.mxu1 }
 0x103   :  { %v1900_v21 = vpop.eup %1899  ;;  %1396 = vst.msk [vmem:[%s2834_s3 + $0x94] sm:$0xf] %vm1358_vm3, %v1659_v11  ;;  %1925 = vrcp.f32 %v888_v15  ;;  %v886_v23 = vadd.f32 1.0, %v1898_v17  ;;  %v1746_v52 = vpop.f32.mrf.mxu0  ;;  %v1510_v42 = vmul.f32 -1.442695, %v2465_v46  ;;  %v2483_v47 = vadd.f32 %v2242_v38, %v594_v33 }
 0x104   :  { %v1902_v24 = vpop.eup %1901  ;;  %1927 = vrcp.f32 %v854_v53  ;;  %v857_v54 = vadd.f32 1.0, %v1900_v21  ;;  %v2486_v0 = vadd.f32 %v1746_v52, %v2242_v38  ;;  %v1542_v11 = vmul.f32 -1.442695, %v2469_v55 }
 0x105   :  { %v1904_v27 = vpop.eup %1903  ;;  %1929 = vrcp.f32 %v886_v23  ;;  %v889_v29 = vadd.f32 1.0, %v1902_v24  ;;  %v479_v10 = vpop.f32.mrf.mxu0  ;;  %v1513_v15 = vmul.f32 -1.442695, %v2472_v44  ;;  %v1545_v20 = vmul.f32 -1.442695, %v2476_v63 }
 0x106   :  { %v1906_v32 = vpop.eup %1905  ;;  %1931 = vrcp.f32 %v857_v54  ;;  %v855_v59 = vadd.f32 1.0, %v1904_v27  ;;  %v2492_v21 = vadd.f32 %v1778_v57, %v2242_v38  ;;  %v1511_v54 = vmul.f32 -1.442695, %v2480_v4 }
 0x107   :  { %v1908_v1 = vpop.eup %1907  ;;  %1933 = vrcp.f32 %v889_v29  ;;  %v887_v37 = vadd.f32 1.0, %v1906_v32  ;;  %v2497_v27 = vadd.f32 %v2242_v38, %v479_v10  ;;  %v1543_v32 = vmul.f32 -1.442695, %v2483_v47  ;;  %v1747_v33 = vpop.f32.mrf.mxu0 }
 0x108   :  { %v1910_v40 = vpop.eup %1909  ;;  %1935 = vrcp.f32 %v855_v59  ;;  %v860_v2 = vadd.f32 1.0, %v1908_v1  ;;  %v1516_v59 = vmul.f32 -1.442695, %v2486_v0 }
 0x109   :  { %v1912_v35 = vpop.eup %1911  ;;  %1937 = vrcp.f32 %v887_v37  ;;  %v892_v49 = vadd.f32 1.0, %v1910_v40 }
 0x10a   :  { %v1914_v6 = vpop.eup %1913  ;;  %1939 = vrcp.f32 %v860_v2  ;;  %v858_v50 = vadd.f32 1.0, %v1912_v35  ;;  %v1779_v2 = vpop.f32.mrf.mxu1 }
 0x10b   :  { %v1916_v7 = vpop.eup %1915  ;;  %1941 = vrcp.f32 %v892_v49  ;;  %v890_v60 = vadd.f32 1.0, %v1914_v6 }
 0x10c   :  { %v1918_v3 = vpop.eup %1917  ;;  %1943 = vrcp.f32 %v858_v50  ;;  %v861_v13 = vadd.f32 1.0, %v1916_v7 }
 0x10d   :  { %v1920_v5 = vpop.eup %1919  ;;  %1945 = vrcp.f32 %v890_v60  ;;  %v893_v14 = vadd.f32 1.0, %v1918_v3  ;;  %v2520_v60 = vadd.f32 %v1747_v33, %v2242_v38 }
 0x10e   :  { %v1922_v18 = vpop.eup %1921  ;;  %1947 = vrcp.f32 %v861_v13  ;;  %v859_v48 = vadd.f32 1.0, %v1920_v5  ;;  %v610_v5 = vpop.f32.mrf.mxu1 }
 0x10f   :  { %v1924_v17 = vpop.eup %1923  ;;  %1949 = vrcp.f32 %v893_v14  ;;  %v891_v53 = vadd.f32 1.0, %v1922_v18  ;;  %v2534_v18 = vadd.f32 %v1779_v2, %v2242_v38 }
 0x110   :  { %v1926_v23 = vpop.eup %1925  ;;  %v1048_v24 = vmul.f32 %v1924_v17, %v2309_v45  ;;  %1951 = vrcp.f32 %v859_v48  ;;  %v2504_v45 = vadd.f32 %v2242_v38, %v607_v19 }
 0x111   :  { %v1928_v29 = vpop.eup %1927  ;;  %v1080_v30 = vmul.f32 %v1926_v23, %v2312_v56  ;;  %1953 = vrcp.f32 %v891_v53  ;;  %v1548_v56 = vmul.f32 -1.442695, %v2492_v21  ;;  %v2550_v53 = vadd.f32 %v2242_v38, %v610_v5 }
 0x112   :  { %v1930_v1 = vpop.eup %1929  ;;  %v1632_v37 = vpack.c.bf16 %v1048_v24, %v1048_v24  ;;  %v1046_v40 = vmul.f32 %v1928_v29, %v2315_v61  ;;  %1955 = vpow2.f32 %v1512_v51  ;;  %v1514_v51 = vmul.f32 -1.442695, %v2497_v27  ;;  %v2560_v29 = vpop.f32.mrf.mxu1 }
 0x113   :  { %v1932_v35 = vpop.eup %1931  ;;  %v1664_v49 = vpack.c.bf16 %v1080_v30, %v1080_v30  ;;  %v1078_v52 = vmul.f32 %v1930_v1, %v2319_v8  ;;  %1957 = vpow2.f32 %v1544_v62  ;;  %v482_v62 = vpop.f32.mrf.mxu0  ;;  %v1549_v33 = vmul.f32 -1.442695, %v2534_v18 }
 0x114   :  { %v1934_v6 = vpop.eup %1933  ;;  %1369 = vst.msk [vmem:[%s2834_s3 + $0x28] sm:$0xf] %vm1358_vm3, %v1632_v37  ;;  %v1630_v50 = vpack.c.bf16 %v1046_v40, %v1046_v40  ;;  %v1049_v61 = vmul.f32 %v1932_v35, %v2322_v9  ;;  %1959 = vpow2.f32 %v1510_v42  ;;  %v1546_v42 = vmul.f32 -1.442695, %v2504_v45 }
 0x115   :  { %v1936_v57 = vpop.eup %1935  ;;  %1401 = vst.msk [vmem:[%s2834_s3 + $0xa8] sm:$0xf] %vm1358_vm3, %v1664_v49  ;;  %v1662_v8 = vpack.c.bf16 %v1078_v52, %v1078_v52  ;;  %v1081_v7 = vmul.f32 %v1934_v6, %v2326_v16  ;;  %1961 = vpow2.f32 %v1542_v11  ;;  %v1547_v35 = vmul.f32 -1.442695, %v2550_v53  ;;  %v623_v6 = vpop.f32.mrf.mxu1 }
 0x116   :  { %v1938_v3 = vpop.eup %1937  ;;  %1367 = vst.msk [vmem:[%s2834_s3 + $0x20] sm:$0xf] %vm1358_vm3, %v1630_v50  ;;  %v1633_v9 = vpack.c.bf16 %v1049_v61, %v1049_v61  ;;  %v1047_v13 = vmul.f32 %v1936_v57, %v2330_v22  ;;  %1963 = vpow2.f32 %v1513_v15  ;;  %v2542_v15 = vadd.f32 %v2242_v38, %v482_v62 }
 0x117   :  { %v1940_v14 = vpop.eup %1939  ;;  %1399 = vst.msk [vmem:[%s2834_s3 + $0xa0] sm:$0xf] %vm1358_vm3, %v1662_v8  ;;  %v1665_v16 = vpack.c.bf16 %v1081_v7, %v1081_v7  ;;  %v1079_v10 = vmul.f32 %v1938_v3, %v2333_v25  ;;  %1965 = vpow2.f32 %v1545_v20  ;;  %v2552_v20 = vpop.f32.mrf.mxu0 }
 0x118   :  { %v1942_v48 = vpop.eup %1941  ;;  %1370 = vst.msk [vmem:[%s2834_s3 + $0x2c] sm:$0xf] %vm1358_vm3, %v1633_v9  ;;  %v1631_v22 = vpack.c.bf16 %v1047_v13, %v1047_v13  ;;  %v1052_v11 = vmul.f32 %v1940_v14, %v2336_v26  ;;  %1967 = vpow2.f32 %v1511_v54  ;;  %v1517_v54 = vmul.f32 -1.442695, %v2520_v60  ;;  %v1783_v13 = vpop.f32.mrf.mxu1 }
 0x119   :  { %v1944_v19 = vpop.eup %1943  ;;  %1402 = vst.msk [vmem:[%s2834_s3 + $0xac] sm:$0xf] %vm1358_vm3, %v1665_v16  ;;  %v1663_v25 = vpack.c.bf16 %v1079_v10, %v1079_v10  ;;  %v1084_v17 = vmul.f32 %v1942_v48, %v2342_v36  ;;  %1969 = vpow2.f32 %v1543_v32  ;;  %v1515_v37 = vmul.f32 -1.442695, %v2542_v15  ;;  %v495_v49 = vpop.f32.mrf.mxu0 }
 0x11a   :  { %v1946_v26 = vpop.eup %1945  ;;  %1368 = vst.msk [vmem:[%s2834_s3 + $0x24] sm:$0xf] %vm1358_vm3, %v1631_v22  ;;  %v1636_v23 = vpack.c.bf16 %v1052_v11, %v1052_v11  ;;  %v1050_v24 = vmul.f32 %v1944_v19, %v2347_v43  ;;  %1971 = vpow2.f32 %v1516_v59 }
 0x11b   :  { %v1948_v36 = vpop.eup %1947  ;;  %1400 = vst.msk [vmem:[%s2834_s3 + $0xa4] sm:$0xf] %vm1358_vm3, %v1663_v25  ;;  %v1668_v30 = vpack.c.bf16 %v1084_v17, %v1084_v17  ;;  %v1082_v32 = vmul.f32 %v1946_v26, %v2354_v41  ;;  %1973 = vpow2.f32 %v1548_v56  ;;  %v2608_v25 = vadd.f32 %v2552_v20, %v2242_v38  ;;  %v626_v17 = vpop.f32.mrf.mxu1 }
 0x11c   :  { %v1950_v1 = vpop.eup %1949  ;;  %1373 = vst.msk [vmem:[%s2834_s3 + $0x38] sm:$0xf] %vm1358_vm3, %v1636_v23  ;;  %v1634_v43 = vpack.c.bf16 %v1050_v24, %v1050_v24  ;;  %v1053_v59 = vmul.f32 %v1948_v36, %v2370_v12  ;;  %1975 = vpow2.f32 %v1514_v51  ;;  %v2612_v24 = vadd.f32 %v2560_v29, %v2242_v38 }
 0x11d   :  { %v1952_v40 = vpop.eup %1951  ;;  %1405 = vst.msk [vmem:[%s2834_s3 + $0xb8] sm:$0xf] %vm1358_vm3, %v1668_v30  ;;  %v1666_v41 = vpack.c.bf16 %v1082_v32, %v1082_v32  ;;  %v1085_v2 = vmul.f32 %v1950_v1, %v2384_v28  ;;  %1977 = vpow2.f32 %v1546_v42  ;;  %v2615_v30 = vadd.f32 %v2242_v38, %v495_v49 }
 0x11e   :  { %v1954_v52 = vpop.eup %1953  ;;  %1371 = vst.msk [vmem:[%s2834_s3 + $0x30] sm:$0xf] %vm1358_vm3, %v1634_v43  ;;  %v1637_v12 = vpack.c.bf16 %v1053_v59, %v1053_v59  ;;  %v1051_v56 = vmul.f32 %v1952_v40, %v2392_v31  ;;  %1979 = vpow2.f32 %v1517_v54  ;;  %v2618_v20 = vadd.f32 %v2242_v38, %v623_v6  ;;  %v1786_v40 = vpop.f32.mrf.mxu1 }
 0x11f   :  { %v1956_v50 = vpop.eup %1955  ;;  %1403 = vst.msk [vmem:[%s2834_s3 + $0xb0] sm:$0xf] %vm1358_vm3, %v1666_v41  ;;  %v1669_v28 = vpack.c.bf16 %v1085_v2, %v1085_v2  ;;  %v1083_v61 = vmul.f32 %v1954_v52, %v2400_v34  ;;  %1981 = vpow2.f32 %v1549_v33  ;;  %v1751_v34 = vpop.f32.mrf.mxu0  ;;  %v2626_v49 = vadd.f32 %v1783_v13, %v2242_v38 }
 0x120   :  { %v1958_v51 = vpop.eup %1957  ;;  %1374 = vst.msk [vmem:[%s2834_s3 + $0x3c] sm:$0xf] %vm1358_vm3, %v1637_v12  ;;  %v1635_v57 = vpack.c.bf16 %v1051_v56, %v1051_v56  ;;  %v864_v31 = vadd.f32 1.0, %v1956_v50  ;;  %1983 = vpow2.f32 %v1515_v37  ;;  %v1520_v37 = vmul.f32 -1.442695, %v2608_v25 }
 0x121   :  { %v1960_v8 = vpop.eup %1959  ;;  %1406 = vst.msk [vmem:[%s2834_s3 + $0xbc] sm:$0xf] %vm1358_vm3, %v1669_v28  ;;  %v1667_v7 = vpack.c.bf16 %v1083_v61, %v1083_v61  ;;  %v896_v62 = vadd.f32 1.0, %v1958_v51  ;;  %1985 = vpow2.f32 %v1547_v35  ;;  %v498_v22 = vpop.f32.mrf.mxu0  ;;  %v2622_v29 = vadd.f32 %v1751_v34, %v2242_v38 }
 0x122   :  { %v1962_v3 = vpop.eup %1961  ;;  %1372 = vst.msk [vmem:[%s2834_s3 + $0x34] sm:$0xf] %vm1358_vm3, %v1635_v57  ;;  %1987 = vrcp.f32 %v864_v31  ;;  %v862_v9 = vadd.f32 1.0, %v1960_v8  ;;  %v1552_v35 = vmul.f32 -1.442695, %v2612_v24  ;;  %v2630_v6 = vadd.f32 %v2242_v38, %v498_v22  ;;  %v639_v34 = vpop.f32.mrf.mxu1 }
 0x123   :  { %v1964_v42 = vpop.eup %1963  ;;  %1404 = vst.msk [vmem:[%s2834_s3 + $0xb4] sm:$0xf] %vm1358_vm3, %v1667_v7  ;;  %1989 = vrcp.f32 %v896_v62  ;;  %v894_v5 = vadd.f32 1.0, %v1962_v3  ;;  %v1754_v1 = vpop.f32.mrf.mxu0  ;;  %v1518_v56 = vmul.f32 -1.442695, %v2615_v30  ;;  %v2634_v51 = vadd.f32 %v2242_v38, %v626_v17 }
 0x124   :  { %v1966_v14 = vpop.eup %1965  ;;  %1991 = vrcp.f32 %v862_v9  ;;  %v865_v16 = vadd.f32 1.0, %v1964_v42  ;;  %v1550_v61 = vmul.f32 -1.442695, %v2618_v20  ;;  %v1521_v7 = vmul.f32 -1.442695, %v2622_v29 }
 0x125   :  { %v1968_v10 = vpop.eup %1967  ;;  %1993 = vrcp.f32 %v894_v5  ;;  %v897_v48 = vadd.f32 1.0, %v1966_v14  ;;  %v511_v57 = vpop.f32.mrf.mxu0  ;;  %v2638_v62 = vadd.f32 %v1754_v1, %v2242_v38  ;;  %v1553_v13 = vmul.f32 -1.442695, %v2626_v49 }
 0x126   :  { %v1970_v11 = vpop.eup %1969  ;;  %1995 = vrcp.f32 %v865_v16  ;;  %v863_v19 = vadd.f32 1.0, %v1968_v10  ;;  %v2642_v42 = vadd.f32 %v1786_v40, %v2242_v38  ;;  %v1519_v16 = vmul.f32 -1.442695, %v2630_v6 }
 0x127   :  { %v1972_v26 = vpop.eup %1971  ;;  %1997 = vrcp.f32 %v897_v48  ;;  %v895_v23 = vadd.f32 1.0, %v1970_v11  ;;  %v2647_v10 = vadd.f32 %v2242_v38, %v511_v57  ;;  %v1551_v11 = vmul.f32 -1.442695, %v2634_v51  ;;  %v1755_v17 = vpop.f32.mrf.mxu0 }
 0x128   :  { %v1974_v54 = vpop.eup %1973  ;;  %1999 = vrcp.f32 %v863_v19  ;;  %v868_v36 = vadd.f32 1.0, %v1972_v26  ;;  %v2652_v19 = vadd.f32 %v2242_v38, %v639_v34 }
 0x129   :  { %v1976_v32 = vpop.eup %1975  ;;  %2001 = vrcp.f32 %v895_v23  ;;  %v900_v33 = vadd.f32 1.0, %v1974_v54  ;;  %v1524_v54 = vmul.f32 -1.442695, %v2638_v62 }
 0x12a   :  { %v1978_v43 = vpop.eup %1977  ;;  %2003 = vrcp.f32 %v868_v36  ;;  %v866_v59 = vadd.f32 1.0, %v1976_v32  ;;  %v1787_v36 = vpop.f32.mrf.mxu1 }
 0x12b   :  { %v1980_v41 = vpop.eup %1979  ;;  %2005 = vrcp.f32 %v900_v33  ;;  %v898_v2 = vadd.f32 1.0, %v1978_v43 }
 0x12c   :  { %v1982_v52 = vpop.eup %1981  ;;  %2007 = vrcp.f32 %v866_v59  ;;  %v869_v12 = vadd.f32 1.0, %v1980_v41  ;;  %v1522_v59 = vmul.f32 -1.442695, %v2647_v10  ;;  %v1554_v41 = vmul.f32 -1.442695, %v2652_v19 }
 0x12d   :  { %v1984_v50 = vpop.eup %1983  ;;  %2009 = vrcp.f32 %v898_v2  ;;  %v901_v28 = vadd.f32 1.0, %v1982_v52  ;;  %v514_v2 = vpop.f32.mrf.mxu0 }
 0x12e   :  { %v1986_v31 = vpop.eup %1985  ;;  %2011 = vrcp.f32 %v869_v12  ;;  %v867_v8 = vadd.f32 1.0, %v1984_v50  ;;  %v2083_v12 = vld [vmem:[%s2833_s2] ss:$0 sm:$0xff] }
 0x12f   :  { %v1988_v3 = vpop.eup %1987  ;;  %2013 = vrcp.f32 %v901_v28  ;;  %v899_v9 = vadd.f32 1.0, %v1986_v31  ;;  %v2685_v57 = vadd.f32 %v2083_v12, %v1787_v36 }
 0x130   :  { %v1990_v5 = vpop.eup %1989  ;;  %v1056_v14 = vmul.f32 %v1988_v3, %v2458_v58  ;;  %2015 = vrcp.f32 %v867_v8 }
 0x131   :  { %v1992_v48 = vpop.eup %1991  ;;  %v1088_v22 = vmul.f32 %v1990_v5, %v2462_v39  ;;  %2017 = vrcp.f32 %v899_v9  ;;  %v1556_v39 = vmul.f32 -1.442695, %v2642_v42 }
 0x132   :  { %v1994_v26 = vpop.eup %1993  ;;  %v1640_v23 = vpack.c.bf16 %v1056_v14, %v1056_v14  ;;  %v1054_v58 = vmul.f32 %v1992_v48, %v2465_v46  ;;  %2019 = vpow2.f32 %v1520_v37 }
 0x133   :  { %v1996_v32 = vpop.eup %1995  ;;  %v1672_v33 = vpack.c.bf16 %v1088_v22, %v1088_v22  ;;  %v1086_v1 = vmul.f32 %v1994_v26, %v2469_v55  ;;  %2021 = vpow2.f32 %v1552_v35  ;;  %v1557_v22 = vmul.f32 -1.442695, %v2685_v57 }
 0x134   :  { %v1998_v43 = vpop.eup %1997  ;;  %1377 = vst.msk [vmem:[%s2834_s3 + $0x48] sm:$0xf] %vm1358_vm3, %v1640_v23  ;;  %v1638_v38 = vpack.c.bf16 %v1054_v58, %v1054_v58  ;;  %v1057_v46 = vmul.f32 %v1996_v32, %v2472_v44  ;;  %2023 = vpow2.f32 %v1518_v56  ;;  %v2678_v56 = vadd.f32 %v2083_v12, %v1755_v17 }
 0x135   :  { %v2000_v37 = vpop.eup %1999  ;;  %1409 = vst.msk [vmem:[%s2834_s3 + $0xc8] sm:$0xf] %vm1358_vm3, %v1672_v33  ;;  %v1670_v55 = vpack.c.bf16 %v1086_v1, %v1086_v1  ;;  %v1089_v40 = vmul.f32 %v1998_v43, %v2476_v63  ;;  %2025 = vpow2.f32 %v1550_v61  ;;  %v642_v63 = vpop.f32.mrf.mxu1 }
 0x136   :  { %v2002_v35 = vpop.eup %2001  ;;  %1375 = vst.msk [vmem:[%s2834_s3 + $0x40] sm:$0xf] %vm1358_vm3, %v1638_v38  ;;  %v1641_v44 = vpack.c.bf16 %v1057_v46, %v1057_v46  ;;  %v1055_v52 = vmul.f32 %v2000_v37, %v2480_v4  ;;  %2027 = vpow2.f32 %v1521_v7  ;;  %v2692_v7 = vadd.f32 %v2083_v12, %v514_v2 }
 0x137   :  { %v2004_v50 = vpop.eup %2003  ;;  %1407 = vst.msk [vmem:[%s2834_s3 + $0xc0] sm:$0xf] %vm1358_vm3, %v1670_v55  ;;  %v1673_v28 = vpack.c.bf16 %v1089_v40, %v1089_v40  ;;  %v1087_v61 = vmul.f32 %v2002_v35, %v2483_v47  ;;  %2029 = vpow2.f32 %v1553_v13  ;;  %v2699_v9 = vadd.f32 %v2083_v12, %v642_v63 }
 0x138   :  { %v2006_v4 = vpop.eup %2005  ;;  %1378 = vst.msk [vmem:[%s2834_s3 + $0x4c] sm:$0xf] %vm1358_vm3, %v1641_v44  ;;  %v1639_v31 = vpack.c.bf16 %v1055_v52, %v1055_v52  ;;  %v1060_v8 = vmul.f32 %v2004_v50, %v2486_v0  ;;  %2031 = vpow2.f32 %v1519_v16  ;;  %v1525_v14 = vmul.f32 -1.442695, %v2678_v56 }
 0x139   :  { %v2008_v34 = vpop.eup %2007  ;;  %1410 = vst.msk [vmem:[%s2834_s3 + $0xcc] sm:$0xf] %vm1358_vm3, %v1673_v28  ;;  %v1671_v47 = vpack.c.bf16 %v1087_v61, %v1087_v61  ;;  %v1092_v3 = vmul.f32 %v2006_v4, %v2492_v21  ;;  %2033 = vpow2.f32 %v1551_v11  ;;  %v1523_v26 = vmul.f32 -1.442695, %v2692_v7 }
 0x13a   :  { %v2010_v13 = vpop.eup %2009  ;;  %1376 = vst.msk [vmem:[%s2834_s3 + $0x44] sm:$0xf] %vm1358_vm3, %v1639_v31  ;;  %v1644_v0 = vpack.c.bf16 %v1060_v8, %v1060_v8  ;;  %v1058_v5 = vmul.f32 %v2008_v34, %v2497_v27  ;;  %2035 = vpow2.f32 %v1524_v54  ;;  %v1555_v54 = vmul.f32 -1.442695, %v2699_v9 }
 0x13b   :  { %v2012_v16 = vpop.eup %2011  ;;  %1408 = vst.msk [vmem:[%s2834_s3 + $0xc4] sm:$0xf] %vm1358_vm3, %v1671_v47  ;;  %v1676_v21 = vpack.c.bf16 %v1092_v3, %v1092_v3  ;;  %v1090_v48 = vmul.f32 %v2010_v13, %v2504_v45  ;;  %2037 = vpow2.f32 %v1556_v39 }
 0x13c   :  { %v2014_v11 = vpop.eup %2013  ;;  %1381 = vst.msk [vmem:[%s2834_s3 + $0x58] sm:$0xf] %vm1358_vm3, %v1644_v0  ;;  %v1642_v27 = vpack.c.bf16 %v1058_v5, %v1058_v5  ;;  %v1061_v17 = vmul.f32 %v2012_v16, %v2520_v60  ;;  %2039 = vpow2.f32 %v1522_v59 }
 0x13d   :  { %v2016_v23 = vpop.eup %2015  ;;  %1413 = vst.msk [vmem:[%s2834_s3 + $0xd8] sm:$0xf] %vm1358_vm3, %v1676_v21  ;;  %v1674_v45 = vpack.c.bf16 %v1090_v48, %v1090_v48  ;;  %v1093_v58 = vmul.f32 %v2014_v11, %v2534_v18  ;;  %2041 = vpow2.f32 %v1554_v41 }
 0x13e   :  { %v2018_v36 = vpop.eup %2017  ;;  %1379 = vst.msk [vmem:[%s2834_s3 + $0x50] sm:$0xf] %vm1358_vm3, %v1642_v27  ;;  %v1645_v60 = vpack.c.bf16 %v1061_v17, %v1061_v17  ;;  %v1059_v32 = vmul.f32 %v2016_v23, %v2542_v15  ;;  %2043 = vpow2.f32 %v1525_v14 }
 0x13f   :  { %v2020_v33 = vpop.eup %2019  ;;  %1411 = vst.msk [vmem:[%s2834_s3 + $0xd0] sm:$0xf] %vm1358_vm3, %v1674_v45  ;;  %v1677_v18 = vpack.c.bf16 %v1093_v58, %v1093_v58  ;;  %v1091_v1 = vmul.f32 %v2018_v36, %v2550_v53  ;;  %2045 = vpow2.f32 %v1557_v22 }
 0x140   :  { %v2022_v39 = vpop.eup %2021  ;;  %1382 = vst.msk [vmem:[%s2834_s3 + $0x5c] sm:$0xf] %vm1358_vm3, %v1645_v60  ;;  %v1643_v43 = vpack.c.bf16 %v1059_v32, %v1059_v32  ;;  %v872_v38 = vadd.f32 1.0, %v2020_v33  ;;  %2047 = vpow2.f32 %v1523_v26 }
 0x141   :  { %v2024_v15 = vpop.eup %2023  ;;  %1414 = vst.msk [vmem:[%s2834_s3 + $0xdc] sm:$0xf] %vm1358_vm3, %v1677_v18  ;;  %v1675_v46 = vpack.c.bf16 %v1091_v1, %v1091_v1  ;;  %v904_v59 = vadd.f32 1.0, %v2022_v39  ;;  %2049 = vpow2.f32 %v1555_v54 }
 0x142   :  { %v2026_v53 = vpop.eup %2025  ;;  %1380 = vst.msk [vmem:[%s2834_s3 + $0x54] sm:$0xf] %vm1358_vm3, %v1643_v43  ;;  %2051 = vrcp.f32 %v872_v38  ;;  %v870_v37 = vadd.f32 1.0, %v2024_v15 }
 0x143   :  { %v2028_v55 = vpop.eup %2027  ;;  %1412 = vst.msk [vmem:[%s2834_s3 + $0xd4] sm:$0xf] %vm1358_vm3, %v1675_v46  ;;  %2053 = vrcp.f32 %v904_v59  ;;  %v902_v40 = vadd.f32 1.0, %v2026_v53 }
 0x144   :  { %v2030_v41 = vpop.eup %2029  ;;  %2055 = vrcp.f32 %v870_v37  ;;  %v873_v2 = vadd.f32 1.0, %v2028_v55 }
 0x145   :  { %v2032_v35 = vpop.eup %2031  ;;  %2057 = vrcp.f32 %v902_v40  ;;  %v905_v44 = vadd.f32 1.0, %v2030_v41 }
 0x146   :  { %v2034_v52 = vpop.eup %2033  ;;  %2059 = vrcp.f32 %v873_v2  ;;  %v871_v12 = vadd.f32 1.0, %v2032_v35 }
 0x147   :  { %v2036_v63 = vpop.eup %2035  ;;  %2061 = vrcp.f32 %v905_v44  ;;  %v903_v50 = vadd.f32 1.0, %v2034_v52 }
 0x148   :  { %v2038_v28 = vpop.eup %2037  ;;  %2063 = vrcp.f32 %v871_v12  ;;  %v876_v61 = vadd.f32 1.0, %v2036_v63 }
 0x149   :  { %v2040_v4 = vpop.eup %2039  ;;  %2065 = vrcp.f32 %v903_v50  ;;  %v908_v31 = vadd.f32 1.0, %v2038_v28 }
 0x14a   :  { %v2042_v8 = vpop.eup %2041  ;;  %2067 = vrcp.f32 %v876_v61  ;;  %v874_v34 = vadd.f32 1.0, %v2040_v4 }
 0x14b   :  { %v2044_v47 = vpop.eup %2043  ;;  %2069 = vrcp.f32 %v908_v31  ;;  %v906_v3 = vadd.f32 1.0, %v2042_v8 }
 0x14c   :  { %v2046_v13 = vpop.eup %2045  ;;  %2071 = vrcp.f32 %v874_v34  ;;  %v877_v0 = vadd.f32 1.0, %v2044_v47 }
 0x14d   :  { %v2048_v5 = vpop.eup %2047  ;;  %2073 = vrcp.f32 %v906_v3  ;;  %v909_v14 = vadd.f32 1.0, %v2046_v13 }
 0x14e   :  { %v2050_v16 = vpop.eup %2049  ;;  %2075 = vrcp.f32 %v877_v0  ;;  %v875_v21 = vadd.f32 1.0, %v2048_v5 }
 0x14f   :  { %v2052_v48 = vpop.eup %2051  ;;  %2077 = vrcp.f32 %v909_v14  ;;  %v907_v22 = vadd.f32 1.0, %v2050_v16 }
 0x150   :  { %v2054_v11 = vpop.eup %2053  ;;  %v1064_v27 = vmul.f32 %v2052_v48, %v2608_v25  ;;  %2079 = vrcp.f32 %v875_v21 }
 0x151   :  { %v2056_v17 = vpop.eup %2055  ;;  %v1096_v26 = vmul.f32 %v2054_v11, %v2612_v24  ;;  %2081 = vrcp.f32 %v907_v22 }
 0x152   :  { %v2058_v23 = vpop.eup %2057  ;;  %v1648_v45 = vpack.c.bf16 %v1064_v27, %v1064_v27  ;;  %v1062_v58 = vmul.f32 %v2056_v17, %v2615_v30 }
 0x153   :  { %v2060_v54 = vpop.eup %2059  ;;  %v1680_v36 = vpack.c.bf16 %v1096_v26, %v1096_v26  ;;  %v1094_v60 = vmul.f32 %v2058_v23, %v2618_v20 }
 0x154   :  { %v2062_v32 = vpop.eup %2061  ;;  %1385 = vst.msk [vmem:[%s2834_s3 + $0x68] sm:$0xf] %vm1358_vm3, %v1648_v45  ;;  %v1646_v25 = vpack.c.bf16 %v1062_v58, %v1062_v58  ;;  %v1065_v33 = vmul.f32 %v2060_v54, %v2622_v29 }
 0x155   :  { %v2064_v18 = vpop.eup %2063  ;;  %1417 = vst.msk [vmem:[%s2834_s3 + $0xe8] sm:$0xf] %vm1358_vm3, %v1680_v36  ;;  %v1678_v24 = vpack.c.bf16 %v1094_v60, %v1094_v60  ;;  %v1097_v30 = vmul.f32 %v2062_v32, %v2626_v49 }
 0x156   :  { %v2066_v1 = vpop.eup %2065  ;;  %1383 = vst.msk [vmem:[%s2834_s3 + $0x60] sm:$0xf] %vm1358_vm3, %v1646_v25  ;;  %v1649_v20 = vpack.c.bf16 %v1065_v33, %v1065_v33  ;;  %v1063_v39 = vmul.f32 %v2064_v18, %v2630_v6 }
 0x157   :  { %v2068_v43 = vpop.eup %2067  ;;  %1415 = vst.msk [vmem:[%s2834_s3 + $0xe0] sm:$0xf] %vm1358_vm3, %v1678_v24  ;;  %v1681_v29 = vpack.c.bf16 %v1097_v30, %v1097_v30  ;;  %v1095_v38 = vmul.f32 %v2066_v1, %v2634_v51 }
 0x158   :  { %v2070_v15 = vpop.eup %2069  ;;  %1386 = vst.msk [vmem:[%s2834_s3 + $0x6c] sm:$0xf] %vm1358_vm3, %v1649_v20  ;;  %v1647_v49 = vpack.c.bf16 %v1063_v39, %v1063_v39  ;;  %v1068_v46 = vmul.f32 %v2068_v43, %v2638_v62 }
 0x159   :  { %v2072_v59 = vpop.eup %2071  ;;  %1418 = vst.msk [vmem:[%s2834_s3 + $0xec] sm:$0xf] %vm1358_vm3, %v1681_v29  ;;  %v1679_v6 = vpack.c.bf16 %v1095_v38, %v1095_v38  ;;  %v1100_v53 = vmul.f32 %v2070_v15, %v2642_v42 }
 0x15a   :  { %v2074_v37 = vpop.eup %2073  ;;  %1384 = vst.msk [vmem:[%s2834_s3 + $0x64] sm:$0xf] %vm1358_vm3, %v1647_v49  ;;  %v1652_v51 = vpack.c.bf16 %v1068_v46, %v1068_v46  ;;  %v1066_v55 = vmul.f32 %v2072_v59, %v2647_v10 }
 0x15b   :  { %v2076_v40 = vpop.eup %2075  ;;  %1416 = vst.msk [vmem:[%s2834_s3 + $0xe4] sm:$0xf] %vm1358_vm3, %v1679_v6  ;;  %v1684_v62 = vpack.c.bf16 %v1100_v53, %v1100_v53  ;;  %v1098_v41 = vmul.f32 %v2074_v37, %v2652_v19 }
 0x15c   :  { %v2078_v2 = vpop.eup %2077  ;;  %1389 = vst.msk [vmem:[%s2834_s3 + $0x78] sm:$0xf] %vm1358_vm3, %v1652_v51  ;;  %v1650_v42 = vpack.c.bf16 %v1066_v55, %v1066_v55  ;;  %v1069_v35 = vmul.f32 %v2076_v40, %v2678_v56 }
 0x15d   :  { %v2080_v44 = vpop.eup %2079  ;;  %1421 = vst.msk [vmem:[%s2834_s3 + $0xf8] sm:$0xf] %vm1358_vm3, %v1684_v62  ;;  %v1682_v10 = vpack.c.bf16 %v1098_v41, %v1098_v41  ;;  %v1101_v52 = vmul.f32 %v2078_v2, %v2685_v57 }
 0x15e   :  { %v2082_v12 = vpop.eup %2081  ;;  %1387 = vst.msk [vmem:[%s2834_s3 + $0x70] sm:$0xf] %vm1358_vm3, %v1650_v42  ;;  %v1653_v19 = vpack.c.bf16 %v1069_v35, %v1069_v35  ;;  %v1067_v63 = vmul.f32 %v2080_v44, %v2692_v7 }
 0x15f   :  { %1419 = vst.msk [vmem:[%s2834_s3 + $0xf0] sm:$0xf] %vm1358_vm3, %v1682_v10  ;;  %v1685_v56 = vpack.c.bf16 %v1101_v52, %v1101_v52  ;;  %v1099_v50 = vmul.f32 %v2082_v12, %v2699_v9 }
 0x160   :  { %1390 = vst.msk [vmem:[%s2834_s3 + $0x7c] sm:$0xf] %vm1358_vm3, %v1653_v19  ;;  %v1651_v57 = vpack.c.bf16 %v1067_v63, %v1067_v63 }
 0x161   :  { %1422 = vst.msk [vmem:[%s2834_s3 + $0xfc] sm:$0xf] %vm1358_vm3, %v1685_v56  ;;  %v1683_v7 = vpack.c.bf16 %v1099_v50, %v1099_v50 }
 0x162   :  { %1388 = vst.msk [vmem:[%s2834_s3 + $0x74] sm:$0xf] %vm1358_vm3, %v1651_v57 }
 0x163   :  { %1420 = vst.msk [vmem:[%s2834_s3 + $0xf4] sm:$0xf] %vm1358_vm3, %v1683_v7 }

// kernel: yolox_forward.14
= control target key start
LH: loop header
LB: loop body
LE: loop exit
PB: predicated region body
PF: predicated region fallthrough
CT: control target
= control target key end

     0   :  { %v699_v0 = vmov 0   ;;  %vm182_vm0 = vcmask 130048   ;;  %vm480_vm1 = vcmask 257024   ;;  %s952_s1 = inlined_call_operand.vmem [shape: bf16[144,32], index: 1, kind: input, shape index: {}]   ;;  %s953_s0 = inlined_call_operand.vmem [shape: bf16[128,144], index: 0, kind: input, shape index: {}]   ;;  %s954_s2 = inlined_call_operand.vmem [shape: f32[1,32], index: 2, kind: input, shape index: {}]   ;;  %s955_s3 = inlined_call_operand.vmem [shape: bf16[128,32], index: 3, kind: output, shape index: {}]  }
   0x1   :  { %207 = vmatprep.subr.bf16.mxu0 %v699_v0  ;;  %583 = vmatprep.subr.bf16.mxu1 %v699_v0  ;;  %v602_v1 = vld [vmem:[%s952_s1 + $0x38] sm:$0xff]   ;;  %v603_v2 = vld [vmem:[%s952_s1 + $0x30] sm:$0xff]   ;;  %v604_v3 = vld [vmem:[%s952_s1 + $0x28] sm:$0xff]  }
   0x2   :  { %208 = vmatpush1.bf16.msra.mxu0 %v602_v1  ;;  %592 = vmatpush1.bf16.msra.mxu1 %v602_v1  ;;  %v605_v4 = vld [vmem:[%s952_s1 + $0x20] sm:$0xff]   ;;  %v606_v7 = vld [vmem:[%s952_s1 + $0x18] sm:$0xff]   ;;  %v607_v8 = vld [vmem:[%s952_s1 + $0x10] sm:$0xff]  }
   0x3   :  { %209 = vmatprep.subr.bf16.mxu0 %v699_v0  ;;  %584 = vmatprep.subr.bf16.mxu1 %v699_v0  ;;  %v613_v5 = vld [vmem:[%s953_s0 + $0x4] ss:$8 sps:$4 sm:$0xff]   ;;  %v611_v12 = vld [vmem:[%s953_s0] ss:$8 sps:$4 sm:$0xff]   ;;  %v617_v14 = vld [vmem:[%s953_s0 + $0x14] ss:$8 sps:$4 sm:$0xff]  }
   0x4   :  { %v616_v6 = vld [vmem:[%s953_s0 + $0x44] ss:$8 sps:$4 sm:$0xff]   ;;  %527 = vmatprep.mubr.msk.bf16.mxu0 %vm182_vm0, %v613_v5  ;;  %v614_v13 = vld [vmem:[%s953_s0 + $0x40] ss:$8 sps:$4 sm:$0xff]   ;;  %v619_v15 = vld [vmem:[%s953_s0 + $0x54] ss:$8 sps:$4 sm:$0xff]  }
   0x5   :  { %531 = vmatprep.mubr.msk.bf16.mxu1 %vm182_vm0, %v616_v6  ;;  %v608_v9 = vld [vmem:[%s952_s1 + $0x8] sm:$0xff]   ;;  %v609_v10 = vld [vmem:[%s952_s1] sm:$0xff]   ;;  %v621_v16 = vld [vmem:[%s953_s0 + $0x10] ss:$8 sps:$4 sm:$0xff]  }
   0x6   :  { %210 = vmatpush1.bf16.msra.mxu0 %v603_v2  ;;  %593 = vmatpush1.bf16.msra.mxu1 %v603_v2  ;;  %v610_v11 = vld [vmem:[%s952_s1 + $0x40] sm:$0xff]   ;;  %v622_v17 = vld [vmem:[%s953_s0 + $0x50] ss:$8 sps:$4 sm:$0xff]   ;;  %v629_v22 = vld [vmem:[%s953_s0 + $0x34] ss:$8 sps:$4 sm:$0xff]  }
   0x7   :  { %211 = vmatprep.subr.bf16.mxu0 %v699_v0  ;;  %585 = vmatprep.subr.bf16.mxu1 %v699_v0  ;;  %v623_v18 = vld [vmem:[%s953_s0 + $0x24] ss:$8 sps:$4 sm:$0xff]   ;;  %v627_v20 = vld [vmem:[%s953_s0 + $0x20] ss:$8 sps:$4 sm:$0xff]   ;;  %v631_v23 = vld [vmem:[%s953_s0 + $0x74] ss:$8 sps:$4 sm:$0xff]  }
   0x8   :  { %v625_v19 = vld [vmem:[%s953_s0 + $0x64] ss:$8 sps:$4 sm:$0xff]   ;;  %v628_v21 = vld [vmem:[%s953_s0 + $0x60] ss:$8 sps:$4 sm:$0xff]   ;;  %v633_v24 = vld [vmem:[%s953_s0 + $0x30] ss:$8 sps:$4 sm:$0xff]  }
   0x9   :  { %v634_v25 = vld [vmem:[%s953_s0 + $0x70] ss:$8 sps:$4 sm:$0xff]   ;;  %v806_v26 = vld [vmem:[%s954_s2] ss:$0 sm:$0xff] }
   0xa   :  { %212 = vmatpush1.bf16.msra.mxu0 %v604_v3  ;;  %594 = vmatpush1.bf16.msra.mxu1 %v604_v3 }
   0xb   :  { %213 = vmatprep.subr.bf16.mxu0 %v699_v0  ;;  %586 = vmatprep.subr.bf16.mxu1 %v699_v0 }
   0xe   :  { %214 = vmatpush1.bf16.msra.mxu0 %v605_v4  ;;  %595 = vmatpush1.bf16.msra.mxu1 %v605_v4 }
   0xf   :  { %215 = vmatprep.subr.bf16.mxu0 %v699_v0  ;;  %587 = vmatprep.subr.bf16.mxu1 %v699_v0 }
  0x12   :  { %216 = vmatpush1.bf16.msra.mxu0 %v606_v7  ;;  %596 = vmatpush1.bf16.msra.mxu1 %v606_v7 }
  0x13   :  { %217 = vmatprep.subr.bf16.mxu0 %v699_v0  ;;  %588 = vmatprep.subr.bf16.mxu1 %v699_v0 }
  0x16   :  { %218 = vmatpush1.bf16.msra.mxu0 %v607_v8  ;;  %597 = vmatpush1.bf16.msra.mxu1 %v607_v8 }
  0x17   :  { %219 = vmatprep.subr.bf16.mxu0 %v699_v0  ;;  %589 = vmatprep.subr.bf16.mxu1 %v699_v0 }
  0x1a   :  { %220 = vmatpush1.bf16.msra.mxu0 %v608_v9  ;;  %598 = vmatpush1.bf16.msra.mxu1 %v608_v9 }
  0x1b   :  { %221 = vmatprep.subr.bf16.mxu0 %v699_v0  ;;  %590 = vmatprep.subr.bf16.mxu1 %v699_v0 }
  0x1e   :  { %222 = vmatpush1.bf16.msra.mxu0 %v609_v10  ;;  %599 = vmatpush1.bf16.msra.mxu1 %v609_v10 }
  0x1f   :  { %237 = vmatprep.subr.bf16.mxu0 %v699_v0  ;;  %591 = vmatprep.subr.bf16.mxu1 %v699_v0 }
  0x22   :  { %238 = vmatpush2.bf16.msra.mxu0 %v610_v11  ;;  %600 = vmatpush2.bf16.msra.mxu1 %v610_v11 }
  0x25   :  { %240 = vmatmul.mubr.bf16.vlgmr.msra.gmra.mxu0 %v611_v12  ;;  %272 = vmatmul.mubr.bf16.vlgmr.msra.gmra.mxu1 %v614_v13 }
  0x26   :  { %528 = vmatprep.mubr.msk.bf16.mxu0 %vm182_vm0, %v617_v14  ;;  %532 = vmatprep.mubr.msk.bf16.mxu1 %vm182_vm0, %v619_v15 }
  0x2d   :  { %248 = vmatmul.mubr.bf16.gmra.mxu0 %v621_v16  ;;  %280 = vmatmul.mubr.bf16.gmra.mxu1 %v622_v17 }
  0x2e   :  { %529 = vmatprep.mubr.msk.bf16.mxu0 %vm182_vm0, %v623_v18  ;;  %533 = vmatprep.mubr.msk.bf16.mxu1 %vm182_vm0, %v625_v19 }
  0x35   :  { %256 = vmatmul.mubr.bf16.gmra.mxu0 %v627_v20  ;;  %288 = vmatmul.mubr.bf16.gmra.mxu1 %v628_v21 }
  0x36   :  { %530 = vmatprep.mubr.msk.bf16.mxu0 %vm182_vm0, %v629_v22  ;;  %534 = vmatprep.mubr.msk.bf16.mxu1 %vm182_vm0, %v631_v23 }
  0x3d   :  { %264 = vmatmul.mubr.bf16.gmra.mxu0 %v633_v24  ;;  %296 = vmatmul.mubr.bf16.gmra.mxu1 %v634_v25 }
  0xe5   :  { %v241_v27 = vpop.f32.mrf.mxu0  ;;  %v273_v28 = vpop.f32.mrf.mxu1 }
  0xe6   :  { %v809_v29 = vadd.f32 %v806_v26, %v241_v27  ;;  %v812_v30 = vadd.f32 %v806_v26, %v273_v28 }
  0xe7   :  { %v243_v31 = vpop.f32.mrf.mxu0  ;;  %v275_v32 = vpop.f32.mrf.mxu1 }
  0xe8   :  { %v535_v33 = vmul.f32 -1.442695, %v809_v29  ;;  %v543_v34 = vmul.f32 -1.442695, %v812_v30 }
  0xe9   :  { %v244_v35 = vpop.f32.mrf.mxu0  ;;  %v276_v36 = vpop.f32.mrf.mxu1 }
  0xea   :  { %635 = vpow2.f32 %v535_v33  ;;  %v817_v37 = vadd.f32 %v806_v26, %v244_v35  ;;  %v820_v38 = vadd.f32 %v806_v26, %v276_v36 }
  0xeb   :  { %637 = vpow2.f32 %v543_v34  ;;  %v246_v39 = vpop.f32.mrf.mxu0  ;;  %v278_v40 = vpop.f32.mrf.mxu1 }
  0xec   :  { %v536_v41 = vmul.f32 -1.442695, %v817_v37  ;;  %v544_v42 = vmul.f32 -1.442695, %v820_v38 }
  0xed   :  { %v249_v43 = vpop.f32.mrf.mxu0  ;;  %v281_v44 = vpop.f32.mrf.mxu1 }
  0xee   :  { %639 = vpow2.f32 %v536_v41  ;;  %v825_v45 = vadd.f32 %v806_v26, %v249_v43  ;;  %v828_v46 = vadd.f32 %v806_v26, %v281_v44 }
  0xef   :  { %641 = vpow2.f32 %v544_v42  ;;  %v251_v47 = vpop.f32.mrf.mxu0  ;;  %v283_v48 = vpop.f32.mrf.mxu1 }
  0xf0   :  { %v537_v49 = vmul.f32 -1.442695, %v825_v45  ;;  %v545_v50 = vmul.f32 -1.442695, %v828_v46 }
  0xf1   :  { %v252_v51 = vpop.f32.mrf.mxu0  ;;  %v284_v52 = vpop.f32.mrf.mxu1 }
  0xf2   :  { %643 = vpow2.f32 %v537_v49  ;;  %v833_v53 = vadd.f32 %v806_v26, %v252_v51  ;;  %v836_v54 = vadd.f32 %v806_v26, %v284_v52 }
  0xf3   :  { %645 = vpow2.f32 %v545_v50  ;;  %v254_v55 = vpop.f32.mrf.mxu0  ;;  %v286_v56 = vpop.f32.mrf.mxu1 }
  0xf4   :  { %v538_v57 = vmul.f32 -1.442695, %v833_v53  ;;  %v546_v58 = vmul.f32 -1.442695, %v836_v54 }
  0xf5   :  { %v257_v59 = vpop.f32.mrf.mxu0  ;;  %v289_v60 = vpop.f32.mrf.mxu1 }
  0xf6   :  { %647 = vpow2.f32 %v538_v57  ;;  %v841_v61 = vadd.f32 %v806_v26, %v257_v59  ;;  %v844_v62 = vadd.f32 %v806_v26, %v289_v60 }
  0xf7   :  { %v636_v63 = vpop.eup %635  ;;  %649 = vpow2.f32 %v546_v58  ;;  %v259_v0 = vpop.f32.mrf.mxu0 }
  0xf8   :  { %v291_v1 = vpop.f32.mrf.mxu1  ;;  %v638_v2 = vpop.eup %637  ;;  %v352_v3 = vadd.f32 1.0, %v636_v63  ;;  %v539_v4 = vmul.f32 -1.442695, %v841_v61  ;;  %v547_v6 = vmul.f32 -1.442695, %v844_v62 }
  0xf9   :  { %v360_v5 = vadd.f32 1.0, %v638_v2  ;;  %v260_v7 = vpop.f32.mrf.mxu0 }
  0xfa   :  { %v292_v8 = vpop.f32.mrf.mxu1  ;;  %651 = vrcp.f32 %v352_v3  ;;  %v849_v9 = vadd.f32 %v806_v26, %v260_v7 }
  0xfb   :  { %v852_v10 = vadd.f32 %v806_v26, %v292_v8  ;;  %v640_v11 = vpop.eup %639  ;;  %653 = vrcp.f32 %v360_v5  ;;  %v262_v12 = vpop.f32.mrf.mxu0 }
  0xfc   :  { %v294_v13 = vpop.f32.mrf.mxu1  ;;  %v642_v14 = vpop.eup %641  ;;  %v353_v15 = vadd.f32 1.0, %v640_v11  ;;  %655 = vpow2.f32 %v539_v4  ;;  %v540_v16 = vmul.f32 -1.442695, %v849_v9 }
  0xfd   :  { %v361_v17 = vadd.f32 1.0, %v642_v14  ;;  %657 = vpow2.f32 %v547_v6  ;;  %v548_v18 = vmul.f32 -1.442695, %v852_v10  ;;  %v265_v19 = vpop.f32.mrf.mxu0 }
  0xfe   :  { %v297_v20 = vpop.f32.mrf.mxu1  ;;  %659 = vrcp.f32 %v353_v15  ;;  %v857_v21 = vadd.f32 %v806_v26, %v265_v19 }
  0xff   :  { %v860_v22 = vadd.f32 %v806_v26, %v297_v20  ;;  %v644_v23 = vpop.eup %643  ;;  %661 = vrcp.f32 %v361_v17  ;;  %v267_v24 = vpop.f32.mrf.mxu0 }
 0x100   :  { %v299_v25 = vpop.f32.mrf.mxu1  ;;  %v646_v27 = vpop.eup %645  ;;  %v354_v28 = vadd.f32 1.0, %v644_v23  ;;  %663 = vpow2.f32 %v540_v16  ;;  %v541_v31 = vmul.f32 -1.442695, %v857_v21 }
 0x101   :  { %v362_v32 = vadd.f32 1.0, %v646_v27  ;;  %665 = vpow2.f32 %v548_v18  ;;  %v549_v33 = vmul.f32 -1.442695, %v860_v22  ;;  %v268_v34 = vpop.f32.mrf.mxu0 }
 0x102   :  { %v300_v35 = vpop.f32.mrf.mxu1  ;;  %667 = vrcp.f32 %v354_v28  ;;  %v865_v36 = vadd.f32 %v806_v26, %v268_v34 }
 0x103   :  { %v868_v39 = vadd.f32 %v806_v26, %v300_v35  ;;  %v648_v40 = vpop.eup %647  ;;  %669 = vrcp.f32 %v362_v32  ;;  %v270_v41 = vpop.f32.mrf.mxu0 }
 0x104   :  { %v302_v42 = vpop.f32.mrf.mxu1  ;;  %v650_v43 = vpop.eup %649  ;;  %v355_v44 = vadd.f32 1.0, %v648_v40  ;;  %671 = vpow2.f32 %v541_v31  ;;  %v542_v47 = vmul.f32 -1.442695, %v865_v36 }
 0x105   :  { %v363_v48 = vadd.f32 1.0, %v650_v43  ;;  %673 = vpow2.f32 %v549_v33  ;;  %v550_v49 = vmul.f32 -1.442695, %v868_v39 }
 0x106   :  { %675 = vrcp.f32 %v355_v44 }
 0x107   :  { %v652_v50 = vpop.eup %651  ;;  %677 = vrcp.f32 %v363_v48 }
 0x108   :  { %v654_v51 = vpop.eup %653  ;;  %v400_v26 = vmul.f32 %v652_v50, %v809_v29  ;;  %679 = vpow2.f32 %v542_v47 }
 0x109   :  { %v656_v52 = vpop.eup %655  ;;  %v408_v55 = vmul.f32 %v654_v51, %v812_v30  ;;  %681 = vpow2.f32 %v550_v49 }
 0x10a   :  { %v658_v56 = vpop.eup %657  ;;  %v567_v57 = vpack.c.bf16 %v400_v26, %v400_v26  ;;  %v356_v58 = vadd.f32 1.0, %v656_v52 }
 0x10b   :  { %v660_v59 = vpop.eup %659  ;;  %v575_v60 = vpack.c.bf16 %v408_v55, %v408_v55  ;;  %v364_v63 = vadd.f32 1.0, %v658_v56 }
 0x10c   :  { %v662_v0 = vpop.eup %661  ;;  %481 = vst.msk [vmem:[%s955_s3] sm:$0xf] %vm480_vm1, %v567_v57  ;;  %v401_v29 = vmul.f32 %v660_v59, %v817_v37  ;;  %683 = vrcp.f32 %v356_v58 }
 0x10d   :  { %v664_v1 = vpop.eup %663  ;;  %489 = vst.msk [vmem:[%s955_s3 + $0x20] sm:$0xf] %vm480_vm1, %v575_v60  ;;  %v409_v30 = vmul.f32 %v662_v0, %v820_v38  ;;  %685 = vrcp.f32 %v364_v63 }
 0x10e   :  { %v666_v2 = vpop.eup %665  ;;  %v568_v3 = vpack.c.bf16 %v401_v29, %v401_v29  ;;  %v357_v4 = vadd.f32 1.0, %v664_v1 }
 0x10f   :  { %v668_v5 = vpop.eup %667  ;;  %v576_v6 = vpack.c.bf16 %v409_v30, %v409_v30  ;;  %v365_v7 = vadd.f32 1.0, %v666_v2 }
 0x110   :  { %v670_v8 = vpop.eup %669  ;;  %482 = vst.msk [vmem:[%s955_s3 + $0x4] sm:$0xf] %vm480_vm1, %v568_v3  ;;  %v402_v37 = vmul.f32 %v668_v5, %v825_v45  ;;  %687 = vrcp.f32 %v357_v4 }
 0x111   :  { %v672_v11 = vpop.eup %671  ;;  %490 = vst.msk [vmem:[%s955_s3 + $0x24] sm:$0xf] %vm480_vm1, %v576_v6  ;;  %v410_v38 = vmul.f32 %v670_v8, %v828_v46  ;;  %689 = vrcp.f32 %v365_v7 }
 0x112   :  { %v674_v12 = vpop.eup %673  ;;  %v569_v13 = vpack.c.bf16 %v402_v37, %v402_v37  ;;  %v358_v14 = vadd.f32 1.0, %v672_v11 }
 0x113   :  { %v676_v15 = vpop.eup %675  ;;  %v577_v16 = vpack.c.bf16 %v410_v38, %v410_v38  ;;  %v366_v17 = vadd.f32 1.0, %v674_v12 }
 0x114   :  { %v678_v18 = vpop.eup %677  ;;  %483 = vst.msk [vmem:[%s955_s3 + $0x8] sm:$0xf] %vm480_vm1, %v569_v13  ;;  %v403_v45 = vmul.f32 %v676_v15, %v833_v53  ;;  %691 = vrcp.f32 %v358_v14 }
 0x115   :  { %v680_v19 = vpop.eup %679  ;;  %491 = vst.msk [vmem:[%s955_s3 + $0x28] sm:$0xf] %vm480_vm1, %v577_v16  ;;  %v411_v46 = vmul.f32 %v678_v18, %v836_v54  ;;  %693 = vrcp.f32 %v366_v17 }
 0x116   :  { %v682_v20 = vpop.eup %681  ;;  %v570_v23 = vpack.c.bf16 %v403_v45, %v403_v45  ;;  %v359_v24 = vadd.f32 1.0, %v680_v19 }
 0x117   :  { %v578_v25 = vpack.c.bf16 %v411_v46, %v411_v46  ;;  %v367_v27 = vadd.f32 1.0, %v682_v20 }
 0x118   :  { %484 = vst.msk [vmem:[%s955_s3 + $0xc] sm:$0xf] %vm480_vm1, %v570_v23  ;;  %695 = vrcp.f32 %v359_v24 }
 0x119   :  { %v684_v53 = vpop.eup %683  ;;  %492 = vst.msk [vmem:[%s955_s3 + $0x2c] sm:$0xf] %vm480_vm1, %v578_v25  ;;  %697 = vrcp.f32 %v367_v27 }
 0x11a   :  { %v686_v54 = vpop.eup %685  ;;  %v404_v28 = vmul.f32 %v684_v53, %v841_v61 }
 0x11b   :  { %v412_v31 = vmul.f32 %v686_v54, %v844_v62 }
 0x11c   :  { %v571_v32 = vpack.c.bf16 %v404_v28, %v404_v28 }
 0x11d   :  { %v688_v33 = vpop.eup %687  ;;  %v579_v34 = vpack.c.bf16 %v412_v31, %v412_v31 }
 0x11e   :  { %v690_v35 = vpop.eup %689  ;;  %485 = vst.msk [vmem:[%s955_s3 + $0x10] sm:$0xf] %vm480_vm1, %v571_v32  ;;  %v405_v40 = vmul.f32 %v688_v33, %v849_v9 }
 0x11f   :  { %493 = vst.msk [vmem:[%s955_s3 + $0x30] sm:$0xf] %vm480_vm1, %v579_v34  ;;  %v413_v61 = vmul.f32 %v690_v35, %v852_v10 }
 0x120   :  { %v572_v41 = vpack.c.bf16 %v405_v40, %v405_v40 }
 0x121   :  { %v692_v62 = vpop.eup %691  ;;  %v580_v42 = vpack.c.bf16 %v413_v61, %v413_v61 }
 0x122   :  { %v694_v43 = vpop.eup %693  ;;  %486 = vst.msk [vmem:[%s955_s3 + $0x14] sm:$0xf] %vm480_vm1, %v572_v41  ;;  %v406_v44 = vmul.f32 %v692_v62, %v857_v21 }
 0x123   :  { %494 = vst.msk [vmem:[%s955_s3 + $0x34] sm:$0xf] %vm480_vm1, %v580_v42  ;;  %v414_v9 = vmul.f32 %v694_v43, %v860_v22 }
 0x124   :  { %v573_v47 = vpack.c.bf16 %v406_v44, %v406_v44 }
 0x125   :  { %v696_v10 = vpop.eup %695  ;;  %v581_v48 = vpack.c.bf16 %v414_v9, %v414_v9 }
 0x126   :  { %v698_v49 = vpop.eup %697  ;;  %487 = vst.msk [vmem:[%s955_s3 + $0x18] sm:$0xf] %vm480_vm1, %v573_v47  ;;  %v407_v50 = vmul.f32 %v696_v10, %v865_v36 }
 0x127   :  { %495 = vst.msk [vmem:[%s955_s3 + $0x38] sm:$0xf] %vm480_vm1, %v581_v48  ;;  %v415_v21 = vmul.f32 %v698_v49, %v868_v39 }
 0x128   :  { %v574_v51 = vpack.c.bf16 %v407_v50, %v407_v50 }
 0x129   :  { %v582_v22 = vpack.c.bf16 %v415_v21, %v415_v21 }
 0x12a   :  { %488 = vst.msk [vmem:[%s955_s3 + $0x1c] sm:$0xf] %vm480_vm1, %v574_v51 }
 0x12b   :  { %496 = vst.msk [vmem:[%s955_s3 + $0x3c] sm:$0xf] %vm480_vm1, %v582_v22 }

// kernel: yolox_forward.17
= control target key start
LH: loop header
LB: loop body
LE: loop exit
PB: predicated region body
PF: predicated region fallthrough
CT: control target
= control target key end

     0   :  { %vm94_vm0 = vcmask 261120   ;;  %vm392_vm1 = vcmask 781312   ;;  %s777_s1 = inlined_call_operand.vmem [shape: bf16[32,96], index: 1, kind: input, shape index: {}]   ;;  %s778_s0 = inlined_call_operand.vmem [shape: bf16[128,32], index: 0, kind: input, shape index: {}]   ;;  %s779_s2 = inlined_call_operand.vmem [shape: f32[1,96], index: 2, kind: input, shape index: {}]   ;;  %s780_s3 = inlined_call_operand.vmem [shape: bf16[128,96], index: 3, kind: output, shape index: {}]  }
   0x1   :  { %v514_v0 = vld [vmem:[%s777_s1 + $0x8] sm:$0xff]   ;;  %v515_v1 = vld [vmem:[%s777_s1] sm:$0xff]   ;;  %v520_v6 = vld [vmem:[%s778_s0 + $0x10] sm:$0xff]  }
   0x2   :  { %490 = vmatprep.subr.bf16.mxu0 %v514_v0  ;;  %510 = vmatprep.subr.bf16.mxu1 %v514_v0  ;;  %v516_v2 = vld [vmem:[%s778_s0] sm:$0xff]   ;;  %v518_v4 = vld [vmem:[%s778_s0 + $0x8] sm:$0xff]   ;;  %v521_v7 = vld [vmem:[%s778_s0 + $0x30] sm:$0xff]  }
   0x3   :  { %491 = vmatpush3.bf16.msra.mxu0 %v514_v0  ;;  %512 = vmatpush3.bf16.msra.mxu1 %v514_v0  ;;  %v517_v3 = vld [vmem:[%s778_s0 + $0x20] sm:$0xff]   ;;  %v519_v5 = vld [vmem:[%s778_s0 + $0x28] sm:$0xff]   ;;  %v522_v8 = vld [vmem:[%s778_s0 + $0x18] sm:$0xff]  }
   0x4   :  { %492 = vmatprep.subr.bf16.mxu0 %v515_v1  ;;  %511 = vmatprep.subr.bf16.mxu1 %v515_v1  ;;  %v523_v9 = vld [vmem:[%s778_s0 + $0x38] sm:$0xff]   ;;  %v413_v10 = vld [vmem:[%s779_s2] ss:$0 sm:$0xff] }
   0x5   :  { %494 = vmatprep.mubr.msk.bf16.mxu0 %vm94_vm0, %v516_v2  ;;  %502 = vmatprep.mubr.msk.bf16.mxu1 %vm94_vm0, %v517_v3 }
   0x7   :  { %493 = vmatpush3.bf16.msra.mxu0 %v515_v1  ;;  %513 = vmatpush3.bf16.msra.mxu1 %v515_v1 }
   0xa   :  { %495 = vmatmul.mubr.msk.bf16.vlgmr.msra.gmra.mxu0 %vm94_vm0, %v518_v4  ;;  %503 = vmatmul.mubr.msk.bf16.vlgmr.msra.gmra.mxu1 %vm94_vm0, %v519_v5 }
   0xb   :  { %498 = vmatprep.mubr.msk.bf16.mxu0 %vm94_vm0, %v520_v6  ;;  %506 = vmatprep.mubr.msk.bf16.mxu1 %vm94_vm0, %v521_v7 }
  0x12   :  { %499 = vmatmul.mubr.msk.bf16.gmra.mxu0 %vm94_vm0, %v522_v8  ;;  %507 = vmatmul.mubr.msk.bf16.gmra.mxu1 %vm94_vm0, %v523_v9 }
  0xca   :  { %v496_v11 = vpop.f32.mrf.mxu0  ;;  %v504_v12 = vpop.f32.mrf.mxu1 }
  0xcb   :  { %v649_v13 = vadd.f32 %v496_v11, %v413_v10  ;;  %v651_v14 = vadd.f32 %v504_v12, %v413_v10 }
  0xcc   :  { %v153_v15 = vpop.f32.mrf.mxu0  ;;  %v185_v16 = vpop.f32.mrf.mxu1 }
  0xcd   :  { %v434_v17 = vmul.f32 -1.442695, %v649_v13  ;;  %v442_v18 = vmul.f32 -1.442695, %v651_v14  ;;  %v655_v19 = vadd.f32 %v413_v10, %v153_v15  ;;  %v657_v20 = vadd.f32 %v413_v10, %v185_v16 }
  0xce   :  { %v497_v21 = vpop.f32.mrf.mxu0  ;;  %v505_v22 = vpop.f32.mrf.mxu1 }
  0xcf   :  { %524 = vpow2.f32 %v434_v17  ;;  %v432_v23 = vmul.f32 -1.442695, %v655_v19  ;;  %v440_v24 = vmul.f32 -1.442695, %v657_v20  ;;  %v661_v25 = vadd.f32 %v497_v21, %v413_v10 }
  0xd0   :  { %526 = vpow2.f32 %v442_v18  ;;  %v663_v26 = vadd.f32 %v505_v22, %v413_v10  ;;  %v156_v27 = vpop.f32.mrf.mxu0  ;;  %v188_v28 = vpop.f32.mrf.mxu1 }
  0xd1   :  { %528 = vpow2.f32 %v432_v23  ;;  %v435_v29 = vmul.f32 -1.442695, %v661_v25  ;;  %v666_v30 = vadd.f32 %v413_v10, %v156_v27  ;;  %v668_v31 = vadd.f32 %v413_v10, %v188_v28 }
  0xd2   :  { %530 = vpow2.f32 %v440_v24  ;;  %v443_v32 = vmul.f32 -1.442695, %v663_v26  ;;  %v500_v33 = vpop.f32.mrf.mxu0  ;;  %v508_v34 = vpop.f32.mrf.mxu1 }
  0xd3   :  { %532 = vpow2.f32 %v435_v29  ;;  %v433_v35 = vmul.f32 -1.442695, %v666_v30  ;;  %v441_v36 = vmul.f32 -1.442695, %v668_v31  ;;  %v673_v37 = vadd.f32 %v500_v33, %v413_v10 }
  0xd4   :  { %534 = vpow2.f32 %v443_v32  ;;  %v675_v38 = vadd.f32 %v508_v34, %v413_v10  ;;  %v169_v39 = vpop.f32.mrf.mxu0  ;;  %v201_v40 = vpop.f32.mrf.mxu1 }
  0xd5   :  { %536 = vpow2.f32 %v433_v35  ;;  %v438_v41 = vmul.f32 -1.442695, %v673_v37  ;;  %v678_v42 = vadd.f32 %v413_v10, %v169_v39  ;;  %v680_v43 = vadd.f32 %v413_v10, %v201_v40 }
  0xd6   :  { %538 = vpow2.f32 %v441_v36  ;;  %v446_v44 = vmul.f32 -1.442695, %v675_v38  ;;  %v501_v45 = vpop.f32.mrf.mxu0  ;;  %v509_v46 = vpop.f32.mrf.mxu1 }
  0xd7   :  { %540 = vpow2.f32 %v438_v41  ;;  %v436_v47 = vmul.f32 -1.442695, %v678_v42  ;;  %v444_v48 = vmul.f32 -1.442695, %v680_v43  ;;  %v685_v49 = vadd.f32 %v501_v45, %v413_v10 }
  0xd8   :  { %542 = vpow2.f32 %v446_v44  ;;  %v687_v50 = vadd.f32 %v509_v46, %v413_v10  ;;  %v172_v51 = vpop.f32.mrf.mxu0  ;;  %v204_v52 = vpop.f32.mrf.mxu1 }
  0xd9   :  { %544 = vpow2.f32 %v436_v47  ;;  %v439_v53 = vmul.f32 -1.442695, %v685_v49  ;;  %v690_v54 = vadd.f32 %v413_v10, %v172_v51  ;;  %v692_v55 = vadd.f32 %v413_v10, %v204_v52 }
  0xda   :  { %546 = vpow2.f32 %v444_v48  ;;  %v447_v56 = vmul.f32 -1.442695, %v687_v50 }
  0xdb   :  { %548 = vpow2.f32 %v439_v53  ;;  %v437_v57 = vmul.f32 -1.442695, %v690_v54  ;;  %v445_v58 = vmul.f32 -1.442695, %v692_v55 }
  0xdc   :  { %v525_v59 = vpop.eup %524  ;;  %550 = vpow2.f32 %v447_v56 }
  0xdd   :  { %v527_v60 = vpop.eup %526  ;;  %v266_v61 = vadd.f32 1.0, %v525_v59  ;;  %552 = vpow2.f32 %v437_v57 }
  0xde   :  { %v529_v62 = vpop.eup %528  ;;  %v274_v63 = vadd.f32 1.0, %v527_v60  ;;  %554 = vpow2.f32 %v445_v58 }
  0xdf   :  { %v531_v0 = vpop.eup %530  ;;  %556 = vrcp.f32 %v266_v61  ;;  %v264_v1 = vadd.f32 1.0, %v529_v62 }
  0xe0   :  { %v533_v2 = vpop.eup %532  ;;  %558 = vrcp.f32 %v274_v63  ;;  %v272_v3 = vadd.f32 1.0, %v531_v0 }
  0xe1   :  { %v535_v4 = vpop.eup %534  ;;  %560 = vrcp.f32 %v264_v1  ;;  %v267_v5 = vadd.f32 1.0, %v533_v2 }
  0xe2   :  { %v537_v6 = vpop.eup %536  ;;  %562 = vrcp.f32 %v272_v3  ;;  %v275_v7 = vadd.f32 1.0, %v535_v4 }
  0xe3   :  { %v539_v8 = vpop.eup %538  ;;  %564 = vrcp.f32 %v267_v5  ;;  %v265_v9 = vadd.f32 1.0, %v537_v6 }
  0xe4   :  { %v541_v10 = vpop.eup %540  ;;  %566 = vrcp.f32 %v275_v7  ;;  %v273_v11 = vadd.f32 1.0, %v539_v8 }
  0xe5   :  { %v543_v12 = vpop.eup %542  ;;  %568 = vrcp.f32 %v265_v9  ;;  %v270_v15 = vadd.f32 1.0, %v541_v10 }
  0xe6   :  { %v545_v16 = vpop.eup %544  ;;  %570 = vrcp.f32 %v273_v11  ;;  %v278_v17 = vadd.f32 1.0, %v543_v12 }
  0xe7   :  { %v547_v18 = vpop.eup %546  ;;  %572 = vrcp.f32 %v270_v15  ;;  %v268_v21 = vadd.f32 1.0, %v545_v16 }
  0xe8   :  { %v549_v22 = vpop.eup %548  ;;  %574 = vrcp.f32 %v278_v17  ;;  %v276_v23 = vadd.f32 1.0, %v547_v18 }
  0xe9   :  { %v551_v24 = vpop.eup %550  ;;  %576 = vrcp.f32 %v268_v21  ;;  %v271_v27 = vadd.f32 1.0, %v549_v22 }
  0xea   :  { %v553_v28 = vpop.eup %552  ;;  %578 = vrcp.f32 %v276_v23  ;;  %v279_v29 = vadd.f32 1.0, %v551_v24 }
  0xeb   :  { %v555_v32 = vpop.eup %554  ;;  %580 = vrcp.f32 %v271_v27  ;;  %v269_v33 = vadd.f32 1.0, %v553_v28 }
  0xec   :  { %v557_v34 = vpop.eup %556  ;;  %582 = vrcp.f32 %v279_v29  ;;  %v277_v35 = vadd.f32 1.0, %v555_v32 }
  0xed   :  { %v559_v36 = vpop.eup %558  ;;  %v314_v39 = vmul.f32 %v557_v34, %v649_v13  ;;  %584 = vrcp.f32 %v269_v33 }
  0xee   :  { %v561_v40 = vpop.eup %560  ;;  %v322_v41 = vmul.f32 %v559_v36, %v651_v14  ;;  %586 = vrcp.f32 %v277_v35 }
  0xef   :  { %v563_v44 = vpop.eup %562  ;;  %v466_v45 = vpack.c.bf16 %v314_v39, %v314_v39  ;;  %v312_v46 = vmul.f32 %v561_v40, %v655_v19 }
  0xf0   :  { %v565_v47 = vpop.eup %564  ;;  %v474_v48 = vpack.c.bf16 %v322_v41, %v322_v41  ;;  %v320_v51 = vmul.f32 %v563_v44, %v657_v20 }
  0xf1   :  { %v567_v52 = vpop.eup %566  ;;  %395 = vst.msk [vmem:[%s780_s3 + $0x8] sm:$0xf] %vm392_vm1, %v466_v45  ;;  %v464_v13 = vpack.c.bf16 %v312_v46, %v312_v46  ;;  %v315_v53 = vmul.f32 %v565_v47, %v661_v25 }
  0xf2   :  { %v569_v56 = vpop.eup %568  ;;  %403 = vst.msk [vmem:[%s780_s3 + $0x28] sm:$0xf] %vm392_vm1, %v474_v48  ;;  %v472_v14 = vpack.c.bf16 %v320_v51, %v320_v51  ;;  %v323_v19 = vmul.f32 %v567_v52, %v663_v26 }
  0xf3   :  { %v571_v57 = vpop.eup %570  ;;  %393 = vst.msk [vmem:[%s780_s3] sm:$0xf] %vm392_vm1, %v464_v13  ;;  %v467_v20 = vpack.c.bf16 %v315_v53, %v315_v53  ;;  %v313_v58 = vmul.f32 %v569_v56, %v666_v30 }
  0xf4   :  { %v573_v59 = vpop.eup %572  ;;  %401 = vst.msk [vmem:[%s780_s3 + $0x20] sm:$0xf] %vm392_vm1, %v472_v14  ;;  %v475_v25 = vpack.c.bf16 %v323_v19, %v323_v19  ;;  %v321_v60 = vmul.f32 %v571_v57, %v668_v31 }
  0xf5   :  { %v575_v61 = vpop.eup %574  ;;  %396 = vst.msk [vmem:[%s780_s3 + $0xc] sm:$0xf] %vm392_vm1, %v467_v20  ;;  %v465_v26 = vpack.c.bf16 %v313_v58, %v313_v58  ;;  %v318_v62 = vmul.f32 %v573_v59, %v673_v37 }
  0xf6   :  { %v577_v63 = vpop.eup %576  ;;  %404 = vst.msk [vmem:[%s780_s3 + $0x2c] sm:$0xf] %vm392_vm1, %v475_v25  ;;  %v473_v30 = vpack.c.bf16 %v321_v60, %v321_v60  ;;  %v326_v0 = vmul.f32 %v575_v61, %v675_v38 }
  0xf7   :  { %v579_v1 = vpop.eup %578  ;;  %394 = vst.msk [vmem:[%s780_s3 + $0x4] sm:$0xf] %vm392_vm1, %v465_v26  ;;  %v470_v31 = vpack.c.bf16 %v318_v62, %v318_v62  ;;  %v316_v2 = vmul.f32 %v577_v63, %v678_v42 }
  0xf8   :  { %v581_v3 = vpop.eup %580  ;;  %402 = vst.msk [vmem:[%s780_s3 + $0x24] sm:$0xf] %vm392_vm1, %v473_v30  ;;  %v478_v37 = vpack.c.bf16 %v326_v0, %v326_v0  ;;  %v324_v4 = vmul.f32 %v579_v1, %v680_v43 }
  0xf9   :  { %v583_v5 = vpop.eup %582  ;;  %399 = vst.msk [vmem:[%s780_s3 + $0x18] sm:$0xf] %vm392_vm1, %v470_v31  ;;  %v468_v38 = vpack.c.bf16 %v316_v2, %v316_v2  ;;  %v319_v6 = vmul.f32 %v581_v3, %v685_v49 }
  0xfa   :  { %v585_v7 = vpop.eup %584  ;;  %407 = vst.msk [vmem:[%s780_s3 + $0x38] sm:$0xf] %vm392_vm1, %v478_v37  ;;  %v476_v42 = vpack.c.bf16 %v324_v4, %v324_v4  ;;  %v327_v8 = vmul.f32 %v583_v5, %v687_v50 }
  0xfb   :  { %v587_v9 = vpop.eup %586  ;;  %397 = vst.msk [vmem:[%s780_s3 + $0x10] sm:$0xf] %vm392_vm1, %v468_v38  ;;  %v471_v43 = vpack.c.bf16 %v319_v6, %v319_v6  ;;  %v317_v10 = vmul.f32 %v585_v7, %v690_v54 }
  0xfc   :  { %405 = vst.msk [vmem:[%s780_s3 + $0x30] sm:$0xf] %vm392_vm1, %v476_v42  ;;  %v479_v49 = vpack.c.bf16 %v327_v8, %v327_v8  ;;  %v325_v11 = vmul.f32 %v587_v9, %v692_v55 }
  0xfd   :  { %400 = vst.msk [vmem:[%s780_s3 + $0x1c] sm:$0xf] %vm392_vm1, %v471_v43  ;;  %v469_v50 = vpack.c.bf16 %v317_v10, %v317_v10 }
  0xfe   :  { %408 = vst.msk [vmem:[%s780_s3 + $0x3c] sm:$0xf] %vm392_vm1, %v479_v49  ;;  %v477_v54 = vpack.c.bf16 %v325_v11, %v325_v11 }
  0xff   :  { %398 = vst.msk [vmem:[%s780_s3 + $0x14] sm:$0xf] %vm392_vm1, %v469_v50 }
 0x100   :  { %406 = vst.msk [vmem:[%s780_s3 + $0x34] sm:$0xf] %vm392_vm1, %v477_v54 }

// kernel: yolox_forward.19
= control target key start
LH: loop header
LB: loop body
LE: loop exit
PB: predicated region body
PF: predicated region fallthrough
CT: control target
= control target key end

     0   :  { %vm259_vm0 = vcmask 523264   ;;  %v57_v40 = vlaneseq  ;;  %vm1117_vm13 = vcmask 1039360   ;;  %s2628_s1 = inlined_call_operand.vmem [shape: bf16[192,255], index: 1, kind: input, shape index: {}]   ;;  %s2629_s0 = inlined_call_operand.vmem [shape: bf16[128,192], index: 0, kind: input, shape index: {}]   ;;  %s2630_s2 = inlined_call_operand.vmem [shape: f32[1,255], index: 2, kind: input, shape index: {}]   ;;  %s2631_s3 = inlined_call_operand.vmem [shape: f32[128,255], index: 3, kind: output, shape index: {}]  }
   0x1   :  { %v1257_v0 = vld [vmem:[%s2628_s1 + $0x74] ss:$8 sps:$4 sm:$0xff]   ;;  %v1259_v1 = vld [vmem:[%s2628_s1 + $0x70] ss:$8 sps:$4 sm:$0xff]   ;;  %v1260_v2 = vld [vmem:[%s2628_s1 + $0x64] ss:$8 sps:$4 sm:$0xff]  }
   0x2   :  { %284 = vmatprep.subr.bf16.mxu0 %v1257_v0  ;;  %1233 = vmatprep.subr.bf16.mxu1 %v1257_v0  ;;  %v1262_v3 = vld [vmem:[%s2628_s1 + $0x60] ss:$8 sps:$4 sm:$0xff]   ;;  %v1263_v4 = vld [vmem:[%s2628_s1 + $0x54] ss:$8 sps:$4 sm:$0xff]   ;;  %v1265_v5 = vld [vmem:[%s2628_s1 + $0x50] ss:$8 sps:$4 sm:$0xff]  }
   0x3   :  { %285 = vmatpush1.bf16.msra.mxu0 %v1259_v1  ;;  %1245 = vmatpush1.bf16.msra.mxu1 %v1259_v1  ;;  %v1266_v6 = vld [vmem:[%s2628_s1 + $0x44] ss:$8 sps:$4 sm:$0xff]   ;;  %v1268_v7 = vld [vmem:[%s2628_s1 + $0x40] ss:$8 sps:$4 sm:$0xff]   ;;  %v1269_v8 = vld [vmem:[%s2628_s1 + $0x34] ss:$8 sps:$4 sm:$0xff]  }
   0x4   :  { %286 = vmatprep.subr.bf16.mxu0 %v1260_v2  ;;  %1234 = vmatprep.subr.bf16.mxu1 %v1260_v2  ;;  %v1271_v9 = vld [vmem:[%s2628_s1 + $0x30] ss:$8 sps:$4 sm:$0xff]   ;;  %v1272_v10 = vld [vmem:[%s2628_s1 + $0x24] ss:$8 sps:$4 sm:$0xff]   ;;  %v1274_v13 = vld [vmem:[%s2628_s1 + $0x20] ss:$8 sps:$4 sm:$0xff]  }
   0x5   :  { %v1295_v11 = vld [vmem:[%s2629_s0 + $0x4] ss:$8 sps:$4 sm:$0xff]   ;;  %v1275_v14 = vld [vmem:[%s2628_s1 + $0x14] ss:$8 sps:$4 sm:$0xff]   ;;  %v1277_v15 = vld [vmem:[%s2628_s1 + $0x10] ss:$8 sps:$4 sm:$0xff]  }
   0x6   :  { %v1298_v12 = vld [vmem:[%s2629_s0 + $0x44] ss:$8 sps:$4 sm:$0xff]   ;;  %1193 = vmatprep.mubr.msk.bf16.mxu0 %vm259_vm0, %v1295_v11  ;;  %v1280_v17 = vld [vmem:[%s2628_s1] ss:$8 sps:$4 sm:$0xff]   ;;  %v1281_v18 = vld [vmem:[%s2628_s1 + $0xb4] ss:$8 sps:$4 sm:$0xff]  }
   0x7   :  { %287 = vmatpush1.bf16.msra.mxu0 %v1262_v3  ;;  %1246 = vmatpush1.bf16.msra.mxu1 %v1262_v3  ;;  %v1278_v16 = vld [vmem:[%s2628_s1 + $0x4] ss:$8 sps:$4 sm:$0xff]   ;;  %v1283_v19 = vld [vmem:[%s2628_s1 + $0xb0] ss:$8 sps:$4 sm:$0xff]   ;;  %v1286_v21 = vld [vmem:[%s2628_s1 + $0xa0] ss:$8 sps:$4 sm:$0xff]  }
   0x8   :  { %288 = vmatprep.subr.bf16.mxu0 %v1263_v4  ;;  %1235 = vmatprep.subr.bf16.mxu1 %v1263_v4  ;;  %v1284_v20 = vld [vmem:[%s2628_s1 + $0xa4] ss:$8 sps:$4 sm:$0xff]   ;;  %v1287_v22 = vld [vmem:[%s2628_s1 + $0x94] ss:$8 sps:$4 sm:$0xff]   ;;  %v1289_v23 = vld [vmem:[%s2628_s1 + $0x90] ss:$8 sps:$4 sm:$0xff]  }
   0x9   :  { %1197 = vmatprep.mubr.msk.bf16.mxu1 %vm259_vm0, %v1298_v12  ;;  %v1290_v24 = vld [vmem:[%s2628_s1 + $0x84] ss:$8 sps:$4 sm:$0xff]   ;;  %v1292_v25 = vld [vmem:[%s2628_s1 + $0x80] ss:$8 sps:$4 sm:$0xff]   ;;  %v1299_v28 = vld [vmem:[%s2629_s0 + $0x14] ss:$8 sps:$4 sm:$0xff]  }
   0xa   :  { %v1293_v26 = vld [vmem:[%s2629_s0] ss:$8 sps:$4 sm:$0xff]   ;;  %v1301_v29 = vld [vmem:[%s2629_s0 + $0x54] ss:$8 sps:$4 sm:$0xff]   ;;  %v1303_v30 = vld [vmem:[%s2629_s0 + $0x10] ss:$8 sps:$4 sm:$0xff]  }
   0xb   :  { %289 = vmatpush1.bf16.msra.mxu0 %v1265_v5  ;;  %1247 = vmatpush1.bf16.msra.mxu1 %v1265_v5  ;;  %v1296_v27 = vld [vmem:[%s2629_s0 + $0x40] ss:$8 sps:$4 sm:$0xff]   ;;  %v1304_v31 = vld [vmem:[%s2629_s0 + $0x50] ss:$8 sps:$4 sm:$0xff]   ;;  %v1305_v32 = vld [vmem:[%s2629_s0 + $0x24] ss:$8 sps:$4 sm:$0xff]  }
   0xc   :  { %290 = vmatprep.subr.bf16.mxu0 %v1266_v6  ;;  %1236 = vmatprep.subr.bf16.mxu1 %v1266_v6  ;;  %v1307_v33 = vld [vmem:[%s2629_s0 + $0x64] ss:$8 sps:$4 sm:$0xff]   ;;  %v1309_v34 = vld [vmem:[%s2629_s0 + $0x20] ss:$8 sps:$4 sm:$0xff]   ;;  %v1311_v36 = vld [vmem:[%s2629_s0 + $0x34] ss:$8 sps:$4 sm:$0xff]  }
   0xd   :  { %v1310_v35 = vld [vmem:[%s2629_s0 + $0x60] ss:$8 sps:$4 sm:$0xff]   ;;  %v1313_v37 = vld [vmem:[%s2629_s0 + $0x74] ss:$8 sps:$4 sm:$0xff]   ;;  %v1315_v38 = vld [vmem:[%s2629_s0 + $0x30] ss:$8 sps:$4 sm:$0xff]  }
   0xe   :  { %v1316_v39 = vld [vmem:[%s2629_s0 + $0x70] ss:$8 sps:$4 sm:$0xff]   ;;  %v1657_v41 = vshrl.u32 %v57_v40, 7  ;;  %v398_v47 = vand.u32 127, %v57_v40 }
   0xf   :  { %291 = vmatpush1.bf16.msra.mxu0 %v1268_v7  ;;  %1248 = vmatpush1.bf16.msra.mxu1 %v1268_v7 }
  0x10   :  { %292 = vmatprep.subr.bf16.mxu0 %v1269_v8  ;;  %1237 = vmatprep.subr.bf16.mxu1 %v1269_v8  ;;  %v420_v42 = vadd.s32 64, %v1657_v41  ;;  %v446_v43 = vcvt.s32.f32 %v1657_v41  ;;  %v413_v48 = vadd.s32 8, %v1657_v41  ;;  %v421_v49 = vadd.s32 72, %v1657_v41 }
  0x11   :  { %v400_v52 = vcvt.s32.f32 %v398_v47  ;;  %v1663_v53 = vadd.s32 128, %v398_v47  ;;  %v1666_v58 = vadd.s32 16, %v1657_v41  ;;  %v1669_v59 = vadd.s32 80, %v1657_v41 }
  0x12   :  { %v454_v44 = vcvt.s32.f32 %v420_v42  ;;  %v463_v45 = vmul.f32 0.015625, %v446_v43  ;;  %v447_v54 = vcvt.s32.f32 %v413_v48  ;;  %v455_v55 = vcvt.s32.f32 %v421_v49 }
  0x13   :  { %293 = vmatpush1.bf16.msra.mxu0 %v1271_v9  ;;  %1249 = vmatpush1.bf16.msra.mxu1 %v1271_v9  ;;  %v403_v60 = vmul.f32 0.011764706, %v400_v52  ;;  %v401_v61 = vcvt.s32.f32 %v1663_v53  ;;  %v1673_v0 = vadd.s32 24, %v1657_v41  ;;  %v1676_v3 = vadd.s32 88, %v1657_v41 }
  0x14   :  { %294 = vmatprep.subr.bf16.mxu0 %v1272_v10  ;;  %1238 = vmatprep.subr.bf16.mxu1 %v1272_v10  ;;  %v471_v46 = vmul.f32 0.015625, %v454_v44  ;;  %v479_v50 = vfloor.f32 %v463_v45  ;;  %v464_v62 = vmul.f32 0.015625, %v447_v54  ;;  %v472_v63 = vmul.f32 0.015625, %v455_v55 }
  0x15   :  { %v448_v4 = vcvt.s32.f32 %v1666_v58  ;;  %v456_v5 = vcvt.s32.f32 %v1669_v59  ;;  %v405_v6 = vfloor.f32 %v403_v60  ;;  %v404_v7 = vmul.f32 0.011764706, %v401_v61 }
  0x16   :  { %v487_v51 = vfloor.f32 %v471_v46  ;;  %v495_v56 = vmul.f32 64.0, %v479_v50  ;;  %v480_v8 = vfloor.f32 %v464_v62  ;;  %v488_v9 = vfloor.f32 %v472_v63 }
  0x17   :  { %295 = vmatpush1.bf16.msra.mxu0 %v1274_v13  ;;  %1250 = vmatpush1.bf16.msra.mxu1 %v1274_v13  ;;  %v449_v10 = vcvt.s32.f32 %v1673_v0  ;;  %v1682_v11 = vadd.s32 32, %v1657_v41 }
  0x18   :  { %296 = vmatprep.subr.bf16.mxu0 %v1275_v14  ;;  %1239 = vmatprep.subr.bf16.mxu1 %v1275_v14  ;;  %v503_v57 = vmul.f32 64.0, %v487_v51  ;;  %v511_v1 = vsub.f32 %v446_v43, %v495_v56  ;;  %v457_v14 = vcvt.s32.f32 %v1676_v3 }
  0x1a   :  { %v519_v2 = vsub.f32 %v454_v44, %v503_v57  ;;  %v528_v12 = vmul.f32 0.125, %v511_v1 }
  0x1b   :  { %297 = vmatpush1.bf16.msra.mxu0 %v1277_v15  ;;  %1251 = vmatpush1.bf16.msra.mxu1 %v1277_v15  ;;  %v1686_v15 = vadd.s32 96, %v1657_v41 }
  0x1c   :  { %298 = vmatprep.subr.bf16.mxu0 %v1278_v16  ;;  %1240 = vmatprep.subr.bf16.mxu1 %v1278_v16  ;;  %v536_v13 = vmul.f32 0.125, %v519_v2  ;;  %v465_v16 = vmul.f32 0.015625, %v448_v4 }
  0x1f   :  { %299 = vmatpush1.bf16.msra.mxu0 %v1280_v17  ;;  %1252 = vmatpush1.bf16.msra.mxu1 %v1280_v17  ;;  %v473_v17 = vmul.f32 0.015625, %v456_v5 }
  0x20   :  { %308 = vmatprep.subr.bf16.mxu0 %v1281_v18  ;;  %1241 = vmatprep.subr.bf16.mxu1 %v1281_v18  ;;  %v407_v18 = vmul.f32 85.0, %v405_v6 }
  0x23   :  { %309 = vmatpush2.bf16.msra.mxu0 %v1283_v19  ;;  %1253 = vmatpush2.bf16.msra.mxu1 %v1283_v19  ;;  %v406_v19 = vfloor.f32 %v404_v7 }
  0x24   :  { %310 = vmatprep.subr.bf16.mxu0 %v1284_v20  ;;  %1242 = vmatprep.subr.bf16.mxu1 %v1284_v20  ;;  %v496_v20 = vmul.f32 64.0, %v480_v8 }
  0x27   :  { %311 = vmatpush2.bf16.msra.mxu0 %v1286_v21  ;;  %1254 = vmatpush2.bf16.msra.mxu1 %v1286_v21  ;;  %v1689_v21 = vadd.s32 40, %v1657_v41 }
  0x28   :  { %312 = vmatprep.subr.bf16.mxu0 %v1287_v22  ;;  %1243 = vmatprep.subr.bf16.mxu1 %v1287_v22  ;;  %v504_v22 = vmul.f32 64.0, %v488_v9  ;;  %v63_v9 = vsub.s32 1, %v1657_v41 }
  0x2b   :  { %313 = vmatpush2.bf16.msra.mxu0 %v1289_v23  ;;  %1255 = vmatpush2.bf16.msra.mxu1 %v1289_v23  ;;  %v466_v23 = vmul.f32 0.015625, %v449_v10 }
  0x2c   :  { %314 = vmatprep.subr.bf16.mxu0 %v1290_v24  ;;  %1244 = vmatprep.subr.bf16.mxu1 %v1290_v24  ;;  %v450_v24 = vcvt.s32.f32 %v1682_v11 }
  0x2e   :  { %v467_v40 = vmul.f32 0.015625, %v450_v24 }
  0x2f   :  { %315 = vmatpush2.bf16.msra.mxu0 %v1292_v25  ;;  %1256 = vmatpush2.bf16.msra.mxu1 %v1292_v25  ;;  %v1693_v25 = vadd.s32 104, %v1657_v41 }
  0x31   :  { %v459_v42 = vcvt.s32.f32 %v1693_v25 }
  0x32   :  { %317 = vmatmul.mubr.bf16.vlgmr.msra.gmra.mxu0 %v1293_v26  ;;  %357 = vmatmul.mubr.bf16.vlgmr.msra.gmra.mxu1 %v1296_v27  ;;  %v544_v26 = vfloor.f32 %v528_v12  ;;  %v1695_v27 = vfloor.f32 %v536_v13 }
  0x33   :  { %1194 = vmatprep.mubr.msk.bf16.mxu0 %vm259_vm0, %v1299_v28  ;;  %1198 = vmatprep.mubr.msk.bf16.mxu1 %vm259_vm0, %v1301_v29  ;;  %v474_v28 = vmul.f32 0.015625, %v457_v14  ;;  %v458_v29 = vcvt.s32.f32 %v1686_v15  ;;  %v476_v56 = vmul.f32 0.015625, %v459_v42 }
  0x34   :  { %v560_v43 = vmul.f32 8.0, %v544_v26  ;;  %v568_v44 = vmul.f32 8.0, %v1695_v27 }
  0x35   :  { %v490_v45 = vfloor.f32 %v474_v28  ;;  %v475_v46 = vmul.f32 0.015625, %v458_v29  ;;  %v492_v8 = vfloor.f32 %v476_v56 }
  0x36   :  { %v576_v57 = vsub.f32 %v511_v1, %v560_v43  ;;  %v584_v58 = vsub.f32 %v519_v2, %v568_v44 }
  0x37   :  { %v506_v59 = vmul.f32 64.0, %v490_v45  ;;  %v491_v60 = vfloor.f32 %v475_v46 }
  0x39   :  { %v1738_v12 = vsub.f32 %v457_v14, %v506_v59 }
  0x3a   :  { %327 = vmatmul.mubr.bf16.gmra.mxu0 %v1303_v30  ;;  %367 = vmatmul.mubr.bf16.gmra.mxu1 %v1304_v31  ;;  %v59_v30 = vsub.s32 0, %v1657_v41  ;;  %v481_v31 = vfloor.f32 %v465_v16 }
  0x3b   :  { %1195 = vmatprep.mubr.msk.bf16.mxu0 %vm259_vm0, %v1305_v32  ;;  %1199 = vmatprep.mubr.msk.bf16.mxu1 %vm259_vm0, %v1307_v33  ;;  %v489_v32 = vfloor.f32 %v473_v17  ;;  %v55_v33 = vld [vmem:[%s2630_s2] sm:$0x3] }
  0x3c   :  { %v1713_v47 = vrot.slane %v55_v33, %v59_v30  ;;  %v497_v48 = vmul.f32 64.0, %v481_v31  ;;  %v1761_v28 = vrot.slane %v55_v33, %v63_v9  ;;  %v539_v30 = vmul.f32 0.125, %v1738_v12 }
  0x3d   :  { %v505_v49 = vmul.f32 64.0, %v489_v32 }
  0x3e   :  { %v1727_v62 = vsub.f32 %v448_v4, %v497_v48  ;;  %v507_v4 = vmul.f32 64.0, %v491_v60 }
  0x3f   :  { %v1729_v63 = vsub.f32 %v456_v5, %v505_v49  ;;  %v1741_v5 = vadd.s32 48, %v1657_v41 }
  0x40   :  { %v1764_v31 = vsub.f32 %v458_v29, %v507_v4 }
  0x41   :  { %v538_v16 = vmul.f32 0.125, %v1729_v63  ;;  %v452_v32 = vcvt.s32.f32 %v1741_v5 }
  0x42   :  { %337 = vmatmul.mubr.bf16.gmra.mxu0 %v1309_v34  ;;  %377 = vmatmul.mubr.bf16.gmra.mxu1 %v1310_v35  ;;  %v1702_v34 = vsub.f32 %v400_v52, %v407_v18  ;;  %v408_v35 = vmul.f32 85.0, %v406_v19  ;;  %v540_v48 = vmul.f32 0.125, %v1764_v31 }
  0x43   :  { %1196 = vmatprep.mubr.msk.bf16.mxu0 %vm259_vm0, %v1311_v36  ;;  %1200 = vmatprep.mubr.msk.bf16.mxu1 %vm259_vm0, %v1313_v37  ;;  %v1704_v36 = vsub.f32 %v447_v54, %v496_v20  ;;  %v451_v37 = vcvt.s32.f32 %v1689_v21  ;;  %v469_v21 = vmul.f32 0.015625, %v452_v32 }
  0x44   :  { %vm594_vm1 = vcmp.eq.f32.partialorder %v1702_v34, 1.0  ;;  %v1716_v50 = vsub.f32 %v401_v61, %v408_v35  ;;  %vm592_vm2 = vcmp.eq.f32.partialorder %v1702_v34, 0.0  ;;  %vm724_vm5 = vcmp.ge.f32.partialorder %v1702_v34, 2.0 }
  0x45   :  { %v529_v51 = vmul.f32 0.125, %v1704_v36  ;;  %v468_v52 = vmul.f32 0.015625, %v451_v37  ;;  %v596_v61 = vsel %vm594_vm1, %v544_v26, 0.0  ;;  %v612_v0 = vsel %vm594_vm1, %v1695_v27, 0.0 }
  0x46   :  { %vm595_vm3 = vcmp.eq.f32.partialorder %v1716_v50, 1.0  ;;  %v1745_v13 = vsel %vm592_vm2, %v576_v57, %v596_v61  ;;  %v1749_v15 = vsel %vm592_vm2, %v584_v58, %v612_v0  ;;  %vm593_vm4 = vcmp.eq.f32.partialorder %v1716_v50, 0.0 }
  0x47   :  { %v545_v3 = vfloor.f32 %v529_v51  ;;  %v484_v1 = vfloor.f32 %v468_v52  ;;  %v597_v14 = vsel %vm595_vm3, %v544_v26, 0.0  ;;  %v613_v26 = vsel %vm595_vm3, %v1695_v27, 0.0 }
  0x48   :  { %v1775_v11 = vsel %vm593_vm4, %v576_v57, %v597_v14  ;;  %v1800_v25 = vsel %vm593_vm4, %v584_v58, %v613_v26  ;;  %vm726_vm6 = vcmp.lt.f32.partialorder %v1702_v34, 4.0  ;;  %v556_v60 = vfloor.f32 %v540_v48 }
  0x49   :  { %v561_v17 = vmul.f32 8.0, %v545_v3  ;;  %v500_v18 = vmul.f32 64.0, %v484_v1  ;;  %v598_v29 = vsel %vm594_vm1, %v545_v3, 0.0  ;;  %v485_v61 = vfloor.f32 %v469_v21  ;;  %vm1909_vm9 = vmand %vm724_vm5, %vm726_vm6 }
  0x4a   :  { %347 = vmatmul.mubr.bf16.gmra.mxu0 %v1315_v38  ;;  %387 = vmatmul.mubr.bf16.gmra.mxu1 %v1316_v39  ;;  %v1707_v38 = vsub.f32 %v455_v55, %v504_v22  ;;  %v482_v39 = vfloor.f32 %v466_v23  ;;  %v483_v55 = vfloor.f32 %v467_v40  ;;  %v508_v23 = vmul.f32 64.0, %v492_v8 }
  0x4b   :  { %v1771_v40 = vadd.s32 112, %v1657_v41  ;;  %v1782_v33 = vsub.f32 %v451_v37, %v500_v18  ;;  %v599_v37 = vsel %vm595_vm3, %v545_v3, 0.0  ;;  %vm725_vm7 = vcmp.ge.f32.partialorder %v1716_v50, 2.0 }
  0x4c   :  { %v537_v53 = vmul.f32 0.125, %v1707_v38  ;;  %v498_v54 = vmul.f32 64.0, %v482_v39  ;;  %v499_v7 = vmul.f32 64.0, %v483_v55  ;;  %v554_v39 = vfloor.f32 %v538_v16 }
  0x4d   :  { %v1788_v45 = vsub.f32 %v459_v42, %v508_v23  ;;  %v460_v51 = vcvt.s32.f32 %v1771_v40  ;;  %vm727_vm8 = vcmp.lt.f32.partialorder %v1716_v50, 4.0  ;;  %v572_v18 = vmul.f32 8.0, %v556_v60 }
  0x4e   :  { %v553_v2 = vfloor.f32 %v537_v53  ;;  %v1735_v6 = vsub.f32 %v449_v10, %v498_v54  ;;  %v530_v10 = vmul.f32 0.125, %v1727_v62  ;;  %v1759_v22 = vsub.f32 %v450_v24, %v499_v7  ;;  %vm1951_vm10 = vmand %vm725_vm7, %vm727_vm8 }
  0x4f   :  { %v577_v24 = vsub.f32 %v1704_v36, %v561_v17  ;;  %v555_v36 = vfloor.f32 %v539_v30  ;;  %v570_v49 = vmul.f32 8.0, %v554_v39  ;;  %v533_v53 = vmul.f32 0.125, %v1782_v33 }
  0x50   :  { %v569_v19 = vmul.f32 8.0, %v553_v2  ;;  %v531_v20 = vmul.f32 0.125, %v1735_v6  ;;  %v546_v35 = vfloor.f32 %v530_v10  ;;  %v532_v44 = vmul.f32 0.125, %v1759_v22 }
  0x51   :  { %v614_v46 = vsel %vm594_vm1, %v553_v2, 0.0  ;;  %v1804_v42 = vsel %vm592_vm2, %v577_v24, %v598_v29  ;;  %v615_v52 = vsel %vm595_vm3, %v553_v2, 0.0  ;;  %v541_v57 = vmul.f32 0.125, %v1788_v45 }
  0x52   :  { %v585_v27 = vsub.f32 %v1707_v38, %v569_v19  ;;  %v547_v43 = vfloor.f32 %v531_v20  ;;  %v562_v38 = vmul.f32 8.0, %v546_v35  ;;  %v548_v56 = vfloor.f32 %v532_v44 }
  0x53   :  { %v1818_v58 = vsel %vm593_vm4, %v577_v24, %v599_v37  ;;  %v571_v59 = vmul.f32 8.0, %v555_v36  ;;  %v586_v1 = vsub.f32 %v1729_v63, %v570_v49  ;;  %v477_v2 = vmul.f32 0.015625, %v460_v51 }
  0x54   :  { %v1811_v54 = vsel %vm592_vm2, %v585_v27, %v614_v46  ;;  %v563_v55 = vmul.f32 8.0, %v547_v43  ;;  %v1822_v0 = vsel %vm593_vm4, %v585_v27, %v615_v52  ;;  %v578_v3 = vsub.f32 %v1727_v62, %v562_v38 }
  0x55   :  { %v600_v7 = vsel %vm594_vm1, %v546_v35, 0.0  ;;  %v616_v8 = vsel %vm594_vm1, %v554_v39, 0.0  ;;  %v601_v9 = vsel %vm595_vm3, %v546_v35, 0.0  ;;  %v1834_v4 = vfloor.f32 %v533_v53 }
  0x56   :  { %v617_v62 = vsel %vm595_vm3, %v554_v39, 0.0  ;;  %v579_v63 = vsub.f32 %v1735_v6, %v563_v55  ;;  %v564_v10 = vmul.f32 8.0, %v548_v56  ;;  %v1841_v16 = vfloor.f32 %v541_v57 }
  0x57   :  { %v602_v14 = vsel %vm594_vm1, %v547_v43, 0.0  ;;  %v587_v17 = vsub.f32 %v1738_v12, %v571_v59  ;;  %v501_v19 = vmul.f32 64.0, %v485_v61  ;;  %v1848_v20 = vsel %vm592_vm2, %v578_v3, %v600_v7 }
  0x58   :  { %v1852_v23 = vsel %vm592_vm2, %v586_v1, %v616_v8  ;;  %v618_v6 = vsel %vm594_vm1, %v555_v36, 0.0  ;;  %v493_v30 = vfloor.f32 %v477_v2  ;;  %v1858_v26 = vsel %vm593_vm4, %v578_v3, %v601_v9 }
  0x59   :  { %v603_v12 = vsel %vm595_vm3, %v547_v43, 0.0  ;;  %v619_v35 = vsel %vm595_vm3, %v555_v36, 0.0  ;;  %v565_v39 = vmul.f32 8.0, %v1834_v4  ;;  %v1867_v24 = vsel %vm593_vm4, %v586_v1, %v617_v62 }
  0x5a   :  { %v1871_v29 = vsel %vm592_vm2, %v579_v63, %v602_v14  ;;  %v580_v27 = vsub.f32 %v1759_v22, %v564_v10  ;;  %v573_v44 = vmul.f32 8.0, %v1841_v16  ;;  %v1877_v43 = vsel %vm592_vm2, %v587_v17, %v618_v6 }
  0x5b   :  { %v604_v46 = vsel %vm594_vm1, %v548_v56, 0.0  ;;  %v588_v36 = vsub.f32 %v1764_v31, %v572_v18  ;;  %v1884_v48 = vsub.f32 %v452_v32, %v501_v19  ;;  %v1888_v22 = vsel %vm593_vm4, %v579_v63, %v603_v12 }
  0x5c   :  { %v1892_v38 = vsel %vm593_vm4, %v587_v17, %v619_v35  ;;  %v620_v49 = vsel %vm594_vm1, %v556_v60, 0.0  ;;  %v509_v52 = vmul.f32 64.0, %v493_v30  ;;  %v605_v32 = vsel %vm595_vm3, %v548_v56, 0.0 }
  0x5d   :  { %v581_v53 = vsub.f32 %v1782_v33, %v565_v39  ;;  %v1915_v61 = vsel %vm592_vm2, %v580_v27, %v604_v46  ;;  %v621_v3 = vsel %vm595_vm3, %v556_v60, 0.0  ;;  %v606_v33 = vsel %vm594_vm1, %v1834_v4, 0.0 }
  0x5e   :  { %v589_v56 = vsub.f32 %v1788_v45, %v573_v44  ;;  %v1926_v2 = vsel %vm592_vm2, %v588_v36, %v620_v49  ;;  %v622_v7 = vsel %vm594_vm1, %v1841_v16, 0.0  ;;  %v534_v8 = vmul.f32 0.125, %v1884_v48 }
  0x5f   :  { %v1938_v45 = vsel %vm593_vm4, %v580_v27, %v605_v32  ;;  %v1942_v63 = vsub.f32 %v460_v51, %v509_v52  ;;  %v1957_v17 = vsel %vm593_vm4, %v588_v36, %v621_v3  ;;  %v1961_v40 = vsel %vm592_vm2, %v581_v53, %v606_v33 }
  0x60   :  { %v1969_v6 = vsel %vm592_vm2, %v589_v56, %v622_v7  ;;  %v1972_v30 = vadd.s32 56, %v1657_v41  ;;  %v607_v27 = vsel %vm595_vm3, %v1834_v4, 0.0  ;;  %v1983_v44 = vfloor.f32 %v534_v8 }
  0x61   :  { %v623_v4 = vsel %vm595_vm3, %v1841_v16, 0.0  ;;  %v2009_v16 = vsel %vm593_vm4, %v581_v53, %v607_v27  ;;  %vm1050_vm11 = vcmp.lt.f32.partialorder %v1702_v34, 2.0  ;;  %vm1051_vm12 = vcmp.lt.f32.partialorder %v1716_v50, 2.0 }
  0x62   :  { %v566_v8 = vmul.f32 8.0, %v1983_v44  ;;  %v2021_v53 = vsel %vm593_vm4, %v589_v56, %v623_v4  ;;  %v608_v4 = vsel %vm594_vm1, %v1983_v44, 0.0 }
  0x64   :  { %v2038_v56 = vsub.f32 %v1884_v48, %v566_v8 }
  0x66   :  { %2641 = vst [vmem:[#allocation3_spill] sm:$0xff] %v2038_v56 }
  0xf2   :  { %v318_v21 = vpop.f32.mrf.mxu0  ;;  %v358_v37 = vpop.f32.mrf.mxu1 }
  0xf3   :  { %v1897_v31 = vadd.f32 %v318_v21, %v1713_v47  ;;  %v1900_v5 = vadd.f32 %v358_v37, %v1713_v47  ;;  %v542_v21 = vmul.f32 0.125, %v1942_v63 }
  0xf4   :  { %v320_v57 = vpop.f32.mrf.mxu0  ;;  %v360_v59 = vpop.f32.mrf.mxu1 }
  0xf5   :  { %v1201_v1 = vmul.f32 -1.442695, %v1897_v31  ;;  %v1217_v60 = vmul.f32 -1.442695, %v1900_v5  ;;  %v1934_v9 = vadd.f32 %v320_v57, %v1761_v28  ;;  %v730_v10 = vsel %vm1909_vm9, %v1897_v31, 0.0 }
  0xf6   :  { %v322_v62 = vpop.f32.mrf.mxu0  ;;  %v746_v51 = vsel %vm1909_vm9, %v1900_v5, 0.0  ;;  %v362_v19 = vpop.f32.mrf.mxu1  ;;  %v1975_v12 = vadd.f32 %v360_v59, %v1761_v28  ;;  %v762_v46 = vmul.f32 1.442695, %v730_v10  ;;  %v2632_v59 = vcvt.s32.f32 %v1972_v30 }
  0xf7   :  { %1317 = vpow2.f32 %v1201_v1  ;;  %v1202_v18 = vmul.f32 -1.442695, %v1934_v9  ;;  %v1978_v35 = vadd.f32 %v322_v62, %v1713_v47  ;;  %v731_v36 = vsel %vm1951_vm10, %v1934_v9, 0.0 }
  0xf8   :  { %v324_v39 = vpop.f32.mrf.mxu0  ;;  %1319 = vpow2.f32 %v1217_v60  ;;  %v794_v37 = vmul.f32 1.442695, %v746_v51  ;;  %v1218_v49 = vmul.f32 -1.442695, %v1975_v12  ;;  %v1991_v52 = vadd.f32 %v362_v19, %v1713_v47  ;;  %v364_v7 = vpop.f32.mrf.mxu1 }
  0xf9   :  { %1321 = vpow2.f32 %v1202_v18  ;;  %v747_v32 = vsel %vm1951_vm10, %v1975_v12, 0.0  ;;  %v2000_v57 = vadd.f32 %v324_v39, %v1761_v28  ;;  %v764_v3 = vmul.f32 1.442695, %v731_v36 }
  0xfa   :  { %1323 = vpow2.f32 %v1218_v49  ;;  %v1203_v33 = vmul.f32 -1.442695, %v1978_v35  ;;  %v2005_v1 = vadd.s32 120, %v1657_v41  ;;  %v2012_v60 = vfloor.f32 %v542_v21  ;;  %v328_v41 = vpop.f32.mrf.mxu0  ;;  %v368_v49 = vpop.f32.mrf.mxu1 }
  0xfb   :  { %1325 = vpow2.f32 %v762_v46  ;;  %v796_v62 = vmul.f32 1.442695, %v747_v32  ;;  %v732_v10 = vsel %vm1909_vm9, %v1978_v35, 0.0  ;;  %v1219_v51 = vmul.f32 -1.442695, %v1991_v52 }
  0xfc   :  { %2640 = vst [vmem:[#allocation2_spill] sm:$0xff] %v2012_v60  ;;  %1327 = vpow2.f32 %v794_v37  ;;  %v1204_v18 = vmul.f32 -1.442695, %v2000_v57  ;;  %v2025_v19 = vmul.f32 0.015625, %v2632_v59  ;;  %v748_v39 = vsel %vm1909_vm9, %v1991_v52, 0.0 }
  0xfd   :  { %1329 = vpow2.f32 %v1203_v33  ;;  %v2031_v27 = vadd.f32 %v364_v7, %v1761_v28  ;;  %v2633_v46 = vcvt.s32.f32 %v2005_v1  ;;  %v766_v36 = vmul.f32 1.442695, %v732_v10 }
  0xfe   :  { %1331 = vpow2.f32 %v764_v3  ;;  %v2035_v21 = vadd.f32 %v328_v41, %v1713_v47  ;;  %v574_v32 = vmul.f32 8.0, %v2012_v60  ;;  %v798_v33 = vmul.f32 1.442695, %v748_v39  ;;  %v330_v39 = vpop.f32.mrf.mxu0 }
  0xff   :  { %1333 = vpow2.f32 %v1219_v51  ;;  %v1220_v37 = vmul.f32 -1.442695, %v2031_v27  ;;  %v733_v7 = vsel %vm1951_vm10, %v2000_v57, 0.0  ;;  %v660_v8 = vadd.f32 %v1745_v13, %v1897_v31 }
 0x100   :  { %1335 = vpow2.f32 %v796_v62  ;;  %v2053_v10 = vmul.f32 0.015625, %v2633_v46  ;;  %v1205_v51 = vmul.f32 -1.442695, %v2035_v21  ;;  %v2057_v41 = vadd.f32 %v368_v49, %v1713_v47 }
 0x101   :  { %1337 = vpow2.f32 %v1204_v18  ;;  %v2062_v18 = vsel %vm592_vm2, %v2038_v56, %v608_v4  ;;  %v676_v13 = vadd.f32 %v1749_v15, %v1900_v5  ;;  %v768_v31 = vmul.f32 1.442695, %v733_v7 }
 0x102   :  { %1339 = vpow2.f32 %v1220_v37  ;;  %2642 = vst [vmem:[#allocation4_spill] sm:$0xff] %v2062_v18  ;;  %v2067_v37 = vsub.f32 %v1942_v63, %v574_v32  ;;  %v661_v49 = vadd.f32 %v1775_v11, %v1934_v9  ;;  %v2074_v46 = vmul.f32 4.0, %v660_v8  ;;  %v370_v8 = vpop.f32.mrf.mxu1 }
 0x103   :  { %1341 = vpow2.f32 %v766_v36  ;;  %v2082_v15 = vsel %vm594_vm1, %v2012_v60, 0.0  ;;  %v677_v9 = vadd.f32 %v1800_v25, %v1975_v12  ;;  %v1221_v63 = vmul.f32 -1.442695, %v2057_v41 }
 0x104   :  { %v1318_v3 = vpop.eup %1317  ;;  %v2088_v32 = vmul.f32 4.0, %v676_v13  ;;  %v734_v25 = vsel %vm1909_vm9, %v2035_v21, 0.0  ;;  %v678_v13 = vadd.f32 %v1811_v54, %v1991_v52  ;;  %v664_v54 = vadd.f32 %v1848_v20, %v2035_v21 }
 0x105   :  { %v954_v62 = vadd.f32 1.0, %v1318_v3  ;;  %v1320_v59 = vpop.eup %1319  ;;  %v749_v3 = vsel %vm1951_vm10, %v2031_v27, 0.0 }
 0x106   :  { %v970_v36 = vadd.f32 1.0, %v1320_v59  ;;  %v1322_v4 = vpop.eup %1321  ;;  %v800_v7 = vmul.f32 1.442695, %v749_v3 }
 0x107   :  { %1343 = vrcp.f32 %v954_v62  ;;  %v2077_v62 = vadd.f32 %v330_v39, %v1761_v28  ;;  %v1324_v5 = vpop.eup %1323  ;;  %v955_v11 = vadd.f32 1.0, %v1322_v4  ;;  %v2090_v39 = vmul.f32 4.0, %v661_v49  ;;  %v332_v49 = vpop.f32.mrf.mxu0 }
 0x108   :  { %1345 = vpow2.f32 %v798_v33  ;;  %v1326_v59 = vpop.eup %1325  ;;  %v971_v33 = vadd.f32 1.0, %v1324_v5  ;;  %v2102_v5 = vmul.f32 4.0, %v677_v9  ;;  %v750_v9 = vsel %vm1909_vm9, %v2057_v41, 0.0 }
 0x109   :  { %1347 = vpow2.f32 %v1205_v51  ;;  %v1328_v51 = vpop.eup %1327  ;;  %v1206_v3 = vmul.f32 -1.442695, %v2077_v62  ;;  %v802_v60 = vmul.f32 1.442695, %v750_v9 }
 0x10a   :  { %1349 = vrcp.f32 %v970_v36  ;;  %v662_v36 = vadd.f32 %v1804_v42, %v1978_v35  ;;  %v1330_v12 = vpop.eup %1329  ;;  %v2105_v42 = vadd.f32 %v370_v8, %v1761_v28  ;;  %v372_v8 = vpop.f32.mrf.mxu1 }
 0x10b   :  { %1351 = vpow2.f32 %v768_v31  ;;  %v663_v31 = vadd.f32 %v1818_v58, %v2000_v57  ;;  %v1332_v4 = vpop.eup %1331  ;;  %v770_v58 = vmul.f32 1.442695, %v734_v25  ;;  %v2126_v56 = vadd.f32 %v372_v8, %v1713_v47 }
 0x10c   :  { %1353 = vrcp.f32 %v955_v11  ;;  %v956_v11 = vadd.f32 1.0, %v1330_v12  ;;  %v1334_v35 = vpop.eup %1333 }
 0x10d   :  { %1355 = vrcp.f32 %v971_v33  ;;  %v679_v33 = vadd.f32 %v1822_v0, %v2031_v27  ;;  %v1336_v52 = vpop.eup %1335  ;;  %v972_v57 = vadd.f32 1.0, %v1334_v35  ;;  %v2118_v0 = vmul.f32 4.0, %v662_v36  ;;  %v334_v35 = vpop.f32.mrf.mxu0 }
 0x10e   :  { %1357 = vpow2.f32 %v1221_v63  ;;  %v2116_v63 = vadd.f32 %v332_v49, %v1713_v47  ;;  %v1338_v12 = vpop.eup %1337  ;;  %v2120_v27 = vmul.f32 4.0, %v678_v13  ;;  %v2122_v20 = vmul.f32 4.0, %v663_v31 }
 0x10f   :  { %1359 = vpow2.f32 %v800_v7  ;;  %v1340_v21 = vpop.eup %1339  ;;  %v826_v7 = vmul.f32 4.0, %v1326_v59  ;;  %v957_v25 = vadd.f32 1.0, %v1338_v12  ;;  %v2128_v13 = vmul.f32 4.0, %v679_v33 }
 0x110   :  { %1361 = vrcp.f32 %v956_v11  ;;  %v1222_v11 = vmul.f32 -1.442695, %v2105_v42  ;;  %v1342_v48 = vpop.eup %1341  ;;  %v973_v49 = vadd.f32 1.0, %v1340_v21  ;;  %v2130_v31 = vmul.f32 4.0, %v664_v54  ;;  %v374_v21 = vpop.f32.mrf.mxu1 }
 0x111   :  { %1363 = vpow2.f32 %v1206_v3  ;;  %v1207_v59 = vmul.f32 -1.442695, %v2116_v63  ;;  %v2139_v9 = vadd.f32 %v334_v35, %v1761_v28  ;;  %v842_v54 = vmul.f32 4.0, %v1328_v51 }
 0x112   :  { %1365 = vrcp.f32 %v972_v57  ;;  %v827_v12 = vmul.f32 4.0, %v1332_v4  ;;  %v751_v35 = vsel %vm1951_vm10, %v2105_v42, 0.0  ;;  %v843_v51 = vmul.f32 4.0, %v1336_v52 }
 0x113   :  { %1367 = vpow2.f32 %v770_v58  ;;  %v735_v58 = vsel %vm1951_vm10, %v2077_v62, 0.0 }
 0x114   :  { %v1344_v36 = vpop.eup %1343  ;;  %1369 = vrcp.f32 %v957_v25  ;;  %v772_v4 = vmul.f32 1.442695, %v735_v58  ;;  %v804_v58 = vmul.f32 1.442695, %v751_v35 }
 0x115   :  { %v1346_v3 = vpop.eup %1345  ;;  %v1052_v57 = vsel %vm1909_vm9, %v826_v7, %v1344_v36  ;;  %1371 = vrcp.f32 %v973_v49  ;;  %v1223_v49 = vmul.f32 -1.442695, %v2126_v56 }
 0x116   :  { %v1348_v8 = vpop.eup %1347  ;;  %v1084_v33 = vsel %vm1050_vm11, %v2074_v46, %v1052_v57  ;;  %1373 = vpow2.f32 %v1222_v11  ;;  %v338_v11 = vpop.f32.mrf.mxu0 }
 0x117   :  { %v1350_v25 = vpop.eup %1349  ;;  %1116 = vst [vmem:[%s2631_s3] sm:$0xff] %v1084_v33  ;;  %v958_v7 = vadd.f32 1.0, %v1348_v8  ;;  %1375 = vpow2.f32 %v802_v60  ;;  %v1208_v60 = vmul.f32 -1.442695, %v2139_v9  ;;  %v2158_v33 = vadd.f32 %v374_v21, %v1761_v28 }
 0x118   :  { %v1352_v36 = vpop.eup %1351  ;;  %v1068_v46 = vsel %vm1909_vm9, %v842_v54, %v1350_v25  ;;  %1377 = vpow2.f32 %v1207_v59  ;;  %v828_v59 = vmul.f32 4.0, %v1342_v48 }
 0x119   :  { %v1354_v57 = vpop.eup %1353  ;;  %v1100_v8 = vsel %vm1050_vm11, %v2088_v32, %v1068_v46  ;;  %1379 = vrcp.f32 %v958_v7  ;;  %v736_v32 = vsel %vm1909_vm9, %v2116_v63, 0.0  ;;  %v2174_v7 = vadd.f32 %v338_v11, %v1713_v47  ;;  %v378_v11 = vpop.f32.mrf.mxu1 }
 0x11a   :  { %v1356_v18 = vpop.eup %1355  ;;  %1133 = vst [vmem:[%s2631_s3 + $0x80] sm:$0xff] %v1100_v8  ;;  %v1053_v52 = vsel %vm1951_vm10, %v827_v12, %v1354_v57  ;;  %1381 = vpow2.f32 %v1223_v49  ;;  %v844_v12 = vmul.f32 4.0, %v1346_v3  ;;  %v752_v49 = vsel %vm1909_vm9, %v2126_v56, 0.0 }
 0x11b   :  { %v1358_v54 = vpop.eup %1357  ;;  %v1085_v21 = vsel %vm1051_vm12, %v2090_v39, %v1053_v52  ;;  %v1069_v25 = vsel %vm1951_vm10, %v843_v51, %v1356_v18  ;;  %1383 = vpow2.f32 %v772_v4  ;;  %v829_v18 = vmul.f32 4.0, %v1352_v36 }
 0x11c   :  { %v1360_v46 = vpop.eup %1359  ;;  %1118 = vst.msk [vmem:[%s2631_s3 + $0x8] sm:$0xff] %vm1117_vm13, %v1085_v21  ;;  %v1101_v48 = vsel %vm1051_vm12, %v2102_v5, %v1069_v25  ;;  %v974_v35 = vadd.f32 1.0, %v1358_v54  ;;  %1385 = vpow2.f32 %v1208_v60  ;;  %v1224_v51 = vmul.f32 -1.442695, %v2158_v33  ;;  %v340_v54 = vpop.f32.mrf.mxu0 }
 0x11d   :  { %v1362_v39 = vpop.eup %1361  ;;  %1134 = vst.msk [vmem:[%s2631_s3 + $0x88] sm:$0xff] %vm1117_vm13, %v1101_v48  ;;  %v774_v3 = vmul.f32 1.442695, %v736_v32  ;;  %v737_v4 = vsel %vm1951_vm10, %v2139_v9, 0.0  ;;  %v1209_v60 = vmul.f32 -1.442695, %v2174_v7  ;;  %v2206_v25 = vadd.f32 %v378_v11, %v1713_v47 }
 0x11e   :  { %v1364_v57 = vpop.eup %1363  ;;  %v1054_v5 = vsel %vm1909_vm9, %v828_v59, %v1362_v39  ;;  %1387 = vrcp.f32 %v974_v35  ;;  %v806_v32 = vmul.f32 1.442695, %v752_v49  ;;  %v776_v35 = vmul.f32 1.442695, %v737_v4  ;;  %v380_v4 = vpop.f32.mrf.mxu1 }
 0x11f   :  { %v1366_v8 = vpop.eup %1365  ;;  %v1086_v36 = vsel %vm1050_vm11, %v2118_v0, %v1054_v5  ;;  %v959_v52 = vadd.f32 1.0, %v1364_v57  ;;  %1389 = vpow2.f32 %v804_v58  ;;  %v845_v58 = vmul.f32 4.0, %v1360_v46 }
 0x120   :  { %v1368_v21 = vpop.eup %1367  ;;  %1119 = vst [vmem:[%s2631_s3 + $0x10] sm:$0xff] %v1086_v36  ;;  %v1070_v59 = vsel %vm1909_vm9, %v844_v12, %v1366_v8  ;;  %1391 = vpow2.f32 %v1224_v51  ;;  %v753_v49 = vsel %vm1951_vm10, %v2158_v33, 0.0  ;;  %v2220_v51 = vadd.f32 %v340_v54, %v1761_v28 }
 0x121   :  { %v1370_v48 = vpop.eup %1369  ;;  %v1102_v0 = vsel %vm1050_vm11, %v2120_v27, %v1070_v59  ;;  %1393 = vrcp.f32 %v959_v52  ;;  %v680_v57 = vadd.f32 %v1852_v23, %v2057_v41  ;;  %v830_v23 = vmul.f32 4.0, %v1368_v21  ;;  %v342_v52 = vpop.f32.mrf.mxu0 }
 0x122   :  { %v1372_v39 = vpop.eup %1371  ;;  %1135 = vst [vmem:[%s2631_s3 + $0x90] sm:$0xff] %v1102_v0  ;;  %v1055_v12 = vsel %vm1951_vm10, %v829_v18, %v1370_v48  ;;  %1395 = vpow2.f32 %v774_v3  ;;  %v808_v41 = vmul.f32 1.442695, %v753_v49  ;;  %v738_v36 = vsel %vm1909_vm9, %v2174_v7, 0.0 }
 0x123   :  { %v1374_v27 = vpop.eup %1373  ;;  %v1087_v46 = vsel %vm1051_vm12, %v2122_v20, %v1055_v12  ;;  %v1071_v11 = vsel %vm1951_vm10, %v845_v58, %v1372_v39  ;;  %1397 = vpow2.f32 %v1209_v60  ;;  %v1225_v20 = vmul.f32 -1.442695, %v2206_v25 }
 0x124   :  { %v1376_v18 = vpop.eup %1375  ;;  %1120 = vst.msk [vmem:[%s2631_s3 + $0x18] sm:$0xff] %vm1117_vm13, %v1087_v46  ;;  %v1103_v5 = vsel %vm1051_vm12, %v2128_v13, %v1071_v11  ;;  %v975_v3 = vadd.f32 1.0, %v1374_v27  ;;  %1399 = vpow2.f32 %v806_v32  ;;  %v665_v60 = vadd.f32 %v1858_v26, %v2077_v62 }
 0x125   :  { %v1378_v8 = vpop.eup %1377  ;;  %1136 = vst.msk [vmem:[%s2631_s3 + $0x98] sm:$0xff] %vm1117_vm13, %v1103_v5  ;;  %1401 = vpow2.f32 %v776_v35  ;;  %v1210_v59 = vmul.f32 -1.442695, %v2220_v51  ;;  %v681_v21 = vadd.f32 %v1867_v24, %v2105_v42  ;;  %v2252_v48 = vadd.f32 %v380_v4, %v1761_v28  ;;  %v382_v4 = vpop.f32.mrf.mxu1 }
 0x126   :  { %v1380_v13 = vpop.eup %1379  ;;  %1403 = vrcp.f32 %v975_v3  ;;  %v960_v54 = vadd.f32 1.0, %v1378_v8  ;;  %v778_v26 = vmul.f32 1.442695, %v738_v36  ;;  %v2258_v62 = vadd.f32 %v342_v52, %v1713_v47 }
 0x127   :  { %v1056_v32 = vsel %vm1909_vm9, %v830_v23, %v1380_v13  ;;  %1405 = vpow2.f32 %v1225_v20  ;;  %v1382_v0 = vpop.eup %1381  ;;  %v2643_v42 = vfloor.f32 %v2025_v19  ;;  %v494_v12 = vfloor.f32 %v2053_v10  ;;  %v344_v13 = vpop.f32.mrf.mxu0 }
 0x128   :  { %v1088_v58 = vsel %vm1050_vm11, %v2130_v31, %v1056_v32  ;;  %1407 = vrcp.f32 %v960_v54  ;;  %v1384_v35 = vpop.eup %1383  ;;  %v976_v24 = vadd.f32 1.0, %v1382_v0  ;;  %v712_v31 = vmul.f32 4.0, %v680_v57 }
 0x129   :  { %1121 = vst [vmem:[%s2631_s3 + $0x20] sm:$0xff] %v1088_v58  ;;  %1409 = vpow2.f32 %v808_v41  ;;  %v2265_v39 = vmul.f32 64.0, %v2643_v42  ;;  %v1386_v49 = vpop.eup %1385  ;;  %v846_v27 = vmul.f32 4.0, %v1376_v18  ;;  %v1226_v46 = vmul.f32 -1.442695, %v2252_v48 }
 0x12a   :  { %1411 = vpow2.f32 %v1210_v59  ;;  %v697_v5 = vmul.f32 4.0, %v665_v60  ;;  %v961_v3 = vadd.f32 1.0, %v1386_v49  ;;  %v754_v20 = vsel %vm1909_vm9, %v2206_v25, 0.0 }
 0x12b   :  { %v1388_v11 = vpop.eup %1387  ;;  %1413 = vrcp.f32 %v976_v24  ;;  %v713_v23 = vmul.f32 4.0, %v681_v21  ;;  %v1211_v57 = vmul.f32 -1.442695, %v2258_v62  ;;  %v831_v36 = vmul.f32 4.0, %v1384_v35 }
 0x12c   :  { %v1390_v19 = vpop.eup %1389  ;;  %v1072_v8 = vsel %vm1909_vm9, %v846_v27, %v1388_v11  ;;  %1415 = vpow2.f32 %v778_v26  ;;  %v739_v52 = vsel %vm1951_vm10, %v2220_v51, 0.0  ;;  %v810_v59 = vmul.f32 1.442695, %v754_v20 }
 0x12d   :  { %v1392_v18 = vpop.eup %1391  ;;  %v1104_v41 = vsel %vm1050_vm11, %v712_v31, %v1072_v8  ;;  %1417 = vrcp.f32 %v961_v3  ;;  %v2284_v32 = vadd.f32 %v382_v4, %v1713_v47  ;;  %v666_v58 = vadd.f32 %v1871_v29, %v2116_v63  ;;  %v384_v31 = vpop.f32.mrf.mxu1 }
 0x12e   :  { %v1394_v60 = vpop.eup %1393  ;;  %1137 = vst [vmem:[%s2631_s3 + $0xa0] sm:$0xff] %v1104_v41  ;;  %v977_v54 = vadd.f32 1.0, %v1392_v18  ;;  %1419 = vpow2.f32 %v1226_v46  ;;  %v755_v26 = vsel %vm1951_vm10, %v2252_v48, 0.0  ;;  %v780_v42 = vmul.f32 1.442695, %v739_v52 }
 0x12f   :  { %v1396_v21 = vpop.eup %1395  ;;  %v1057_v0 = vsel %vm1951_vm10, %v831_v36, %v1394_v60  ;;  %1421 = vpow2.f32 %v1211_v57  ;;  %v2296_v49 = vadd.f32 %v344_v13, %v1761_v28  ;;  %v682_v29 = vadd.f32 %v1877_v43, %v2126_v56 }
 0x130   :  { %v1398_v35 = vpop.eup %1397  ;;  %v1089_v24 = vsel %vm1051_vm12, %v697_v5, %v1057_v0  ;;  %1423 = vrcp.f32 %v977_v54  ;;  %v667_v63 = vadd.f32 %v1888_v22, %v2139_v9  ;;  %v1227_v11 = vmul.f32 -1.442695, %v2284_v32 }
 0x131   :  { %v1400_v27 = vpop.eup %1399  ;;  %1122 = vst.msk [vmem:[%s2631_s3 + $0x28] sm:$0xff] %vm1117_vm13, %v1089_v24  ;;  %v962_v46 = vadd.f32 1.0, %v1398_v35  ;;  %v847_v3 = vmul.f32 4.0, %v1390_v19  ;;  %1425 = vpow2.f32 %v810_v59  ;;  %v812_v20 = vmul.f32 1.442695, %v755_v26  ;;  %v388_v26 = vpop.f32.mrf.mxu1 }
 0x132   :  { %v1402_v5 = vpop.eup %1401  ;;  %v740_v4 = vsel %vm1909_vm9, %v2258_v62, 0.0  ;;  %v698_v57 = vmul.f32 4.0, %v666_v58  ;;  %v683_v18 = vadd.f32 %v1892_v38, %v2158_v33  ;;  %v2313_v43 = vadd.f32 %v384_v31, %v1761_v28  ;;  %v348_v38 = vpop.f32.mrf.mxu0 }
 0x133   :  { %v1404_v8 = vpop.eup %1403  ;;  %1427 = vrcp.f32 %v962_v46  ;;  %v832_v9 = vmul.f32 4.0, %v1396_v21  ;;  %v1212_v19 = vmul.f32 -1.442695, %v2296_v49  ;;  %v782_v13 = vmul.f32 1.442695, %v740_v4 }
 0x134   :  { %v1406_v22 = vpop.eup %1405  ;;  %v1073_v56 = vsel %vm1951_vm10, %v847_v3, %v1404_v8  ;;  %1429 = vpow2.f32 %v780_v42  ;;  %v714_v54 = vmul.f32 4.0, %v682_v29  ;;  %v699_v59 = vmul.f32 4.0, %v667_v63 }
 0x135   :  { %v1408_v41 = vpop.eup %1407  ;;  %v1105_v36 = vsel %vm1051_vm12, %v713_v23, %v1073_v56  ;;  %v978_v52 = vadd.f32 1.0, %v1406_v22  ;;  %1431 = vpow2.f32 %v1227_v11  ;;  %v848_v0 = vmul.f32 4.0, %v1400_v27  ;;  %v350_v11 = vpop.f32.mrf.mxu0 }
 0x136   :  { %v1410_v33 = vpop.eup %1409  ;;  %1138 = vst.msk [vmem:[%s2631_s3 + $0xa8] sm:$0xff] %vm1117_vm13, %v1105_v36  ;;  %v1058_v60 = vsel %vm1909_vm9, %v832_v9, %v1408_v41  ;;  %1433 = vpow2.f32 %v812_v20  ;;  %v1228_v58 = vmul.f32 -1.442695, %v2313_v43  ;;  %v715_v24 = vmul.f32 4.0, %v683_v18 }
 0x137   :  { %v1412_v21 = vpop.eup %1411  ;;  %v1090_v23 = vsel %vm1050_vm11, %v698_v57, %v1058_v60  ;;  %1435 = vrcp.f32 %v978_v52  ;;  %v2333_v31 = vadd.f32 %v348_v38, %v1713_v47  ;;  %v833_v27 = vmul.f32 4.0, %v1402_v5  ;;  %v390_v38 = vpop.f32.mrf.mxu1 }
 0x138   :  { %v1414_v35 = vpop.eup %1413  ;;  %1123 = vst [vmem:[%s2631_s3 + $0x30] sm:$0xff] %v1090_v23  ;;  %v963_v42 = vadd.f32 1.0, %v1412_v21  ;;  %1437 = vpow2.f32 %v1212_v19  ;;  %v668_v46 = vadd.f32 %v1915_v61, %v2174_v7  ;;  %v756_v4 = vsel %vm1909_vm9, %v2284_v32, 0.0 }
 0x139   :  { %v1416_v29 = vpop.eup %1415  ;;  %v1074_v63 = vsel %vm1909_vm9, %v848_v0, %v1414_v35  ;;  %1439 = vpow2.f32 %v782_v13  ;;  %v2345_v8 = vadd.f32 %v388_v26, %v1713_v47  ;;  %v849_v7 = vmul.f32 4.0, %v1410_v33 }
 0x13a   :  { %v1418_v3 = vpop.eup %1417  ;;  %v1106_v20 = vsel %vm1050_vm11, %v714_v54, %v1074_v63  ;;  %1441 = vrcp.f32 %v963_v42  ;;  %v1213_v5 = vmul.f32 -1.442695, %v2333_v31  ;;  %v741_v9 = vsel %vm1951_vm10, %v2296_v49, 0.0 }
 0x13b   :  { %v1420_v57 = vpop.eup %1419  ;;  %1139 = vst [vmem:[%s2631_s3 + $0xb0] sm:$0xff] %v1106_v20  ;;  %v1059_v61 = vsel %vm1951_vm10, %v833_v27, %v1418_v3  ;;  %1443 = vpow2.f32 %v1228_v58  ;;  %v2359_v19 = vadd.f32 %v350_v11, %v1761_v28  ;;  %v684_v36 = vadd.f32 %v1926_v2, %v2206_v25 }
 0x13c   :  { %v1422_v18 = vpop.eup %1421  ;;  %v1091_v22 = vsel %vm1051_vm12, %v699_v59, %v1059_v61  ;;  %v979_v56 = vadd.f32 1.0, %v1420_v57  ;;  %v814_v13 = vmul.f32 1.442695, %v756_v4  ;;  %1445 = vpow2.f32 %v1213_v5 }
 0x13d   :  { %v1424_v41 = vpop.eup %1423  ;;  %1124 = vst.msk [vmem:[%s2631_s3 + $0x38] sm:$0xff] %vm1117_vm13, %v1091_v22  ;;  %v964_v52 = vadd.f32 1.0, %v1422_v18  ;;  %v834_v60 = vmul.f32 4.0, %v1416_v29  ;;  %v1229_v54 = vmul.f32 -1.442695, %v2345_v8  ;;  %v757_v2 = vsel %vm1951_vm10, %v2313_v43, 0.0  ;;  %v392_v18 = vpop.f32.mrf.mxu1 }
 0x13e   :  { %v1075_v33 = vsel %vm1951_vm10, %v849_v7, %v1424_v41  ;;  %1447 = vrcp.f32 %v979_v56  ;;  %v1426_v59 = vpop.eup %1425  ;;  %v784_v23 = vmul.f32 1.442695, %v741_v9  ;;  %v700_v0 = vmul.f32 4.0, %v668_v46 }
 0x13f   :  { %v1107_v21 = vsel %vm1051_vm12, %v715_v24, %v1075_v33  ;;  %1449 = vrcp.f32 %v964_v52  ;;  %v1214_v58 = vmul.f32 -1.442695, %v2359_v19  ;;  %v2381_v26 = vadd.f32 %v390_v38, %v1761_v28 }
 0x140   :  { %v1428_v25 = vpop.eup %1427  ;;  %1140 = vst.msk [vmem:[%s2631_s3 + $0xb8] sm:$0xff] %vm1117_vm13, %v1107_v21  ;;  %v2644_v35 = vcvt.s32.f32 %v1972_v30  ;;  %v716_v63 = vmul.f32 4.0, %v684_v36  ;;  %1451 = vpow2.f32 %v814_v13  ;;  %v2392_v27 = vmul.f32 64.0, %v494_v12 }
 0x141   :  { %v1430_v42 = vpop.eup %1429  ;;  %v1060_v29 = vsel %vm1909_vm9, %v834_v60, %v1428_v25  ;;  %v816_v3 = vmul.f32 1.442695, %v757_v2  ;;  %v742_v30 = vsel %vm1909_vm9, %v2333_v31, 0.0  ;;  %1453 = vpow2.f32 %v1229_v54 }
 0x142   :  { %v2386_v24 = vsub.f32 %v2644_v35, %v2265_v39  ;;  %v1432_v46 = vpop.eup %1431  ;;  %v1092_v11 = vsel %vm1050_vm11, %v700_v0, %v1060_v29  ;;  %v352_v39 = vpop.f32.mrf.mxu0  ;;  %v850_v4 = vmul.f32 4.0, %v1426_v59  ;;  %v669_v10 = vadd.f32 %v1938_v45, %v2220_v51 }
 0x143   :  { %v1434_v20 = vpop.eup %1433  ;;  %1125 = vst [vmem:[%s2631_s3 + $0x40] sm:$0xff] %v1092_v11  ;;  %v980_v12 = vadd.f32 1.0, %v1432_v46  ;;  %1455 = vpow2.f32 %v784_v23  ;;  %v685_v61 = vadd.f32 %v1957_v17, %v2252_v48  ;;  %v670_v7 = vadd.f32 %v1961_v40, %v2258_v62 }
 0x144   :  { %v1436_v57 = vpop.eup %1435  ;;  %1457 = vpow2.f32 %v1214_v58  ;;  %v1230_v5 = vmul.f32 -1.442695, %v2381_v26  ;;  %v786_v9 = vmul.f32 1.442695, %v742_v30  ;;  %v2412_v45 = vadd.f32 %v352_v39, %v1713_v47  ;;  %v354_v13 = vpop.f32.mrf.mxu0 }
 0x145   :  { %v1438_v22 = vpop.eup %1437  ;;  %v1076_v56 = vsel %vm1909_vm9, %v850_v4, %v1436_v57  ;;  %1459 = vrcp.f32 %v980_v12  ;;  %v835_v48 = vmul.f32 4.0, %v1430_v42  ;;  %v701_v62 = vmul.f32 4.0, %v669_v10  ;;  %v394_v39 = vpop.f32.mrf.mxu1 }
 0x146   :  { %v1440_v51 = vpop.eup %1439  ;;  %v1108_v17 = vsel %vm1050_vm11, %v716_v63, %v1076_v56  ;;  %v965_v41 = vadd.f32 1.0, %v1438_v22  ;;  %1461 = vpow2.f32 %v816_v3  ;;  %v758_v36 = vsel %vm1909_vm9, %v2345_v8, 0.0 }
 0x147   :  { %v1442_v40 = vpop.eup %1441  ;;  %1141 = vst [vmem:[%s2631_s3 + $0xc0] sm:$0xff] %v1108_v17  ;;  %1463 = vpow2.f32 %v1230_v5  ;;  %v2423_v52 = vadd.f32 %v392_v18, %v1713_v47  ;;  %v717_v60 = vmul.f32 4.0, %v685_v61  ;;  %v1215_v54 = vmul.f32 -1.442695, %v2412_v45 }
 0x148   :  { %v1444_v38 = vpop.eup %1443  ;;  %v1061_v33 = vsel %vm1951_vm10, %v835_v48, %v1442_v40  ;;  %1465 = vrcp.f32 %v965_v41  ;;  %v743_v23 = vsel %vm1951_vm10, %v2359_v19, 0.0  ;;  %v851_v2 = vmul.f32 4.0, %v1434_v20 }
 0x149   :  { %v1093_v59 = vsel %vm1051_vm12, %v701_v62, %v1061_v33  ;;  %v981_v21 = vadd.f32 1.0, %v1444_v38  ;;  %1467 = vpow2.f32 %v786_v9  ;;  %v1446_v47 = vpop.eup %1445  ;;  %v702_v25 = vmul.f32 4.0, %v670_v7 }
 0x14a   :  { %1126 = vst.msk [vmem:[%s2631_s3 + $0x48] sm:$0xff] %vm1117_vm13, %v1093_v59  ;;  %v818_v0 = vmul.f32 1.442695, %v758_v36  ;;  %v2438_v58 = vadd.f32 %v354_v13, %v1761_v28  ;;  %v836_v42 = vmul.f32 4.0, %v1440_v51  ;;  %v966_v29 = vadd.f32 1.0, %v1446_v47 }
 0x14b   :  { %v1448_v35 = vpop.eup %1447  ;;  %1469 = vrcp.f32 %v981_v21  ;;  %v1231_v63 = vmul.f32 -1.442695, %v2423_v52  ;;  %v788_v3 = vmul.f32 1.442695, %v743_v23  ;;  %v759_v30 = vsel %vm1951_vm10, %v2381_v26, 0.0 }
 0x14c   :  { %v1450_v46 = vpop.eup %1449  ;;  %v1077_v11 = vsel %vm1951_vm10, %v851_v2, %v1448_v35  ;;  %1471 = vpow2.f32 %v1215_v54  ;;  %v2454_v10 = vsel %vm592_vm2, %v2067_v37, %v2082_v15  ;;  %v686_v61 = vadd.f32 %v1969_v6, %v2284_v32  ;;  %v2646_v2 = vld [vmem:[#allocation4_spill] sm:$0xff] }
 0x14d   :  { %v1109_v20 = vsel %vm1051_vm12, %v717_v60, %v1077_v11  ;;  %v1062_v4 = vsel %vm1909_vm9, %v836_v42, %v1450_v46  ;;  %1473 = vrcp.f32 %v966_v29  ;;  %v1452_v12 = vpop.eup %1451  ;;  %v1216_v7 = vmul.f32 -1.442695, %v2438_v58  ;;  %v2647_v11 = vld [vmem:[#allocation3_spill] sm:$0xff] }
 0x14e   :  { %1142 = vst.msk [vmem:[%s2631_s3 + $0xc8] sm:$0xff] %vm1117_vm13, %v1109_v20  ;;  %v1094_v57 = vsel %vm1050_vm11, %v702_v25, %v1062_v4  ;;  %1475 = vpow2.f32 %v818_v0  ;;  %v1454_v5 = vpop.eup %1453  ;;  %v820_v15 = vmul.f32 1.442695, %v759_v30  ;;  %v535_v18 = vmul.f32 0.125, %v2386_v24 }
 0x14f   :  { %1127 = vst [vmem:[%s2631_s3 + $0x50] sm:$0xff] %v1094_v57  ;;  %1477 = vpow2.f32 %v1231_v63  ;;  %v2470_v22 = vadd.f32 %v394_v39, %v1761_v28  ;;  %v982_v9 = vadd.f32 1.0, %v1454_v5  ;;  %v609_v6 = vsel %vm595_vm3, %v1983_v44, 0.0 }
 0x150   :  { %v1456_v56 = vpop.eup %1455  ;;  %1479 = vpow2.f32 %v788_v3  ;;  %v2645_v32 = vcvt.s32.f32 %v2005_v1  ;;  %v852_v48 = vmul.f32 4.0, %v1452_v12  ;;  %v671_v41 = vadd.f32 %v2009_v16, %v2296_v49  ;;  %v2648_v3 = vld [vmem:[#allocation2_spill] sm:$0xff] }
 0x151   :  { %v1458_v17 = vpop.eup %1457  ;;  %v744_v28 = vsel %vm1909_vm9, %v2412_v45, 0.0  ;;  %1481 = vpow2.f32 %v1216_v7  ;;  %v718_v62 = vmul.f32 4.0, %v686_v61  ;;  %v1232_v36 = vmul.f32 -1.442695, %v2470_v22 }
 0x152   :  { %v2478_v51 = vsub.f32 %v2645_v32, %v2392_v27  ;;  %v1460_v40 = vpop.eup %1459  ;;  %1483 = vrcp.f32 %v982_v9  ;;  %v967_v44 = vadd.f32 1.0, %v1458_v17  ;;  %v837_v27 = vmul.f32 4.0, %v1456_v56 }
 0x153   :  { %v1462_v13 = vpop.eup %1461  ;;  %v1078_v1 = vsel %vm1909_vm9, %v852_v48, %v1460_v40  ;;  %v687_v38 = vadd.f32 %v2021_v53, %v2313_v43  ;;  %1485 = vpow2.f32 %v820_v15  ;;  %v790_v33 = vmul.f32 1.442695, %v744_v28 }
 0x154   :  { %v1464_v16 = vpop.eup %1463  ;;  %v1110_v49 = vsel %vm1050_vm11, %v718_v62, %v1078_v1  ;;  %1487 = vrcp.f32 %v967_v44  ;;  %v760_v60 = vsel %vm1909_vm9, %v2423_v52, 0.0  ;;  %v703_v59 = vmul.f32 4.0, %v671_v41 }
 0x155   :  { %v1466_v54 = vpop.eup %1465  ;;  %1143 = vst [vmem:[%s2631_s3 + $0xd0] sm:$0xff] %v1110_v49  ;;  %v983_v21 = vadd.f32 1.0, %v1464_v16  ;;  %v2498_v23 = vfloor.f32 %v535_v18  ;;  %v543_v53 = vmul.f32 0.125, %v2478_v51  ;;  %v672_v25 = vadd.f32 %v2646_v2, %v2333_v31 }
 0x156   :  { %v1468_v43 = vpop.eup %1467  ;;  %v1063_v47 = vsel %vm1951_vm10, %v837_v27, %v1466_v54  ;;  %v745_v0 = vsel %vm1951_vm10, %v2438_v58, 0.0  ;;  %1489 = vpow2.f32 %v1232_v36  ;;  %v853_v42 = vmul.f32 4.0, %v1462_v13 }
 0x157   :  { %v1095_v35 = vsel %vm1051_vm12, %v703_v59, %v1063_v47  ;;  %1491 = vrcp.f32 %v983_v21  ;;  %v822_v29 = vmul.f32 1.442695, %v760_v60  ;;  %v719_v46 = vmul.f32 4.0, %v687_v38 }
 0x158   :  { %v1470_v63 = vpop.eup %1469  ;;  %1128 = vst.msk [vmem:[%s2631_s3 + $0x58] sm:$0xff] %vm1117_vm13, %v1095_v35  ;;  %v641_v31 = vsel %vm593_vm4, %v2647_v11, %v609_v6  ;;  %v625_v30 = vsel %vm595_vm3, %v2648_v3, 0.0  ;;  %1493 = vpow2.f32 %v790_v33  ;;  %v838_v4 = vmul.f32 4.0, %v1468_v43 }
 0x159   :  { %v1472_v39 = vpop.eup %1471  ;;  %v1079_v20 = vsel %vm1951_vm10, %v853_v42, %v1470_v63  ;;  %v2522_v12 = vfloor.f32 %v543_v53  ;;  %v792_v57 = vmul.f32 1.442695, %v745_v0  ;;  %v704_v5 = vmul.f32 4.0, %v672_v25 }
 0x15a   :  { %v1474_v61 = vpop.eup %1473  ;;  %v1111_v7 = vsel %vm1051_vm12, %v719_v46, %v1079_v20  ;;  %v567_v15 = vmul.f32 8.0, %v2498_v23  ;;  %v968_v18 = vadd.f32 1.0, %v1472_v39  ;;  %v688_v6 = vadd.f32 %v2454_v10, %v2345_v8 }
 0x15b   :  { %v1476_v56 = vpop.eup %1475  ;;  %1144 = vst.msk [vmem:[%s2631_s3 + $0xd8] sm:$0xff] %vm1117_vm13, %v1111_v7  ;;  %v1064_v9 = vsel %vm1909_vm9, %v838_v4, %v1474_v61  ;;  %1495 = vpow2.f32 %v822_v29  ;;  %v761_v32 = vsel %vm1951_vm10, %v2470_v22, 0.0  ;;  %v657_v41 = vsel %vm593_vm4, %v2067_v37, %v625_v30 }
 0x15c   :  { %v1478_v17 = vpop.eup %1477  ;;  %v1096_v48 = vsel %vm1050_vm11, %v704_v5, %v1064_v9  ;;  %1497 = vrcp.f32 %v968_v18  ;;  %v673_v8 = vadd.f32 %v641_v31, %v2359_v19  ;;  %v575_v10 = vmul.f32 8.0, %v2522_v12 }
 0x15d   :  { %v1480_v28 = vpop.eup %1479  ;;  %1129 = vst [vmem:[%s2631_s3 + $0x60] sm:$0xff] %v1096_v48  ;;  %v984_v40 = vadd.f32 1.0, %v1478_v17  ;;  %1499 = vpow2.f32 %v792_v57  ;;  %v854_v44 = vmul.f32 4.0, %v1476_v56  ;;  %v583_v36 = vsub.f32 %v2386_v24, %v567_v15 }
 0x15e   :  { %v1482_v62 = vpop.eup %1481  ;;  %v824_v13 = vmul.f32 1.442695, %v761_v32  ;;  %v720_v27 = vmul.f32 4.0, %v688_v6  ;;  %v610_v37 = vsel %vm594_vm1, %v2498_v23, 0.0  ;;  %v839_v49 = vmul.f32 4.0, %v1480_v28 }
 0x15f   :  { %v1484_v1 = vpop.eup %1483  ;;  %1501 = vrcp.f32 %v984_v40  ;;  %v969_v38 = vadd.f32 1.0, %v1482_v62  ;;  %v689_v33 = vadd.f32 %v657_v41, %v2381_v26  ;;  %v705_v54 = vmul.f32 4.0, %v673_v8 }
 0x160   :  { %v1486_v16 = vpop.eup %1485  ;;  %v1080_v19 = vsel %vm1909_vm9, %v854_v44, %v1484_v1  ;;  %v591_v59 = vsub.f32 %v2478_v51, %v575_v10  ;;  %v642_v53 = vsel %vm592_vm2, %v583_v36, %v610_v37  ;;  %v626_v26 = vsel %vm594_vm1, %v2522_v12, 0.0 }
 0x161   :  { %v1488_v60 = vpop.eup %1487  ;;  %v1112_v24 = vsel %vm1050_vm11, %v720_v27, %v1080_v19  ;;  %1503 = vrcp.f32 %v969_v38  ;;  %v855_v47 = vmul.f32 4.0, %v1486_v16  ;;  %v721_v25 = vmul.f32 4.0, %v689_v33 }
 0x162   :  { %1145 = vst [vmem:[%s2631_s3 + $0xe0] sm:$0xff] %v1112_v24  ;;  %v1065_v21 = vsel %vm1951_vm10, %v839_v49, %v1488_v60  ;;  %1505 = vpow2.f32 %v824_v13  ;;  %v611_v0 = vsel %vm595_vm3, %v2498_v23, 0.0  ;;  %v674_v63 = vadd.f32 %v642_v53, %v2412_v45 }
 0x163   :  { %v1490_v43 = vpop.eup %1489  ;;  %v1097_v51 = vsel %vm1051_vm12, %v705_v54, %v1065_v21  ;;  %v658_v46 = vsel %vm592_vm2, %v591_v59, %v626_v26  ;;  %v643_v23 = vsel %vm593_vm4, %v583_v36, %v611_v0  ;;  %v627_v20 = vsel %vm595_vm3, %v2522_v12, 0.0 }
 0x164   :  { %v1492_v2 = vpop.eup %1491  ;;  %1130 = vst.msk [vmem:[%s2631_s3 + $0x68] sm:$0xff] %vm1117_vm13, %v1097_v51  ;;  %v985_v35 = vadd.f32 1.0, %v1490_v43  ;;  %v690_v30 = vadd.f32 %v658_v46, %v2423_v52  ;;  %v706_v39 = vmul.f32 4.0, %v674_v63  ;;  %v675_v61 = vadd.f32 %v643_v23, %v2438_v58 }
 0x165   :  { %v1494_v42 = vpop.eup %1493  ;;  %v1081_v29 = vsel %vm1951_vm10, %v855_v47, %v1492_v2  ;;  %v659_v18 = vsel %vm593_vm4, %v591_v59, %v627_v20 }
 0x166   :  { %v1113_v11 = vsel %vm1051_vm12, %v721_v25, %v1081_v29  ;;  %1507 = vrcp.f32 %v985_v35  ;;  %v840_v3 = vmul.f32 4.0, %v1494_v42  ;;  %v722_v52 = vmul.f32 4.0, %v690_v30 }
 0x167   :  { %1146 = vst.msk [vmem:[%s2631_s3 + $0xe8] sm:$0xff] %vm1117_vm13, %v1113_v11  ;;  %v707_v6 = vmul.f32 4.0, %v675_v61  ;;  %v691_v48 = vadd.f32 %v659_v18, %v2470_v22 }
 0x168   :  { %v1496_v31 = vpop.eup %1495 }
 0x169   :  { %v1498_v45 = vpop.eup %1497  ;;  %v856_v5 = vmul.f32 4.0, %v1496_v31  ;;  %v723_v28 = vmul.f32 4.0, %v691_v48 }
 0x16a   :  { %v1500_v4 = vpop.eup %1499  ;;  %v1066_v57 = vsel %vm1909_vm9, %v840_v3, %v1498_v45 }
 0x16b   :  { %v1098_v7 = vsel %vm1050_vm11, %v706_v39, %v1066_v57  ;;  %v841_v56 = vmul.f32 4.0, %v1500_v4 }
 0x16c   :  { %v1502_v15 = vpop.eup %1501  ;;  %1131 = vst [vmem:[%s2631_s3 + $0x70] sm:$0xff] %v1098_v7 }
 0x16d   :  { %v1082_v12 = vsel %vm1909_vm9, %v856_v5, %v1502_v15 }
 0x16e   :  { %v1504_v9 = vpop.eup %1503  ;;  %v1114_v58 = vsel %vm1050_vm11, %v722_v52, %v1082_v12 }
 0x16f   :  { %v1506_v32 = vpop.eup %1505  ;;  %1147 = vst [vmem:[%s2631_s3 + $0xf0] sm:$0xff] %v1114_v58  ;;  %v1067_v17 = vsel %vm1951_vm10, %v841_v56, %v1504_v9 }
 0x170   :  { %v1099_v55 = vsel %vm1051_vm12, %v707_v6, %v1067_v17  ;;  %v857_v34 = vmul.f32 4.0, %v1506_v32 }
 0x171   :  { %1132 = vst.msk [vmem:[%s2631_s3 + $0x78] sm:$0xff] %vm1117_vm13, %v1099_v55 }
 0x173   :  { %v1508_v41 = vpop.eup %1507 }
 0x174   :  { %v1083_v8 = vsel %vm1951_vm10, %v857_v34, %v1508_v41 }
 0x175   :  { %v1115_v10 = vsel %vm1051_vm12, %v723_v28, %v1083_v8 }
 0x176   :  { %1148 = vst.msk [vmem:[%s2631_s3 + $0xf8] sm:$0xff] %vm1117_vm13, %v1115_v10 }

// kernel: yolox_forward.18
= control target key start
LH: loop header
LB: loop body
LE: loop exit
PB: predicated region body
PF: predicated region fallthrough
CT: control target
= control target key end

     0   :  { %vm1019_vm0 = vcmask 785408   ;;  %vm1816_vm1 = vcmask 1043456   ;;  %vm1817_vm2 = vcmask 523268   ;;  %s3427_s1 = inlined_call_operand.vmem [shape: bf16[864,192], index: 1, kind: input, shape index: {}]   ;;  %s3428_s0 = inlined_call_operand.vmem [shape: bf16[128,864], index: 0, kind: input, shape index: {}]   ;;  %s3429_s2 = inlined_call_operand.vmem [shape: f32[1,192], index: 2, kind: input, shape index: {}]   ;;  %s3430_s3 = inlined_call_operand.vmem [shape: bf16[128,192], index: 3, kind: output, shape index: {}]  }
   0x1   :  { %v2076_v0 = vld [vmem:[%s3427_s1 + $0x74] ss:$8 sps:$4 sm:$0xff]   ;;  %v2080_v2 = vld [vmem:[%s3427_s1 + $0x70] ss:$8 sps:$4 sm:$0xff]   ;;  %v2082_v4 = vld [vmem:[%s3427_s1 + $0x64] ss:$8 sps:$4 sm:$0xff]  }
   0x2   :  { %v2078_v1 = vld [vmem:[%s3427_s1 + $0x174] ss:$8 sps:$4 sm:$0xff]   ;;  %1044 = vmatprep.subr.bf16.mxu0 %v2076_v0  ;;  %v2081_v3 = vld [vmem:[%s3427_s1 + $0x170] ss:$8 sps:$4 sm:$0xff]   ;;  %v2084_v5 = vld [vmem:[%s3427_s1 + $0x164] ss:$8 sps:$4 sm:$0xff]  }
   0x3   :  { %1157 = vmatprep.subr.bf16.mxu1 %v2078_v1  ;;  %1045 = vmatpush1.bf16.msra.mxu0 %v2080_v2  ;;  %v2086_v6 = vld [vmem:[%s3427_s1 + $0x60] ss:$8 sps:$4 sm:$0xff]   ;;  %v2088_v8 = vld [vmem:[%s3427_s1 + $0x54] ss:$8 sps:$4 sm:$0xff]   ;;  %v2092_v10 = vld [vmem:[%s3427_s1 + $0x50] ss:$8 sps:$4 sm:$0xff]  }
   0x4   :  { %1158 = vmatpush1.bf16.msra.mxu1 %v2081_v3  ;;  %1046 = vmatprep.subr.bf16.mxu0 %v2082_v4  ;;  %v2087_v7 = vld [vmem:[%s3427_s1 + $0x160] ss:$8 sps:$4 sm:$0xff]   ;;  %v2090_v9 = vld [vmem:[%s3427_s1 + $0x154] ss:$8 sps:$4 sm:$0xff]   ;;  %v2093_v11 = vld [vmem:[%s3427_s1 + $0x150] ss:$8 sps:$4 sm:$0xff]  }
   0x5   :  { %1159 = vmatprep.subr.bf16.mxu1 %v2084_v5  ;;  %v2094_v12 = vld [vmem:[%s3427_s1 + $0x44] ss:$8 sps:$4 sm:$0xff]   ;;  %v2098_v14 = vld [vmem:[%s3427_s1 + $0x40] ss:$8 sps:$4 sm:$0xff]   ;;  %v2100_v16 = vld [vmem:[%s3427_s1 + $0x34] ss:$8 sps:$4 sm:$0xff]  }
   0x6   :  { %v2096_v13 = vld [vmem:[%s3427_s1 + $0x144] ss:$8 sps:$4 sm:$0xff]   ;;  %v2099_v15 = vld [vmem:[%s3427_s1 + $0x140] ss:$8 sps:$4 sm:$0xff]   ;;  %v2102_v17 = vld [vmem:[%s3427_s1 + $0x134] ss:$8 sps:$4 sm:$0xff]  }
   0x7   :  { %1047 = vmatpush1.bf16.msra.mxu0 %v2086_v6  ;;  %v2104_v18 = vld [vmem:[%s3427_s1 + $0x30] ss:$8 sps:$4 sm:$0xff]   ;;  %v2106_v20 = vld [vmem:[%s3427_s1 + $0x24] ss:$8 sps:$4 sm:$0xff]   ;;  %v2110_v22 = vld [vmem:[%s3427_s1 + $0x20] ss:$8 sps:$4 sm:$0xff]  }
   0x8   :  { %1160 = vmatpush1.bf16.msra.mxu1 %v2087_v7  ;;  %1048 = vmatprep.subr.bf16.mxu0 %v2088_v8  ;;  %v2105_v19 = vld [vmem:[%s3427_s1 + $0x130] ss:$8 sps:$4 sm:$0xff]   ;;  %v2108_v21 = vld [vmem:[%s3427_s1 + $0x124] ss:$8 sps:$4 sm:$0xff]   ;;  %v2111_v23 = vld [vmem:[%s3427_s1 + $0x120] ss:$8 sps:$4 sm:$0xff]  }
   0x9   :  { %1161 = vmatprep.subr.bf16.mxu1 %v2090_v9  ;;  %v2112_v24 = vld [vmem:[%s3427_s1 + $0x14] ss:$8 sps:$4 sm:$0xff]   ;;  %v2116_v26 = vld [vmem:[%s3427_s1 + $0x10] ss:$8 sps:$4 sm:$0xff]   ;;  %v2118_v28 = vld [vmem:[%s3427_s1 + $0x4] ss:$8 sps:$4 sm:$0xff]  }
   0xa   :  { %v2114_v25 = vld [vmem:[%s3427_s1 + $0x114] ss:$8 sps:$4 sm:$0xff]   ;;  %v2117_v27 = vld [vmem:[%s3427_s1 + $0x110] ss:$8 sps:$4 sm:$0xff]   ;;  %v2120_v29 = vld [vmem:[%s3427_s1 + $0x104] ss:$8 sps:$4 sm:$0xff]  }
   0xb   :  { %1049 = vmatpush1.bf16.msra.mxu0 %v2092_v10  ;;  %v2122_v30 = vld [vmem:[%s3427_s1] ss:$8 sps:$4 sm:$0xff]   ;;  %v2124_v32 = vld [vmem:[%s3427_s1 + $0xf4] ss:$8 sps:$4 sm:$0xff]   ;;  %v2128_v34 = vld [vmem:[%s3427_s1 + $0xf0] ss:$8 sps:$4 sm:$0xff]  }
   0xc   :  { %1162 = vmatpush1.bf16.msra.mxu1 %v2093_v11  ;;  %1050 = vmatprep.subr.bf16.mxu0 %v2094_v12  ;;  %v2123_v31 = vld [vmem:[%s3427_s1 + $0x100] ss:$8 sps:$4 sm:$0xff]   ;;  %v2126_v33 = vld [vmem:[%s3427_s1 + $0x1f4] ss:$8 sps:$4 sm:$0xff]   ;;  %v2129_v35 = vld [vmem:[%s3427_s1 + $0x1f0] ss:$8 sps:$4 sm:$0xff]  }
   0xd   :  { %1163 = vmatprep.subr.bf16.mxu1 %v2096_v13  ;;  %v2130_v36 = vld [vmem:[%s3427_s1 + $0xe4] ss:$8 sps:$4 sm:$0xff]   ;;  %v2134_v38 = vld [vmem:[%s3427_s1 + $0xe0] ss:$8 sps:$4 sm:$0xff]   ;;  %v2136_v40 = vld [vmem:[%s3427_s1 + $0xd4] ss:$8 sps:$4 sm:$0xff]  }
   0xe   :  { %v2132_v37 = vld [vmem:[%s3427_s1 + $0x1e4] ss:$8 sps:$4 sm:$0xff]   ;;  %v2135_v39 = vld [vmem:[%s3427_s1 + $0x1e0] ss:$8 sps:$4 sm:$0xff]   ;;  %v2138_v41 = vld [vmem:[%s3427_s1 + $0x1d4] ss:$8 sps:$4 sm:$0xff]  }
   0xf   :  { %1051 = vmatpush1.bf16.msra.mxu0 %v2098_v14  ;;  %v2140_v42 = vld [vmem:[%s3427_s1 + $0xd0] ss:$8 sps:$4 sm:$0xff]   ;;  %v2142_v44 = vld [vmem:[%s3427_s1 + $0xc4] ss:$8 sps:$4 sm:$0xff]   ;;  %v2146_v46 = vld [vmem:[%s3427_s1 + $0xc0] ss:$8 sps:$4 sm:$0xff]  }
  0x10   :  { %1164 = vmatpush1.bf16.msra.mxu1 %v2099_v15  ;;  %1052 = vmatprep.subr.bf16.mxu0 %v2100_v16  ;;  %v2141_v43 = vld [vmem:[%s3427_s1 + $0x1d0] ss:$8 sps:$4 sm:$0xff]   ;;  %v2144_v45 = vld [vmem:[%s3427_s1 + $0x1c4] ss:$8 sps:$4 sm:$0xff]   ;;  %v2147_v47 = vld [vmem:[%s3427_s1 + $0x1c0] ss:$8 sps:$4 sm:$0xff]  }
  0x11   :  { %1165 = vmatprep.subr.bf16.mxu1 %v2102_v17  ;;  %v2148_v48 = vld [vmem:[%s3427_s1 + $0xb4] ss:$8 sps:$4 sm:$0xff]   ;;  %v2174_v49 = vld [vmem:[%s3428_s0 + $0x4] ss:$28 sps:$4 sm:$0xff]   ;;  %v2177_v51 = vld [vmem:[%s3428_s0 + $0xc] ss:$28 sps:$4 sm:$0xff]  }
  0x12   :  { %v2150_v50 = vld [vmem:[%s3427_s1 + $0x1b4] ss:$8 sps:$4 sm:$0xff]   ;;  %1076 = vmatprep.mubr.bf16.mxu0 %v2174_v49  ;;  %v2152_v52 = vld [vmem:[%s3427_s1 + $0xb0] ss:$8 sps:$4 sm:$0xff]   ;;  %1189 = vmatprep.mubr.bf16.mxu1 %v2177_v51  ;;  %v2154_v54 = vld [vmem:[%s3427_s1 + $0xa4] ss:$8 sps:$4 sm:$0xff]  }
  0x13   :  { %1053 = vmatpush1.bf16.msra.mxu0 %v2104_v18  ;;  %v2153_v53 = vld [vmem:[%s3427_s1 + $0x1b0] ss:$8 sps:$4 sm:$0xff]   ;;  %v2156_v55 = vld [vmem:[%s3427_s1 + $0x1a4] ss:$8 sps:$4 sm:$0xff]   ;;  %v2158_v56 = vld [vmem:[%s3427_s1 + $0xa0] ss:$8 sps:$4 sm:$0xff]  }
  0x14   :  { %1166 = vmatpush1.bf16.msra.mxu1 %v2105_v19  ;;  %1054 = vmatprep.subr.bf16.mxu0 %v2106_v20  ;;  %v2159_v57 = vld [vmem:[%s3427_s1 + $0x1a0] ss:$8 sps:$4 sm:$0xff]   ;;  %v2160_v58 = vld [vmem:[%s3427_s1 + $0x94] ss:$8 sps:$4 sm:$0xff]   ;;  %v2164_v60 = vld [vmem:[%s3427_s1 + $0x90] ss:$8 sps:$4 sm:$0xff]  }
  0x15   :  { %1167 = vmatprep.subr.bf16.mxu1 %v2108_v21  ;;  %v2162_v59 = vld [vmem:[%s3427_s1 + $0x194] ss:$8 sps:$4 sm:$0xff]   ;;  %v2165_v61 = vld [vmem:[%s3427_s1 + $0x190] ss:$8 sps:$4 sm:$0xff]   ;;  %v2166_v62 = vld [vmem:[%s3427_s1 + $0x84] ss:$8 sps:$4 sm:$0xff]  }
  0x16   :  { %v2168_v63 = vld [vmem:[%s3427_s1 + $0x184] ss:$8 sps:$4 sm:$0xff]   ;;  %v2170_v0 = vld [vmem:[%s3427_s1 + $0x80] ss:$8 sps:$4 sm:$0xff]   ;;  %v2180_v2 = vld [vmem:[%s3427_s1 + $0x274] ss:$8 sps:$4 sm:$0xff]  }
  0x17   :  { %1055 = vmatpush1.bf16.msra.mxu0 %v2110_v22  ;;  %v2171_v1 = vld [vmem:[%s3427_s1 + $0x180] ss:$8 sps:$4 sm:$0xff]   ;;  %v2183_v3 = vld [vmem:[%s3427_s1 + $0x354] ss:$8 sps:$4 sm:$0xff]   ;;  %v2178_v6 = vld [vmem:[%s3427_s1 + $0x270] ss:$8 sps:$4 sm:$0xff]  }
  0x18   :  { %1168 = vmatpush1.bf16.msra.mxu1 %v2111_v23  ;;  %1056 = vmatprep.subr.bf16.mxu0 %v2112_v24  ;;  %v2172_v4 = vld [vmem:[%s3428_s0] ss:$28 sps:$4 sm:$0xff]   ;;  %v2175_v5 = vld [vmem:[%s3428_s0 + $0x8] ss:$28 sps:$4 sm:$0xff]   ;;  %v2181_v7 = vld [vmem:[%s3427_s1 + $0x350] ss:$8 sps:$4 sm:$0xff]  }
  0x19   :  { %1169 = vmatprep.subr.bf16.mxu1 %v2114_v25  ;;  %v2186_v8 = vld [vmem:[%s3427_s1 + $0x264] ss:$8 sps:$4 sm:$0xff]   ;;  %v2187_v9 = vld [vmem:[%s3428_s0 + $0x3c] ss:$28 sps:$4 sm:$0xff]   ;;  %v2184_v12 = vld [vmem:[%s3427_s1 + $0x260] ss:$8 sps:$4 sm:$0xff]  }
  0x1a   :  { %v2189_v10 = vld [vmem:[%s3428_s0 + $0x44] ss:$28 sps:$4 sm:$0xff]   ;;  %v2195_v13 = vld [vmem:[%s3427_s1 + $0x254] ss:$8 sps:$4 sm:$0xff]   ;;  %v2193_v18 = vld [vmem:[%s3427_s1 + $0x250] ss:$8 sps:$4 sm:$0xff]  }
  0x1b   :  { %1057 = vmatpush1.bf16.msra.mxu0 %v2116_v26  ;;  %v2201_v11 = vld [vmem:[%s3427_s1 + $0x344] ss:$8 sps:$4 sm:$0xff]   ;;  %v2199_v14 = vld [vmem:[%s3427_s1 + $0x340] ss:$8 sps:$4 sm:$0xff]   ;;  %v2225_v15 = vld [vmem:[%s3427_s1 + $0x334] ss:$8 sps:$4 sm:$0xff]  }
  0x1c   :  { %1170 = vmatpush1.bf16.msra.mxu1 %v2117_v27  ;;  %1058 = vmatprep.subr.bf16.mxu0 %v2118_v28  ;;  %v2191_v16 = vld [vmem:[%s3428_s0 + $0x38] ss:$28 sps:$4 sm:$0xff]   ;;  %v2192_v17 = vld [vmem:[%s3428_s0 + $0x40] ss:$28 sps:$4 sm:$0xff]   ;;  %v2198_v19 = vld [vmem:[%s3427_s1 + $0x244] ss:$8 sps:$4 sm:$0xff]  }
  0x1d   :  { %1171 = vmatprep.subr.bf16.mxu1 %v2120_v29  ;;  %v2202_v20 = vld [vmem:[%s3428_s0 + $0x74] ss:$28 sps:$4 sm:$0xff]   ;;  %v2204_v21 = vld [vmem:[%s3428_s0 + $0x7c] ss:$28 sps:$4 sm:$0xff]   ;;  %v2240_v23 = vld [vmem:[%s3427_s1 + $0x324] ss:$8 sps:$4 sm:$0xff]  }
  0x1e   :  { %v2223_v22 = vld [vmem:[%s3427_s1 + $0x330] ss:$8 sps:$4 sm:$0xff]   ;;  %v2196_v24 = vld [vmem:[%s3427_s1 + $0x240] ss:$8 sps:$4 sm:$0xff]   ;;  %v2210_v26 = vld [vmem:[%s3427_s1 + $0x234] ss:$8 sps:$4 sm:$0xff]  }
  0x1f   :  { %1059 = vmatpush1.bf16.msra.mxu0 %v2122_v30  ;;  %v2206_v25 = vld [vmem:[%s3428_s0 + $0x70] ss:$28 sps:$4 sm:$0xff]   ;;  %v2207_v27 = vld [vmem:[%s3428_s0 + $0x78] ss:$28 sps:$4 sm:$0xff]   ;;  %v2238_v28 = vld [vmem:[%s3427_s1 + $0x320] ss:$8 sps:$4 sm:$0xff]  }
  0x20   :  { %1172 = vmatpush1.bf16.msra.mxu1 %v2123_v31  ;;  %1060 = vmatprep.subr.bf16.mxu0 %v2124_v32  ;;  %v2208_v29 = vld [vmem:[%s3427_s1 + $0x230] ss:$8 sps:$4 sm:$0xff]   ;;  %v2213_v30 = vld [vmem:[%s3427_s1 + $0x224] ss:$8 sps:$4 sm:$0xff]   ;;  %vm3252_vm3 = vmor %vm1817_vm2, %vm1816_vm1 }
  0x21   :  { %1173 = vmatprep.subr.bf16.mxu1 %v2126_v33  ;;  %v2214_v31 = vld [vmem:[%s3428_s0 + $0xac] ss:$28 sps:$4 sm:$0xff]   ;;  %v2216_v32 = vld [vmem:[%s3428_s0 + $0xb4] ss:$28 sps:$4 sm:$0xff]   ;;  %v2244_v51 = vld [vmem:[%s3428_s0 + $0x11c] ss:$28 sps:$4 sm:$0xff]  }
  0x22   :  { %v2258_v33 = vld [vmem:[%s3427_s1 + $0x314] ss:$8 sps:$4 sm:$0xff]   ;;  %v2235_v49 = vld [vmem:[%s3427_s1 + $0x2f0] ss:$8 sps:$4 sm:$0xff]  }
  0x23   :  { %1061 = vmatpush2.bf16.msra.mxu0 %v2128_v34  ;;  %v2256_v34 = vld [vmem:[%s3427_s1 + $0x310] ss:$8 sps:$4 sm:$0xff]  }
  0x24   :  { %1174 = vmatpush2.bf16.msra.mxu1 %v2129_v35  ;;  %1062 = vmatprep.subr.bf16.mxu0 %v2130_v36  ;;  %v2211_v35 = vld [vmem:[%s3427_s1 + $0x220] ss:$8 sps:$4 sm:$0xff]   ;;  %v2222_v36 = vld [vmem:[%s3427_s1 + $0x214] ss:$8 sps:$4 sm:$0xff]  }
  0x25   :  { %1175 = vmatprep.subr.bf16.mxu1 %v2132_v37  ;;  %v2218_v37 = vld [vmem:[%s3428_s0 + $0xa8] ss:$28 sps:$4 sm:$0xff]  }
  0x27   :  { %1063 = vmatpush2.bf16.msra.mxu0 %v2134_v38  ;;  %v2219_v38 = vld [vmem:[%s3428_s0 + $0xb0] ss:$28 sps:$4 sm:$0xff]  }
  0x28   :  { %1176 = vmatpush2.bf16.msra.mxu1 %v2135_v39  ;;  %1064 = vmatprep.subr.bf16.mxu0 %v2136_v40  ;;  %v2220_v39 = vld [vmem:[%s3427_s1 + $0x210] ss:$8 sps:$4 sm:$0xff]   ;;  %v2228_v40 = vld [vmem:[%s3427_s1 + $0x204] ss:$8 sps:$4 sm:$0xff]  }
  0x29   :  { %1177 = vmatprep.subr.bf16.mxu1 %v2138_v41  ;;  %v2229_v41 = vld [vmem:[%s3428_s0 + $0xe4] ss:$28 sps:$4 sm:$0xff]  }
  0x2b   :  { %1065 = vmatpush2.bf16.msra.mxu0 %v2140_v42  ;;  %v2231_v42 = vld [vmem:[%s3428_s0 + $0xec] ss:$28 sps:$4 sm:$0xff]  }
  0x2c   :  { %1178 = vmatpush2.bf16.msra.mxu1 %v2141_v43  ;;  %1066 = vmatprep.subr.bf16.mxu0 %v2142_v44  ;;  %v2280_v43 = vld [vmem:[%s3427_s1 + $0x300] ss:$8 sps:$4 sm:$0xff]   ;;  %v2282_v44 = vld [vmem:[%s3427_s1 + $0x304] ss:$8 sps:$4 sm:$0xff]  }
  0x2d   :  { %1179 = vmatprep.subr.bf16.mxu1 %v2144_v45  ;;  %v2226_v45 = vld [vmem:[%s3427_s1 + $0x200] ss:$8 sps:$4 sm:$0xff]  }
  0x2f   :  { %1067 = vmatpush2.bf16.msra.mxu0 %v2146_v46  ;;  %v2237_v46 = vld [vmem:[%s3427_s1 + $0x2f4] ss:$8 sps:$4 sm:$0xff]  }
  0x30   :  { %1180 = vmatpush2.bf16.msra.mxu1 %v2147_v47  ;;  %1068 = vmatprep.subr.bf16.mxu0 %v2148_v48  ;;  %v2233_v47 = vld [vmem:[%s3428_s0 + $0xe0] ss:$28 sps:$4 sm:$0xff]   ;;  %v2234_v48 = vld [vmem:[%s3428_s0 + $0xe8] ss:$28 sps:$4 sm:$0xff]  }
  0x31   :  { %1181 = vmatprep.subr.bf16.mxu1 %v2150_v50  ;;  %v2243_v50 = vld [vmem:[%s3427_s1 + $0x2e4] ss:$8 sps:$4 sm:$0xff]  }
  0x33   :  { %1069 = vmatpush2.bf16.msra.mxu0 %v2152_v52  ;;  %v2246_v52 = vld [vmem:[%s3428_s0 + $0x124] ss:$28 sps:$4 sm:$0xff]  }
  0x34   :  { %1182 = vmatpush2.bf16.msra.mxu1 %v2153_v53  ;;  %1070 = vmatprep.subr.bf16.mxu0 %v2154_v54  ;;  %v2241_v53 = vld [vmem:[%s3427_s1 + $0x2e0] ss:$8 sps:$4 sm:$0xff]   ;;  %v2248_v54 = vld [vmem:[%s3428_s0 + $0x118] ss:$28 sps:$4 sm:$0xff]  }
  0x35   :  { %1183 = vmatprep.subr.bf16.mxu1 %v2156_v55  ;;  %v2252_v55 = vld [vmem:[%s3427_s1 + $0x2d4] ss:$8 sps:$4 sm:$0xff]  }
  0x37   :  { %1071 = vmatpush2.bf16.msra.mxu0 %v2158_v56  ;;  %v2249_v56 = vld [vmem:[%s3428_s0 + $0x120] ss:$28 sps:$4 sm:$0xff]  }
  0x38   :  { %1184 = vmatpush2.bf16.msra.mxu1 %v2159_v57  ;;  %1072 = vmatprep.subr.bf16.mxu0 %v2160_v58  ;;  %v2250_v57 = vld [vmem:[%s3427_s1 + $0x2d0] ss:$8 sps:$4 sm:$0xff]   ;;  %v2255_v58 = vld [vmem:[%s3427_s1 + $0x2c4] ss:$8 sps:$4 sm:$0xff]  }
  0x39   :  { %1185 = vmatprep.subr.bf16.mxu1 %v2162_v59  ;;  %v2259_v59 = vld [vmem:[%s3428_s0 + $0x154] ss:$28 sps:$4 sm:$0xff]  }
  0x3b   :  { %1073 = vmatpush2.bf16.msra.mxu0 %v2164_v60  ;;  %v2261_v60 = vld [vmem:[%s3428_s0 + $0x15c] ss:$28 sps:$4 sm:$0xff]  }
  0x3c   :  { %1186 = vmatpush2.bf16.msra.mxu1 %v2165_v61  ;;  %1074 = vmatprep.subr.bf16.mxu0 %v2166_v62  ;;  %v2253_v61 = vld [vmem:[%s3427_s1 + $0x2c0] ss:$8 sps:$4 sm:$0xff]   ;;  %v2267_v62 = vld [vmem:[%s3427_s1 + $0x2b4] ss:$8 sps:$4 sm:$0xff]  }
  0x3d   :  { %1187 = vmatprep.subr.bf16.mxu1 %v2168_v63  ;;  %v2263_v63 = vld [vmem:[%s3428_s0 + $0x150] ss:$28 sps:$4 sm:$0xff]  }
  0x3f   :  { %1075 = vmatpush2.bf16.msra.mxu0 %v2170_v0  ;;  %v2264_v0 = vld [vmem:[%s3428_s0 + $0x158] ss:$28 sps:$4 sm:$0xff]  }
  0x40   :  { %1188 = vmatpush2.bf16.msra.mxu1 %v2171_v1  ;;  %1270 = vmatprep.subr.bf16.mxu0 %v2180_v2  ;;  %v2265_v1 = vld [vmem:[%s3427_s1 + $0x2b0] ss:$8 sps:$4 sm:$0xff]   ;;  %v2271_v2 = vld [vmem:[%s3428_s0 + $0x18c] ss:$28 sps:$4 sm:$0xff]  }
  0x41   :  { %1387 = vmatprep.subr.bf16.mxu1 %v2183_v3  ;;  %v2270_v3 = vld [vmem:[%s3427_s1 + $0x2a4] ss:$8 sps:$4 sm:$0xff]  }
  0x42   :  { %1077 = vmatmul.mubr.bf16.vlgmr.msra.gmra.mxu0 %v2172_v4  ;;  %v2273_v4 = vld [vmem:[%s3428_s0 + $0x194] ss:$28 sps:$4 sm:$0xff]  }
  0x43   :  { %1190 = vmatmul.mubr.bf16.vlgmr.msra.gmra.mxu1 %v2175_v5  ;;  %1271 = vmatpush1.bf16.msra.mxu0 %v2178_v6  ;;  %v2268_v5 = vld [vmem:[%s3427_s1 + $0x2a0] ss:$8 sps:$4 sm:$0xff]   ;;  %v2279_v6 = vld [vmem:[%s3427_s1 + $0x294] ss:$8 sps:$4 sm:$0xff]  }
  0x44   :  { %1388 = vmatpush1.bf16.msra.mxu1 %v2181_v7  ;;  %1272 = vmatprep.subr.bf16.mxu0 %v2186_v8  ;;  %v2275_v7 = vld [vmem:[%s3428_s0 + $0x188] ss:$28 sps:$4 sm:$0xff]   ;;  %v2276_v8 = vld [vmem:[%s3428_s0 + $0x190] ss:$28 sps:$4 sm:$0xff]  }
  0x45   :  { %1086 = vmatprep.mubr.bf16.mxu0 %v2187_v9  ;;  %1199 = vmatprep.mubr.bf16.mxu1 %v2189_v10  ;;  %v2277_v9 = vld [vmem:[%s3427_s1 + $0x290] ss:$8 sps:$4 sm:$0xff]  }
  0x46   :  { %1389 = vmatprep.subr.bf16.mxu1 %v2201_v11  ;;  %v2288_v10 = vld [vmem:[%s3428_s0 + $0x14] ss:$28 sps:$4 sm:$0xff]   ;;  %v2285_v11 = vld [vmem:[%s3427_s1 + $0x284] ss:$8 sps:$4 sm:$0xff]  }
  0x47   :  { %1273 = vmatpush1.bf16.msra.mxu0 %v2184_v12  ;;  %v2283_v12 = vld [vmem:[%s3427_s1 + $0x280] ss:$8 sps:$4 sm:$0xff]  }
  0x48   :  { %1390 = vmatpush1.bf16.msra.mxu1 %v2199_v14  ;;  %1274 = vmatprep.subr.bf16.mxu0 %v2195_v13  ;;  %v2446_v13 = vmov 0   ;;  %v2286_v14 = vld [vmem:[%s3428_s0 + $0x10] ss:$28 sps:$4 sm:$0xff]  }
  0x49   :  { %1391 = vmatprep.subr.bf16.mxu1 %v2225_v15  ;;  %v2289_v15 = vld [vmem:[%s3428_s0 + $0x18] ss:$28 sps:$4 sm:$0xff]  }
  0x4a   :  { %1087 = vmatmul.mubr.bf16.gmra.mxu0 %v2191_v16  ;;  %v2290_v16 = vld [vmem:[%s3428_s0 + $0x4c] ss:$28 sps:$4 sm:$0xff]  }
  0x4b   :  { %1200 = vmatmul.mubr.bf16.gmra.mxu1 %v2192_v17  ;;  %1275 = vmatpush1.bf16.msra.mxu0 %v2193_v18  ;;  %v2292_v17 = vld [vmem:[%s3428_s0 + $0x48] ss:$28 sps:$4 sm:$0xff]   ;;  %v2293_v18 = vld [vmem:[%s3428_s0 + $0x50] ss:$28 sps:$4 sm:$0xff]  }
  0x4c   :  { %1096 = vmatprep.mubr.bf16.mxu0 %v2202_v20  ;;  %1276 = vmatprep.subr.bf16.mxu0 %v2198_v19  ;;  %v2294_v19 = vld [vmem:[%s3428_s0 + $0x84] ss:$28 sps:$4 sm:$0xff]  }
  0x4d   :  { %1209 = vmatprep.mubr.bf16.mxu1 %v2204_v21  ;;  %1392 = vmatpush1.bf16.msra.mxu1 %v2223_v22  ;;  %v2296_v20 = vld [vmem:[%s3428_s0 + $0x80] ss:$28 sps:$4 sm:$0xff]   ;;  %v2297_v21 = vld [vmem:[%s3428_s0 + $0x88] ss:$28 sps:$4 sm:$0xff]  }
  0x4e   :  { %1393 = vmatprep.subr.bf16.mxu1 %v2240_v23  ;;  %v2298_v22 = vld [vmem:[%s3428_s0 + $0xbc] ss:$28 sps:$4 sm:$0xff]  }
  0x4f   :  { %1277 = vmatpush1.bf16.msra.mxu0 %v2196_v24  ;;  %v2300_v23 = vld [vmem:[%s3428_s0 + $0xb8] ss:$28 sps:$4 sm:$0xff]   ;;  %v2301_v24 = vld [vmem:[%s3428_s0 + $0xc0] ss:$28 sps:$4 sm:$0xff]  }
  0x50   :  { %1278 = vmatprep.subr.bf16.mxu0 %v2210_v26  ;;  %v2304_v26 = vld [vmem:[%s3428_s0 + $0xf0] ss:$28 sps:$4 sm:$0xff]  }
  0x51   :  { %1394 = vmatpush1.bf16.msra.mxu1 %v2238_v28  ;;  %v2306_v28 = vld [vmem:[%s3428_s0 + $0x12c] ss:$28 sps:$4 sm:$0xff]  }
  0x52   :  { %1097 = vmatmul.mubr.bf16.gmra.mxu0 %v2206_v25  ;;  %1395 = vmatprep.subr.bf16.mxu1 %v2258_v33  ;;  %v2302_v25 = vld [vmem:[%s3428_s0 + $0xf4] ss:$28 sps:$4 sm:$0xff]   ;;  %v2313_v33 = vld [vmem:[%s3428_s0 + $0x168] ss:$28 sps:$4 sm:$0xff]  }
  0x53   :  { %1210 = vmatmul.mubr.bf16.gmra.mxu1 %v2207_v27  ;;  %1279 = vmatpush1.bf16.msra.mxu0 %v2208_v29  ;;  %v2305_v27 = vld [vmem:[%s3428_s0 + $0xf8] ss:$28 sps:$4 sm:$0xff]   ;;  %v2308_v29 = vld [vmem:[%s3428_s0 + $0x128] ss:$28 sps:$4 sm:$0xff]  }
  0x54   :  { %1106 = vmatprep.mubr.bf16.mxu0 %v2214_v31  ;;  %1280 = vmatprep.subr.bf16.mxu0 %v2213_v30  ;;  %v2309_v30 = vld [vmem:[%s3428_s0 + $0x130] ss:$28 sps:$4 sm:$0xff]   ;;  %v2310_v31 = vld [vmem:[%s3428_s0 + $0x164] ss:$28 sps:$4 sm:$0xff]  }
  0x55   :  { %1219 = vmatprep.mubr.bf16.mxu1 %v2216_v32  ;;  %1396 = vmatpush1.bf16.msra.mxu1 %v2256_v34  ;;  %v2312_v32 = vld [vmem:[%s3428_s0 + $0x160] ss:$28 sps:$4 sm:$0xff]  }
  0x56   :  { %1397 = vmatprep.subr.bf16.mxu1 %v2282_v44  ;;  %v2314_v34 = vld [vmem:[%s3428_s0 + $0x19c] ss:$28 sps:$4 sm:$0xff]  }
  0x57   :  { %1281 = vmatpush1.bf16.msra.mxu0 %v2211_v35  ;;  %v2316_v35 = vld [vmem:[%s3428_s0 + $0x198] ss:$28 sps:$4 sm:$0xff]  }
  0x58   :  { %1282 = vmatprep.subr.bf16.mxu0 %v2222_v36  ;;  %v2317_v36 = vld [vmem:[%s3428_s0 + $0x1a0] ss:$28 sps:$4 sm:$0xff]  }
  0x59   :  { %1398 = vmatpush1.bf16.msra.mxu1 %v2280_v43 }
  0x5a   :  { %1107 = vmatmul.mubr.bf16.gmra.mxu0 %v2218_v37 }
  0x5b   :  { %1220 = vmatmul.mubr.bf16.gmra.mxu1 %v2219_v38  ;;  %1283 = vmatpush1.bf16.msra.mxu0 %v2220_v39 }
  0x5c   :  { %1116 = vmatprep.mubr.bf16.mxu0 %v2229_v41  ;;  %1284 = vmatprep.subr.bf16.mxu0 %v2228_v40 }
  0x5d   :  { %1229 = vmatprep.mubr.bf16.mxu1 %v2231_v42 }
  0x5f   :  { %1285 = vmatpush1.bf16.msra.mxu0 %v2226_v45 }
  0x60   :  { %1286 = vmatprep.subr.bf16.mxu0 %v2237_v46 }
  0x62   :  { %1117 = vmatmul.mubr.bf16.gmra.mxu0 %v2233_v47 }
  0x63   :  { %1230 = vmatmul.mubr.bf16.gmra.mxu1 %v2234_v48  ;;  %1287 = vmatpush2.bf16.msra.mxu0 %v2235_v49 }
  0x64   :  { %1126 = vmatprep.mubr.bf16.mxu0 %v2244_v51  ;;  %1288 = vmatprep.subr.bf16.mxu0 %v2243_v50 }
  0x65   :  { %1239 = vmatprep.mubr.bf16.mxu1 %v2246_v52 }
  0x67   :  { %1289 = vmatpush2.bf16.msra.mxu0 %v2241_v53 }
  0x68   :  { %1290 = vmatprep.subr.bf16.mxu0 %v2252_v55 }
  0x6a   :  { %1127 = vmatmul.mubr.bf16.gmra.mxu0 %v2248_v54 }
  0x6b   :  { %1240 = vmatmul.mubr.bf16.gmra.mxu1 %v2249_v56  ;;  %1291 = vmatpush2.bf16.msra.mxu0 %v2250_v57  ;;  %v189_v57 = vlaneseq }
  0x6c   :  { %1136 = vmatprep.mubr.bf16.mxu0 %v2259_v59  ;;  %1292 = vmatprep.subr.bf16.mxu0 %v2255_v58 }
  0x6d   :  { %1249 = vmatprep.mubr.bf16.mxu1 %v2261_v60 }
  0x6f   :  { %1293 = vmatpush2.bf16.msra.mxu0 %v2253_v61 }
  0x70   :  { %1294 = vmatprep.subr.bf16.mxu0 %v2267_v62  ;;  %v190_v62 = vshrl.u32 %v189_v57, 7 }
  0x72   :  { %1137 = vmatmul.mubr.bf16.gmra.mxu0 %v2263_v63 }
  0x73   :  { %1250 = vmatmul.mubr.bf16.gmra.mxu1 %v2264_v0  ;;  %1295 = vmatpush2.bf16.msra.mxu0 %v2265_v1 }
  0x74   :  { %1146 = vmatprep.mubr.bf16.mxu0 %v2271_v2  ;;  %1296 = vmatprep.subr.bf16.mxu0 %v2270_v3  ;;  %v191_v3 = vsub.s32 0, %v190_v62 }
  0x75   :  { %1259 = vmatprep.mubr.bf16.mxu1 %v2273_v4  ;;  %v187_v4 = vld [vmem:[%s3429_s2] sm:$0x3] }
  0x77   :  { %1297 = vmatpush2.bf16.msra.mxu0 %v2268_v5 }
  0x78   :  { %1298 = vmatprep.subr.bf16.mxu0 %v2279_v6 }
  0x7a   :  { %1147 = vmatmul.mubr.bf16.gmra.mxu0 %v2275_v7 }
  0x7b   :  { %1260 = vmatmul.mubr.bf16.gmra.mxu1 %v2276_v8  ;;  %1299 = vmatpush2.bf16.msra.mxu0 %v2277_v9  ;;  %v3034_v9 = vrot.slane %v187_v4, %v191_v3 }
  0x7c   :  { %1302 = vmatprep.mubr.bf16.mxu0 %v2288_v10  ;;  %1300 = vmatprep.subr.bf16.mxu0 %v2285_v11 }
  0x7d   :  { %1415 = vmatprep.mubr.bf16.mxu1 %v2446_v13 }
  0x7f   :  { %1301 = vmatpush2.bf16.msra.mxu0 %v2283_v12 }
  0x82   :  { %1303 = vmatmul.mubr.bf16.vlgmr.msra.gmra.mxu0 %v2286_v14 }
  0x83   :  { %2003 = vmatmul.mubr.msk.bf16.vlgmr.msra.gmra.mxu1 %vm1019_vm0, %v2289_v15  ;;  %1312 = vmatprep.mubr.bf16.mxu0 %v2290_v16 }
  0x84   :  { %1425 = vmatprep.mubr.bf16.mxu1 %v2446_v13 }
  0x8a   :  { %1313 = vmatmul.mubr.bf16.gmra.mxu0 %v2292_v17 }
  0x8b   :  { %2004 = vmatmul.mubr.msk.bf16.gmra.mxu1 %vm1019_vm0, %v2293_v18  ;;  %1322 = vmatprep.mubr.bf16.mxu0 %v2294_v19 }
  0x8c   :  { %1435 = vmatprep.mubr.bf16.mxu1 %v2446_v13 }
  0x92   :  { %1323 = vmatmul.mubr.bf16.gmra.mxu0 %v2296_v20 }
  0x93   :  { %2005 = vmatmul.mubr.msk.bf16.gmra.mxu1 %vm1019_vm0, %v2297_v21  ;;  %1332 = vmatprep.mubr.bf16.mxu0 %v2298_v22 }
  0x94   :  { %1445 = vmatprep.mubr.bf16.mxu1 %v2446_v13 }
  0x9a   :  { %1333 = vmatmul.mubr.bf16.gmra.mxu0 %v2300_v23 }
  0x9b   :  { %2006 = vmatmul.mubr.msk.bf16.gmra.mxu1 %vm1019_vm0, %v2301_v24  ;;  %1342 = vmatprep.mubr.bf16.mxu0 %v2302_v25 }
  0x9c   :  { %1455 = vmatprep.mubr.bf16.mxu1 %v2446_v13 }
  0xa2   :  { %1343 = vmatmul.mubr.bf16.gmra.mxu0 %v2304_v26 }
  0xa3   :  { %2007 = vmatmul.mubr.msk.bf16.gmra.mxu1 %vm1019_vm0, %v2305_v27  ;;  %1352 = vmatprep.mubr.bf16.mxu0 %v2306_v28 }
  0xa4   :  { %1465 = vmatprep.mubr.bf16.mxu1 %v2446_v13 }
  0xaa   :  { %1353 = vmatmul.mubr.bf16.gmra.mxu0 %v2308_v29 }
  0xab   :  { %2008 = vmatmul.mubr.msk.bf16.gmra.mxu1 %vm1019_vm0, %v2309_v30  ;;  %1362 = vmatprep.mubr.bf16.mxu0 %v2310_v31 }
  0xac   :  { %1475 = vmatprep.mubr.bf16.mxu1 %v2446_v13 }
  0xb2   :  { %1363 = vmatmul.mubr.bf16.gmra.mxu0 %v2312_v32 }
  0xb3   :  { %2009 = vmatmul.mubr.msk.bf16.gmra.mxu1 %vm1019_vm0, %v2313_v33  ;;  %1372 = vmatprep.mubr.bf16.mxu0 %v2314_v34 }
  0xb4   :  { %1485 = vmatprep.mubr.bf16.mxu1 %v2446_v13 }
  0xba   :  { %1373 = vmatmul.mubr.bf16.gmra.mxu0 %v2316_v35 }
  0xbb   :  { %2010 = vmatmul.mubr.msk.bf16.gmra.mxu1 %vm1019_vm0, %v2317_v36 }
 0x102   :  { %v2967_v37 = vpop.f32.mrf.mxu0 }
 0x103   :  { %v2969_v38 = vpop.f32.mrf.mxu1 }
 0x104   :  { %v2971_v39 = vpop.f32.mrf.mxu0 }
 0x105   :  { %v2973_v40 = vpop.f32.mrf.mxu1 }
 0x106   :  { %v2975_v41 = vpop.f32.mrf.mxu0 }
 0x107   :  { %v2977_v42 = vpop.f32.mrf.mxu1 }
 0x108   :  { %v2979_v43 = vpop.f32.mrf.mxu0 }
 0x109   :  { %v2981_v44 = vpop.f32.mrf.mxu1 }
 0x10a   :  { %v2983_v45 = vpop.f32.mrf.mxu0 }
 0x10b   :  { %v2985_v46 = vpop.f32.mrf.mxu1 }
 0x10c   :  { %v2987_v47 = vpop.f32.mrf.mxu0 }
 0x10d   :  { %v2989_v48 = vpop.f32.mrf.mxu1 }
 0x10e   :  { %v2991_v49 = vpop.f32.mrf.mxu0 }
 0x10f   :  { %v2993_v50 = vpop.f32.mrf.mxu1 }
 0x110   :  { %v2995_v51 = vpop.f32.mrf.mxu0 }
 0x111   :  { %v2997_v52 = vpop.f32.mrf.mxu1 }
 0x112   :  { %v2999_v53 = vpop.f32.mrf.mxu0 }
 0x113   :  { %v3001_v54 = vpop.f32.mrf.mxu1 }
 0x114   :  { %v3003_v55 = vpop.f32.mrf.mxu0 }
 0x115   :  { %v3005_v56 = vpop.f32.mrf.mxu1 }
 0x116   :  { %v3007_v58 = vpop.f32.mrf.mxu0 }
 0x117   :  { %v3009_v59 = vpop.f32.mrf.mxu1 }
 0x118   :  { %v3011_v60 = vpop.f32.mrf.mxu0 }
 0x119   :  { %v3013_v61 = vpop.f32.mrf.mxu1 }
 0x11a   :  { %v3015_v63 = vpop.f32.mrf.mxu0 }
 0x11b   :  { %v3017_v0 = vpop.f32.mrf.mxu1 }
 0x11c   :  { %v3019_v1 = vpop.f32.mrf.mxu0 }
 0x11d   :  { %v3021_v2 = vpop.f32.mrf.mxu1 }
 0x11e   :  { %v3026_v5 = vpop.f32.mrf.mxu0 }
 0x11f   :  { %v3028_v6 = vpop.f32.mrf.mxu1 }
 0x120   :  { %v3030_v7 = vpop.f32.mrf.mxu0 }
 0x121   :  { %v3032_v8 = vpop.f32.mrf.mxu1 }
 0x122   :  { %v1118_v10 = vpop.f32.mrf.mxu0 }
 0x123   :  { %v1231_v11 = vpop.f32.mrf.mxu1  ;;  %v1119_v12 = vadd.f32 %v1118_v10, %v3034_v9 }
 0x124   :  { %v3037_v13 = vpop.f32.mrf.mxu0 }
 0x125   :  { %v3039_v14 = vpop.f32.mrf.mxu1  ;;  %v3041_v15 = vadd.f32 %v1231_v11, %v1119_v12  ;;  %v195_v11 = vsub.s32 1, %v190_v62 }
 0x126   :  { %v1122_v16 = vpop.f32.mrf.mxu0 }
 0x127   :  { %v1235_v17 = vpop.f32.mrf.mxu1  ;;  %v1123_v18 = vadd.f32 %v1122_v16, %v3034_v9 }
 0x128   :  { %v3044_v19 = vpop.f32.mrf.mxu0 }
 0x129   :  { %v3046_v20 = vpop.f32.mrf.mxu1  ;;  %v3048_v21 = vadd.f32 %v1235_v17, %v1123_v18 }
 0x12a   :  { %v1128_v22 = vpop.f32.mrf.mxu0 }
 0x12b   :  { %3431 = vst [vmem:[#allocation2_spill] sm:$0xff] %v3048_v21  ;;  %v1241_v23 = vpop.f32.mrf.mxu1  ;;  %v1129_v24 = vadd.f32 %v1128_v22, %v3034_v9  ;;  %v3084_v22 = vrot.slane %v187_v4, %v195_v11  ;;  %v1083_v11 = vadd.f32 %v2975_v41, %v3034_v9 }
 0x12c   :  { %v3051_v25 = vpop.f32.mrf.mxu0 }
 0x12d   :  { %v3053_v26 = vpop.f32.mrf.mxu1  ;;  %v3055_v27 = vadd.f32 %v1241_v23, %v1129_v24  ;;  %v1091_v41 = vadd.f32 %v2987_v47, %v3084_v22 }
 0x12e   :  { %v1132_v28 = vpop.f32.mrf.mxu0 }
 0x12f   :  { %3432 = vst [vmem:[#allocation3_spill] sm:$0xff] %v3055_v27  ;;  %v1245_v29 = vpop.f32.mrf.mxu1  ;;  %v1133_v30 = vadd.f32 %v1132_v28, %v3034_v9  ;;  %v1079_v28 = vadd.f32 %v2967_v37, %v3034_v9 }
 0x130   :  { %v3058_v31 = vpop.f32.mrf.mxu0 }
 0x131   :  { %v3060_v32 = vpop.f32.mrf.mxu1  ;;  %v3062_v33 = vadd.f32 %v1245_v29, %v1133_v30  ;;  %v1081_v30 = vadd.f32 %v2971_v39, %v3084_v22  ;;  %v1192_v4 = vadd.f32 %v2969_v38, %v1079_v28  ;;  %v1089_v39 = vadd.f32 %v2983_v45, %v3034_v9 }
 0x132   :  { %v3064_v34 = vpop.f32.mrf.mxu0 }
 0x133   :  { %3433 = vst [vmem:[#allocation4_spill] sm:$0xff] %v3062_v33  ;;  %v3066_v35 = vpop.f32.mrf.mxu1  ;;  %v1194_v37 = vadd.f32 %v2973_v40, %v1081_v30  ;;  %v1202_v45 = vadd.f32 %v2985_v46, %v1089_v39 }
 0x134   :  { %v3068_v36 = vpop.f32.mrf.mxu0 }
 0x135   :  { %v3070_v57 = vpop.f32.mrf.mxu1 }
 0x136   :  { %v3072_v3 = vpop.f32.mrf.mxu0 }
 0x137   :  { %v3074_v10 = vpop.f32.mrf.mxu1 }
 0x138   :  { %v3076_v12 = vpop.f32.mrf.mxu0 }
 0x139   :  { %v3078_v16 = vpop.f32.mrf.mxu1 }
 0x13a   :  { %3434 = vst [vmem:[#allocation5_spill] sm:$0xff] %v3078_v16  ;;  %v3080_v17 = vpop.f32.mrf.mxu0 }
 0x13b   :  { %v3082_v18 = vpop.f32.mrf.mxu1 }
 0x13c   :  { %3435 = vst [vmem:[#allocation6_spill] sm:$0xff] %v3082_v18  ;;  %v3086_v23 = vpop.f32.mrf.mxu0 }
 0x13d   :  { %3436 = vst [vmem:[#allocation7_spill] sm:$0xff] %v3086_v23  ;;  %v3088_v24 = vpop.f32.mrf.mxu1 }
 0x13e   :  { %3437 = vst [vmem:[#allocation8_spill] sm:$0xff] %v3088_v24  ;;  %v3092_v29 = vpop.f32.mrf.mxu0 }
 0x13f   :  { %3438 = vst [vmem:[#allocation9_spill] sm:$0xff] %v3092_v29  ;;  %v3094_v62 = vpop.f32.mrf.mxu1  ;;  %v1085_v29 = vadd.f32 %v2979_v43, %v3084_v22 }
 0x140   :  { %3439 = vst [vmem:[#allocation10_spill] sm:$0xff] %v3094_v62  ;;  %v3098_v33 = vpop.f32.mrf.mxu0 }
 0x141   :  { %3440 = vst [vmem:[#allocation11_spill] sm:$0xff] %v3098_v33  ;;  %v3100_v27 = vpop.f32.mrf.mxu1  ;;  %v1198_v40 = vadd.f32 %v2981_v44, %v1085_v29  ;;  %v1204_v44 = vadd.f32 %v2989_v48, %v1091_v41 }
 0x142   :  { %3441 = vst [vmem:[#allocation12_spill] sm:$0xff] %v3100_v27  ;;  %v1304_v24 = vpop.f32.mrf.mxu0  ;;  %v1196_v27 = vadd.f32 %v2977_v42, %v1083_v11  ;;  %v1093_v42 = vadd.f32 %v2991_v49, %v3034_v9 }
 0x143   :  { %v1417_v23 = vpop.f32.mrf.mxu1  ;;  %v1305_v62 = vadd.f32 %v1304_v24, %v1192_v4 }
 0x144   :  { %v1306_v18 = vpop.f32.mrf.mxu0 }
 0x145   :  { %v1419_v33 = vpop.f32.mrf.mxu1  ;;  %v3111_v16 = vadd.f32 %v1417_v23, %v1305_v62  ;;  %v1307_v38 = vadd.f32 %v1306_v18, %v1194_v37  ;;  %v1206_v37 = vadd.f32 %v2993_v50, %v1093_v42 }
 0x146   :  { %v1308_v28 = vpop.f32.mrf.mxu0 }
 0x147   :  { %v1421_v21 = vpop.f32.mrf.mxu1  ;;  %v2011_v43 = vmul.f32 -1.442695, %v3111_v16  ;;  %v3117_v24 = vadd.f32 %v1419_v33, %v1307_v38  ;;  %v1309_v30 = vadd.f32 %v1308_v28, %v1196_v27  ;;  %v1095_v33 = vadd.f32 %v2995_v51, %v3084_v22 }
 0x148   :  { %v1310_v23 = vpop.f32.mrf.mxu0 }
 0x149   :  { %v1423_v62 = vpop.f32.mrf.mxu1  ;;  %2318 = vpow2.f32 %v2011_v43  ;;  %v2012_v18 = vmul.f32 -1.442695, %v3117_v24  ;;  %v3123_v47 = vadd.f32 %v1421_v21, %v1309_v30  ;;  %v1311_v4 = vadd.f32 %v1310_v23, %v1198_v40 }
 0x14a   :  { %v1314_v29 = vpop.f32.mrf.mxu0  ;;  %v1099_v21 = vadd.f32 %v2999_v53, %v3034_v9  ;;  %v1208_v28 = vadd.f32 %v2997_v52, %v1095_v33  ;;  %v1101_v40 = vadd.f32 %v3003_v55, %v3084_v22  ;;  %v1103_v23 = vadd.f32 %v3007_v58, %v3034_v9 }
 0x14b   :  { %v1427_v27 = vpop.f32.mrf.mxu1  ;;  %2320 = vpow2.f32 %v2012_v18  ;;  %v2013_v46 = vmul.f32 -1.442695, %v3123_v47  ;;  %v3129_v11 = vadd.f32 %v1423_v62, %v1311_v4  ;;  %v1315_v49 = vadd.f32 %v1314_v29, %v1202_v45 }
 0x14c   :  { %v1316_v39 = vpop.f32.mrf.mxu0  ;;  %v1212_v42 = vadd.f32 %v3001_v54, %v1099_v21  ;;  %v1105_v33 = vadd.f32 %v3011_v60, %v3084_v22  ;;  %v1109_v29 = vadd.f32 %v3015_v63, %v3034_v9  ;;  %v1111_v54 = vadd.f32 %v3019_v1, %v3084_v22 }
 0x14d   :  { %v1429_v38 = vpop.f32.mrf.mxu1  ;;  %2322 = vpow2.f32 %v2013_v46  ;;  %v2014_v48 = vmul.f32 -1.442695, %v3129_v11  ;;  %v3135_v41 = vadd.f32 %v1427_v27, %v1315_v49  ;;  %v1317_v51 = vadd.f32 %v1316_v39, %v1204_v44 }
 0x14e   :  { %v1318_v43 = vpop.f32.mrf.mxu0  ;;  %v1214_v44 = vadd.f32 %v3005_v56, %v1101_v40  ;;  %v1216_v21 = vadd.f32 %v3009_v59, %v1103_v23  ;;  %v1113_v56 = vadd.f32 %v3026_v5, %v3034_v9  ;;  %v1224_v40 = vadd.f32 %v3021_v2, %v1111_v54 }
 0x14f   :  { %v1431_v30 = vpop.f32.mrf.mxu1  ;;  %2324 = vpow2.f32 %v2014_v48  ;;  %v2015_v50 = vmul.f32 -1.442695, %v3135_v41  ;;  %v3141_v45 = vadd.f32 %v1429_v38, %v1317_v51  ;;  %v1319_v53 = vadd.f32 %v1318_v43, %v1206_v37 }
 0x150   :  { %v1320_v62 = vpop.f32.mrf.mxu0  ;;  %v1218_v51 = vadd.f32 %v3013_v61, %v1105_v33  ;;  %v1115_v59 = vadd.f32 %v3030_v7, %v3084_v22  ;;  %v1226_v23 = vadd.f32 %v3028_v6, %v1113_v56  ;;  %v1121_v61 = vadd.f32 %v3037_v13, %v3084_v22 }
 0x151   :  { %v1433_v18 = vpop.f32.mrf.mxu1  ;;  %2326 = vpow2.f32 %v2015_v50  ;;  %v2016_v52 = vmul.f32 -1.442695, %v3141_v45  ;;  %v3147_v4 = vadd.f32 %v1431_v30, %v1319_v53  ;;  %v1321_v55 = vadd.f32 %v1320_v62, %v1208_v28 }
 0x152   :  { %v1324_v58 = vpop.f32.mrf.mxu0  ;;  %v1222_v28 = vadd.f32 %v3017_v0, %v1109_v29  ;;  %v1125_v0 = vadd.f32 %v3044_v19, %v3084_v22  ;;  %v1228_v33 = vadd.f32 %v3032_v8, %v1115_v59  ;;  %v1131_v6 = vadd.f32 %v3051_v25, %v3084_v22 }
 0x153   :  { %v1437_v27 = vpop.f32.mrf.mxu1  ;;  %2328 = vpow2.f32 %v2016_v52  ;;  %v2017_v46 = vmul.f32 -1.442695, %v3147_v4  ;;  %v3157_v49 = vadd.f32 %v1433_v18, %v1321_v55  ;;  %v1325_v37 = vadd.f32 %v1324_v58, %v1212_v42 }
 0x154   :  { %v1326_v60 = vpop.f32.mrf.mxu0 }
 0x155   :  { %v1439_v39 = vpop.f32.mrf.mxu1  ;;  %2330 = vpow2.f32 %v2017_v46  ;;  %v2018_v63 = vmul.f32 -1.442695, %v3157_v49  ;;  %v3163_v38 = vadd.f32 %v1437_v27, %v1325_v37  ;;  %v1327_v1 = vadd.f32 %v1326_v60, %v1214_v44 }
 0x156   :  { %v2319_v48 = vpop.eup %2318  ;;  %v1328_v43 = vpop.f32.mrf.mxu0  ;;  %v1234_v37 = vadd.f32 %v3039_v14, %v1121_v61  ;;  %v1135_v14 = vadd.f32 %v3058_v31, %v3084_v22 }
 0x157   :  { %v1441_v5 = vpop.f32.mrf.mxu1  ;;  %v1592_v30 = vadd.f32 1.0, %v2319_v48  ;;  %2332 = vpow2.f32 %v2018_v63  ;;  %v2019_v50 = vmul.f32 -1.442695, %v3163_v38  ;;  %v3171_v53 = vadd.f32 %v1439_v39, %v1327_v1 }
 0x158   :  { %v2321_v42 = vpop.eup %2320  ;;  %v1329_v2 = vadd.f32 %v1328_v43, %v1216_v21  ;;  %v1330_v62 = vpop.f32.mrf.mxu0  ;;  %v3188_v21 = vadd.f32 %v3046_v20, %v1125_v0  ;;  %v3195_v48 = vadd.f32 %v3053_v26, %v1131_v6  ;;  %v1141_v26 = vadd.f32 %v3068_v36, %v3084_v22 }
 0x159   :  { %v1443_v7 = vpop.f32.mrf.mxu1  ;;  %2334 = vrcp.f32 %v1592_v30  ;;  %v1593_v18 = vadd.f32 1.0, %v2321_v42  ;;  %v2020_v52 = vmul.f32 -1.442695, %v3171_v53  ;;  %v1331_v55 = vadd.f32 %v1330_v62, %v1218_v51 }
 0x15a   :  { %v2323_v44 = vpop.eup %2322  ;;  %2336 = vpow2.f32 %v2019_v50  ;;  %v3182_v29 = vadd.f32 %v1441_v5, %v1329_v2  ;;  %v1334_v13 = vpop.f32.mrf.mxu0  ;;  %v1139_v50 = vadd.f32 %v3064_v34, %v3034_v9  ;;  %v1143_v34 = vadd.f32 %v3072_v3, %v3034_v9 }
 0x15b   :  { %v1447_v54 = vpop.f32.mrf.mxu1  ;;  %2338 = vrcp.f32 %v1593_v18  ;;  %v1594_v19 = vadd.f32 1.0, %v2323_v44  ;;  %v3184_v58 = vadd.f32 %v1443_v7, %v1331_v55  ;;  %v1335_v27 = vadd.f32 %v1334_v13, %v1222_v28 }
 0x15c   :  { %v2325_v46 = vpop.eup %2324  ;;  %2340 = vpow2.f32 %v2020_v52  ;;  %v2021_v8 = vmul.f32 -1.442695, %v3182_v29  ;;  %v1336_v25 = vpop.f32.mrf.mxu0 }
 0x15d   :  { %v1449_v56 = vpop.f32.mrf.mxu1  ;;  %2342 = vrcp.f32 %v1594_v19  ;;  %v1595_v60 = vadd.f32 1.0, %v2325_v46  ;;  %v2022_v39 = vmul.f32 -1.442695, %v3184_v58  ;;  %v3192_v63 = vadd.f32 %v1447_v54, %v1335_v27 }
 0x15e   :  { %v2327_v1 = vpop.eup %2326  ;;  %2344 = vpow2.f32 %v2021_v8  ;;  %v1337_v20 = vadd.f32 %v1336_v25, %v1224_v40  ;;  %v1338_v51 = vpop.f32.mrf.mxu0  ;;  %v1145_v25 = vadd.f32 %v3076_v12, %v3084_v22 }
 0x15f   :  { %v1451_v28 = vpop.f32.mrf.mxu1  ;;  %2346 = vrcp.f32 %v1595_v60  ;;  %v1596_v59 = vadd.f32 1.0, %v2327_v1  ;;  %v2023_v43 = vmul.f32 -1.442695, %v3192_v63  ;;  %v1339_v5 = vadd.f32 %v1338_v51, %v1226_v23 }
 0x160   :  { %v2329_v30 = vpop.eup %2328  ;;  %2348 = vpow2.f32 %v2022_v39  ;;  %v3204_v31 = vadd.f32 %v1449_v56, %v1337_v20  ;;  %v1340_v40 = vpop.f32.mrf.mxu0  ;;  %v3209_v23 = vadd.f32 %v3060_v32, %v1135_v14  ;;  %v3221_v32 = vadd.f32 %v3070_v57, %v1141_v26 }
 0x161   :  { %v1453_v42 = vpop.f32.mrf.mxu1  ;;  %2350 = vrcp.f32 %v1596_v59  ;;  %v1597_v61 = vadd.f32 1.0, %v2329_v30  ;;  %v3206_v0 = vadd.f32 %v1451_v28, %v1339_v5  ;;  %v1341_v2 = vadd.f32 %v1340_v40, %v1228_v33  ;;  %v3443_v40 = vld [vmem:[#allocation5_spill] sm:$0xff] }
 0x162   :  { %v2331_v62 = vpop.eup %2330  ;;  %2352 = vpow2.f32 %v2023_v43  ;;  %v2024_v36 = vmul.f32 -1.442695, %v3204_v31  ;;  %v1344_v7 = vpop.f32.mrf.mxu0  ;;  %v3218_v33 = vadd.f32 %v3066_v35, %v1139_v50  ;;  %v1149_v35 = vadd.f32 %v3080_v17, %v3034_v9 }
 0x163   :  { %v1457_v18 = vpop.f32.mrf.mxu1  ;;  %2354 = vrcp.f32 %v1597_v61  ;;  %v1598_v52 = vadd.f32 1.0, %v2331_v62  ;;  %v2025_v55 = vmul.f32 -1.442695, %v3206_v0  ;;  %v3215_v44 = vadd.f32 %v1453_v42, %v1341_v2 }
 0x164   :  { %v2333_v6 = vpop.eup %2332  ;;  %2356 = vpow2.f32 %v2024_v36  ;;  %v1345_v3 = vadd.f32 %v1344_v7, %v3041_v15  ;;  %v1346_v13 = vpop.f32.mrf.mxu0  ;;  %v3232_v39 = vadd.f32 %v3074_v10, %v1143_v34  ;;  %v3245_v42 = vadd.f32 %v3443_v40, %v1145_v25 }
 0x165   :  { %v1459_v54 = vpop.f32.mrf.mxu1  ;;  %2358 = vrcp.f32 %v1598_v52  ;;  %v1599_v19 = vadd.f32 1.0, %v2333_v6  ;;  %v2026_v27 = vmul.f32 -1.442695, %v3215_v44  ;;  %v1347_v46 = vadd.f32 %v1346_v13, %v1234_v37  ;;  %v3442_v37 = vld [vmem:[#allocation2_spill] sm:$0xff]  ;;  %v3448_v13 = vld [vmem:[#allocation3_spill] sm:$0xff] }
 0x166   :  { %v2335_v8 = vpop.eup %2334  ;;  %2360 = vpow2.f32 %v2025_v55  ;;  %v3229_v57 = vadd.f32 %v1457_v18, %v1345_v3  ;;  %v1348_v56 = vpop.f32.mrf.mxu0 }
 0x167   :  { %v1461_v60 = vpop.f32.mrf.mxu1  ;;  %v2337_v15 = vpop.eup %2336  ;;  %2362 = vrcp.f32 %v1599_v19  ;;  %v3234_v1 = vadd.f32 %v1459_v54, %v1347_v46  ;;  %v1349_v14 = vadd.f32 %v1348_v56, %v3442_v37  ;;  %v1688_v12 = vmul.f32 %v2335_v8, %v3111_v16  ;;  %v3444_v16 = vld [vmem:[#allocation6_spill] sm:$0xff] }
 0x168   :  { %v2339_v20 = vpop.eup %2338  ;;  %v1600_v51 = vadd.f32 1.0, %v2337_v15  ;;  %2364 = vpow2.f32 %v2026_v27  ;;  %v2027_v17 = vmul.f32 -1.442695, %v3229_v57  ;;  %v1350_v28 = vpop.f32.mrf.mxu0  ;;  %v3248_v61 = vadd.f32 %v3444_v16, %v1149_v35 }
 0x169   :  { %v1463_v59 = vpop.f32.mrf.mxu1  ;;  %v2341_v43 = vpop.eup %2340  ;;  %v1689_v5 = vmul.f32 %v2339_v20, %v3117_v24  ;;  %v2028_v10 = vmul.f32 -1.442695, %v3234_v1  ;;  %v3241_v30 = vadd.f32 %v1461_v60, %v1349_v14  ;;  %v1351_v50 = vadd.f32 %v1350_v28, %v3188_v21  ;;  %v3447_v21 = vld [vmem:[#allocation7_spill] sm:$0xff] }
 0x16a   :  { %v2343_v26 = vpop.eup %2342  ;;  %2366 = vrcp.f32 %v1600_v51  ;;  %v1601_v24 = vadd.f32 1.0, %v2341_v43  ;;  %v1354_v62 = vpop.f32.mrf.mxu0  ;;  %v3258_v7 = vadd.f32 %v3447_v21, %v3084_v22 }
 0x16b   :  { %v1467_v34 = vpop.f32.mrf.mxu1  ;;  %v2345_v36 = vpop.eup %2344  ;;  %v2059_v18 = vpack.c.bf16 %v1689_v5, %v1688_v12  ;;  %2368 = vpow2.f32 %v2027_v17  ;;  %v2029_v52 = vmul.f32 -1.442695, %v3241_v30  ;;  %v3261_v3 = vadd.f32 %v1463_v59, %v1351_v50  ;;  %v3449_v59 = vld [vmem:[#allocation4_spill] sm:$0xff] }
 0x16c   :  { %v2347_v55 = vpop.eup %2346  ;;  %2370 = vrcp.f32 %v1601_v24  ;;  %v1602_v6 = vadd.f32 1.0, %v2345_v36  ;;  %v1355_v54 = vadd.f32 %v1354_v62, %v3448_v13  ;;  %v1356_v19 = vpop.f32.mrf.mxu0  ;;  %v1690_v8 = vmul.f32 %v2343_v26, %v3123_v47  ;;  %v3450_v24 = vld [vmem:[#allocation9_spill] sm:$0xff] }
 0x16d   :  { %v1469_v27 = vpop.f32.mrf.mxu1  ;;  %v2349_v46 = vpop.eup %2348  ;;  %1819 = vst.msk [vmem:[%s3430_s3] sm:$0xff] %vm3252_vm3, %v2059_v18  ;;  %v1691_v25 = vmul.f32 %v2347_v55, %v3129_v11  ;;  %2372 = vpow2.f32 %v2028_v10  ;;  %v1357_v35 = vadd.f32 %v1356_v19, %v3195_v48  ;;  %v2030_v15 = vmul.f32 -1.442695, %v3261_v3 }
 0x16e   :  { %v2351_v56 = vpop.eup %2350  ;;  %2374 = vrcp.f32 %v1602_v6  ;;  %v1603_v60 = vadd.f32 1.0, %v2349_v46  ;;  %v3273_v37 = vadd.f32 %v1467_v34, %v1355_v54  ;;  %v1358_v14 = vpop.f32.mrf.mxu0  ;;  %v1153_v62 = vadd.f32 %v3450_v24, %v3034_v9 }
 0x16f   :  { %v1471_v20 = vpop.f32.mrf.mxu1  ;;  %v2353_v12 = vpop.eup %2352  ;;  %v2060_v51 = vpack.c.bf16 %v1691_v25, %v1690_v8  ;;  %v1692_v17 = vmul.f32 %v2351_v56, %v3135_v41  ;;  %2376 = vpow2.f32 %v2029_v52  ;;  %v3276_v47 = vadd.f32 %v1469_v27, %v1357_v35  ;;  %v3451_v35 = vld [vmem:[#allocation8_spill] sm:$0xff] }
 0x170   :  { %v2355_v11 = vpop.eup %2354  ;;  %2378 = vrcp.f32 %v1603_v60  ;;  %v1604_v28 = vadd.f32 1.0, %v2353_v12  ;;  %v2031_v48 = vmul.f32 -1.442695, %v3273_v37  ;;  %v1359_v43 = vadd.f32 %v1358_v14, %v3449_v59  ;;  %v1360_v5 = vpop.f32.mrf.mxu0 }
 0x171   :  { %v1473_v10 = vpop.f32.mrf.mxu1  ;;  %v2357_v50 = vpop.eup %2356  ;;  %1820 = vst.msk [vmem:[%s3430_s3 + $0x8] sm:$0xff] %vm3252_vm3, %v2060_v51  ;;  %v1693_v41 = vmul.f32 %v2355_v11, %v3141_v45  ;;  %2380 = vpow2.f32 %v2030_v15  ;;  %v2032_v26 = vmul.f32 -1.442695, %v3276_v47  ;;  %v1361_v40 = vadd.f32 %v1360_v5, %v3209_v23  ;;  %v3452_v11 = vld [vmem:[#allocation10_spill] sm:$0xff] }
 0x172   :  { %v2359_v16 = vpop.eup %2358  ;;  %2382 = vrcp.f32 %v1604_v28  ;;  %v1605_v34 = vadd.f32 1.0, %v2357_v50  ;;  %v3290_v36 = vadd.f32 %v1471_v20, %v1359_v43  ;;  %v1364_v21 = vpop.f32.mrf.mxu0  ;;  %v1264_v56 = vadd.f32 %v3451_v35, %v3258_v7 }
 0x173   :  { %v1477_v18 = vpop.f32.mrf.mxu1  ;;  %v2361_v52 = vpop.eup %2360  ;;  %v2061_v55 = vpack.c.bf16 %v1693_v41, %v1692_v17  ;;  %v1694_v6 = vmul.f32 %v2359_v16, %v3147_v4  ;;  %2384 = vpow2.f32 %v2031_v48  ;;  %v3293_v45 = vadd.f32 %v1473_v10, %v1361_v40 }
 0x174   :  { %v2363_v13 = vpop.eup %2362  ;;  %2386 = vrcp.f32 %v1605_v34  ;;  %v1606_v23 = vadd.f32 1.0, %v2361_v52  ;;  %v2033_v54 = vmul.f32 -1.442695, %v3290_v36  ;;  %v1365_v9 = vadd.f32 %v1364_v21, %v3218_v33  ;;  %v1366_v19 = vpop.f32.mrf.mxu0 }
 0x175   :  { %v1479_v27 = vpop.f32.mrf.mxu1  ;;  %v2365_v46 = vpop.eup %2364  ;;  %1821 = vst.msk [vmem:[%s3430_s3 + $0x10] sm:$0xff] %vm3252_vm3, %v2061_v55  ;;  %v1695_v4 = vmul.f32 %v2363_v13, %v3157_v49  ;;  %2388 = vpow2.f32 %v2032_v26  ;;  %v2034_v8 = vmul.f32 -1.442695, %v3293_v45  ;;  %v1367_v25 = vadd.f32 %v1366_v19, %v3221_v32  ;;  %v3453_v32 = vld [vmem:[#allocation11_spill] sm:$0xff]  ;;  %v3454_v55 = vld [vmem:[#allocation12_spill] sm:$0xff] }
 0x176   :  { %2390 = vrcp.f32 %v1606_v23  ;;  %v1607_v33 = vadd.f32 1.0, %v2365_v46  ;;  %v3307_v60 = vadd.f32 %v1477_v18, %v1365_v9  ;;  %v1368_v15 = vpop.f32.mrf.mxu0  ;;  %v1266_v28 = vadd.f32 %v3452_v11, %v1153_v62 }
 0x177   :  { %v1481_v14 = vpop.f32.mrf.mxu1  ;;  %v2367_v20 = vpop.eup %2366  ;;  %v2062_v12 = vpack.c.bf16 %v1695_v4, %v1694_v6  ;;  %2392 = vpow2.f32 %v2033_v54  ;;  %v3309_v51 = vadd.f32 %v1479_v27, %v1367_v25  ;;  %v1369_v49 = vadd.f32 %v1368_v15, %v3232_v39 }
 0x178   :  { %v2369_v17 = vpop.eup %2368  ;;  %v1155_v48 = vadd.f32 %v3453_v32, %v3084_v22  ;;  %2394 = vrcp.f32 %v1607_v33  ;;  %v2035_v7 = vmul.f32 -1.442695, %v3307_v60  ;;  %v1370_v59 = vpop.f32.mrf.mxu0  ;;  %v1696_v22 = vmul.f32 %v2367_v20, %v3163_v38 }
 0x179   :  { %v1483_v43 = vpop.f32.mrf.mxu1  ;;  %v2371_v5 = vpop.eup %2370  ;;  %1822 = vst.msk [vmem:[%s3430_s3 + $0x18] sm:$0xff] %vm3252_vm3, %v2062_v12  ;;  %v1608_v10 = vadd.f32 1.0, %v2369_v17  ;;  %2396 = vpow2.f32 %v2034_v8  ;;  %v2036_v39 = vmul.f32 -1.442695, %v3309_v51  ;;  %v3322_v50 = vadd.f32 %v1481_v14, %v1369_v49 }
 0x17a   :  { %v2373_v41 = vpop.eup %2372  ;;  %v1697_v26 = vmul.f32 %v2371_v5, %v3171_v53  ;;  %2398 = vpow2.f32 %v2035_v7  ;;  %v1371_v40 = vadd.f32 %v1370_v59, %v3245_v42  ;;  %v1374_v16 = vpop.f32.mrf.mxu0  ;;  %v1268_v6 = vadd.f32 %v3454_v55, %v1155_v48 }
 0x17b   :  { %v1487_v24 = vpop.f32.mrf.mxu1  ;;  %v2375_v62 = vpop.eup %2374  ;;  %2400 = vrcp.f32 %v1608_v10  ;;  %v1609_v34 = vadd.f32 1.0, %v2373_v41  ;;  %v2037_v21 = vmul.f32 -1.442695, %v3322_v50  ;;  %v1375_v18 = vadd.f32 %v1374_v16, %v3248_v61 }
 0x17c   :  { %v2377_v52 = vpop.eup %2376  ;;  %v2063_v13 = vpack.c.bf16 %v1697_v26, %v1696_v22  ;;  %2402 = vpow2.f32 %v2036_v39  ;;  %v3330_v38 = vadd.f32 %v1483_v43, %v1371_v40  ;;  %v1376_v53 = vpop.f32.mrf.mxu0  ;;  %v1698_v61 = vmul.f32 %v2375_v62, %v3182_v29 }
 0x17d   :  { %v1489_v23 = vpop.f32.mrf.mxu1  ;;  %v2379_v54 = vpop.eup %2378  ;;  %2404 = vrcp.f32 %v1609_v34  ;;  %v1610_v42 = vadd.f32 1.0, %v2377_v52  ;;  %v3332_v9 = vadd.f32 %v1487_v24, %v1375_v18  ;;  %v1377_v19 = vadd.f32 %v1376_v53, %v1264_v56 }
 0x17e   :  { %v2381_v27 = vpop.eup %2380  ;;  %1823 = vst.msk [vmem:[%s3430_s3 + $0x20] sm:$0xff] %vm3252_vm3, %v2063_v13  ;;  %v1699_v46 = vmul.f32 %v2379_v54, %v3184_v58  ;;  %2406 = vpow2.f32 %v2037_v21  ;;  %v2038_v4 = vmul.f32 -1.442695, %v3330_v38  ;;  %v1378_v8 = vpop.f32.mrf.mxu0 }
 0x17f   :  { %v1491_v25 = vpop.f32.mrf.mxu1  ;;  %v2383_v35 = vpop.eup %2382  ;;  %2408 = vrcp.f32 %v1610_v42  ;;  %v1611_v33 = vadd.f32 1.0, %v2381_v27  ;;  %v2039_v56 = vmul.f32 -1.442695, %v3332_v9  ;;  %v3343_v15 = vadd.f32 %v1489_v23, %v1377_v19 }
 0x180   :  { %v2385_v14 = vpop.eup %2384  ;;  %v2064_v20 = vpack.c.bf16 %v1699_v46, %v1698_v61  ;;  %2410 = vpow2.f32 %v2038_v4  ;;  %v1379_v12 = vadd.f32 %v1378_v8, %v1266_v28  ;;  %v1380_v49 = vpop.f32.mrf.mxu0  ;;  %v1700_v48 = vmul.f32 %v2383_v35, %v3192_v63 }
 0x181   :  { %v2387_v29 = vpop.eup %2386  ;;  %2412 = vrcp.f32 %v1611_v33  ;;  %v1612_v58 = vadd.f32 1.0, %v2385_v14  ;;  %v2040_v17 = vmul.f32 -1.442695, %v3343_v15  ;;  %v1381_v11 = vadd.f32 %v1380_v49, %v1268_v6  ;;  %v1493_v59 = vpop.f32.mrf.mxu1 }
 0x182   :  { %v2389_v32 = vpop.eup %2388  ;;  %1824 = vst.msk [vmem:[%s3430_s3 + $0x28] sm:$0xff] %vm3252_vm3, %v2064_v20  ;;  %v1701_v7 = vmul.f32 %v2387_v29, %v3204_v31  ;;  %2414 = vpow2.f32 %v2039_v56  ;;  %v3353_v28 = vadd.f32 %v1491_v25, %v1379_v12 }
 0x183   :  { %v2391_v43 = vpop.eup %2390  ;;  %2416 = vrcp.f32 %v1612_v58  ;;  %v1613_v5 = vadd.f32 1.0, %v2389_v32  ;;  %v3355_v10 = vadd.f32 %v1493_v59, %v1381_v11 }
 0x184   :  { %v2393_v39 = vpop.eup %2392  ;;  %v2065_v41 = vpack.c.bf16 %v1701_v7, %v1700_v48  ;;  %2418 = vpow2.f32 %v2040_v17  ;;  %v2041_v22 = vmul.f32 -1.442695, %v3353_v28  ;;  %v1702_v16 = vmul.f32 %v2391_v43, %v3206_v0 }
 0x185   :  { %v2395_v26 = vpop.eup %2394  ;;  %2420 = vrcp.f32 %v1613_v5  ;;  %v1614_v40 = vadd.f32 1.0, %v2393_v39  ;;  %v2042_v63 = vmul.f32 -1.442695, %v3355_v10 }
 0x186   :  { %v2397_v31 = vpop.eup %2396  ;;  %1825 = vst.msk [vmem:[%s3430_s3 + $0x30] sm:$0xff] %vm3252_vm3, %v2065_v41  ;;  %v1703_v24 = vmul.f32 %v2395_v26, %v3215_v44  ;;  %2422 = vpow2.f32 %v2041_v22 }
 0x187   :  { %v2399_v62 = vpop.eup %2398  ;;  %2424 = vrcp.f32 %v1614_v40  ;;  %v1615_v34 = vadd.f32 1.0, %v2397_v31 }
 0x188   :  { %v2401_v21 = vpop.eup %2400  ;;  %v2066_v18 = vpack.c.bf16 %v1703_v24, %v1702_v16  ;;  %v1616_v52 = vadd.f32 1.0, %v2399_v62  ;;  %2426 = vpow2.f32 %v2042_v63 }
 0x189   :  { %v2403_v55 = vpop.eup %2402  ;;  %2428 = vrcp.f32 %v1615_v34  ;;  %v1704_v13 = vmul.f32 %v2401_v21, %v3229_v57 }
 0x18a   :  { %v2405_v6 = vpop.eup %2404  ;;  %1826 = vst.msk [vmem:[%s3430_s3 + $0x38] sm:$0xff] %vm3252_vm3, %v2066_v18  ;;  %2430 = vrcp.f32 %v1616_v52  ;;  %v1617_v0 = vadd.f32 1.0, %v2403_v55 }
 0x18b   :  { %v2407_v44 = vpop.eup %2406  ;;  %v1705_v53 = vmul.f32 %v2405_v6, %v3234_v1 }
 0x18c   :  { %v2409_v23 = vpop.eup %2408  ;;  %2432 = vrcp.f32 %v1617_v0  ;;  %v1618_v54 = vadd.f32 1.0, %v2407_v44 }
 0x18d   :  { %v2411_v42 = vpop.eup %2410  ;;  %v2067_v19 = vpack.c.bf16 %v1705_v53, %v1704_v13  ;;  %v1706_v4 = vmul.f32 %v2409_v23, %v3241_v30 }
 0x18e   :  { %v2413_v27 = vpop.eup %2412  ;;  %2434 = vrcp.f32 %v1618_v54  ;;  %v1619_v61 = vadd.f32 1.0, %v2411_v42 }
 0x18f   :  { %v2415_v46 = vpop.eup %2414  ;;  %1827 = vst.msk [vmem:[%s3430_s3 + $0x40] sm:$0xff] %vm3252_vm3, %v2067_v19  ;;  %v1707_v57 = vmul.f32 %v2413_v27, %v3261_v3 }
 0x190   :  { %v2417_v1 = vpop.eup %2416  ;;  %2436 = vrcp.f32 %v1619_v61  ;;  %v1620_v8 = vadd.f32 1.0, %v2415_v46 }
 0x191   :  { %v2419_v25 = vpop.eup %2418  ;;  %v2068_v35 = vpack.c.bf16 %v1707_v57, %v1706_v4  ;;  %v1708_v20 = vmul.f32 %v2417_v1, %v3273_v37 }
 0x192   :  { %v2421_v33 = vpop.eup %2420  ;;  %2438 = vrcp.f32 %v1620_v8  ;;  %v1621_v56 = vadd.f32 1.0, %v2419_v25 }
 0x193   :  { %v2423_v14 = vpop.eup %2422  ;;  %1828 = vst.msk [vmem:[%s3430_s3 + $0x48] sm:$0xff] %vm3252_vm3, %v2068_v35  ;;  %v1709_v30 = vmul.f32 %v2421_v33, %v3276_v47 }
 0x194   :  { %v2425_v3 = vpop.eup %2424  ;;  %2440 = vrcp.f32 %v1621_v56  ;;  %v1622_v12 = vadd.f32 1.0, %v2423_v14 }
 0x195   :  { %v2427_v49 = vpop.eup %2426  ;;  %v2069_v29 = vpack.c.bf16 %v1709_v30, %v1708_v20  ;;  %v1710_v32 = vmul.f32 %v2425_v3, %v3290_v36 }
 0x196   :  { %v2429_v58 = vpop.eup %2428  ;;  %2442 = vrcp.f32 %v1622_v12  ;;  %v1623_v17 = vadd.f32 1.0, %v2427_v49 }
 0x197   :  { %v2431_v11 = vpop.eup %2430  ;;  %1829 = vst.msk [vmem:[%s3430_s3 + $0x50] sm:$0xff] %vm3252_vm3, %v2069_v29  ;;  %v1711_v37 = vmul.f32 %v2429_v58, %v3293_v45 }
 0x198   :  { %2444 = vrcp.f32 %v1623_v17  ;;  %v1712_v7 = vmul.f32 %v2431_v11, %v3307_v60 }
 0x199   :  { %v2433_v47 = vpop.eup %2432  ;;  %v2070_v48 = vpack.c.bf16 %v1711_v37, %v1710_v32 }
 0x19a   :  { %v1713_v59 = vmul.f32 %v2433_v47, %v3309_v51 }
 0x19b   :  { %v2435_v43 = vpop.eup %2434  ;;  %1830 = vst.msk [vmem:[%s3430_s3 + $0x58] sm:$0xff] %vm3252_vm3, %v2070_v48 }
 0x19c   :  { %v2071_v5 = vpack.c.bf16 %v1713_v59, %v1712_v7  ;;  %v1714_v36 = vmul.f32 %v2435_v43, %v3322_v50 }
 0x19d   :  { %v2437_v39 = vpop.eup %2436 }
 0x19e   :  { %1831 = vst.msk [vmem:[%s3430_s3 + $0x60] sm:$0xff] %vm3252_vm3, %v2071_v5  ;;  %v1715_v45 = vmul.f32 %v2437_v39, %v3330_v38 }
 0x19f   :  { %v2439_v60 = vpop.eup %2438 }
 0x1a0   :  { %v2072_v51 = vpack.c.bf16 %v1715_v45, %v1714_v36  ;;  %v1716_v22 = vmul.f32 %v2439_v60, %v3332_v9 }
 0x1a1   :  { %v2441_v41 = vpop.eup %2440 }
 0x1a2   :  { %1832 = vst.msk [vmem:[%s3430_s3 + $0x68] sm:$0xff] %vm3252_vm3, %v2072_v51  ;;  %v1717_v26 = vmul.f32 %v2441_v41, %v3343_v15 }
 0x1a3   :  { %v2443_v40 = vpop.eup %2442 }
 0x1a4   :  { %v2073_v63 = vpack.c.bf16 %v1717_v26, %v1716_v22  ;;  %v1718_v50 = vmul.f32 %v2443_v40, %v3353_v28 }
 0x1a5   :  { %v2445_v31 = vpop.eup %2444 }
 0x1a6   :  { %1833 = vst.msk [vmem:[%s3430_s3 + $0x70] sm:$0xff] %vm3252_vm3, %v2073_v63  ;;  %v1719_v38 = vmul.f32 %v2445_v31, %v3355_v10 }
 0x1a8   :  { %v2074_v16 = vpack.c.bf16 %v1719_v38, %v1718_v50 }
 0x1aa   :  { %1834 = vst.msk [vmem:[%s3430_s3 + $0x78] sm:$0xff] %vm3252_vm3, %v2074_v16 }

// kernel: yolox_forward.20
= control target key start
LH: loop header
LB: loop body
LE: loop exit
PB: predicated region body
PF: predicated region fallthrough
CT: control target
= control target key end

     0   :  { %vm68_vm0 = vcmask 523264   ;;  %vm168_vm1 = vcmask 781312   ;;  %s291_s1 = inlined_call_operand.vmem [shape: bf16[64,96], index: 1, kind: input, shape index: {}]   ;;  %s292_s0 = inlined_call_operand.vmem [shape: bf16[32,64], index: 0, kind: input, shape index: {}]   ;;  %s293_s2 = inlined_call_operand.vmem [shape: f32[1,96], index: 2, kind: input, shape index: {}]   ;;  %s294_s3 = inlined_call_operand.vmem [shape: bf16[32,96], index: 3, kind: output, shape index: {}]  }
   0x1   :  { %v216_v0 = vld [vmem:[%s291_s1 + $0x18] sm:$0xff]   ;;  %v217_v1 = vld [vmem:[%s291_s1 + $0x10] sm:$0xff]   ;;  %v218_v2 = vld [vmem:[%s291_s1 + $0x8] sm:$0xff]  }
   0x2   :  { %204 = vmatprep.subr.bf16.mxu0 %v216_v0  ;;  %v220_v3 = vld [vmem:[%s292_s0] sm:$0xff]   ;;  %v221_v5 = vld [vmem:[%s292_s0 + $0x8] sm:$0xff]  }
   0x3   :  { %205 = vmatpush3.bf16.msra.mxu0 %v216_v0  ;;  %212 = vmatprep.mubr.msk.bf16.mxu0 %vm68_vm0, %v220_v3  ;;  %v219_v4 = vld [vmem:[%s291_s1] sm:$0xff]  }
   0x4   :  { %206 = vmatprep.subr.bf16.mxu0 %v217_v1  ;;  %v177_v6 = vld [vmem:[%s293_s2] ss:$0 sm:$0xff] }
   0x7   :  { %207 = vmatpush3.bf16.msra.mxu0 %v217_v1 }
   0x8   :  { %208 = vmatprep.subr.bf16.mxu0 %v218_v2 }
   0xb   :  { %209 = vmatpush3.bf16.msra.mxu0 %v218_v2 }
   0xc   :  { %210 = vmatprep.subr.bf16.mxu0 %v219_v4 }
   0xf   :  { %211 = vmatpush3.bf16.msra.mxu0 %v219_v4 }
  0x12   :  { %213 = vmatmul.mubr.msk.bf16.vlgmr.msra.gmra.mxu0 %vm68_vm0, %v221_v5 }
  0xd2   :  { %v214_v7 = vpop.f32.mrf.mxu0 }
  0xd3   :  { %v118_v8 = vadd.f32 %v214_v7, %v177_v6 }
  0xd4   :  { %v109_v9 = vpop.f32.mrf.mxu0 }
  0xd5   :  { %v188_v10 = vmul.f32 -1.442695, %v118_v8  ;;  %v110_v11 = vadd.f32 %v177_v6, %v109_v9 }
  0xd6   :  { %v215_v12 = vpop.f32.mrf.mxu0 }
  0xd7   :  { %222 = vpow2.f32 %v188_v10  ;;  %v186_v13 = vmul.f32 -1.442695, %v110_v11  ;;  %v121_v14 = vadd.f32 %v215_v12, %v177_v6 }
  0xd8   :  { %v112_v15 = vpop.f32.mrf.mxu0 }
  0xd9   :  { %224 = vpow2.f32 %v186_v13  ;;  %v189_v16 = vmul.f32 -1.442695, %v121_v14  ;;  %v113_v17 = vadd.f32 %v177_v6, %v112_v15 }
  0xdb   :  { %226 = vpow2.f32 %v189_v16  ;;  %v187_v18 = vmul.f32 -1.442695, %v113_v17 }
  0xdd   :  { %228 = vpow2.f32 %v187_v18 }
  0xe4   :  { %v223_v19 = vpop.eup %222 }
  0xe5   :  { %v138_v20 = vadd.f32 1.0, %v223_v19 }
  0xe6   :  { %v225_v21 = vpop.eup %224 }
  0xe7   :  { %230 = vrcp.f32 %v138_v20  ;;  %v136_v22 = vadd.f32 1.0, %v225_v21 }
  0xe8   :  { %v227_v23 = vpop.eup %226 }
  0xe9   :  { %232 = vrcp.f32 %v136_v22  ;;  %v139_v24 = vadd.f32 1.0, %v227_v23 }
  0xea   :  { %v229_v25 = vpop.eup %228 }
  0xeb   :  { %234 = vrcp.f32 %v139_v24  ;;  %v137_v26 = vadd.f32 1.0, %v229_v25 }
  0xed   :  { %236 = vrcp.f32 %v137_v26 }
  0xf4   :  { %v231_v27 = vpop.eup %230 }
  0xf5   :  { %v150_v28 = vmul.f32 %v231_v27, %v118_v8 }
  0xf6   :  { %v233_v29 = vpop.eup %232 }
  0xf7   :  { %v196_v30 = vpack.c.bf16 %v150_v28, %v150_v28  ;;  %v148_v31 = vmul.f32 %v233_v29, %v110_v11 }
  0xf8   :  { %v235_v32 = vpop.eup %234 }
  0xf9   :  { %171 = vst.msk [vmem:[%s294_s3 + $0x8] sm:$0xf] %vm168_vm1, %v196_v30  ;;  %v194_v33 = vpack.c.bf16 %v148_v31, %v148_v31  ;;  %v151_v34 = vmul.f32 %v235_v32, %v121_v14 }
  0xfa   :  { %v237_v35 = vpop.eup %236 }
  0xfb   :  { %169 = vst.msk [vmem:[%s294_s3] sm:$0xf] %vm168_vm1, %v194_v33  ;;  %v197_v36 = vpack.c.bf16 %v151_v34, %v151_v34  ;;  %v149_v37 = vmul.f32 %v237_v35, %v113_v17 }
  0xfd   :  { %172 = vst.msk [vmem:[%s294_s3 + $0xc] sm:$0xf] %vm168_vm1, %v197_v36  ;;  %v195_v38 = vpack.c.bf16 %v149_v37, %v149_v37 }
  0xff   :  { %170 = vst.msk [vmem:[%s294_s3 + $0x4] sm:$0xf] %vm168_vm1, %v195_v38 }

// kernel: yolox_forward.15
= control target key start
LH: loop header
LB: loop body
LE: loop exit
PB: predicated region body
PF: predicated region fallthrough
CT: control target
= control target key end

     0   :  { %vm204_vm0 = vcmask 261120   ;;  %vm353_vm1 = vcmask 519168   ;;  %s590_s1 = inlined_call_operand.vmem [shape: bf16[288,64], index: 1, kind: input, shape index: {}]   ;;  %s591_s0 = inlined_call_operand.vmem [shape: bf16[32,288], index: 0, kind: input, shape index: {}]   ;;  %s592_s2 = inlined_call_operand.vmem [shape: f32[1,64], index: 2, kind: input, shape index: {}]   ;;  %s593_s3 = inlined_call_operand.vmem [shape: bf16[32,64], index: 3, kind: output, shape index: {}]  }
   0x1   :  { %v441_v0 = vld [vmem:[%s590_s1 + $0x78] sm:$0xff]   ;;  %v443_v2 = vld [vmem:[%s590_s1 + $0x70] sm:$0xff]   ;;  %v445_v4 = vld [vmem:[%s590_s1 + $0x68] sm:$0xff]  }
   0x2   :  { %v442_v1 = vld [vmem:[%s590_s1 + $0x38] sm:$0xff]   ;;  %401 = vmatprep.subr.bf16.mxu0 %v441_v0  ;;  %v444_v3 = vld [vmem:[%s590_s1 + $0x30] sm:$0xff]   ;;  %v446_v5 = vld [vmem:[%s590_s1 + $0x28] sm:$0xff]  }
   0x3   :  { %402 = vmatpush3.bf16.msra.mxu0 %v442_v1  ;;  %v447_v6 = vld [vmem:[%s590_s1 + $0x60] sm:$0xff]   ;;  %v449_v8 = vld [vmem:[%s590_s1 + $0x58] sm:$0xff]   ;;  %v456_v10 = vld [vmem:[%s590_s1 + $0x88] sm:$0xff]  }
   0x4   :  { %403 = vmatprep.subr.bf16.mxu0 %v443_v2  ;;  %v448_v7 = vld [vmem:[%s590_s1 + $0x20] sm:$0xff]   ;;  %v450_v9 = vld [vmem:[%s590_s1 + $0x18] sm:$0xff]   ;;  %v451_v11 = vld [vmem:[%s590_s1 + $0x50] sm:$0xff]   ;;  %433 = vmatprep.subr.bf16.mxu1 %v456_v10 }
   0x5   :  { %v452_v12 = vld [vmem:[%s590_s1 + $0x10] sm:$0xff]   ;;  %v453_v13 = vld [vmem:[%s590_s1 + $0x48] sm:$0xff]   ;;  %434 = vmatpush3.bf16.msra.mxu1 %v456_v10  ;;  %v461_v15 = vld [vmem:[%s590_s1 + $0x80] sm:$0xff]  }
   0x6   :  { %v460_v14 = vld [vmem:[%s591_s0 + $0x4] ss:$12 sps:$4 sm:$0xff]   ;;  %v462_v16 = vld [vmem:[%s591_s0 + $0x8] ss:$12 sps:$4 sm:$0xff]   ;;  %435 = vmatprep.subr.bf16.mxu1 %v461_v15  ;;  %v463_v17 = vld [vmem:[%s591_s0 + $0x20] ss:$12 sps:$4 sm:$0xff]  }
   0x7   :  { %404 = vmatpush3.bf16.msra.mxu0 %v444_v3  ;;  %243 = vmatprep.mubr.bf16.mxu0 %v460_v14  ;;  %v454_v18 = vld [vmem:[%s590_s1 + $0x8] sm:$0xff]   ;;  %v455_v19 = vld [vmem:[%s590_s1 + $0x40] sm:$0xff]  }
   0x8   :  { %405 = vmatprep.subr.bf16.mxu0 %v445_v4  ;;  %437 = vmatprep.mubr.msk.bf16.mxu1 %vm204_vm0, %v462_v16  ;;  %v457_v20 = vld [vmem:[%s590_s1] sm:$0xff]   ;;  %v464_v22 = vld [vmem:[%s591_s0 + $0x1c] ss:$12 sps:$4 sm:$0xff]  }
   0x9   :  { %436 = vmatpush3.bf16.msra.mxu1 %v461_v15  ;;  %v458_v21 = vld [vmem:[%s591_s0] ss:$12 sps:$4 sm:$0xff]   ;;  %v466_v23 = vld [vmem:[%s591_s0 + $0x18] ss:$12 sps:$4 sm:$0xff]  }
   0xa   :  { %v362_v28 = vld [vmem:[%s592_s2] ss:$0 sm:$0xff] }
   0xb   :  { %406 = vmatpush3.bf16.msra.mxu0 %v446_v5 }
   0xc   :  { %407 = vmatprep.subr.bf16.mxu0 %v447_v6  ;;  %438 = vmatmul.mubr.msk.bf16.vlgmr.msra.gmra.mxu1 %vm204_vm0, %v463_v17 }
   0xf   :  { %408 = vmatpush3.bf16.msra.mxu0 %v448_v7 }
  0x10   :  { %409 = vmatprep.subr.bf16.mxu0 %v449_v8 }
  0x13   :  { %410 = vmatpush3.bf16.msra.mxu0 %v450_v9 }
  0x14   :  { %411 = vmatprep.subr.bf16.mxu0 %v451_v11 }
  0x17   :  { %412 = vmatpush3.bf16.msra.mxu0 %v452_v12 }
  0x18   :  { %413 = vmatprep.subr.bf16.mxu0 %v453_v13 }
  0x1b   :  { %414 = vmatpush3.bf16.msra.mxu0 %v454_v18 }
  0x1c   :  { %415 = vmatprep.subr.bf16.mxu0 %v455_v19 }
  0x1f   :  { %416 = vmatpush3.bf16.msra.mxu0 %v457_v20 }
  0x22   :  { %244 = vmatmul.mubr.bf16.vlgmr.msra.gmra.mxu0 %v458_v21 }
  0x23   :  { %251 = vmatprep.mubr.bf16.mxu0 %v464_v22 }
  0x2a   :  { %252 = vmatmul.mubr.bf16.gmra.mxu0 %v466_v23 }
  0xcc   :  { %v439_v24 = vpop.f32.mrf.mxu1 }
  0xce   :  { %v294_v26 = vpop.f32.mrf.mxu1 }
  0xd0   :  { %v440_v31 = vpop.f32.mrf.mxu1 }
  0xd2   :  { %v297_v37 = vpop.f32.mrf.mxu1 }
  0xe2   :  { %v417_v25 = vpop.f32.mrf.mxu0 }
  0xe4   :  { %v418_v27 = vpop.f32.mrf.mxu0 }
  0xe5   :  { %v419_v29 = vadd.f32 %v418_v27, %v417_v25 }
  0xe6   :  { %v420_v30 = vpop.f32.mrf.mxu0 }
  0xe7   :  { %v246_v32 = vadd.f32 %v419_v29, %v362_v28 }
  0xe8   :  { %v421_v33 = vpop.f32.mrf.mxu0 }
  0xe9   :  { %v422_v34 = vadd.f32 %v421_v33, %v420_v30  ;;  %v295_v35 = vadd.f32 %v294_v26, %v246_v32 }
  0xea   :  { %v423_v36 = vpop.f32.mrf.mxu0 }
  0xeb   :  { %v389_v38 = vmul.f32 -1.442695, %v295_v35  ;;  %v249_v39 = vadd.f32 %v422_v34, %v362_v28 }
  0xec   :  { %v424_v40 = vpop.f32.mrf.mxu0 }
  0xed   :  { %467 = vpow2.f32 %v389_v38  ;;  %v425_v41 = vadd.f32 %v424_v40, %v423_v36  ;;  %v298_v42 = vadd.f32 %v297_v37, %v249_v39 }
  0xee   :  { %v426_v43 = vpop.f32.mrf.mxu0 }
  0xef   :  { %v254_v44 = vadd.f32 %v425_v41, %v362_v28  ;;  %v390_v45 = vmul.f32 -1.442695, %v298_v42 }
  0xf0   :  { %v427_v46 = vpop.f32.mrf.mxu0 }
  0xf1   :  { %v303_v47 = vadd.f32 %v439_v24, %v254_v44  ;;  %469 = vpow2.f32 %v390_v45  ;;  %v428_v48 = vadd.f32 %v427_v46, %v426_v43 }
  0xf3   :  { %v391_v49 = vmul.f32 -1.442695, %v303_v47  ;;  %v257_v50 = vadd.f32 %v428_v48, %v362_v28 }
  0xf5   :  { %471 = vpow2.f32 %v391_v49  ;;  %v306_v51 = vadd.f32 %v440_v31, %v257_v50 }
  0xf7   :  { %v392_v52 = vmul.f32 -1.442695, %v306_v51 }
  0xf9   :  { %473 = vpow2.f32 %v392_v52 }
  0xfa   :  { %v468_v53 = vpop.eup %467 }
  0xfb   :  { %v321_v54 = vadd.f32 1.0, %v468_v53 }
  0xfd   :  { %475 = vrcp.f32 %v321_v54 }
  0xfe   :  { %v470_v55 = vpop.eup %469 }
  0xff   :  { %v322_v56 = vadd.f32 1.0, %v470_v55 }
 0x101   :  { %477 = vrcp.f32 %v322_v56 }
 0x102   :  { %v472_v57 = vpop.eup %471 }
 0x103   :  { %v323_v58 = vadd.f32 1.0, %v472_v57 }
 0x105   :  { %479 = vrcp.f32 %v323_v58 }
 0x106   :  { %v474_v59 = vpop.eup %473 }
 0x107   :  { %v324_v60 = vadd.f32 1.0, %v474_v59 }
 0x109   :  { %481 = vrcp.f32 %v324_v60 }
 0x10a   :  { %v476_v61 = vpop.eup %475 }
 0x10b   :  { %v333_v62 = vmul.f32 %v476_v61, %v295_v35 }
 0x10d   :  { %v397_v63 = vpack.c.bf16 %v333_v62, %v333_v62 }
 0x10e   :  { %v478_v0 = vpop.eup %477 }
 0x10f   :  { %354 = vst.msk [vmem:[%s593_s3] sm:$0xf] %vm353_vm1, %v397_v63  ;;  %v334_v1 = vmul.f32 %v478_v0, %v298_v42 }
 0x111   :  { %v398_v2 = vpack.c.bf16 %v334_v1, %v334_v1 }
 0x112   :  { %v480_v3 = vpop.eup %479 }
 0x113   :  { %v335_v4 = vmul.f32 %v480_v3, %v303_v47  ;;  %355 = vst.msk [vmem:[%s593_s3 + $0x4] sm:$0xf] %vm353_vm1, %v398_v2 }
 0x115   :  { %v399_v5 = vpack.c.bf16 %v335_v4, %v335_v4 }
 0x116   :  { %v482_v6 = vpop.eup %481 }
 0x117   :  { %356 = vst.msk [vmem:[%s593_s3 + $0x8] sm:$0xf] %vm353_vm1, %v399_v5  ;;  %v336_v7 = vmul.f32 %v482_v6, %v306_v51 }
 0x119   :  { %v400_v8 = vpack.c.bf16 %v336_v7, %v336_v7 }
 0x11b   :  { %357 = vst.msk [vmem:[%s593_s3 + $0xc] sm:$0xf] %vm353_vm1, %v400_v8 }

// kernel: yolox_forward.22
= control target key start
LH: loop header
LB: loop body
LE: loop exit
PB: predicated region body
PF: predicated region fallthrough
CT: control target
= control target key end

     0   :  { %vm193_vm0 = vcmask 523264   ;;  %v45_v28 = vlaneseq  ;;  %vm457_vm13 = vcmask 1039360   ;;  %s930_s1 = inlined_call_operand.vmem [shape: bf16[192,255], index: 1, kind: input, shape index: {}]   ;;  %s931_s0 = inlined_call_operand.vmem [shape: bf16[32,192], index: 0, kind: input, shape index: {}]   ;;  %s932_s2 = inlined_call_operand.vmem [shape: f32[1,255], index: 2, kind: input, shape index: {}]   ;;  %s933_s3 = inlined_call_operand.vmem [shape: f32[32,255], index: 3, kind: output, shape index: {}]  }
   0x1   :  { %v531_v0 = vld [vmem:[%s930_s1 + $0x74] ss:$8 sps:$4 sm:$0xff]   ;;  %v533_v1 = vld [vmem:[%s930_s1 + $0x70] ss:$8 sps:$4 sm:$0xff]   ;;  %v534_v2 = vld [vmem:[%s930_s1 + $0x64] ss:$8 sps:$4 sm:$0xff]  }
   0x2   :  { %200 = vmatprep.subr.bf16.mxu0 %v531_v0  ;;  %507 = vmatprep.subr.bf16.mxu1 %v531_v0  ;;  %v536_v3 = vld [vmem:[%s930_s1 + $0x60] ss:$8 sps:$4 sm:$0xff]   ;;  %v537_v4 = vld [vmem:[%s930_s1 + $0x54] ss:$8 sps:$4 sm:$0xff]   ;;  %v539_v5 = vld [vmem:[%s930_s1 + $0x50] ss:$8 sps:$4 sm:$0xff]  }
   0x3   :  { %201 = vmatpush1.bf16.msra.mxu0 %v533_v1  ;;  %519 = vmatpush1.bf16.msra.mxu1 %v533_v1  ;;  %v540_v6 = vld [vmem:[%s930_s1 + $0x44] ss:$8 sps:$4 sm:$0xff]   ;;  %v542_v7 = vld [vmem:[%s930_s1 + $0x40] ss:$8 sps:$4 sm:$0xff]   ;;  %v543_v8 = vld [vmem:[%s930_s1 + $0x34] ss:$8 sps:$4 sm:$0xff]  }
   0x4   :  { %202 = vmatprep.subr.bf16.mxu0 %v534_v2  ;;  %508 = vmatprep.subr.bf16.mxu1 %v534_v2  ;;  %v545_v9 = vld [vmem:[%s930_s1 + $0x30] ss:$8 sps:$4 sm:$0xff]   ;;  %v546_v10 = vld [vmem:[%s930_s1 + $0x24] ss:$8 sps:$4 sm:$0xff]   ;;  %v572_v12 = vld [vmem:[%s931_s0 + $0x14] ss:$8 sps:$4 sm:$0xff]  }
   0x5   :  { %v569_v11 = vld [vmem:[%s931_s0 + $0x4] ss:$8 sps:$4 sm:$0xff]   ;;  %v548_v13 = vld [vmem:[%s930_s1 + $0x20] ss:$8 sps:$4 sm:$0xff]   ;;  %v549_v14 = vld [vmem:[%s930_s1 + $0x14] ss:$8 sps:$4 sm:$0xff]   ;;  %498 = vmatprep.mubr.msk.bf16.mxu1 %vm193_vm0, %v572_v12 }
   0x6   :  { %497 = vmatprep.mubr.msk.bf16.mxu0 %vm193_vm0, %v569_v11  ;;  %v551_v15 = vld [vmem:[%s930_s1 + $0x10] ss:$8 sps:$4 sm:$0xff]   ;;  %v552_v16 = vld [vmem:[%s930_s1 + $0x4] ss:$8 sps:$4 sm:$0xff]   ;;  %v554_v17 = vld [vmem:[%s930_s1] ss:$8 sps:$4 sm:$0xff]  }
   0x7   :  { %203 = vmatpush1.bf16.msra.mxu0 %v536_v3  ;;  %520 = vmatpush1.bf16.msra.mxu1 %v536_v3  ;;  %v555_v18 = vld [vmem:[%s930_s1 + $0xb4] ss:$8 sps:$4 sm:$0xff]   ;;  %v557_v19 = vld [vmem:[%s930_s1 + $0xb0] ss:$8 sps:$4 sm:$0xff]   ;;  %v558_v20 = vld [vmem:[%s930_s1 + $0xa4] ss:$8 sps:$4 sm:$0xff]  }
   0x8   :  { %204 = vmatprep.subr.bf16.mxu0 %v537_v4  ;;  %509 = vmatprep.subr.bf16.mxu1 %v537_v4  ;;  %v560_v21 = vld [vmem:[%s930_s1 + $0xa0] ss:$8 sps:$4 sm:$0xff]   ;;  %v561_v22 = vld [vmem:[%s930_s1 + $0x94] ss:$8 sps:$4 sm:$0xff]   ;;  %v563_v23 = vld [vmem:[%s930_s1 + $0x90] ss:$8 sps:$4 sm:$0xff]  }
   0x9   :  { %v564_v24 = vld [vmem:[%s930_s1 + $0x84] ss:$8 sps:$4 sm:$0xff]   ;;  %v566_v25 = vld [vmem:[%s930_s1 + $0x80] ss:$8 sps:$4 sm:$0xff]   ;;  %v570_v27 = vld [vmem:[%s931_s0 + $0x10] ss:$8 sps:$4 sm:$0xff]  }
   0xa   :  { %v567_v26 = vld [vmem:[%s931_s0] ss:$8 sps:$4 sm:$0xff]   ;;  %v254_v29 = vand.u32 127, %v45_v28  ;;  %v46_v30 = vshrl.u32 %v45_v28, 7 }
   0xb   :  { %205 = vmatpush1.bf16.msra.mxu0 %v539_v5  ;;  %521 = vmatpush1.bf16.msra.mxu1 %v539_v5  ;;  %v43_v42 = vld [vmem:[%s932_s2] sm:$0x3] }
   0xc   :  { %206 = vmatprep.subr.bf16.mxu0 %v540_v6  ;;  %510 = vmatprep.subr.bf16.mxu1 %v540_v6  ;;  %v256_v31 = vcvt.s32.f32 %v254_v29  ;;  %v255_v32 = vadd.s32 128, %v254_v29  ;;  %v278_v33 = vcvt.s32.f32 %v46_v30  ;;  %v270_v34 = vadd.s32 16, %v46_v30 }
   0xd   :  { %v47_v40 = vsub.s32 0, %v46_v30  ;;  %v728_v43 = vadd.s32 8, %v46_v30  ;;  %v730_v46 = vadd.s32 24, %v46_v30  ;;  %v51_v48 = vsub.s32 1, %v46_v30 }
   0xe   :  { %v259_v35 = vmul.f32 0.011764706, %v256_v31  ;;  %v257_v36 = vcvt.s32.f32 %v255_v32  ;;  %v283_v37 = vmul.f32 0.0625, %v278_v33  ;;  %v280_v38 = vcvt.s32.f32 %v270_v34 }
   0xf   :  { %207 = vmatpush1.bf16.msra.mxu0 %v542_v7  ;;  %522 = vmatpush1.bf16.msra.mxu1 %v542_v7  ;;  %v48_v49 = vrot.slane %v43_v42, %v47_v40  ;;  %v279_v51 = vcvt.s32.f32 %v728_v43  ;;  %v281_v54 = vcvt.s32.f32 %v730_v46  ;;  %v52_v58 = vrot.slane %v43_v42, %v51_v48 }
  0x10   :  { %208 = vmatprep.subr.bf16.mxu0 %v543_v8  ;;  %511 = vmatprep.subr.bf16.mxu1 %v543_v8  ;;  %v261_v39 = vfloor.f32 %v259_v35  ;;  %v260_v41 = vmul.f32 0.011764706, %v257_v36  ;;  %v287_v44 = vfloor.f32 %v283_v37  ;;  %v285_v45 = vmul.f32 0.0625, %v280_v38 }
  0x11   :  { %v284_v0 = vmul.f32 0.0625, %v279_v51  ;;  %v286_v4 = vmul.f32 0.0625, %v281_v54 }
  0x12   :  { %v263_v47 = vmul.f32 85.0, %v261_v39  ;;  %v262_v50 = vfloor.f32 %v260_v41  ;;  %v291_v52 = vmul.f32 16.0, %v287_v44  ;;  %v289_v53 = vfloor.f32 %v285_v45 }
  0x13   :  { %209 = vmatpush1.bf16.msra.mxu0 %v545_v9  ;;  %523 = vmatpush1.bf16.msra.mxu1 %v545_v9 }
  0x14   :  { %210 = vmatprep.subr.bf16.mxu0 %v546_v10  ;;  %512 = vmatprep.subr.bf16.mxu1 %v546_v10  ;;  %v734_v56 = vsub.f32 %v256_v31, %v263_v47  ;;  %v264_v61 = vmul.f32 85.0, %v262_v50  ;;  %v740_v1 = vsub.f32 %v278_v33, %v291_v52  ;;  %v293_v3 = vmul.f32 16.0, %v289_v53 }
  0x15   :  { %v288_v10 = vfloor.f32 %v284_v0 }
  0x16   :  { %vm352_vm1 = vcmp.ge.f32.partialorder %v734_v56, 2.0  ;;  %vm354_vm2 = vcmp.lt.f32.partialorder %v734_v56, 4.0  ;;  %v748_v8 = vsub.f32 %v257_v36, %v264_v61  ;;  %vm318_vm7 = vcmp.eq.f32.partialorder %v734_v56, 1.0 }
  0x17   :  { %211 = vmatpush1.bf16.msra.mxu0 %v548_v13  ;;  %524 = vmatpush1.bf16.msra.mxu1 %v548_v13  ;;  %vm751_vm3 = vmand %vm352_vm1, %vm354_vm2  ;;  %v755_v13 = vsub.f32 %v280_v38, %v293_v3  ;;  %vm316_vm8 = vcmp.eq.f32.partialorder %v734_v56, 0.0  ;;  %vm438_vm11 = vcmp.lt.f32.partialorder %v734_v56, 2.0 }
  0x18   :  { %212 = vmatprep.subr.bf16.mxu0 %v549_v14  ;;  %513 = vmatprep.subr.bf16.mxu1 %v549_v14  ;;  %vm353_vm4 = vcmp.ge.f32.partialorder %v748_v8, 2.0  ;;  %vm355_vm5 = vcmp.lt.f32.partialorder %v748_v8, 4.0  ;;  %vm319_vm9 = vcmp.eq.f32.partialorder %v748_v8, 1.0  ;;  %vm317_vm10 = vcmp.eq.f32.partialorder %v748_v8, 0.0 }
  0x19   :  { %vm774_vm6 = vmand %vm353_vm4, %vm355_vm5  ;;  %vm439_vm12 = vcmp.lt.f32.partialorder %v748_v8, 2.0 }
  0x1b   :  { %213 = vmatpush1.bf16.msra.mxu0 %v551_v15  ;;  %525 = vmatpush1.bf16.msra.mxu1 %v551_v15 }
  0x1c   :  { %214 = vmatprep.subr.bf16.mxu0 %v552_v16  ;;  %514 = vmatprep.subr.bf16.mxu1 %v552_v16  ;;  %v290_v16 = vfloor.f32 %v286_v4 }
  0x1f   :  { %215 = vmatpush1.bf16.msra.mxu0 %v554_v17  ;;  %526 = vmatpush1.bf16.msra.mxu1 %v554_v17 }
  0x20   :  { %224 = vmatprep.subr.bf16.mxu0 %v555_v18  ;;  %515 = vmatprep.subr.bf16.mxu1 %v555_v18  ;;  %v300_v18 = vmul.f32 0.25, %v740_v1 }
  0x23   :  { %225 = vmatpush2.bf16.msra.mxu0 %v557_v19  ;;  %527 = vmatpush2.bf16.msra.mxu1 %v557_v19 }
  0x24   :  { %226 = vmatprep.subr.bf16.mxu0 %v558_v20  ;;  %516 = vmatprep.subr.bf16.mxu1 %v558_v20 }
  0x27   :  { %227 = vmatpush2.bf16.msra.mxu0 %v560_v21  ;;  %528 = vmatpush2.bf16.msra.mxu1 %v560_v21 }
  0x28   :  { %228 = vmatprep.subr.bf16.mxu0 %v561_v22  ;;  %517 = vmatprep.subr.bf16.mxu1 %v561_v22  ;;  %v292_v22 = vmul.f32 16.0, %v288_v10 }
  0x2a   :  { %v782_v33 = vsub.f32 %v279_v51, %v292_v22 }
  0x2b   :  { %229 = vmatpush2.bf16.msra.mxu0 %v563_v23  ;;  %529 = vmatpush2.bf16.msra.mxu1 %v563_v23 }
  0x2c   :  { %230 = vmatprep.subr.bf16.mxu0 %v564_v24  ;;  %518 = vmatprep.subr.bf16.mxu1 %v564_v24  ;;  %v302_v24 = vmul.f32 0.25, %v755_v13  ;;  %v301_v45 = vmul.f32 0.25, %v782_v33 }
  0x2e   :  { %v306_v35 = vfloor.f32 %v302_v24 }
  0x2f   :  { %231 = vmatpush2.bf16.msra.mxu0 %v566_v25  ;;  %530 = vmatpush2.bf16.msra.mxu1 %v566_v25 }
  0x30   :  { %v310_v51 = vmul.f32 4.0, %v306_v35  ;;  %v324_v10 = vsel %vm318_vm7, %v306_v35, 0.0 }
  0x32   :  { %233 = vmatmul.mubr.bf16.vlgmr.msra.gmra.mxu0 %v567_v26  ;;  %243 = vmatmul.mubr.bf16.vlgmr.msra.gmra.mxu1 %v570_v27  ;;  %v294_v26 = vmul.f32 16.0, %v290_v16  ;;  %v304_v27 = vfloor.f32 %v300_v18  ;;  %v314_v4 = vsub.f32 %v755_v13, %v310_v51  ;;  %v325_v18 = vsel %vm319_vm9, %v306_v35, 0.0 }
  0x34   :  { %v788_v37 = vsub.f32 %v281_v54, %v294_v26  ;;  %v308_v39 = vmul.f32 4.0, %v304_v27  ;;  %v321_v16 = vsel %vm319_vm9, %v304_v27, 0.0  ;;  %v332_v26 = vsel %vm316_vm8, %v314_v4, %v324_v10 }
  0x36   :  { %v312_v50 = vsub.f32 %v740_v1, %v308_v39 }
  0xf2   :  { %v234_v55 = vpop.f32.mrf.mxu0  ;;  %v244_v57 = vpop.f32.mrf.mxu1 }
  0xf3   :  { %v736_v59 = vadd.f32 %v234_v55, %v48_v49  ;;  %v738_v60 = vadd.f32 %v244_v57, %v48_v49  ;;  %v320_v55 = vsel %vm318_vm7, %v304_v27, 0.0 }
  0xf4   :  { %v236_v62 = vpop.f32.mrf.mxu0  ;;  %v246_v63 = vpop.f32.mrf.mxu1 }
  0xf5   :  { %v499_v2 = vmul.f32 -1.442695, %v736_v59  ;;  %v503_v5 = vmul.f32 -1.442695, %v738_v60  ;;  %v746_v6 = vadd.f32 %v236_v62, %v52_v58  ;;  %v757_v14 = vadd.f32 %v246_v63, %v52_v58 }
  0xf6   :  { %v238_v7 = vpop.f32.mrf.mxu0  ;;  %v248_v11 = vpop.f32.mrf.mxu1  ;;  %v358_v21 = vsel %vm751_vm3, %v736_v59, 0.0  ;;  %v362_v31 = vsel %vm751_vm3, %v738_v60, 0.0  ;;  %v813_v62 = vfloor.f32 %v301_v45 }
  0xf7   :  { %573 = vpow2.f32 %v499_v2  ;;  %v500_v9 = vmul.f32 -1.442695, %v746_v6  ;;  %v759_v15 = vadd.f32 %v238_v7, %v48_v49  ;;  %v504_v19 = vmul.f32 -1.442695, %v757_v14 }
  0xf8   :  { %v240_v17 = vpop.f32.mrf.mxu0  ;;  %575 = vpow2.f32 %v503_v5  ;;  %v765_v20 = vadd.f32 %v248_v11, %v48_v49  ;;  %v250_v29 = vpop.f32.mrf.mxu1  ;;  %v366_v30 = vmul.f32 1.442695, %v358_v21  ;;  %v359_v36 = vsel %vm774_vm6, %v746_v6, 0.0 }
  0xf9   :  { %577 = vpow2.f32 %v500_v9  ;;  %v770_v23 = vadd.f32 %v240_v17, %v52_v58  ;;  %v501_v25 = vmul.f32 -1.442695, %v759_v15  ;;  %v790_v38 = vadd.f32 %v250_v29, %v52_v58 }
  0xfa   :  { %579 = vpow2.f32 %v504_v19  ;;  %v505_v32 = vmul.f32 -1.442695, %v765_v20  ;;  %v374_v40 = vmul.f32 1.442695, %v362_v31  ;;  %v363_v41 = vsel %vm774_vm6, %v757_v14, 0.0 }
  0xfb   :  { %581 = vpow2.f32 %v501_v25  ;;  %v502_v34 = vmul.f32 -1.442695, %v770_v23  ;;  %v506_v42 = vmul.f32 -1.442695, %v790_v38  ;;  %v368_v44 = vmul.f32 1.442695, %v359_v36 }
  0xfc   :  { %583 = vpow2.f32 %v505_v32  ;;  %v360_v46 = vsel %vm751_vm3, %v759_v15, 0.0  ;;  %v376_v48 = vmul.f32 1.442695, %v363_v41  ;;  %v303_v49 = vmul.f32 0.25, %v788_v37 }
  0xfd   :  { %585 = vpow2.f32 %v366_v30  ;;  %v370_v53 = vmul.f32 1.442695, %v360_v46  ;;  %v364_v54 = vsel %vm751_vm3, %v765_v20, 0.0  ;;  %v361_v58 = vsel %vm774_vm6, %v770_v23, 0.0 }
  0xfe   :  { %587 = vpow2.f32 %v502_v34  ;;  %v815_v63 = vfloor.f32 %v303_v49  ;;  %v378_v2 = vmul.f32 1.442695, %v364_v54  ;;  %v365_v3 = vsel %vm774_vm6, %v790_v38, 0.0 }
  0xff   :  { %589 = vpow2.f32 %v506_v42  ;;  %v372_v7 = vmul.f32 1.442695, %v361_v58  ;;  %v328_v9 = vsel %vm316_vm8, %v312_v50, %v320_v55  ;;  %v309_v17 = vmul.f32 4.0, %v813_v62 }
 0x100   :  { %591 = vpow2.f32 %v374_v40  ;;  %v380_v13 = vmul.f32 1.442695, %v365_v3  ;;  %v311_v21 = vmul.f32 4.0, %v815_v63  ;;  %v336_v25 = vadd.f32 %v328_v9, %v736_v59 }
 0x101   :  { %v329_v30 = vsel %vm317_vm10, %v312_v50, %v321_v16  ;;  %v333_v31 = vsel %vm317_vm10, %v314_v4, %v325_v18  ;;  %v313_v32 = vsub.f32 %v782_v33, %v309_v17  ;;  %v322_v59 = vsel %vm318_vm7, %v813_v62, 0.0 }
 0x102   :  { %v315_v35 = vsub.f32 %v788_v37, %v311_v21  ;;  %v340_v41 = vadd.f32 %v332_v26, %v738_v60  ;;  %v326_v33 = vsel %vm318_vm7, %v815_v63, 0.0  ;;  %v337_v46 = vadd.f32 %v329_v30, %v746_v6 }
 0x103   :  { %v341_v49 = vadd.f32 %v333_v31, %v757_v14  ;;  %v330_v50 = vsel %vm316_vm8, %v313_v32, %v322_v59  ;;  %v327_v14 = vsel %vm319_vm9, %v815_v63, 0.0 }
 0x104   :  { %v574_v43 = vpop.eup %573  ;;  %v334_v6 = vsel %vm316_vm8, %v315_v35, %v326_v33  ;;  %v335_v10 = vsel %vm317_vm10, %v315_v35, %v327_v14 }
 0x105   :  { %v414_v47 = vadd.f32 1.0, %v574_v43  ;;  %v576_v52 = vpop.eup %575  ;;  %v349_v3 = vmul.f32 8.0, %v341_v49 }
 0x106   :  { %v418_v57 = vadd.f32 1.0, %v576_v52  ;;  %v578_v61 = vpop.eup %577  ;;  %v348_v52 = vmul.f32 8.0, %v340_v41 }
 0x107   :  { %593 = vrcp.f32 %v414_v47  ;;  %v580_v0 = vpop.eup %579  ;;  %v415_v1 = vadd.f32 1.0, %v578_v61 }
 0x108   :  { %595 = vpow2.f32 %v368_v44  ;;  %v419_v5 = vadd.f32 1.0, %v580_v0  ;;  %v582_v11 = vpop.eup %581  ;;  %v344_v44 = vmul.f32 8.0, %v336_v25  ;;  %v345_v0 = vmul.f32 8.0, %v337_v46 }
 0x109   :  { %597 = vpow2.f32 %v376_v48  ;;  %v416_v19 = vadd.f32 1.0, %v582_v11  ;;  %v584_v22 = vpop.eup %583 }
 0x10a   :  { %599 = vrcp.f32 %v418_v57  ;;  %v586_v24 = vpop.eup %585  ;;  %v420_v27 = vadd.f32 1.0, %v584_v22 }
 0x10b   :  { %601 = vpow2.f32 %v370_v53  ;;  %v588_v29 = vpop.eup %587  ;;  %v382_v40 = vmul.f32 8.0, %v586_v24  ;;  %v323_v53 = vsel %vm319_vm9, %v813_v62, 0.0  ;;  %v338_v62 = vadd.f32 %v330_v50, %v759_v15 }
 0x10c   :  { %603 = vrcp.f32 %v415_v1  ;;  %v590_v34 = vpop.eup %589  ;;  %v417_v36 = vadd.f32 1.0, %v588_v29  ;;  %v331_v4 = vsel %vm317_vm10, %v313_v32, %v323_v53  ;;  %v342_v15 = vadd.f32 %v334_v6, %v765_v20 }
 0x10d   :  { %605 = vrcp.f32 %v419_v5  ;;  %v592_v39 = vpop.eup %591  ;;  %v421_v42 = vadd.f32 1.0, %v590_v34  ;;  %v346_v20 = vmul.f32 8.0, %v338_v62  ;;  %v339_v18 = vadd.f32 %v331_v4, %v770_v23 }
 0x10e   :  { %607 = vpow2.f32 %v378_v2  ;;  %v386_v60 = vmul.f32 8.0, %v592_v39  ;;  %v343_v24 = vadd.f32 %v335_v10, %v790_v38 }
 0x10f   :  { %609 = vpow2.f32 %v372_v7  ;;  %v347_v32 = vmul.f32 8.0, %v339_v18 }
 0x110   :  { %611 = vrcp.f32 %v416_v19  ;;  %v351_v35 = vmul.f32 8.0, %v343_v24 }
 0x111   :  { %613 = vpow2.f32 %v380_v13 }
 0x112   :  { %615 = vrcp.f32 %v420_v27  ;;  %v350_v27 = vmul.f32 8.0, %v342_v15 }
 0x113   :  { %617 = vrcp.f32 %v417_v36 }
 0x114   :  { %v594_v43 = vpop.eup %593  ;;  %619 = vrcp.f32 %v421_v42 }
 0x115   :  { %v596_v45 = vpop.eup %595  ;;  %v440_v37 = vsel %vm751_vm3, %v382_v40, %v594_v43 }
 0x116   :  { %v598_v47 = vpop.eup %597  ;;  %v448_v48 = vsel %vm438_vm11, %v344_v44, %v440_v37  ;;  %v383_v57 = vmul.f32 8.0, %v596_v45 }
 0x117   :  { %v600_v51 = vpop.eup %599  ;;  %456 = vst [vmem:[%s933_s3] sm:$0xff] %v448_v48  ;;  %v387_v1 = vmul.f32 8.0, %v598_v47 }
 0x118   :  { %v602_v54 = vpop.eup %601  ;;  %v444_v55 = vsel %vm751_vm3, %v386_v60, %v600_v51 }
 0x119   :  { %v604_v58 = vpop.eup %603  ;;  %v452_v61 = vsel %vm438_vm11, %v348_v52, %v444_v55  ;;  %v384_v17 = vmul.f32 8.0, %v602_v54 }
 0x11a   :  { %v606_v2 = vpop.eup %605  ;;  %461 = vst [vmem:[%s933_s3 + $0x20] sm:$0xff] %v452_v61  ;;  %v441_v63 = vsel %vm774_vm6, %v383_v57, %v604_v58 }
 0x11b   :  { %v608_v5 = vpop.eup %607  ;;  %v449_v7 = vsel %vm439_vm12, %v345_v0, %v441_v63  ;;  %v445_v9 = vsel %vm774_vm6, %v387_v1, %v606_v2 }
 0x11c   :  { %v610_v11 = vpop.eup %609  ;;  %458 = vst.msk [vmem:[%s933_s3 + $0x8] sm:$0xff] %vm457_vm13, %v449_v7  ;;  %v453_v16 = vsel %vm439_vm12, %v349_v3, %v445_v9  ;;  %v388_v22 = vmul.f32 8.0, %v608_v5 }
 0x11d   :  { %v612_v13 = vpop.eup %611  ;;  %462 = vst.msk [vmem:[%s933_s3 + $0x28] sm:$0xff] %vm457_vm13, %v453_v16  ;;  %v385_v23 = vmul.f32 8.0, %v610_v11 }
 0x11e   :  { %v614_v19 = vpop.eup %613  ;;  %v442_v21 = vsel %vm751_vm3, %v384_v17, %v612_v13 }
 0x11f   :  { %v616_v25 = vpop.eup %615  ;;  %v450_v26 = vsel %vm438_vm11, %v346_v20, %v442_v21  ;;  %v389_v34 = vmul.f32 8.0, %v614_v19 }
 0x120   :  { %459 = vst [vmem:[%s933_s3 + $0x10] sm:$0xff] %v450_v26  ;;  %v446_v29 = vsel %vm751_vm3, %v388_v22, %v616_v25  ;;  %v618_v30 = vpop.eup %617 }
 0x121   :  { %v454_v31 = vsel %vm438_vm11, %v350_v27, %v446_v29  ;;  %v620_v38 = vpop.eup %619  ;;  %v443_v59 = vsel %vm774_vm6, %v385_v23, %v618_v30 }
 0x122   :  { %463 = vst [vmem:[%s933_s3 + $0x30] sm:$0xff] %v454_v31  ;;  %v451_v12 = vsel %vm439_vm12, %v347_v32, %v443_v59  ;;  %v447_v36 = vsel %vm774_vm6, %v389_v34, %v620_v38 }
 0x123   :  { %460 = vst.msk [vmem:[%s933_s3 + $0x18] sm:$0xff] %vm457_vm13, %v451_v12  ;;  %v455_v56 = vsel %vm439_vm12, %v351_v35, %v447_v36 }
 0x124   :  { %464 = vst.msk [vmem:[%s933_s3 + $0x38] sm:$0xff] %vm457_vm13, %v455_v56 }

// kernel: yolox_forward.21
= control target key start
LH: loop header
LB: loop body
LE: loop exit
PB: predicated region body
PF: predicated region fallthrough
CT: control target
= control target key end

     0   :  { %vm761_vm0 = vcmask 785408   ;;  %vm1060_vm1 = vcmask 1043456   ;;  %vm1061_vm2 = vcmask 523268   ;;  %s1862_s1 = inlined_call_operand.vmem [shape: bf16[864,192], index: 1, kind: input, shape index: {}]   ;;  %s1863_s0 = inlined_call_operand.vmem [shape: bf16[32,864], index: 0, kind: input, shape index: {}]   ;;  %s1864_s2 = inlined_call_operand.vmem [shape: f32[1,192], index: 2, kind: input, shape index: {}]   ;;  %s1865_s3 = inlined_call_operand.vmem [shape: bf16[32,192], index: 3, kind: output, shape index: {}]  }
   0x1   :  { %v1212_v0 = vld [vmem:[%s1862_s1 + $0x74] ss:$8 sps:$4 sm:$0xff]   ;;  %v1214_v1 = vld [vmem:[%s1862_s1 + $0x70] ss:$8 sps:$4 sm:$0xff]   ;;  %v1218_v4 = vld [vmem:[%s1862_s1 + $0x64] ss:$8 sps:$4 sm:$0xff]  }
   0x2   :  { %768 = vmatprep.subr.bf16.mxu0 %v1212_v0  ;;  %v1215_v2 = vld [vmem:[%s1862_s1 + $0x174] ss:$8 sps:$4 sm:$0xff]   ;;  %v1217_v3 = vld [vmem:[%s1862_s1 + $0x170] ss:$8 sps:$4 sm:$0xff]   ;;  %v1220_v5 = vld [vmem:[%s1862_s1 + $0x60] ss:$8 sps:$4 sm:$0xff]  }
   0x3   :  { %769 = vmatpush1.bf16.msra.mxu0 %v1214_v1  ;;  %821 = vmatprep.subr.bf16.mxu1 %v1215_v2  ;;  %v1221_v6 = vld [vmem:[%s1862_s1 + $0x164] ss:$8 sps:$4 sm:$0xff]   ;;  %v1223_v7 = vld [vmem:[%s1862_s1 + $0x160] ss:$8 sps:$4 sm:$0xff]   ;;  %v1224_v8 = vld [vmem:[%s1862_s1 + $0x54] ss:$8 sps:$4 sm:$0xff]  }
   0x4   :  { %822 = vmatpush1.bf16.msra.mxu1 %v1217_v3  ;;  %770 = vmatprep.subr.bf16.mxu0 %v1218_v4  ;;  %v1226_v9 = vld [vmem:[%s1862_s1 + $0x50] ss:$8 sps:$4 sm:$0xff]   ;;  %v1227_v10 = vld [vmem:[%s1862_s1 + $0x154] ss:$8 sps:$4 sm:$0xff]   ;;  %v1230_v11 = vld [vmem:[%s1862_s1 + $0x44] ss:$8 sps:$4 sm:$0xff]  }
   0x5   :  { %823 = vmatprep.subr.bf16.mxu1 %v1221_v6  ;;  %v1229_v12 = vld [vmem:[%s1862_s1 + $0x150] ss:$8 sps:$4 sm:$0xff]   ;;  %v1233_v13 = vld [vmem:[%s1862_s1 + $0x144] ss:$8 sps:$4 sm:$0xff]   ;;  %v1232_v14 = vld [vmem:[%s1862_s1 + $0x40] ss:$8 sps:$4 sm:$0xff]  }
   0x6   :  { %v1236_v15 = vld [vmem:[%s1862_s1 + $0x34] ss:$8 sps:$4 sm:$0xff]   ;;  %v1235_v16 = vld [vmem:[%s1862_s1 + $0x140] ss:$8 sps:$4 sm:$0xff]   ;;  %v1238_v18 = vld [vmem:[%s1862_s1 + $0x30] ss:$8 sps:$4 sm:$0xff]  }
   0x7   :  { %771 = vmatpush1.bf16.msra.mxu0 %v1220_v5  ;;  %v1239_v17 = vld [vmem:[%s1862_s1 + $0x134] ss:$8 sps:$4 sm:$0xff]   ;;  %v1242_v19 = vld [vmem:[%s1862_s1 + $0x24] ss:$8 sps:$4 sm:$0xff]   ;;  %v1241_v20 = vld [vmem:[%s1862_s1 + $0x130] ss:$8 sps:$4 sm:$0xff]  }
   0x8   :  { %772 = vmatprep.subr.bf16.mxu0 %v1224_v8  ;;  %824 = vmatpush1.bf16.msra.mxu1 %v1223_v7  ;;  %v1245_v21 = vld [vmem:[%s1862_s1 + $0x124] ss:$8 sps:$4 sm:$0xff]   ;;  %v1244_v22 = vld [vmem:[%s1862_s1 + $0x20] ss:$8 sps:$4 sm:$0xff]   ;;  %v1248_v23 = vld [vmem:[%s1862_s1 + $0x14] ss:$8 sps:$4 sm:$0xff]  }
   0x9   :  { %825 = vmatprep.subr.bf16.mxu1 %v1227_v10  ;;  %v1247_v24 = vld [vmem:[%s1862_s1 + $0x120] ss:$8 sps:$4 sm:$0xff]   ;;  %v1251_v25 = vld [vmem:[%s1862_s1 + $0x114] ss:$8 sps:$4 sm:$0xff]   ;;  %v1250_v26 = vld [vmem:[%s1862_s1 + $0x10] ss:$8 sps:$4 sm:$0xff]  }
   0xa   :  { %v1254_v27 = vld [vmem:[%s1862_s1 + $0x4] ss:$8 sps:$4 sm:$0xff]   ;;  %v1253_v28 = vld [vmem:[%s1862_s1 + $0x110] ss:$8 sps:$4 sm:$0xff]   ;;  %v1256_v30 = vld [vmem:[%s1862_s1] ss:$8 sps:$4 sm:$0xff]  }
   0xb   :  { %773 = vmatpush1.bf16.msra.mxu0 %v1226_v9  ;;  %v1257_v29 = vld [vmem:[%s1862_s1 + $0x104] ss:$8 sps:$4 sm:$0xff]   ;;  %v1260_v31 = vld [vmem:[%s1862_s1 + $0xf4] ss:$8 sps:$4 sm:$0xff]   ;;  %v1259_v32 = vld [vmem:[%s1862_s1 + $0x100] ss:$8 sps:$4 sm:$0xff]  }
   0xc   :  { %774 = vmatprep.subr.bf16.mxu0 %v1230_v11  ;;  %826 = vmatpush1.bf16.msra.mxu1 %v1229_v12  ;;  %v1263_v33 = vld [vmem:[%s1862_s1 + $0x1f4] ss:$8 sps:$4 sm:$0xff]   ;;  %v1262_v34 = vld [vmem:[%s1862_s1 + $0xf0] ss:$8 sps:$4 sm:$0xff]   ;;  %v1266_v35 = vld [vmem:[%s1862_s1 + $0xe4] ss:$8 sps:$4 sm:$0xff]  }
   0xd   :  { %827 = vmatprep.subr.bf16.mxu1 %v1233_v13  ;;  %v1265_v36 = vld [vmem:[%s1862_s1 + $0x1f0] ss:$8 sps:$4 sm:$0xff]   ;;  %v1269_v37 = vld [vmem:[%s1862_s1 + $0x1e4] ss:$8 sps:$4 sm:$0xff]   ;;  %v1268_v38 = vld [vmem:[%s1862_s1 + $0xe0] ss:$8 sps:$4 sm:$0xff]  }
   0xe   :  { %v1272_v39 = vld [vmem:[%s1862_s1 + $0xd4] ss:$8 sps:$4 sm:$0xff]   ;;  %v1271_v40 = vld [vmem:[%s1862_s1 + $0x1e0] ss:$8 sps:$4 sm:$0xff]   ;;  %v1274_v42 = vld [vmem:[%s1862_s1 + $0xd0] ss:$8 sps:$4 sm:$0xff]  }
   0xf   :  { %775 = vmatpush1.bf16.msra.mxu0 %v1232_v14  ;;  %v1275_v41 = vld [vmem:[%s1862_s1 + $0x1d4] ss:$8 sps:$4 sm:$0xff]   ;;  %v1278_v43 = vld [vmem:[%s1862_s1 + $0xc4] ss:$8 sps:$4 sm:$0xff]   ;;  %v1277_v44 = vld [vmem:[%s1862_s1 + $0x1d0] ss:$8 sps:$4 sm:$0xff]  }
  0x10   :  { %776 = vmatprep.subr.bf16.mxu0 %v1236_v15  ;;  %828 = vmatpush1.bf16.msra.mxu1 %v1235_v16  ;;  %v1281_v45 = vld [vmem:[%s1862_s1 + $0x1c4] ss:$8 sps:$4 sm:$0xff]   ;;  %v1280_v46 = vld [vmem:[%s1862_s1 + $0xc0] ss:$8 sps:$4 sm:$0xff]   ;;  %v1284_v48 = vld [vmem:[%s1862_s1 + $0xb4] ss:$8 sps:$4 sm:$0xff]  }
  0x11   :  { %829 = vmatprep.subr.bf16.mxu1 %v1239_v17  ;;  %v1309_v47 = vld [vmem:[%s1863_s0 + $0x4] ss:$28 sps:$4 sm:$0xff]   ;;  %v1287_v50 = vld [vmem:[%s1862_s1 + $0x1b4] ss:$8 sps:$4 sm:$0xff]   ;;  %v1316_v51 = vld [vmem:[%s1863_s0 + $0xc] ss:$28 sps:$4 sm:$0xff]  }
  0x12   :  { %v1283_v49 = vld [vmem:[%s1862_s1 + $0x1c0] ss:$8 sps:$4 sm:$0xff]   ;;  %800 = vmatprep.mubr.bf16.mxu0 %v1309_v47  ;;  %v1286_v52 = vld [vmem:[%s1862_s1 + $0xb0] ss:$8 sps:$4 sm:$0xff]   ;;  %v1290_v53 = vld [vmem:[%s1862_s1 + $0xa4] ss:$8 sps:$4 sm:$0xff]   ;;  %853 = vmatprep.mubr.bf16.mxu1 %v1316_v51 }
  0x13   :  { %777 = vmatpush1.bf16.msra.mxu0 %v1238_v18  ;;  %v1289_v54 = vld [vmem:[%s1862_s1 + $0x1b0] ss:$8 sps:$4 sm:$0xff]   ;;  %v1293_v55 = vld [vmem:[%s1862_s1 + $0x1a4] ss:$8 sps:$4 sm:$0xff]   ;;  %v1292_v56 = vld [vmem:[%s1862_s1 + $0xa0] ss:$8 sps:$4 sm:$0xff]  }
  0x14   :  { %778 = vmatprep.subr.bf16.mxu0 %v1242_v19  ;;  %830 = vmatpush1.bf16.msra.mxu1 %v1241_v20  ;;  %v1296_v57 = vld [vmem:[%s1862_s1 + $0x94] ss:$8 sps:$4 sm:$0xff]   ;;  %v1295_v58 = vld [vmem:[%s1862_s1 + $0x1a0] ss:$8 sps:$4 sm:$0xff]   ;;  %v1298_v60 = vld [vmem:[%s1862_s1 + $0x90] ss:$8 sps:$4 sm:$0xff]  }
  0x15   :  { %831 = vmatprep.subr.bf16.mxu1 %v1245_v21  ;;  %v1299_v59 = vld [vmem:[%s1862_s1 + $0x194] ss:$8 sps:$4 sm:$0xff]   ;;  %v1302_v61 = vld [vmem:[%s1862_s1 + $0x84] ss:$8 sps:$4 sm:$0xff]   ;;  %v1301_v62 = vld [vmem:[%s1862_s1 + $0x190] ss:$8 sps:$4 sm:$0xff]  }
  0x16   :  { %v1305_v63 = vld [vmem:[%s1862_s1 + $0x184] ss:$8 sps:$4 sm:$0xff]   ;;  %v1304_v0 = vld [vmem:[%s1862_s1 + $0x80] ss:$8 sps:$4 sm:$0xff]   ;;  %v1313_v1 = vld [vmem:[%s1862_s1 + $0x274] ss:$8 sps:$4 sm:$0xff]  }
  0x17   :  { %779 = vmatpush1.bf16.msra.mxu0 %v1244_v22  ;;  %v1310_v2 = vld [vmem:[%s1862_s1 + $0x180] ss:$8 sps:$4 sm:$0xff]   ;;  %v1346_v4 = vld [vmem:[%s1862_s1 + $0x354] ss:$8 sps:$4 sm:$0xff]   ;;  %v1311_v5 = vld [vmem:[%s1862_s1 + $0x270] ss:$8 sps:$4 sm:$0xff]  }
  0x18   :  { %780 = vmatprep.subr.bf16.mxu0 %v1248_v23  ;;  %832 = vmatpush1.bf16.msra.mxu1 %v1247_v24  ;;  %v1307_v3 = vld [vmem:[%s1863_s0] ss:$28 sps:$4 sm:$0xff]   ;;  %v1314_v6 = vld [vmem:[%s1863_s0 + $0x8] ss:$28 sps:$4 sm:$0xff]   ;;  %v1344_v8 = vld [vmem:[%s1862_s1 + $0x350] ss:$8 sps:$4 sm:$0xff]  }
  0x19   :  { %833 = vmatprep.subr.bf16.mxu1 %v1251_v25  ;;  %v1319_v7 = vld [vmem:[%s1862_s1 + $0x264] ss:$8 sps:$4 sm:$0xff]   ;;  %v1317_v9 = vld [vmem:[%s1862_s1 + $0x260] ss:$8 sps:$4 sm:$0xff]   ;;  %v1322_v11 = vld [vmem:[%s1862_s1 + $0x254] ss:$8 sps:$4 sm:$0xff]  }
  0x1a   :  { %v1352_v10 = vld [vmem:[%s1862_s1 + $0x344] ss:$8 sps:$4 sm:$0xff]   ;;  %v1350_v12 = vld [vmem:[%s1862_s1 + $0x340] ss:$8 sps:$4 sm:$0xff]   ;;  %v1365_v13 = vld [vmem:[%s1863_s0 + $0x3c] ss:$28 sps:$4 sm:$0xff]  }
  0x1b   :  { %781 = vmatpush1.bf16.msra.mxu0 %v1250_v26  ;;  %v1358_v14 = vld [vmem:[%s1862_s1 + $0x334] ss:$8 sps:$4 sm:$0xff]   ;;  %v1368_v16 = vld [vmem:[%s1863_s0 + $0x44] ss:$28 sps:$4 sm:$0xff]   ;;  %v1320_v17 = vld [vmem:[%s1862_s1 + $0x250] ss:$8 sps:$4 sm:$0xff]  }
  0x1c   :  { %782 = vmatprep.subr.bf16.mxu0 %v1254_v27  ;;  %834 = vmatpush1.bf16.msra.mxu1 %v1253_v28  ;;  %v1367_v15 = vld [vmem:[%s1863_s0 + $0x38] ss:$28 sps:$4 sm:$0xff]   ;;  %v1325_v18 = vld [vmem:[%s1862_s1 + $0x244] ss:$8 sps:$4 sm:$0xff]   ;;  %v1370_v19 = vld [vmem:[%s1863_s0 + $0x40] ss:$28 sps:$4 sm:$0xff]  }
  0x1d   :  { %835 = vmatprep.subr.bf16.mxu1 %v1257_v29  ;;  %v1356_v20 = vld [vmem:[%s1862_s1 + $0x330] ss:$8 sps:$4 sm:$0xff]   ;;  %v1364_v21 = vld [vmem:[%s1862_s1 + $0x324] ss:$8 sps:$4 sm:$0xff]   ;;  %v1323_v22 = vld [vmem:[%s1862_s1 + $0x240] ss:$8 sps:$4 sm:$0xff]  }
  0x1e   :  { %v1328_v23 = vld [vmem:[%s1862_s1 + $0x234] ss:$8 sps:$4 sm:$0xff]   ;;  %v1362_v24 = vld [vmem:[%s1862_s1 + $0x320] ss:$8 sps:$4 sm:$0xff]   ;;  %v1426_v25 = vmov 0   ;;  %vm1835_vm3 = vmor %vm1061_vm2, %vm1060_vm1 }
  0x1f   :  { %783 = vmatpush1.bf16.msra.mxu0 %v1256_v30  ;;  %v1376_v26 = vld [vmem:[%s1862_s1 + $0x314] ss:$8 sps:$4 sm:$0xff]   ;;  %v1326_v27 = vld [vmem:[%s1862_s1 + $0x230] ss:$8 sps:$4 sm:$0xff]   ;;  %v1331_v29 = vld [vmem:[%s1862_s1 + $0x224] ss:$8 sps:$4 sm:$0xff]  }
  0x20   :  { %784 = vmatprep.subr.bf16.mxu0 %v1260_v31  ;;  %836 = vmatpush1.bf16.msra.mxu1 %v1259_v32  ;;  %v1389_v28 = vld [vmem:[%s1863_s0 + $0x14] ss:$28 sps:$4 sm:$0xff]   ;;  %v1382_v31 = vld [vmem:[%s1862_s1 + $0x304] ss:$8 sps:$4 sm:$0xff]   ;;  %v1329_v32 = vld [vmem:[%s1862_s1 + $0x220] ss:$8 sps:$4 sm:$0xff]  }
  0x21   :  { %837 = vmatprep.subr.bf16.mxu1 %v1263_v33  ;;  %v1374_v30 = vld [vmem:[%s1862_s1 + $0x310] ss:$8 sps:$4 sm:$0xff]   ;;  %v1334_v33 = vld [vmem:[%s1862_s1 + $0x214] ss:$8 sps:$4 sm:$0xff]   ;;  %v1353_v47 = vld [vmem:[%s1862_s1 + $0x2c0] ss:$8 sps:$4 sm:$0xff]  }
  0x22   :  { %v1371_v51 = vld [vmem:[%s1862_s1 + $0x2a0] ss:$8 sps:$4 sm:$0xff]  }
  0x23   :  { %785 = vmatpush2.bf16.msra.mxu0 %v1262_v34  ;;  %v1380_v34 = vld [vmem:[%s1862_s1 + $0x300] ss:$8 sps:$4 sm:$0xff]  }
  0x24   :  { %786 = vmatprep.subr.bf16.mxu0 %v1266_v35  ;;  %838 = vmatpush2.bf16.msra.mxu1 %v1265_v36  ;;  %v1332_v35 = vld [vmem:[%s1862_s1 + $0x210] ss:$8 sps:$4 sm:$0xff]   ;;  %v1337_v36 = vld [vmem:[%s1862_s1 + $0x204] ss:$8 sps:$4 sm:$0xff]  }
  0x25   :  { %839 = vmatprep.subr.bf16.mxu1 %v1269_v37  ;;  %v1386_v37 = vld [vmem:[%s1863_s0 + $0x18] ss:$28 sps:$4 sm:$0xff]  }
  0x27   :  { %787 = vmatpush2.bf16.msra.mxu0 %v1268_v38  ;;  %v1335_v38 = vld [vmem:[%s1862_s1 + $0x200] ss:$8 sps:$4 sm:$0xff]  }
  0x28   :  { %788 = vmatprep.subr.bf16.mxu0 %v1272_v39  ;;  %840 = vmatpush2.bf16.msra.mxu1 %v1271_v40  ;;  %v1340_v39 = vld [vmem:[%s1862_s1 + $0x2f4] ss:$8 sps:$4 sm:$0xff]   ;;  %v1338_v40 = vld [vmem:[%s1862_s1 + $0x2f0] ss:$8 sps:$4 sm:$0xff]  }
  0x29   :  { %841 = vmatprep.subr.bf16.mxu1 %v1275_v41  ;;  %v1343_v41 = vld [vmem:[%s1862_s1 + $0x2e4] ss:$8 sps:$4 sm:$0xff]  }
  0x2b   :  { %789 = vmatpush2.bf16.msra.mxu0 %v1274_v42  ;;  %v1390_v42 = vld [vmem:[%s1863_s0 + $0x50] ss:$28 sps:$4 sm:$0xff]  }
  0x2c   :  { %790 = vmatprep.subr.bf16.mxu0 %v1278_v43  ;;  %842 = vmatpush2.bf16.msra.mxu1 %v1277_v44  ;;  %v1341_v43 = vld [vmem:[%s1862_s1 + $0x2e0] ss:$8 sps:$4 sm:$0xff]   ;;  %v1349_v44 = vld [vmem:[%s1862_s1 + $0x2d4] ss:$8 sps:$4 sm:$0xff]  }
  0x2d   :  { %843 = vmatprep.subr.bf16.mxu1 %v1281_v45  ;;  %v1347_v45 = vld [vmem:[%s1862_s1 + $0x2d0] ss:$8 sps:$4 sm:$0xff]  }
  0x2f   :  { %791 = vmatpush2.bf16.msra.mxu0 %v1280_v46  ;;  %v1355_v46 = vld [vmem:[%s1862_s1 + $0x2c4] ss:$8 sps:$4 sm:$0xff]  }
  0x30   :  { %792 = vmatprep.subr.bf16.mxu0 %v1284_v48  ;;  %844 = vmatpush2.bf16.msra.mxu1 %v1283_v49  ;;  %v1361_v48 = vld [vmem:[%s1862_s1 + $0x2b4] ss:$8 sps:$4 sm:$0xff]   ;;  %v1359_v49 = vld [vmem:[%s1862_s1 + $0x2b0] ss:$8 sps:$4 sm:$0xff]  }
  0x31   :  { %845 = vmatprep.subr.bf16.mxu1 %v1287_v50  ;;  %v1373_v50 = vld [vmem:[%s1862_s1 + $0x2a4] ss:$8 sps:$4 sm:$0xff]  }
  0x33   :  { %793 = vmatpush2.bf16.msra.mxu0 %v1286_v52  ;;  %v1379_v52 = vld [vmem:[%s1862_s1 + $0x294] ss:$8 sps:$4 sm:$0xff]  }
  0x34   :  { %794 = vmatprep.subr.bf16.mxu0 %v1290_v53  ;;  %846 = vmatpush2.bf16.msra.mxu1 %v1289_v54  ;;  %v1377_v53 = vld [vmem:[%s1862_s1 + $0x290] ss:$8 sps:$4 sm:$0xff]   ;;  %v1385_v54 = vld [vmem:[%s1862_s1 + $0x284] ss:$8 sps:$4 sm:$0xff]  }
  0x35   :  { %847 = vmatprep.subr.bf16.mxu1 %v1293_v55  ;;  %v1383_v55 = vld [vmem:[%s1862_s1 + $0x280] ss:$8 sps:$4 sm:$0xff]  }
  0x37   :  { %795 = vmatpush2.bf16.msra.mxu0 %v1292_v56  ;;  %v1387_v56 = vld [vmem:[%s1863_s0 + $0x10] ss:$28 sps:$4 sm:$0xff]  }
  0x38   :  { %796 = vmatprep.subr.bf16.mxu0 %v1296_v57  ;;  %848 = vmatpush2.bf16.msra.mxu1 %v1295_v58  ;;  %v1391_v57 = vld [vmem:[%s1863_s0 + $0x4c] ss:$28 sps:$4 sm:$0xff]  }
  0x39   :  { %849 = vmatprep.subr.bf16.mxu1 %v1299_v59  ;;  %v1393_v58 = vld [vmem:[%s1863_s0 + $0x48] ss:$28 sps:$4 sm:$0xff]  }
  0x3b   :  { %797 = vmatpush2.bf16.msra.mxu0 %v1298_v60 }
  0x3c   :  { %798 = vmatprep.subr.bf16.mxu0 %v1302_v61  ;;  %850 = vmatpush2.bf16.msra.mxu1 %v1301_v62 }
  0x3d   :  { %851 = vmatprep.subr.bf16.mxu1 %v1305_v63 }
  0x3f   :  { %799 = vmatpush2.bf16.msra.mxu0 %v1304_v0 }
  0x40   :  { %874 = vmatprep.subr.bf16.mxu0 %v1313_v1  ;;  %852 = vmatpush2.bf16.msra.mxu1 %v1310_v2 }
  0x41   :  { %931 = vmatprep.subr.bf16.mxu1 %v1346_v4 }
  0x42   :  { %801 = vmatmul.mubr.bf16.vlgmr.msra.gmra.mxu0 %v1307_v3  ;;  %v141_v3 = vlaneseq }
  0x43   :  { %875 = vmatpush1.bf16.msra.mxu0 %v1311_v5  ;;  %854 = vmatmul.mubr.bf16.vlgmr.msra.gmra.mxu1 %v1314_v6 }
  0x44   :  { %876 = vmatprep.subr.bf16.mxu0 %v1319_v7  ;;  %932 = vmatpush1.bf16.msra.mxu1 %v1344_v8  ;;  %v142_v6 = vshrl.u32 %v141_v3, 7 }
  0x45   :  { %933 = vmatprep.subr.bf16.mxu1 %v1352_v10  ;;  %810 = vmatprep.mubr.bf16.mxu0 %v1365_v13 }
  0x46   :  { %863 = vmatprep.mubr.bf16.mxu1 %v1368_v16  ;;  %v143_v10 = vsub.s32 0, %v142_v6  ;;  %v147_v13 = vsub.s32 1, %v142_v6 }
  0x47   :  { %877 = vmatpush1.bf16.msra.mxu0 %v1317_v9 }
  0x48   :  { %878 = vmatprep.subr.bf16.mxu0 %v1322_v11  ;;  %934 = vmatpush1.bf16.msra.mxu1 %v1350_v12  ;;  %v139_v11 = vld [vmem:[%s1864_s2] sm:$0x3] }
  0x49   :  { %935 = vmatprep.subr.bf16.mxu1 %v1358_v14 }
  0x4a   :  { %811 = vmatmul.mubr.bf16.gmra.mxu0 %v1367_v15  ;;  %v144_v15 = vrot.slane %v139_v11, %v143_v10 }
  0x4b   :  { %879 = vmatpush1.bf16.msra.mxu0 %v1320_v17  ;;  %864 = vmatmul.mubr.bf16.gmra.mxu1 %v1370_v19  ;;  %v148_v17 = vrot.slane %v139_v11, %v147_v13 }
  0x4c   :  { %880 = vmatprep.subr.bf16.mxu0 %v1325_v18  ;;  %936 = vmatpush1.bf16.msra.mxu1 %v1356_v20 }
  0x4d   :  { %959 = vmatprep.mubr.bf16.mxu1 %v1426_v25  ;;  %937 = vmatprep.subr.bf16.mxu1 %v1364_v21 }
  0x4e   :  { %906 = vmatprep.mubr.bf16.mxu0 %v1389_v28 }
  0x4f   :  { %881 = vmatpush1.bf16.msra.mxu0 %v1323_v22 }
  0x50   :  { %882 = vmatprep.subr.bf16.mxu0 %v1328_v23  ;;  %938 = vmatpush1.bf16.msra.mxu1 %v1362_v24 }
  0x51   :  { %939 = vmatprep.subr.bf16.mxu1 %v1376_v26 }
  0x53   :  { %883 = vmatpush1.bf16.msra.mxu0 %v1326_v27 }
  0x54   :  { %884 = vmatprep.subr.bf16.mxu0 %v1331_v29  ;;  %940 = vmatpush1.bf16.msra.mxu1 %v1374_v30 }
  0x55   :  { %941 = vmatprep.subr.bf16.mxu1 %v1382_v31 }
  0x57   :  { %885 = vmatpush1.bf16.msra.mxu0 %v1329_v32 }
  0x58   :  { %886 = vmatprep.subr.bf16.mxu0 %v1334_v33  ;;  %942 = vmatpush1.bf16.msra.mxu1 %v1380_v34 }
  0x5b   :  { %887 = vmatpush1.bf16.msra.mxu0 %v1332_v35  ;;  %1193 = vmatmul.mubr.msk.bf16.vlgmr.msra.gmra.mxu1 %vm761_vm0, %v1386_v37 }
  0x5c   :  { %888 = vmatprep.subr.bf16.mxu0 %v1337_v36  ;;  %969 = vmatprep.mubr.bf16.mxu1 %v1426_v25 }
  0x5f   :  { %889 = vmatpush1.bf16.msra.mxu0 %v1335_v38 }
  0x60   :  { %890 = vmatprep.subr.bf16.mxu0 %v1340_v39 }
  0x63   :  { %891 = vmatpush2.bf16.msra.mxu0 %v1338_v40  ;;  %1194 = vmatmul.mubr.msk.bf16.gmra.mxu1 %vm761_vm0, %v1390_v42 }
  0x64   :  { %892 = vmatprep.subr.bf16.mxu0 %v1343_v41 }
  0x67   :  { %893 = vmatpush2.bf16.msra.mxu0 %v1341_v43 }
  0x68   :  { %894 = vmatprep.subr.bf16.mxu0 %v1349_v44 }
  0x6b   :  { %895 = vmatpush2.bf16.msra.mxu0 %v1347_v45 }
  0x6c   :  { %896 = vmatprep.subr.bf16.mxu0 %v1355_v46 }
  0x6f   :  { %897 = vmatpush2.bf16.msra.mxu0 %v1353_v47 }
  0x70   :  { %898 = vmatprep.subr.bf16.mxu0 %v1361_v48 }
  0x73   :  { %899 = vmatpush2.bf16.msra.mxu0 %v1359_v49 }
  0x74   :  { %900 = vmatprep.subr.bf16.mxu0 %v1373_v50 }
  0x77   :  { %901 = vmatpush2.bf16.msra.mxu0 %v1371_v51 }
  0x78   :  { %902 = vmatprep.subr.bf16.mxu0 %v1379_v52 }
  0x7b   :  { %903 = vmatpush2.bf16.msra.mxu0 %v1377_v53 }
  0x7c   :  { %904 = vmatprep.subr.bf16.mxu0 %v1385_v54 }
  0x7f   :  { %905 = vmatpush2.bf16.msra.mxu0 %v1383_v55 }
  0x82   :  { %907 = vmatmul.mubr.bf16.vlgmr.msra.gmra.mxu0 %v1387_v56 }
  0x83   :  { %916 = vmatprep.mubr.bf16.mxu0 %v1391_v57 }
  0x8a   :  { %917 = vmatmul.mubr.bf16.gmra.mxu0 %v1393_v58 }
 0x102   :  { %v802_v63 = vpop.f32.mrf.mxu0 }
 0x103   :  { %v855_v59 = vpop.f32.mrf.mxu1  ;;  %v803_v19 = vadd.f32 %v802_v63, %v144_v15 }
 0x104   :  { %v804_v1 = vpop.f32.mrf.mxu0 }
 0x105   :  { %v857_v60 = vpop.f32.mrf.mxu1  ;;  %v805_v21 = vadd.f32 %v804_v1, %v148_v17  ;;  %v856_v23 = vadd.f32 %v855_v59, %v803_v19 }
 0x106   :  { %v806_v4 = vpop.f32.mrf.mxu0 }
 0x107   :  { %v859_v61 = vpop.f32.mrf.mxu1  ;;  %v807_v24 = vadd.f32 %v806_v4, %v144_v15  ;;  %v858_v27 = vadd.f32 %v857_v60, %v805_v21 }
 0x108   :  { %v808_v7 = vpop.f32.mrf.mxu0 }
 0x109   :  { %v861_v62 = vpop.f32.mrf.mxu1  ;;  %v809_v28 = vadd.f32 %v808_v7, %v148_v17  ;;  %v860_v32 = vadd.f32 %v859_v61, %v807_v24 }
 0x10a   :  { %v812_v9 = vpop.f32.mrf.mxu0 }
 0x10b   :  { %v865_v0 = vpop.f32.mrf.mxu1  ;;  %v813_v30 = vadd.f32 %v812_v9, %v144_v15  ;;  %v862_v38 = vadd.f32 %v861_v62, %v809_v28 }
 0x10c   :  { %v814_v14 = vpop.f32.mrf.mxu0 }
 0x10d   :  { %v867_v2 = vpop.f32.mrf.mxu1  ;;  %v815_v35 = vadd.f32 %v814_v14, %v148_v17  ;;  %v866_v42 = vadd.f32 %v865_v0, %v813_v30 }
 0x10e   :  { %v816_v18 = vpop.f32.mrf.mxu0 }
 0x10f   :  { %v869_v5 = vpop.f32.mrf.mxu1  ;;  %v817_v43 = vadd.f32 %v816_v18, %v144_v15  ;;  %v868_v48 = vadd.f32 %v867_v2, %v815_v35 }
 0x110   :  { %v818_v22 = vpop.f32.mrf.mxu0 }
 0x111   :  { %v871_v8 = vpop.f32.mrf.mxu1  ;;  %v819_v49 = vadd.f32 %v818_v22, %v148_v17  ;;  %v870_v55 = vadd.f32 %v869_v5, %v817_v43 }
 0x113   :  { %v872_v60 = vadd.f32 %v871_v8, %v819_v49 }
 0x11b   :  { %v961_v12 = vpop.f32.mrf.mxu1 }
 0x11d   :  { %v963_v16 = vpop.f32.mrf.mxu1 }
 0x11f   :  { %v965_v20 = vpop.f32.mrf.mxu1 }
 0x121   :  { %v967_v26 = vpop.f32.mrf.mxu1 }
 0x123   :  { %v971_v37 = vpop.f32.mrf.mxu1 }
 0x125   :  { %v973_v50 = vpop.f32.mrf.mxu1 }
 0x127   :  { %v975_v61 = vpop.f32.mrf.mxu1 }
 0x129   :  { %v977_v6 = vpop.f32.mrf.mxu1 }
 0x142   :  { %v908_v25 = vpop.f32.mrf.mxu0 }
 0x143   :  { %v909_v29 = vadd.f32 %v908_v25, %v856_v23 }
 0x144   :  { %v910_v31 = vpop.f32.mrf.mxu0 }
 0x145   :  { %v1818_v33 = vadd.f32 %v961_v12, %v909_v29  ;;  %v911_v34 = vadd.f32 %v910_v31, %v858_v27 }
 0x146   :  { %v912_v36 = vpop.f32.mrf.mxu0 }
 0x147   :  { %v1195_v39 = vmul.f32 -1.442695, %v1818_v33  ;;  %v1821_v40 = vadd.f32 %v963_v16, %v911_v34  ;;  %v913_v41 = vadd.f32 %v912_v36, %v860_v32 }
 0x148   :  { %v914_v44 = vpop.f32.mrf.mxu0 }
 0x149   :  { %1394 = vpow2.f32 %v1195_v39  ;;  %v1196_v45 = vmul.f32 -1.442695, %v1821_v40  ;;  %v1824_v46 = vadd.f32 %v965_v20, %v913_v41  ;;  %v915_v47 = vadd.f32 %v914_v44, %v862_v38 }
 0x14a   :  { %v918_v51 = vpop.f32.mrf.mxu0 }
 0x14b   :  { %1396 = vpow2.f32 %v1196_v45  ;;  %v1197_v52 = vmul.f32 -1.442695, %v1824_v46  ;;  %v1827_v53 = vadd.f32 %v967_v26, %v915_v47  ;;  %v919_v54 = vadd.f32 %v918_v51, %v866_v42 }
 0x14c   :  { %v920_v56 = vpop.f32.mrf.mxu0 }
 0x14d   :  { %1398 = vpow2.f32 %v1197_v52  ;;  %v1198_v57 = vmul.f32 -1.442695, %v1827_v53  ;;  %v1830_v58 = vadd.f32 %v971_v37, %v919_v54  ;;  %v921_v59 = vadd.f32 %v920_v56, %v868_v48 }
 0x14e   :  { %v922_v62 = vpop.f32.mrf.mxu0 }
 0x14f   :  { %1400 = vpow2.f32 %v1198_v57  ;;  %v1199_v63 = vmul.f32 -1.442695, %v1830_v58  ;;  %v974_v0 = vadd.f32 %v973_v50, %v921_v59  ;;  %v923_v1 = vadd.f32 %v922_v62, %v870_v55 }
 0x150   :  { %v924_v2 = vpop.f32.mrf.mxu0 }
 0x151   :  { %1402 = vpow2.f32 %v1199_v63  ;;  %v1200_v3 = vmul.f32 -1.442695, %v974_v0  ;;  %v976_v4 = vadd.f32 %v975_v61, %v923_v1  ;;  %v925_v5 = vadd.f32 %v924_v2, %v872_v60 }
 0x153   :  { %1404 = vpow2.f32 %v1200_v3  ;;  %v1201_v7 = vmul.f32 -1.442695, %v976_v4  ;;  %v978_v9 = vadd.f32 %v977_v6, %v925_v5 }
 0x155   :  { %1406 = vpow2.f32 %v1201_v7  ;;  %v1202_v10 = vmul.f32 -1.442695, %v978_v9 }
 0x156   :  { %v1395_v11 = vpop.eup %1394 }
 0x157   :  { %v1004_v8 = vadd.f32 1.0, %v1395_v11  ;;  %1408 = vpow2.f32 %v1202_v10 }
 0x158   :  { %v1397_v12 = vpop.eup %1396 }
 0x159   :  { %1410 = vrcp.f32 %v1004_v8  ;;  %v1005_v13 = vadd.f32 1.0, %v1397_v12 }
 0x15a   :  { %v1399_v14 = vpop.eup %1398 }
 0x15b   :  { %1412 = vrcp.f32 %v1005_v13  ;;  %v1006_v15 = vadd.f32 1.0, %v1399_v14 }
 0x15c   :  { %v1401_v16 = vpop.eup %1400 }
 0x15d   :  { %1414 = vrcp.f32 %v1006_v15  ;;  %v1007_v17 = vadd.f32 1.0, %v1401_v16 }
 0x15e   :  { %v1403_v18 = vpop.eup %1402 }
 0x15f   :  { %1416 = vrcp.f32 %v1007_v17  ;;  %v1008_v19 = vadd.f32 1.0, %v1403_v18 }
 0x160   :  { %v1405_v20 = vpop.eup %1404 }
 0x161   :  { %1418 = vrcp.f32 %v1008_v19  ;;  %v1009_v21 = vadd.f32 1.0, %v1405_v20 }
 0x162   :  { %v1407_v22 = vpop.eup %1406 }
 0x163   :  { %1420 = vrcp.f32 %v1009_v21  ;;  %v1010_v23 = vadd.f32 1.0, %v1407_v22 }
 0x164   :  { %v1409_v24 = vpop.eup %1408 }
 0x165   :  { %1422 = vrcp.f32 %v1010_v23  ;;  %v1011_v25 = vadd.f32 1.0, %v1409_v24 }
 0x166   :  { %v1411_v26 = vpop.eup %1410 }
 0x167   :  { %1424 = vrcp.f32 %v1011_v25  ;;  %v1028_v28 = vmul.f32 %v1411_v26, %v1818_v33 }
 0x168   :  { %v1413_v27 = vpop.eup %1412 }
 0x169   :  { %v1029_v29 = vmul.f32 %v1413_v27, %v1821_v40 }
 0x16a   :  { %v1415_v30 = vpop.eup %1414 }
 0x16b   :  { %v1207_v32 = vpack.c.bf16 %v1029_v29, %v1028_v28  ;;  %v1030_v35 = vmul.f32 %v1415_v30, %v1824_v46 }
 0x16c   :  { %v1417_v34 = vpop.eup %1416 }
 0x16d   :  { %1063 = vst.msk [vmem:[%s1865_s3] sm:$0xff] %vm1835_vm3, %v1207_v32  ;;  %v1031_v36 = vmul.f32 %v1417_v34, %v1827_v53 }
 0x16e   :  { %v1419_v33 = vpop.eup %1418 }
 0x16f   :  { %v1208_v37 = vpack.c.bf16 %v1031_v36, %v1030_v35  ;;  %v1032_v39 = vmul.f32 %v1419_v33, %v1830_v58 }
 0x170   :  { %v1421_v38 = vpop.eup %1420 }
 0x171   :  { %1064 = vst.msk [vmem:[%s1865_s3 + $0x8] sm:$0xff] %vm1835_vm3, %v1208_v37  ;;  %v1033_v40 = vmul.f32 %v1421_v38, %v974_v0 }
 0x172   :  { %v1423_v41 = vpop.eup %1422 }
 0x173   :  { %v1209_v42 = vpack.c.bf16 %v1033_v40, %v1032_v39  ;;  %v1034_v44 = vmul.f32 %v1423_v41, %v976_v4 }
 0x174   :  { %v1425_v43 = vpop.eup %1424 }
 0x175   :  { %1065 = vst.msk [vmem:[%s1865_s3 + $0x10] sm:$0xff] %vm1835_vm3, %v1209_v42  ;;  %v1035_v45 = vmul.f32 %v1425_v43, %v978_v9 }
 0x177   :  { %v1210_v46 = vpack.c.bf16 %v1035_v45, %v1034_v44 }
 0x179   :  { %1066 = vst.msk [vmem:[%s1865_s3 + $0x18] sm:$0xff] %vm1835_vm3, %v1210_v46 }

// kernel: yolox_forward.16
= control target key start
LH: loop header
LB: loop body
LE: loop exit
PB: predicated region body
PF: predicated region fallthrough
CT: control target
= control target key end

     0   :  { %v619_v35 = vmov 0.0   ;;  %vm620_vm0 = vmmov 0   ;;  %vm330_vm1 = vcmask 523264   ;;  %s764_s1 = inlined_call_operand.vmem [shape: bf16[576,128], index: 1, kind: input, shape index: {}]   ;;  %s765_s0 = inlined_call_operand.vmem [shape: bf16[8,576], index: 0, kind: input, shape index: {}]   ;;  %s766_s2 = inlined_call_operand.vmem [shape: f32[1,128], index: 2, kind: input, shape index: {}]   ;;  %s767_s3 = inlined_call_operand.vmem [shape: bf16[8,128], index: 3, kind: output, shape index: {}]  }
   0x1   :  { %v574_v0 = vld [vmem:[%s764_s1 + $0x78] sm:$0xff]   ;;  %v578_v4 = vld [vmem:[%s764_s1 + $0x70] sm:$0xff]   ;;  %v582_v8 = vld [vmem:[%s764_s1 + $0x68] sm:$0xff]  }
   0x2   :  { %v575_v1 = vld [vmem:[%s764_s1 + $0x38] sm:$0xff]   ;;  %511 = vmatprep.subr.bf16.mxu0 %v574_v0  ;;  %v579_v5 = vld [vmem:[%s764_s1 + $0x30] sm:$0xff]   ;;  %v583_v9 = vld [vmem:[%s764_s1 + $0x28] sm:$0xff]  }
   0x3   :  { %v576_v2 = vld [vmem:[%s764_s1 + $0xf8] sm:$0xff]   ;;  %512 = vmatpush3.bf16.msra.mxu0 %v575_v1  ;;  %v580_v6 = vld [vmem:[%s764_s1 + $0xf0] sm:$0xff]   ;;  %v584_v10 = vld [vmem:[%s764_s1 + $0xe8] sm:$0xff]  }
   0x4   :  { %v577_v3 = vld [vmem:[%s764_s1 + $0xb8] sm:$0xff]   ;;  %533 = vmatprep.subr.bf16.mxu1 %v576_v2  ;;  %513 = vmatprep.subr.bf16.mxu0 %v578_v4  ;;  %v581_v7 = vld [vmem:[%s764_s1 + $0xb0] sm:$0xff]   ;;  %v585_v11 = vld [vmem:[%s764_s1 + $0xa8] sm:$0xff]  }
   0x5   :  { %534 = vmatpush3.bf16.msra.mxu1 %v577_v3  ;;  %v586_v12 = vld [vmem:[%s764_s1 + $0x60] sm:$0xff]   ;;  %v590_v16 = vld [vmem:[%s764_s1 + $0x58] sm:$0xff]   ;;  %v594_v20 = vld [vmem:[%s764_s1 + $0x50] sm:$0xff]  }
   0x6   :  { %535 = vmatprep.subr.bf16.mxu1 %v580_v6  ;;  %v587_v13 = vld [vmem:[%s764_s1 + $0x20] sm:$0xff]   ;;  %v591_v17 = vld [vmem:[%s764_s1 + $0x18] sm:$0xff]   ;;  %v595_v21 = vld [vmem:[%s764_s1 + $0x10] sm:$0xff]  }
   0x7   :  { %514 = vmatpush3.bf16.msra.mxu0 %v579_v5  ;;  %v588_v14 = vld [vmem:[%s764_s1 + $0xe0] sm:$0xff]   ;;  %v592_v18 = vld [vmem:[%s764_s1 + $0xd8] sm:$0xff]   ;;  %v596_v22 = vld [vmem:[%s764_s1 + $0xd0] sm:$0xff]  }
   0x8   :  { %515 = vmatprep.subr.bf16.mxu0 %v582_v8  ;;  %v589_v15 = vld [vmem:[%s764_s1 + $0xa0] sm:$0xff]   ;;  %v593_v19 = vld [vmem:[%s764_s1 + $0x98] sm:$0xff]   ;;  %v597_v23 = vld [vmem:[%s764_s1 + $0x90] sm:$0xff]  }
   0x9   :  { %536 = vmatpush3.bf16.msra.mxu1 %v581_v7  ;;  %v598_v24 = vld [vmem:[%s764_s1 + $0x48] sm:$0xff]   ;;  %v602_v28 = vld [vmem:[%s764_s1 + $0x40] sm:$0xff]   ;;  %v611_v39 = vld [vmem:[%s764_s1 + $0x118] sm:$0xff]  }
   0xa   :  { %537 = vmatprep.subr.bf16.mxu1 %v584_v10  ;;  %v599_v25 = vld [vmem:[%s764_s1 + $0x8] sm:$0xff]   ;;  %v603_v29 = vld [vmem:[%s764_s1] sm:$0xff]   ;;  %v612_v40 = vld [vmem:[%s764_s1 + $0x110] sm:$0xff]  }
   0xb   :  { %516 = vmatpush3.bf16.msra.mxu0 %v583_v9  ;;  %v600_v26 = vld [vmem:[%s764_s1 + $0xc8] sm:$0xff]   ;;  %v604_v30 = vld [vmem:[%s764_s1 + $0xc0] sm:$0xff]   ;;  %v607_v43 = vld [vmem:[%s765_s0 + $0x10] ss:$0 sps:$4 sm:$0xff]  }
   0xc   :  { %517 = vmatprep.subr.bf16.mxu0 %v586_v12  ;;  %v601_v27 = vld [vmem:[%s764_s1 + $0x88] sm:$0xff]   ;;  %v15_v31 = vld [vmem:[%s765_s0] sm:$0xff] }
   0xd   :  { %538 = vmatpush3.bf16.msra.mxu1 %v585_v11  ;;  %v468_v32 = vcombine.low %v15_v31, %v15_v31  ;;  %v469_v33 = vcombine.high %v15_v31, %v15_v31  ;;  %v608_v34 = vld [vmem:[%s764_s1 + $0x80] sm:$0xff]   ;;  %v16_v36 = vld [vmem:[%s765_s0 + $0x8] sm:$0xff] }
   0xe   :  { %539 = vmatprep.subr.bf16.mxu1 %v588_v14  ;;  %v470_v37 = vcombine.low %v16_v36, %v16_v36  ;;  %v471_v38 = vcombine.high %v16_v36, %v16_v36  ;;  %v613_v41 = vld [vmem:[%s764_s1 + $0x108] sm:$0xff]   ;;  %v614_v42 = vld [vmem:[%s764_s1 + $0x100] sm:$0xff]  }
   0xf   :  { %518 = vmatpush3.bf16.msra.mxu0 %v587_v13  ;;  %366 = vmatprep.mubr.bf16.mxu0 %v469_v33  ;;  %v467_v52 = vld [vmem:[%s766_s2] ss:$0 sm:$0xff] }
  0x10   :  { %519 = vmatprep.subr.bf16.mxu0 %v590_v16  ;;  %406 = vmatprep.mubr.bf16.mxu1 %v471_v38 }
  0x11   :  { %540 = vmatpush3.bf16.msra.mxu1 %v589_v15 }
  0x12   :  { %541 = vmatprep.subr.bf16.mxu1 %v592_v18 }
  0x13   :  { %520 = vmatpush3.bf16.msra.mxu0 %v591_v17 }
  0x14   :  { %521 = vmatprep.subr.bf16.mxu0 %v594_v20 }
  0x15   :  { %542 = vmatpush3.bf16.msra.mxu1 %v593_v19 }
  0x16   :  { %543 = vmatprep.subr.bf16.mxu1 %v596_v22 }
  0x17   :  { %522 = vmatpush3.bf16.msra.mxu0 %v595_v21 }
  0x18   :  { %523 = vmatprep.subr.bf16.mxu0 %v598_v24 }
  0x19   :  { %544 = vmatpush3.bf16.msra.mxu1 %v597_v23 }
  0x1a   :  { %545 = vmatprep.subr.bf16.mxu1 %v600_v26 }
  0x1b   :  { %524 = vmatpush3.bf16.msra.mxu0 %v599_v25 }
  0x1c   :  { %525 = vmatprep.subr.bf16.mxu0 %v602_v28 }
  0x1d   :  { %546 = vmatpush3.bf16.msra.mxu1 %v601_v27 }
  0x1e   :  { %547 = vmatprep.subr.bf16.mxu1 %v604_v30 }
  0x1f   :  { %526 = vmatpush3.bf16.msra.mxu0 %v603_v29 }
  0x20   :  { %560 = vmatprep.subr.bf16.mxu0 %v619_v35 }
  0x21   :  { %548 = vmatpush3.bf16.msra.mxu1 %v608_v34 }
  0x22   :  { %367 = vmatmul.mubr.bf16.vlgmr.msra.gmra.mxu0 %v468_v32 }
  0x23   :  { %561 = vmatpush3.bf16.msra.mxu0 %v611_v39  ;;  %568 = vmatprep.mubr.msk.bf16.mxu0 %vm620_vm0, %v619_v35 }
  0x24   :  { %407 = vmatmul.mubr.bf16.vlgmr.msra.gmra.mxu1 %v470_v37  ;;  %562 = vmatprep.subr.bf16.mxu0 %v619_v35 }
  0x27   :  { %563 = vmatpush3.bf16.msra.mxu0 %v612_v40 }
  0x28   :  { %564 = vmatprep.subr.bf16.mxu0 %v619_v35 }
  0x2b   :  { %565 = vmatpush3.bf16.msra.mxu0 %v613_v41 }
  0x2c   :  { %566 = vmatprep.subr.bf16.mxu0 %v619_v35 }
  0x2f   :  { %567 = vmatpush3.bf16.msra.mxu0 %v614_v42 }
  0x32   :  { %569 = vmatmul.mubr.msk.bf16.vlgmr.msra.gmra.mxu0 %vm330_vm1, %v607_v43 }
  0xe2   :  { %v527_v44 = vpop.f32.mrf.mxu0 }
  0xe4   :  { %v528_v45 = vpop.f32.mrf.mxu0  ;;  %v549_v46 = vpop.f32.mrf.mxu1 }
  0xe5   :  { %v529_v51 = vadd.f32 %v528_v45, %v527_v44 }
  0xe6   :  { %v530_v47 = vpop.f32.mrf.mxu0  ;;  %v550_v48 = vpop.f32.mrf.mxu1 }
  0xe7   :  { %v369_v54 = vadd.f32 %v529_v51, %v467_v52  ;;  %v551_v55 = vadd.f32 %v550_v48, %v549_v46 }
  0xe8   :  { %v531_v49 = vpop.f32.mrf.mxu0  ;;  %v552_v50 = vpop.f32.mrf.mxu1 }
  0xe9   :  { %v409_v56 = vadd.f32 %v551_v55, %v369_v54 }
  0xea   :  { %v553_v53 = vpop.f32.mrf.mxu1 }
  0xf2   :  { %v448_v57 = vpop.f32.mrf.mxu0 }
  0xf3   :  { %v449_v58 = vadd.f32 %v448_v57, %v409_v56 }
  0xf4   :  { %v570_v59 = vpop.f32.mrf.mxu0 }
  0xf5   :  { %v510_v60 = vmul.f32 -1.442695, %v449_v58 }
  0xf6   :  { %v451_v61 = vpop.f32.mrf.mxu0 }
  0xf7   :  { %615 = vpow2.f32 %v510_v60 }
  0xf8   :  { %v571_v62 = vpop.f32.mrf.mxu0 }
 0x104   :  { %v616_v63 = vpop.eup %615 }
 0x105   :  { %v457_v0 = vadd.f32 1.0, %v616_v63 }
 0x107   :  { %617 = vrcp.f32 %v457_v0 }
 0x114   :  { %v618_v1 = vpop.eup %617 }
 0x115   :  { %v460_v2 = vmul.f32 %v618_v1, %v449_v58 }
 0x117   :  { %v461_v3 = vpack.c.bf16 %v460_v2, %v460_v2 }
 0x119   :  { %462 = vst [vmem:[%s767_s3] sm:$0xf] %v461_v3 }

// kernel: yolox_forward.23
= control target key start
LH: loop header
LB: loop body
LE: loop exit
PB: predicated region body
PF: predicated region fallthrough
CT: control target
= control target key end

     0   :  { %v194_v0 = vmov 0.0   ;;  %vm195_vm0 = vmmov 0   ;;  %vm135_vm1 = vcmask 781312   ;;  %s249_s1 = inlined_call_operand.vmem [shape: bf16[128,96], index: 1, kind: input, shape index: {}]   ;;  %s250_s0 = inlined_call_operand.vmem [shape: bf16[8,128], index: 0, kind: input, shape index: {}]   ;;  %s251_s2 = inlined_call_operand.vmem [shape: f32[1,96], index: 2, kind: input, shape index: {}]   ;;  %s252_s3 = inlined_call_operand.vmem [shape: bf16[8,96], index: 3, kind: output, shape index: {}]  }
   0x1   :  { %160 = vmatprep.subr.bf16.mxu0 %v194_v0  ;;  %v182_v1 = vld [vmem:[%s249_s1 + $0x38] sm:$0xff]   ;;  %176 = vmatprep.mubr.msk.bf16.mxu0 %vm195_vm0, %v194_v0  ;;  %v183_v2 = vld [vmem:[%s249_s1 + $0x30] sm:$0xff]   ;;  %v184_v3 = vld [vmem:[%s249_s1 + $0x28] sm:$0xff]  }
   0x2   :  { %161 = vmatpush3.bf16.msra.mxu0 %v182_v1  ;;  %v185_v4 = vld [vmem:[%s249_s1 + $0x20] sm:$0xff]   ;;  %v186_v5 = vld [vmem:[%s249_s1 + $0x18] sm:$0xff]   ;;  %v187_v6 = vld [vmem:[%s249_s1 + $0x10] sm:$0xff]  }
   0x3   :  { %162 = vmatprep.subr.bf16.mxu0 %v194_v0  ;;  %v188_v7 = vld [vmem:[%s249_s1 + $0x8] sm:$0xff]   ;;  %v189_v8 = vld [vmem:[%s249_s1] sm:$0xff]  }
   0x4   :  { %v15_v9 = vld [vmem:[%s250_s0] sm:$0xf] }
   0x5   :  { %v141_v10 = vld [vmem:[%s251_s2] ss:$0 sm:$0xff] }
   0x6   :  { %163 = vmatpush3.bf16.msra.mxu0 %v183_v2 }
   0x7   :  { %164 = vmatprep.subr.bf16.mxu0 %v194_v0 }
   0xa   :  { %165 = vmatpush3.bf16.msra.mxu0 %v184_v3 }
   0xb   :  { %166 = vmatprep.subr.bf16.mxu0 %v194_v0 }
   0xe   :  { %167 = vmatpush3.bf16.msra.mxu0 %v185_v4 }
   0xf   :  { %168 = vmatprep.subr.bf16.mxu0 %v194_v0 }
  0x12   :  { %169 = vmatpush3.bf16.msra.mxu0 %v186_v5 }
  0x13   :  { %170 = vmatprep.subr.bf16.mxu0 %v194_v0 }
  0x16   :  { %171 = vmatpush3.bf16.msra.mxu0 %v187_v6 }
  0x17   :  { %172 = vmatprep.subr.bf16.mxu0 %v194_v0 }
  0x1a   :  { %173 = vmatpush3.bf16.msra.mxu0 %v188_v7 }
  0x1b   :  { %174 = vmatprep.subr.bf16.mxu0 %v194_v0 }
  0x1e   :  { %175 = vmatpush3.bf16.msra.mxu0 %v189_v8 }
  0x21   :  { %177 = vmatmul.mubr.bf16.vlgmr.msra.gmra.mxu0 %v15_v9 }
  0xe1   :  { %v121_v11 = vpop.f32.mrf.mxu0 }
  0xe2   :  { %v122_v12 = vadd.f32 %v141_v10, %v121_v11 }
  0xe3   :  { %v178_v13 = vpop.f32.mrf.mxu0 }
  0xe4   :  { %v150_v14 = vmul.f32 -1.442695, %v122_v12 }
  0xe5   :  { %v124_v15 = vpop.f32.mrf.mxu0 }
  0xe6   :  { %190 = vpow2.f32 %v150_v14 }
  0xe7   :  { %v179_v16 = vpop.f32.mrf.mxu0 }
  0xf3   :  { %v191_v17 = vpop.eup %190 }
  0xf4   :  { %v130_v18 = vadd.f32 1.0, %v191_v17 }
  0xf6   :  { %192 = vrcp.f32 %v130_v18 }
 0x103   :  { %v193_v19 = vpop.eup %192 }
 0x104   :  { %v133_v20 = vmul.f32 %v193_v19, %v122_v12 }
 0x106   :  { %v134_v21 = vpack.c.bf16 %v133_v20, %v133_v20 }
 0x108   :  { %136 = vst.msk [vmem:[%s252_s3] sm:$0xf] %vm135_vm1, %v134_v21 }

// kernel: yolox_forward.25
= control target key start
LH: loop header
LB: loop body
LE: loop exit
PB: predicated region body
PF: predicated region fallthrough
CT: control target
= control target key end

     0   :  { %vm178_vm0 = vcmask 523264   ;;  %v42_v27 = vlaneseq  ;;  %vm298_vm13 = vcmask 1039360   ;;  %s503_s1 = inlined_call_operand.vmem [shape: bf16[192,255], index: 1, kind: input, shape index: {}]   ;;  %s504_s0 = inlined_call_operand.vmem [shape: bf16[8,192], index: 0, kind: input, shape index: {}]   ;;  %s505_s2 = inlined_call_operand.vmem [shape: f32[1,255], index: 2, kind: input, shape index: {}]   ;;  %s506_s3 = inlined_call_operand.vmem [shape: f32[8,255], index: 3, kind: output, shape index: {}]  }
   0x1   :  { %v333_v0 = vld [vmem:[%s503_s1 + $0x74] ss:$8 sps:$4 sm:$0xff]   ;;  %v335_v1 = vld [vmem:[%s503_s1 + $0x70] ss:$8 sps:$4 sm:$0xff]   ;;  %v336_v2 = vld [vmem:[%s503_s1 + $0x64] ss:$8 sps:$4 sm:$0xff]  }
   0x2   :  { %182 = vmatprep.subr.bf16.mxu0 %v333_v0  ;;  %v338_v3 = vld [vmem:[%s503_s1 + $0x60] ss:$8 sps:$4 sm:$0xff]   ;;  %v339_v4 = vld [vmem:[%s503_s1 + $0x54] ss:$8 sps:$4 sm:$0xff]   ;;  %v341_v5 = vld [vmem:[%s503_s1 + $0x50] ss:$8 sps:$4 sm:$0xff]  }
   0x3   :  { %183 = vmatpush1.bf16.msra.mxu0 %v335_v1  ;;  %v342_v6 = vld [vmem:[%s503_s1 + $0x44] ss:$8 sps:$4 sm:$0xff]   ;;  %v344_v7 = vld [vmem:[%s503_s1 + $0x40] ss:$8 sps:$4 sm:$0xff]   ;;  %v345_v8 = vld [vmem:[%s503_s1 + $0x34] ss:$8 sps:$4 sm:$0xff]  }
   0x4   :  { %184 = vmatprep.subr.bf16.mxu0 %v336_v2  ;;  %v347_v9 = vld [vmem:[%s503_s1 + $0x30] ss:$8 sps:$4 sm:$0xff]   ;;  %v348_v10 = vld [vmem:[%s503_s1 + $0x24] ss:$8 sps:$4 sm:$0xff]   ;;  %v350_v13 = vld [vmem:[%s503_s1 + $0x20] ss:$8 sps:$4 sm:$0xff]  }
   0x5   :  { %v15_v11 = vld [vmem:[%s504_s0] sm:$0xff]  ;;  %v351_v14 = vld [vmem:[%s503_s1 + $0x14] ss:$8 sps:$4 sm:$0xff]   ;;  %v353_v15 = vld [vmem:[%s503_s1 + $0x10] ss:$8 sps:$4 sm:$0xff]   ;;  %v224_v28 = vand.u32 127, %v42_v27 }
   0x6   :  { %v305_v12 = vcombine.high %v15_v11, %v15_v11  ;;  %v354_v16 = vld [vmem:[%s503_s1 + $0x4] ss:$8 sps:$4 sm:$0xff]   ;;  %v356_v17 = vld [vmem:[%s503_s1] ss:$8 sps:$4 sm:$0xff]   ;;  %v357_v18 = vld [vmem:[%s503_s1 + $0xb4] ss:$8 sps:$4 sm:$0xff]   ;;  %v304_v26 = vcombine.low %v15_v11, %v15_v11 }
   0x7   :  { %185 = vmatpush1.bf16.msra.mxu0 %v338_v3  ;;  %v359_v19 = vld [vmem:[%s503_s1 + $0xb0] ss:$8 sps:$4 sm:$0xff]   ;;  %v360_v20 = vld [vmem:[%s503_s1 + $0xa4] ss:$8 sps:$4 sm:$0xff]   ;;  %v362_v21 = vld [vmem:[%s503_s1 + $0xa0] ss:$8 sps:$4 sm:$0xff]   ;;  %v226_v30 = vcvt.s32.f32 %v224_v28 }
   0x8   :  { %186 = vmatprep.subr.bf16.mxu0 %v339_v4  ;;  %330 = vmatprep.mubr.msk.bf16.mxu0 %vm178_vm0, %v305_v12  ;;  %v363_v22 = vld [vmem:[%s503_s1 + $0x94] ss:$8 sps:$4 sm:$0xff]   ;;  %v365_v23 = vld [vmem:[%s503_s1 + $0x90] ss:$8 sps:$4 sm:$0xff]   ;;  %v366_v24 = vld [vmem:[%s503_s1 + $0x84] ss:$8 sps:$4 sm:$0xff]  }
   0x9   :  { %v368_v25 = vld [vmem:[%s503_s1 + $0x80] ss:$8 sps:$4 sm:$0xff]   ;;  %v225_v29 = vadd.s32 128, %v224_v28  ;;  %v43_v31 = vshrl.u32 %v42_v27, 7  ;;  %v229_v33 = vmul.f32 0.011764706, %v226_v30 }
   0xa   :  { %v40_v38 = vld [vmem:[%s505_s2] sm:$0x3] }
   0xb   :  { %187 = vmatpush1.bf16.msra.mxu0 %v341_v5  ;;  %v227_v32 = vcvt.s32.f32 %v225_v29  ;;  %v242_v35 = vcvt.s32.f32 %v43_v31  ;;  %v231_v36 = vfloor.f32 %v229_v33  ;;  %v44_v37 = vsub.s32 0, %v43_v31 }
   0xc   :  { %188 = vmatprep.subr.bf16.mxu0 %v342_v6  ;;  %v48_v41 = vsub.s32 1, %v43_v31 }
   0xd   :  { %v230_v34 = vmul.f32 0.011764706, %v227_v32  ;;  %v244_v40 = vmul.f32 0.25, %v242_v35  ;;  %v233_v42 = vmul.f32 85.0, %v231_v36  ;;  %v45_v43 = vrot.slane %v40_v38, %v44_v37 }
   0xe   :  { %v49_v46 = vrot.slane %v40_v38, %v48_v41 }
   0xf   :  { %189 = vmatpush1.bf16.msra.mxu0 %v344_v7  ;;  %v232_v39 = vfloor.f32 %v230_v34  ;;  %v245_v45 = vfloor.f32 %v244_v40  ;;  %v235_v48 = vsub.f32 %v226_v30, %v233_v42 }
  0x10   :  { %190 = vmatprep.subr.bf16.mxu0 %v345_v8 }
  0x11   :  { %v234_v44 = vmul.f32 85.0, %v232_v39  ;;  %v246_v52 = vmul.f32 4.0, %v245_v45  ;;  %vm265_vm1 = vcmp.ge.f32.partialorder %v235_v48, 2.0  ;;  %vm267_vm2 = vcmp.lt.f32.partialorder %v235_v48, 4.0 }
  0x12   :  { %vm481_vm3 = vmand %vm265_vm1, %vm267_vm2  ;;  %vm255_vm7 = vcmp.eq.f32.partialorder %v235_v48, 1.0  ;;  %vm253_vm8 = vcmp.eq.f32.partialorder %v235_v48, 0.0  ;;  %vm291_vm11 = vcmp.lt.f32.partialorder %v235_v48, 2.0 }
  0x13   :  { %191 = vmatpush1.bf16.msra.mxu0 %v347_v9  ;;  %v236_v51 = vsub.f32 %v227_v32, %v234_v44  ;;  %v247_v58 = vsub.f32 %v242_v35, %v246_v52 }
  0x14   :  { %192 = vmatprep.subr.bf16.mxu0 %v348_v10 }
  0x15   :  { %vm266_vm4 = vcmp.ge.f32.partialorder %v236_v51, 2.0  ;;  %vm268_vm5 = vcmp.lt.f32.partialorder %v236_v51, 4.0  ;;  %v249_v62 = vmul.f32 0.5, %v247_v58  ;;  %vm256_vm9 = vcmp.eq.f32.partialorder %v236_v51, 1.0 }
  0x16   :  { %vm487_vm6 = vmand %vm266_vm4, %vm268_vm5  ;;  %vm254_vm10 = vcmp.eq.f32.partialorder %v236_v51, 0.0  ;;  %vm292_vm12 = vcmp.lt.f32.partialorder %v236_v51, 2.0 }
  0x17   :  { %193 = vmatpush1.bf16.msra.mxu0 %v350_v13  ;;  %v250_v1 = vfloor.f32 %v249_v62 }
  0x18   :  { %194 = vmatprep.subr.bf16.mxu0 %v351_v14 }
  0x19   :  { %v251_v4 = vmul.f32 2.0, %v250_v1  ;;  %v257_v9 = vsel %vm255_vm7, %v250_v1, 0.0  ;;  %v258_v11 = vsel %vm256_vm9, %v250_v1, 0.0 }
  0x1b   :  { %195 = vmatpush1.bf16.msra.mxu0 %v353_v15  ;;  %v252_v7 = vsub.f32 %v247_v58, %v251_v4 }
  0x1c   :  { %196 = vmatprep.subr.bf16.mxu0 %v354_v16 }
  0x1d   :  { %v259_v10 = vsel %vm253_vm8, %v252_v7, %v257_v9  ;;  %v260_v14 = vsel %vm254_vm10, %v252_v7, %v258_v11 }
  0x1f   :  { %197 = vmatpush1.bf16.msra.mxu0 %v356_v17 }
  0x20   :  { %206 = vmatprep.subr.bf16.mxu0 %v357_v18 }
  0x23   :  { %207 = vmatpush2.bf16.msra.mxu0 %v359_v19 }
  0x24   :  { %208 = vmatprep.subr.bf16.mxu0 %v360_v20 }
  0x27   :  { %209 = vmatpush2.bf16.msra.mxu0 %v362_v21 }
  0x28   :  { %210 = vmatprep.subr.bf16.mxu0 %v363_v22 }
  0x2b   :  { %211 = vmatpush2.bf16.msra.mxu0 %v365_v23 }
  0x2c   :  { %212 = vmatprep.subr.bf16.mxu0 %v366_v24 }
  0x2f   :  { %213 = vmatpush2.bf16.msra.mxu0 %v368_v25 }
  0x32   :  { %215 = vmatmul.mubr.bf16.vlgmr.msra.gmra.mxu0 %v304_v26 }
  0xf2   :  { %v216_v47 = vpop.f32.mrf.mxu0 }
  0xf3   :  { %v217_v49 = vadd.f32 %v216_v47, %v45_v43 }
  0xf4   :  { %v218_v50 = vpop.f32.mrf.mxu0 }
  0xf5   :  { %v331_v53 = vmul.f32 -1.442695, %v217_v49  ;;  %v219_v54 = vadd.f32 %v218_v50, %v49_v46  ;;  %v271_v60 = vsel %vm481_vm3, %v217_v49, 0.0  ;;  %v261_v13 = vadd.f32 %v259_v10, %v217_v49 }
  0xf6   :  { %v220_v55 = vpop.f32.mrf.mxu0  ;;  %v273_v63 = vmul.f32 1.442695, %v271_v60 }
  0xf7   :  { %371 = vpow2.f32 %v331_v53  ;;  %v332_v56 = vmul.f32 -1.442695, %v219_v54  ;;  %v272_v0 = vsel %vm487_vm6, %v219_v54, 0.0  ;;  %v263_v18 = vmul.f32 16.0, %v261_v13 }
  0xf8   :  { %v221_v57 = vpop.f32.mrf.mxu0  ;;  %v275_v2 = vmul.f32 1.442695, %v272_v0  ;;  %v262_v19 = vadd.f32 %v260_v14, %v219_v54 }
  0xf9   :  { %373 = vpow2.f32 %v332_v56 }
  0xfa   :  { %375 = vpow2.f32 %v273_v63  ;;  %v264_v24 = vmul.f32 16.0, %v262_v19 }
  0xfb   :  { %377 = vpow2.f32 %v275_v2 }
 0x104   :  { %v372_v3 = vpop.eup %371 }
 0x105   :  { %v285_v5 = vadd.f32 1.0, %v372_v3 }
 0x106   :  { %v374_v6 = vpop.eup %373 }
 0x107   :  { %379 = vrcp.f32 %v285_v5  ;;  %v286_v8 = vadd.f32 1.0, %v374_v6  ;;  %v376_v12 = vpop.eup %375 }
 0x108   :  { %v378_v15 = vpop.eup %377  ;;  %v277_v16 = vmul.f32 16.0, %v376_v12 }
 0x109   :  { %381 = vrcp.f32 %v286_v8  ;;  %v278_v22 = vmul.f32 16.0, %v378_v15 }
 0x114   :  { %v380_v17 = vpop.eup %379 }
 0x115   :  { %v293_v20 = vsel %vm481_vm3, %v277_v16, %v380_v17 }
 0x116   :  { %v295_v21 = vsel %vm291_vm11, %v263_v18, %v293_v20  ;;  %v382_v23 = vpop.eup %381 }
 0x117   :  { %297 = vst [vmem:[%s506_s3] sm:$0xff] %v295_v21  ;;  %v294_v25 = vsel %vm487_vm6, %v278_v22, %v382_v23 }
 0x118   :  { %v296_v26 = vsel %vm292_vm12, %v264_v24, %v294_v25 }
 0x119   :  { %299 = vst.msk [vmem:[%s506_s3 + $0x8] sm:$0xff] %vm298_vm13, %v296_v26 }

// kernel: yolox_forward.24
= control target key start
LH: loop header
LB: loop body
LE: loop exit
PB: predicated region body
PF: predicated region fallthrough
CT: control target
= control target key end

     0   :  { %vm703_vm0 = vcmask 785408   ;;  %vm893_vm1 = vcmask 1043456   ;;  %vm894_vm2 = vcmask 523268   ;;  %s1568_s1 = inlined_call_operand.vmem [shape: bf16[864,192], index: 1, kind: input, shape index: {}]   ;;  %s1569_s0 = inlined_call_operand.vmem [shape: bf16[8,864], index: 0, kind: input, shape index: {}]   ;;  %s1570_s2 = inlined_call_operand.vmem [shape: f32[1,192], index: 2, kind: input, shape index: {}]   ;;  %s1571_s3 = inlined_call_operand.vmem [shape: bf16[8,192], index: 3, kind: output, shape index: {}]  }
   0x1   :  { %v1022_v0 = vld [vmem:[%s1568_s1 + $0x74] ss:$8 sps:$4 sm:$0xff]   ;;  %v1024_v1 = vld [vmem:[%s1568_s1 + $0x70] ss:$8 sps:$4 sm:$0xff]   ;;  %v1028_v4 = vld [vmem:[%s1568_s1 + $0x64] ss:$8 sps:$4 sm:$0xff]  }
   0x2   :  { %707 = vmatprep.subr.bf16.mxu0 %v1022_v0  ;;  %v1025_v2 = vld [vmem:[%s1568_s1 + $0x174] ss:$8 sps:$4 sm:$0xff]   ;;  %v1027_v3 = vld [vmem:[%s1568_s1 + $0x170] ss:$8 sps:$4 sm:$0xff]   ;;  %v1030_v5 = vld [vmem:[%s1568_s1 + $0x60] ss:$8 sps:$4 sm:$0xff]  }
   0x3   :  { %708 = vmatpush1.bf16.msra.mxu0 %v1024_v1  ;;  %748 = vmatprep.subr.bf16.mxu1 %v1025_v2  ;;  %v1031_v6 = vld [vmem:[%s1568_s1 + $0x164] ss:$8 sps:$4 sm:$0xff]   ;;  %v1033_v7 = vld [vmem:[%s1568_s1 + $0x160] ss:$8 sps:$4 sm:$0xff]   ;;  %v1034_v8 = vld [vmem:[%s1568_s1 + $0x54] ss:$8 sps:$4 sm:$0xff]  }
   0x4   :  { %749 = vmatpush1.bf16.msra.mxu1 %v1027_v3  ;;  %709 = vmatprep.subr.bf16.mxu0 %v1028_v4  ;;  %v1036_v9 = vld [vmem:[%s1568_s1 + $0x50] ss:$8 sps:$4 sm:$0xff]   ;;  %v1037_v10 = vld [vmem:[%s1568_s1 + $0x154] ss:$8 sps:$4 sm:$0xff]   ;;  %v1040_v11 = vld [vmem:[%s1568_s1 + $0x44] ss:$8 sps:$4 sm:$0xff]  }
   0x5   :  { %750 = vmatprep.subr.bf16.mxu1 %v1031_v6  ;;  %v1039_v12 = vld [vmem:[%s1568_s1 + $0x150] ss:$8 sps:$4 sm:$0xff]   ;;  %v1043_v13 = vld [vmem:[%s1568_s1 + $0x144] ss:$8 sps:$4 sm:$0xff]   ;;  %v1042_v14 = vld [vmem:[%s1568_s1 + $0x40] ss:$8 sps:$4 sm:$0xff]  }
   0x6   :  { %v1046_v15 = vld [vmem:[%s1568_s1 + $0x34] ss:$8 sps:$4 sm:$0xff]   ;;  %v1045_v16 = vld [vmem:[%s1568_s1 + $0x140] ss:$8 sps:$4 sm:$0xff]   ;;  %v1048_v18 = vld [vmem:[%s1568_s1 + $0x30] ss:$8 sps:$4 sm:$0xff]  }
   0x7   :  { %710 = vmatpush1.bf16.msra.mxu0 %v1030_v5  ;;  %v1049_v17 = vld [vmem:[%s1568_s1 + $0x134] ss:$8 sps:$4 sm:$0xff]   ;;  %v1052_v19 = vld [vmem:[%s1568_s1 + $0x24] ss:$8 sps:$4 sm:$0xff]   ;;  %v1051_v20 = vld [vmem:[%s1568_s1 + $0x130] ss:$8 sps:$4 sm:$0xff]  }
   0x8   :  { %711 = vmatprep.subr.bf16.mxu0 %v1034_v8  ;;  %751 = vmatpush1.bf16.msra.mxu1 %v1033_v7  ;;  %v1055_v21 = vld [vmem:[%s1568_s1 + $0x124] ss:$8 sps:$4 sm:$0xff]   ;;  %v1054_v22 = vld [vmem:[%s1568_s1 + $0x20] ss:$8 sps:$4 sm:$0xff]   ;;  %v1058_v23 = vld [vmem:[%s1568_s1 + $0x14] ss:$8 sps:$4 sm:$0xff]  }
   0x9   :  { %752 = vmatprep.subr.bf16.mxu1 %v1037_v10  ;;  %v1057_v24 = vld [vmem:[%s1568_s1 + $0x120] ss:$8 sps:$4 sm:$0xff]   ;;  %v1061_v25 = vld [vmem:[%s1568_s1 + $0x114] ss:$8 sps:$4 sm:$0xff]   ;;  %v1060_v26 = vld [vmem:[%s1568_s1 + $0x10] ss:$8 sps:$4 sm:$0xff]  }
   0xa   :  { %v1064_v27 = vld [vmem:[%s1568_s1 + $0x4] ss:$8 sps:$4 sm:$0xff]   ;;  %v1063_v28 = vld [vmem:[%s1568_s1 + $0x110] ss:$8 sps:$4 sm:$0xff]   ;;  %v1066_v30 = vld [vmem:[%s1568_s1] ss:$8 sps:$4 sm:$0xff]  }
   0xb   :  { %712 = vmatpush1.bf16.msra.mxu0 %v1036_v9  ;;  %v1067_v29 = vld [vmem:[%s1568_s1 + $0x104] ss:$8 sps:$4 sm:$0xff]   ;;  %v1070_v31 = vld [vmem:[%s1568_s1 + $0xf4] ss:$8 sps:$4 sm:$0xff]   ;;  %v1069_v32 = vld [vmem:[%s1568_s1 + $0x100] ss:$8 sps:$4 sm:$0xff]  }
   0xc   :  { %713 = vmatprep.subr.bf16.mxu0 %v1040_v11  ;;  %753 = vmatpush1.bf16.msra.mxu1 %v1039_v12  ;;  %v1073_v33 = vld [vmem:[%s1568_s1 + $0x1f4] ss:$8 sps:$4 sm:$0xff]   ;;  %v1072_v34 = vld [vmem:[%s1568_s1 + $0xf0] ss:$8 sps:$4 sm:$0xff]   ;;  %v1076_v35 = vld [vmem:[%s1568_s1 + $0xe4] ss:$8 sps:$4 sm:$0xff]  }
   0xd   :  { %754 = vmatprep.subr.bf16.mxu1 %v1043_v13  ;;  %v1075_v36 = vld [vmem:[%s1568_s1 + $0x1f0] ss:$8 sps:$4 sm:$0xff]   ;;  %v1079_v37 = vld [vmem:[%s1568_s1 + $0x1e4] ss:$8 sps:$4 sm:$0xff]   ;;  %v1078_v38 = vld [vmem:[%s1568_s1 + $0xe0] ss:$8 sps:$4 sm:$0xff]  }
   0xe   :  { %v1082_v39 = vld [vmem:[%s1568_s1 + $0xd4] ss:$8 sps:$4 sm:$0xff]   ;;  %v1081_v40 = vld [vmem:[%s1568_s1 + $0x1e0] ss:$8 sps:$4 sm:$0xff]   ;;  %v1084_v42 = vld [vmem:[%s1568_s1 + $0xd0] ss:$8 sps:$4 sm:$0xff]  }
   0xf   :  { %714 = vmatpush1.bf16.msra.mxu0 %v1042_v14  ;;  %v1085_v41 = vld [vmem:[%s1568_s1 + $0x1d4] ss:$8 sps:$4 sm:$0xff]   ;;  %v1088_v43 = vld [vmem:[%s1568_s1 + $0xc4] ss:$8 sps:$4 sm:$0xff]   ;;  %v1087_v44 = vld [vmem:[%s1568_s1 + $0x1d0] ss:$8 sps:$4 sm:$0xff]  }
  0x10   :  { %715 = vmatprep.subr.bf16.mxu0 %v1046_v15  ;;  %755 = vmatpush1.bf16.msra.mxu1 %v1045_v16  ;;  %v1091_v45 = vld [vmem:[%s1568_s1 + $0x1c4] ss:$8 sps:$4 sm:$0xff]   ;;  %v1090_v47 = vld [vmem:[%s1568_s1 + $0xc0] ss:$8 sps:$4 sm:$0xff]   ;;  %v1094_v50 = vld [vmem:[%s1568_s1 + $0xb4] ss:$8 sps:$4 sm:$0xff]  }
  0x11   :  { %756 = vmatprep.subr.bf16.mxu1 %v1049_v17  ;;  %v15_v46 = vld [vmem:[%s1569_s0] sm:$0xff]  ;;  %v16_v51 = vld [vmem:[%s1569_s0 + $0x8] sm:$0xff]  ;;  %v1097_v52 = vld [vmem:[%s1568_s1 + $0x1b4] ss:$8 sps:$4 sm:$0xff]   ;;  %v1199_v15 = vmov 0  }
  0x12   :  { %v902_v48 = vcombine.high %v15_v46, %v15_v46  ;;  %v1093_v49 = vld [vmem:[%s1568_s1 + $0x1c0] ss:$8 sps:$4 sm:$0xff]   ;;  %v904_v53 = vcombine.high %v16_v51, %v16_v51  ;;  %v1096_v54 = vld [vmem:[%s1568_s1 + $0xb0] ss:$8 sps:$4 sm:$0xff]   ;;  %v1100_v55 = vld [vmem:[%s1568_s1 + $0xa4] ss:$8 sps:$4 sm:$0xff]   ;;  %v901_v5 = vcombine.low %v15_v46, %v15_v46  ;;  %v903_v8 = vcombine.low %v16_v51, %v16_v51 }
  0x13   :  { %716 = vmatpush1.bf16.msra.mxu0 %v1048_v18  ;;  %v1099_v56 = vld [vmem:[%s1568_s1 + $0x1b0] ss:$8 sps:$4 sm:$0xff]   ;;  %v1103_v57 = vld [vmem:[%s1568_s1 + $0x1a4] ss:$8 sps:$4 sm:$0xff]   ;;  %v1102_v58 = vld [vmem:[%s1568_s1 + $0xa0] ss:$8 sps:$4 sm:$0xff]  }
  0x14   :  { %717 = vmatprep.subr.bf16.mxu0 %v1052_v19  ;;  %757 = vmatpush1.bf16.msra.mxu1 %v1051_v20  ;;  %v1106_v59 = vld [vmem:[%s1568_s1 + $0x94] ss:$8 sps:$4 sm:$0xff]   ;;  %v1105_v60 = vld [vmem:[%s1568_s1 + $0x1a0] ss:$8 sps:$4 sm:$0xff]   ;;  %v1108_v62 = vld [vmem:[%s1568_s1 + $0x90] ss:$8 sps:$4 sm:$0xff]  }
  0x15   :  { %758 = vmatprep.subr.bf16.mxu1 %v1055_v21  ;;  %739 = vmatprep.mubr.bf16.mxu0 %v902_v48  ;;  %v1109_v61 = vld [vmem:[%s1568_s1 + $0x194] ss:$8 sps:$4 sm:$0xff]   ;;  %v1112_v63 = vld [vmem:[%s1568_s1 + $0x84] ss:$8 sps:$4 sm:$0xff]   ;;  %v1111_v0 = vld [vmem:[%s1568_s1 + $0x190] ss:$8 sps:$4 sm:$0xff]  }
  0x16   :  { %780 = vmatprep.mubr.bf16.mxu1 %v904_v53  ;;  %v1115_v1 = vld [vmem:[%s1568_s1 + $0x184] ss:$8 sps:$4 sm:$0xff]   ;;  %v1114_v2 = vld [vmem:[%s1568_s1 + $0x80] ss:$8 sps:$4 sm:$0xff]   ;;  %v1123_v3 = vld [vmem:[%s1568_s1 + $0x274] ss:$8 sps:$4 sm:$0xff]  }
  0x17   :  { %718 = vmatpush1.bf16.msra.mxu0 %v1054_v22  ;;  %v1120_v4 = vld [vmem:[%s1568_s1 + $0x180] ss:$8 sps:$4 sm:$0xff]   ;;  %v1155_v6 = vld [vmem:[%s1568_s1 + $0x354] ss:$8 sps:$4 sm:$0xff]   ;;  %v1121_v7 = vld [vmem:[%s1568_s1 + $0x270] ss:$8 sps:$4 sm:$0xff]  }
  0x18   :  { %719 = vmatprep.subr.bf16.mxu0 %v1058_v23  ;;  %759 = vmatpush1.bf16.msra.mxu1 %v1057_v24  ;;  %v1128_v9 = vld [vmem:[%s1568_s1 + $0x264] ss:$8 sps:$4 sm:$0xff]   ;;  %v1153_v10 = vld [vmem:[%s1568_s1 + $0x350] ss:$8 sps:$4 sm:$0xff]   ;;  %v1126_v12 = vld [vmem:[%s1568_s1 + $0x260] ss:$8 sps:$4 sm:$0xff]  }
  0x19   :  { %760 = vmatprep.subr.bf16.mxu1 %v1061_v25  ;;  %v1161_v11 = vld [vmem:[%s1568_s1 + $0x344] ss:$8 sps:$4 sm:$0xff]   ;;  %v1131_v13 = vld [vmem:[%s1568_s1 + $0x254] ss:$8 sps:$4 sm:$0xff]   ;;  %v1159_v14 = vld [vmem:[%s1568_s1 + $0x340] ss:$8 sps:$4 sm:$0xff]  }
  0x1a   :  { %v1167_v16 = vld [vmem:[%s1568_s1 + $0x334] ss:$8 sps:$4 sm:$0xff]   ;;  %v1129_v17 = vld [vmem:[%s1568_s1 + $0x250] ss:$8 sps:$4 sm:$0xff]   ;;  %v1134_v18 = vld [vmem:[%s1568_s1 + $0x244] ss:$8 sps:$4 sm:$0xff]  }
  0x1b   :  { %720 = vmatpush1.bf16.msra.mxu0 %v1060_v26  ;;  %v1165_v19 = vld [vmem:[%s1568_s1 + $0x330] ss:$8 sps:$4 sm:$0xff]   ;;  %v1173_v21 = vld [vmem:[%s1568_s1 + $0x324] ss:$8 sps:$4 sm:$0xff]   ;;  %v1132_v23 = vld [vmem:[%s1568_s1 + $0x240] ss:$8 sps:$4 sm:$0xff]  }
  0x1c   :  { %721 = vmatprep.subr.bf16.mxu0 %v1064_v27  ;;  %761 = vmatpush1.bf16.msra.mxu1 %v1063_v28  ;;  %v1460_v20 = vld [vmem:[%s1569_s0 + $0x10] sm:$0xff]  ;;  %v1171_v25 = vld [vmem:[%s1568_s1 + $0x320] ss:$8 sps:$4 sm:$0xff]   ;;  %v1140_v28 = vld [vmem:[%s1568_s1 + $0x224] ss:$8 sps:$4 sm:$0xff]  }
  0x1d   :  { %762 = vmatprep.subr.bf16.mxu1 %v1067_v29  ;;  %v906_v22 = vcombine.high %v1460_v20, %v1460_v20  ;;  %v1137_v24 = vld [vmem:[%s1568_s1 + $0x234] ss:$8 sps:$4 sm:$0xff]   ;;  %v1135_v27 = vld [vmem:[%s1568_s1 + $0x230] ss:$8 sps:$4 sm:$0xff]   ;;  %v1176_v48 = vld [vmem:[%s1568_s1 + $0x2a4] ss:$8 sps:$4 sm:$0xff]  }
  0x1e   :  { %v1179_v26 = vld [vmem:[%s1568_s1 + $0x314] ss:$8 sps:$4 sm:$0xff]   ;;  %v1177_v29 = vld [vmem:[%s1568_s1 + $0x310] ss:$8 sps:$4 sm:$0xff]   ;;  %v1186_v53 = vld [vmem:[%s1568_s1 + $0x280] ss:$8 sps:$4 sm:$0xff]  }
  0x1f   :  { %722 = vmatpush1.bf16.msra.mxu0 %v1066_v30  ;;  %v1185_v30 = vld [vmem:[%s1568_s1 + $0x304] ss:$8 sps:$4 sm:$0xff]   ;;  %v1170_v46 = vld [vmem:[%s1568_s1 + $0x2b4] ss:$8 sps:$4 sm:$0xff]   ;;  %v1180_v51 = vld [vmem:[%s1568_s1 + $0x290] ss:$8 sps:$4 sm:$0xff]  }
  0x20   :  { %723 = vmatprep.subr.bf16.mxu0 %v1070_v31  ;;  %763 = vmatpush1.bf16.msra.mxu1 %v1069_v32  ;;  %v1138_v31 = vld [vmem:[%s1568_s1 + $0x220] ss:$8 sps:$4 sm:$0xff]   ;;  %v1143_v32 = vld [vmem:[%s1568_s1 + $0x214] ss:$8 sps:$4 sm:$0xff]   ;;  %vm895_vm3 = vmor %vm894_vm2, %vm893_vm1 }
  0x21   :  { %764 = vmatprep.subr.bf16.mxu1 %v1073_v33  ;;  %v1183_v33 = vld [vmem:[%s1568_s1 + $0x300] ss:$8 sps:$4 sm:$0xff]  }
  0x23   :  { %724 = vmatpush2.bf16.msra.mxu0 %v1072_v34  ;;  %v1141_v34 = vld [vmem:[%s1568_s1 + $0x210] ss:$8 sps:$4 sm:$0xff]  }
  0x24   :  { %725 = vmatprep.subr.bf16.mxu0 %v1076_v35  ;;  %765 = vmatpush2.bf16.msra.mxu1 %v1075_v36  ;;  %v1119_v35 = vld [vmem:[%s1569_s0 + $0x18] ss:$0 sps:$4 sm:$0xff]   ;;  %v1146_v36 = vld [vmem:[%s1568_s1 + $0x204] ss:$8 sps:$4 sm:$0xff]  }
  0x25   :  { %766 = vmatprep.subr.bf16.mxu1 %v1079_v37  ;;  %v1144_v37 = vld [vmem:[%s1568_s1 + $0x200] ss:$8 sps:$4 sm:$0xff]  }
  0x27   :  { %726 = vmatpush2.bf16.msra.mxu0 %v1078_v38  ;;  %v1149_v38 = vld [vmem:[%s1568_s1 + $0x2f4] ss:$8 sps:$4 sm:$0xff]  }
  0x28   :  { %727 = vmatprep.subr.bf16.mxu0 %v1082_v39  ;;  %767 = vmatpush2.bf16.msra.mxu1 %v1081_v40  ;;  %v1147_v39 = vld [vmem:[%s1568_s1 + $0x2f0] ss:$8 sps:$4 sm:$0xff]   ;;  %v1152_v40 = vld [vmem:[%s1568_s1 + $0x2e4] ss:$8 sps:$4 sm:$0xff]  }
  0x29   :  { %768 = vmatprep.subr.bf16.mxu1 %v1085_v41  ;;  %v1150_v41 = vld [vmem:[%s1568_s1 + $0x2e0] ss:$8 sps:$4 sm:$0xff]  }
  0x2b   :  { %728 = vmatpush2.bf16.msra.mxu0 %v1084_v42  ;;  %v1158_v42 = vld [vmem:[%s1568_s1 + $0x2d4] ss:$8 sps:$4 sm:$0xff]  }
  0x2c   :  { %729 = vmatprep.subr.bf16.mxu0 %v1088_v43  ;;  %769 = vmatpush2.bf16.msra.mxu1 %v1087_v44  ;;  %v1156_v43 = vld [vmem:[%s1568_s1 + $0x2d0] ss:$8 sps:$4 sm:$0xff]   ;;  %v1164_v44 = vld [vmem:[%s1568_s1 + $0x2c4] ss:$8 sps:$4 sm:$0xff]  }
  0x2d   :  { %770 = vmatprep.subr.bf16.mxu1 %v1091_v45  ;;  %v1162_v45 = vld [vmem:[%s1568_s1 + $0x2c0] ss:$8 sps:$4 sm:$0xff]  }
  0x2f   :  { %730 = vmatpush2.bf16.msra.mxu0 %v1090_v47  ;;  %v1168_v47 = vld [vmem:[%s1568_s1 + $0x2b0] ss:$8 sps:$4 sm:$0xff]  }
  0x30   :  { %731 = vmatprep.subr.bf16.mxu0 %v1094_v50  ;;  %771 = vmatpush2.bf16.msra.mxu1 %v1093_v49  ;;  %v1174_v49 = vld [vmem:[%s1568_s1 + $0x2a0] ss:$8 sps:$4 sm:$0xff]   ;;  %v1182_v50 = vld [vmem:[%s1568_s1 + $0x294] ss:$8 sps:$4 sm:$0xff]  }
  0x31   :  { %772 = vmatprep.subr.bf16.mxu1 %v1097_v52  ;;  %v1188_v52 = vld [vmem:[%s1568_s1 + $0x284] ss:$8 sps:$4 sm:$0xff]  }
  0x33   :  { %732 = vmatpush2.bf16.msra.mxu0 %v1096_v54  ;;  %v905_v54 = vcombine.low %v1460_v20, %v1460_v20 }
  0x34   :  { %733 = vmatprep.subr.bf16.mxu0 %v1100_v55  ;;  %773 = vmatpush2.bf16.msra.mxu1 %v1099_v56 }
  0x35   :  { %774 = vmatprep.subr.bf16.mxu1 %v1103_v57 }
  0x37   :  { %734 = vmatpush2.bf16.msra.mxu0 %v1102_v58 }
  0x38   :  { %735 = vmatprep.subr.bf16.mxu0 %v1106_v59  ;;  %775 = vmatpush2.bf16.msra.mxu1 %v1105_v60 }
  0x39   :  { %776 = vmatprep.subr.bf16.mxu1 %v1109_v61 }
  0x3b   :  { %736 = vmatpush2.bf16.msra.mxu0 %v1108_v62 }
  0x3c   :  { %737 = vmatprep.subr.bf16.mxu0 %v1112_v63  ;;  %777 = vmatpush2.bf16.msra.mxu1 %v1111_v0 }
  0x3d   :  { %778 = vmatprep.subr.bf16.mxu1 %v1115_v1 }
  0x3f   :  { %738 = vmatpush2.bf16.msra.mxu0 %v1114_v2 }
  0x40   :  { %789 = vmatprep.subr.bf16.mxu0 %v1123_v3  ;;  %779 = vmatpush2.bf16.msra.mxu1 %v1120_v4  ;;  %v129_v3 = vlaneseq }
  0x41   :  { %834 = vmatprep.subr.bf16.mxu1 %v1155_v6  ;;  %v127_v6 = vld [vmem:[%s1570_s2] sm:$0x3] }
  0x42   :  { %740 = vmatmul.mubr.bf16.vlgmr.msra.gmra.mxu0 %v901_v5  ;;  %v130_v4 = vshrl.u32 %v129_v3, 7 }
  0x43   :  { %790 = vmatpush1.bf16.msra.mxu0 %v1121_v7  ;;  %781 = vmatmul.mubr.bf16.vlgmr.msra.gmra.mxu1 %v903_v8 }
  0x44   :  { %791 = vmatprep.subr.bf16.mxu0 %v1128_v9  ;;  %835 = vmatpush1.bf16.msra.mxu1 %v1153_v10  ;;  %v131_v5 = vsub.s32 0, %v130_v4  ;;  %v135_v7 = vsub.s32 1, %v130_v4 }
  0x45   :  { %862 = vmatprep.mubr.bf16.mxu1 %v1199_v15  ;;  %836 = vmatprep.subr.bf16.mxu1 %v1161_v11 }
  0x46   :  { %821 = vmatprep.mubr.bf16.mxu0 %v906_v22  ;;  %v132_v8 = vrot.slane %v127_v6, %v131_v5  ;;  %v136_v9 = vrot.slane %v127_v6, %v135_v7 }
  0x47   :  { %792 = vmatpush1.bf16.msra.mxu0 %v1126_v12 }
  0x48   :  { %793 = vmatprep.subr.bf16.mxu0 %v1131_v13  ;;  %837 = vmatpush1.bf16.msra.mxu1 %v1159_v14 }
  0x49   :  { %838 = vmatprep.subr.bf16.mxu1 %v1167_v16 }
  0x4b   :  { %794 = vmatpush1.bf16.msra.mxu0 %v1129_v17 }
  0x4c   :  { %795 = vmatprep.subr.bf16.mxu0 %v1134_v18  ;;  %839 = vmatpush1.bf16.msra.mxu1 %v1165_v19 }
  0x4d   :  { %840 = vmatprep.subr.bf16.mxu1 %v1173_v21 }
  0x4f   :  { %796 = vmatpush1.bf16.msra.mxu0 %v1132_v23 }
  0x50   :  { %797 = vmatprep.subr.bf16.mxu0 %v1137_v24  ;;  %841 = vmatpush1.bf16.msra.mxu1 %v1171_v25 }
  0x51   :  { %842 = vmatprep.subr.bf16.mxu1 %v1179_v26 }
  0x53   :  { %798 = vmatpush1.bf16.msra.mxu0 %v1135_v27 }
  0x54   :  { %799 = vmatprep.subr.bf16.mxu0 %v1140_v28  ;;  %843 = vmatpush1.bf16.msra.mxu1 %v1177_v29 }
  0x55   :  { %844 = vmatprep.subr.bf16.mxu1 %v1185_v30 }
  0x57   :  { %800 = vmatpush1.bf16.msra.mxu0 %v1138_v31 }
  0x58   :  { %801 = vmatprep.subr.bf16.mxu0 %v1143_v32  ;;  %845 = vmatpush1.bf16.msra.mxu1 %v1183_v33 }
  0x5b   :  { %802 = vmatpush1.bf16.msra.mxu0 %v1141_v34  ;;  %1016 = vmatmul.mubr.msk.bf16.vlgmr.msra.gmra.mxu1 %vm703_vm0, %v1119_v35 }
  0x5c   :  { %803 = vmatprep.subr.bf16.mxu0 %v1146_v36 }
  0x5f   :  { %804 = vmatpush1.bf16.msra.mxu0 %v1144_v37 }
  0x60   :  { %805 = vmatprep.subr.bf16.mxu0 %v1149_v38 }
  0x63   :  { %806 = vmatpush2.bf16.msra.mxu0 %v1147_v39 }
  0x64   :  { %807 = vmatprep.subr.bf16.mxu0 %v1152_v40 }
  0x67   :  { %808 = vmatpush2.bf16.msra.mxu0 %v1150_v41 }
  0x68   :  { %809 = vmatprep.subr.bf16.mxu0 %v1158_v42 }
  0x6b   :  { %810 = vmatpush2.bf16.msra.mxu0 %v1156_v43 }
  0x6c   :  { %811 = vmatprep.subr.bf16.mxu0 %v1164_v44 }
  0x6f   :  { %812 = vmatpush2.bf16.msra.mxu0 %v1162_v45 }
  0x70   :  { %813 = vmatprep.subr.bf16.mxu0 %v1170_v46 }
  0x73   :  { %814 = vmatpush2.bf16.msra.mxu0 %v1168_v47 }
  0x74   :  { %815 = vmatprep.subr.bf16.mxu0 %v1176_v48 }
  0x77   :  { %816 = vmatpush2.bf16.msra.mxu0 %v1174_v49 }
  0x78   :  { %817 = vmatprep.subr.bf16.mxu0 %v1182_v50 }
  0x7b   :  { %818 = vmatpush2.bf16.msra.mxu0 %v1180_v51 }
  0x7c   :  { %819 = vmatprep.subr.bf16.mxu0 %v1188_v52 }
  0x7f   :  { %820 = vmatpush2.bf16.msra.mxu0 %v1186_v53 }
  0x82   :  { %822 = vmatmul.mubr.bf16.vlgmr.msra.gmra.mxu0 %v905_v54 }
 0x102   :  { %v741_v55 = vpop.f32.mrf.mxu0 }
 0x103   :  { %v782_v57 = vpop.f32.mrf.mxu1  ;;  %v742_v10 = vadd.f32 %v741_v55, %v132_v8 }
 0x104   :  { %v743_v56 = vpop.f32.mrf.mxu0 }
 0x105   :  { %v784_v59 = vpop.f32.mrf.mxu1  ;;  %v744_v11 = vadd.f32 %v743_v56, %v136_v9  ;;  %v783_v12 = vadd.f32 %v782_v57, %v742_v10 }
 0x106   :  { %v745_v58 = vpop.f32.mrf.mxu0 }
 0x107   :  { %v786_v61 = vpop.f32.mrf.mxu1  ;;  %v785_v14 = vadd.f32 %v784_v59, %v744_v11 }
 0x108   :  { %v746_v60 = vpop.f32.mrf.mxu0 }
 0x109   :  { %v787_v62 = vpop.f32.mrf.mxu1 }
 0x11b   :  { %v864_v63 = vpop.f32.mrf.mxu1 }
 0x11d   :  { %v866_v0 = vpop.f32.mrf.mxu1 }
 0x11f   :  { %v868_v1 = vpop.f32.mrf.mxu1 }
 0x121   :  { %v869_v2 = vpop.f32.mrf.mxu1 }
 0x142   :  { %v823_v13 = vpop.f32.mrf.mxu0 }
 0x143   :  { %v824_v15 = vadd.f32 %v823_v13, %v783_v12 }
 0x144   :  { %v825_v16 = vpop.f32.mrf.mxu0 }
 0x145   :  { %v865_v17 = vadd.f32 %v864_v63, %v824_v15  ;;  %v826_v18 = vadd.f32 %v825_v16, %v785_v14 }
 0x146   :  { %v827_v19 = vpop.f32.mrf.mxu0 }
 0x147   :  { %v1017_v20 = vmul.f32 -1.442695, %v865_v17  ;;  %v867_v21 = vadd.f32 %v866_v0, %v826_v18 }
 0x148   :  { %v828_v22 = vpop.f32.mrf.mxu0 }
 0x149   :  { %1191 = vpow2.f32 %v1017_v20  ;;  %v1018_v23 = vmul.f32 -1.442695, %v867_v21 }
 0x14b   :  { %1193 = vpow2.f32 %v1018_v23 }
 0x156   :  { %v1192_v24 = vpop.eup %1191 }
 0x157   :  { %v877_v25 = vadd.f32 1.0, %v1192_v24 }
 0x158   :  { %v1194_v26 = vpop.eup %1193 }
 0x159   :  { %1195 = vrcp.f32 %v877_v25  ;;  %v878_v27 = vadd.f32 1.0, %v1194_v26 }
 0x15b   :  { %1197 = vrcp.f32 %v878_v27 }
 0x166   :  { %v1196_v28 = vpop.eup %1195 }
 0x167   :  { %v883_v30 = vmul.f32 %v1196_v28, %v865_v17 }
 0x168   :  { %v1198_v29 = vpop.eup %1197 }
 0x169   :  { %v884_v31 = vmul.f32 %v1198_v29, %v867_v21 }
 0x16b   :  { %v1020_v32 = vpack.c.bf16 %v884_v31, %v883_v30 }
 0x16d   :  { %896 = vst.msk [vmem:[%s1571_s3] sm:$0xff] %vm895_vm3, %v1020_v32 }

</bundles_post_ra>
